<compile_context>
chip_gen: v7x
topology: tpu7x:2x2x1
jax: 0.10.0
libtpu: 0.0.40
codegen_flags: <defaults>
</compile_context>

<pallas_src>
import functools

import jax
import jax.numpy as jnp
from jax import lax
from jax.experimental import pallas as pl
from jax.experimental.pallas import tpu as pltpu


# -----------------------------------------------------------------------------
# Fused inception kernel (one batch element per grid step)
# -----------------------------------------------------------------------------
def _inception_kernel(x_ref, w1_ref, b1_ref, w3_ref, b3_ref, w5_ref, b5_ref,
                      wp_ref, bp_ref, o_ref, x2p_ref, x3p_ref, xp_ref, *,
                      H, W, Cin, C1, C3r, C3, C5r, C5, Cpp):
    """Whole inception block for one image.

    x_ref  : (1, H, W, Cin) bf16     unpadded input tile
    w1_ref : (Cin, C1+C3r+C5r) bf16  fused 1x1 weights (b1 | b2-reduce | b3-reduce)
    b1_ref : (1, C1+C3r+C5r) f32
    w3_ref : (9,  C3r, C3) bf16      3x3 weights, one (Cr,Cout) slab per tap
    w5_ref : (25, C5r, C5) bf16      5x5 weights, one (Cr,Cout) slab per tap
    wp_ref : (Cin, Cpp) bf16         pool-proj 1x1
    o_ref  : (1, H, W, C1+C3+C5+Cpp) f32   channel-concatenated output
    x2p_ref: VMEM scratch (1, H+2, W+2, C3r) f32  zero-bordered branch2 reduce
    x3p_ref: VMEM scratch (1, H+4, W+4, C5r) f32  zero-bordered branch3 reduce
    xp_ref : VMEM scratch (1, H+2, W+2, Cin) f32  NEG-bordered copy of x (pool)
    """
    NHW = H * W
    f32 = jnp.float32
    bf16 = jnp.bfloat16
    # Stand-in for torch's -inf maxpool padding.  Safe because the center tap
    # (always real data) is never the border value, so NEG never propagates.
    NEG = -1e30

    def fill_border(ref, pad, value):
        _, Hp, Wp, C = ref.shape
        dt = ref.dtype
        ref[:, 0:pad, :, :] = jnp.full((1, pad, Wp, C), value, dt)
        ref[:, Hp - pad:Hp, :, :] = jnp.full((1, pad, Wp, C), value, dt)
        ref[:, :, 0:pad, :] = jnp.full((1, Hp, pad, C), value, dt)
        ref[:, :, Wp - pad:Wp, :] = jnp.full((1, Hp, pad, C), value, dt)

    x = x_ref[...]                                    # (1, H, W, Cin) bf16
    x_mat = x.reshape(NHW, Cin)                       # contiguous collapse

    # ---- all three 1x1 convs that read x: a single bf16 MXU matmul ---------
    y1 = jnp.dot(x_mat, w1_ref[...], preferred_element_type=f32) + b1_ref[...]

    # branch1 (bare Conv2d, no ReLU) goes straight to its output channel slice
    o_ref[:, :, :, 0:C1] = y1[:, 0:C1].reshape(1, H, W, C1)

    # ---- (re)write only the thin borders of the padded scratches -----------
    # Interiors are fully overwritten below, so every element is defined every
    # grid step (no reliance on cross-step scratch persistence -> megacore-safe).
    fill_border(x2p_ref, 1, 0.0)
    fill_border(x3p_ref, 2, 0.0)
    fill_border(xp_ref, 1, NEG)

    x2p_ref[:, 1:1 + H, 1:1 + W, :] = jnp.maximum(
        y1[:, C1:C1 + C3r], 0.0).reshape(1, H, W, C3r)
    x3p_ref[:, 2:2 + H, 2:2 + W, :] = jnp.maximum(
        y1[:, C1 + C3r:C1 + C3r + C5r], 0.0).reshape(1, H, W, C5r)
    xp_ref[:, 1:1 + H, 1:1 + W, :] = x.astype(f32)

    # ---- branch2: 3x3 conv as 9 per-tap matmuls into an f32 accumulator ----
    acc = None
    for kh in range(3):
        for kw in range(3):
            tap = x2p_ref[:, kh:kh + H, kw:kw + W, :].reshape(NHW, C3r)
            part = jnp.dot(tap.astype(bf16), w3_ref[kh * 3 + kw],
                           preferred_element_type=f32)
            acc = part if acc is None else acc + part
    o_ref[:, :, :, C1:C1 + C3] = jnp.maximum(
        acc + b3_ref[...], 0.0).reshape(1, H, W, C3)

    # ---- branch3: 5x5 conv as 25 per-tap matmuls into an f32 accumulator ---
    acc = None
    for kh in range(5):
        for kw in range(5):
            tap = x3p_ref[:, kh:kh + H, kw:kw + W, :].reshape(NHW, C5r)
            part = jnp.dot(tap.astype(bf16), w5_ref[kh * 5 + kw],
                           preferred_element_type=f32)
            acc = part if acc is None else acc + part
    o_ref[:, :, :, C1 + C3:C1 + C3 + C5] = jnp.maximum(
        acc + b5_ref[...], 0.0).reshape(1, H, W, C5)

    # ---- branch4: 3x3/s1/p1 maxpool (NEG border, no masks) + 1x1 + ReLU ----
    pooled = None
    for kh in range(3):
        for kw in range(3):
            t = xp_ref[:, kh:kh + H, kw:kw + W, :]
            pooled = t if pooled is None else jnp.maximum(pooled, t)
    p_mat = pooled.reshape(NHW, Cin).astype(bf16)
    x4 = jnp.dot(p_mat, wp_ref[...], preferred_element_type=f32) + bp_ref[...]
    c0 = C1 + C3 + C5
    o_ref[:, :, :, c0:c0 + Cpp] = jnp.maximum(x4, 0.0).reshape(1, H, W, Cpp)


# -----------------------------------------------------------------------------
# Wrapper: layout plumbing + weight fusion + pallas_call
# -----------------------------------------------------------------------------
def _fused_params(p, Cin):
    C1 = p["b1_w"].shape[-1]
    C3r = p["b2r_w"].shape[-1]
    C3 = p["b2_w"].shape[-1]
    C5r = p["b3r_w"].shape[-1]
    C5 = p["b3_w"].shape[-1]
    Cpp = p["b4_w"].shape[-1]
    f32, bf16 = jnp.float32, jnp.bfloat16
    w1 = jnp.concatenate([p["b1_w"].reshape(Cin, C1),
                          p["b2r_w"].reshape(Cin, C3r),
                          p["b3r_w"].reshape(Cin, C5r)], axis=-1).astype(bf16)
    b1 = jnp.concatenate([p["b1_b"], p["b2r_b"], p["b3r_b"]]).reshape(1, -1).astype(f32)
    w3 = p["b2_w"].reshape(9, C3r, C3).astype(bf16)     # (kh*3+kw, ci, co)
    b3 = p["b2_b"].reshape(1, C3).astype(f32)
    w5 = p["b3_w"].reshape(25, C5r, C5).astype(bf16)    # (kh*5+kw, ci, co)
    b5 = p["b3_b"].reshape(1, C5).astype(f32)
    wp = p["b4_w"].reshape(Cin, Cpp).astype(bf16)
    bp = p["b4_b"].reshape(1, Cpp).astype(f32)
    return (w1, b1, w3, b3, w5, b5, wp, bp), (C1, C3r, C3, C5r, C5, Cpp)


def inception_forward(x_nchw, p):
    x = jnp.transpose(x_nchw, (0, 2, 3, 1)).astype(jnp.bfloat16)   # -> NHWC bf16
    N, H, W, Cin = x.shape
    (w1, b1, w3, b3, w5, b5, wp, bp), dims = _fused_params(p, Cin)
    C1, C3r, C3, C5r, C5, Cpp = dims
    Ctot = C1 + C3 + C5 + Cpp

    kernel = functools.partial(
        _inception_kernel, H=H, W=W, Cin=Cin,
        C1=C1, C3r=C3r, C3=C3, C5r=C5r, C5=C5, Cpp=Cpp)

    def wspec(a):
        nd = a.ndim
        return pl.BlockSpec(a.shape, lambda n: (0,) * nd)

    y_nhwc = pl.pallas_call(
        kernel,
        out_shape=jax.ShapeDtypeStruct((N, H, W, Ctot), jnp.float32),
        grid=(N,),
        in_specs=[
            pl.BlockSpec((1, H, W, Cin), lambda n: (n, 0, 0, 0)),
            wspec(w1), wspec(b1),
            wspec(w3), wspec(b3),
            wspec(w5), wspec(b5),
            wspec(wp), wspec(bp),
        ],
        out_specs=pl.BlockSpec((1, H, W, Ctot), lambda n: (n, 0, 0, 0)),
        scratch_shapes=[
            pltpu.VMEM((1, H + 2, W + 2, C3r), jnp.float32),
            pltpu.VMEM((1, H + 4, W + 4, C5r), jnp.float32),
            pltpu.VMEM((1, H + 2, W + 2, Cin), jnp.float32),
        ],
        compiler_params=pltpu.CompilerParams(
            dimension_semantics=("parallel",),
            vmem_limit_bytes=32 * 1024 * 1024),
    )(x, w1, b1, w3, b3, w5, b5, wp, bp)

    return jnp.transpose(y_nhwc, (0, 3, 1, 2))                     # -> NCHW


# -----------------------------------------------------------------------------
# Parameter init (deterministic, synthetic; stored as HWIO, fp32 "master")
# -----------------------------------------------------------------------------
def init_params(key, in_channels, _1x1, _3x3_reduce, _3x3, _5x5_reduce, _5x5,
                _pool_proj):
    def conv_param(k, kh, kw, cin, cout):
        kw_key, kb_key = jax.random.split(k)
        w = 0.1 * jax.random.normal(kw_key, (kh, kw, cin, cout), jnp.float32)
        b = 0.1 * jax.random.normal(kb_key, (cout,), jnp.float32)
        return w, b

    keys = jax.random.split(key, 6)
    p = {}
    p["b1_w"], p["b1_b"] = conv_param(keys[0], 1, 1, in_channels, _1x1)
    p["b2r_w"], p["b2r_b"] = conv_param(keys[1], 1, 1, in_channels, _3x3_reduce)
    p["b2_w"], p["b2_b"] = conv_param(keys[2], 3, 3, _3x3_reduce, _3x3)
    p["b3r_w"], p["b3r_b"] = conv_param(keys[3], 1, 1, in_channels, _5x5_reduce)
    p["b3_w"], p["b3_b"] = conv_param(keys[4], 5, 5, _5x5_reduce, _5x5)
    p["b4_w"], p["b4_b"] = conv_param(keys[5], 1, 1, in_channels, _pool_proj)
    return p


# -----------------------------------------------------------------------------
# Pure-JAX reference (mirrors the kernel's bf16 operand / f32 accumulate casts)
# -----------------------------------------------------------------------------
def _ref_conv(x_nhwc, w_hwio, b, padding, relu):
    out = lax.conv_general_dilated(
        x_nhwc.astype(jnp.bfloat16), w_hwio.astype(jnp.bfloat16),
        window_strides=(1, 1),
        padding=((padding, padding), (padding, padding)),
        dimension_numbers=("NHWC", "HWIO", "NHWC"),
        preferred_element_type=jnp.float32)
    out = out + b.reshape(1, 1, 1, -1).astype(jnp.float32)
    return jnp.maximum(out, 0.0) if relu else out


def _ref_forward(x_nchw, p):
    x = jnp.transpose(x_nchw, (0, 2, 3, 1)).astype(jnp.bfloat16)
    x1 = _ref_conv(x, p["b1_w"], p["b1_b"], 0, False)
    x2 = _ref_conv(x, p["b2r_w"], p["b2r_b"], 0, True)
    x2 = _ref_conv(x2, p["b2_w"], p["b2_b"], 1, True)
    x3 = _ref_conv(x, p["b3r_w"], p["b3r_b"], 0, True)
    x3 = _ref_conv(x3, p["b3_w"], p["b3_b"], 2, True)
    x4 = lax.reduce_window(x, jnp.array(-jnp.inf, x.dtype), lax.max,
                           (1, 3, 3, 1), (1, 1, 1, 1),
                           ((0, 0), (1, 1), (1, 1), (0, 0)))
    x4 = _ref_conv(x4, p["b4_w"], p["b4_b"], 0, True)
    y = jnp.concatenate([x1, x2, x3, x4], axis=-1)
    return jnp.transpose(y, (0, 3, 1, 2))


# -----------------------------------------------------------------------------
if __name__ == "__main__":
    # in_channels=4, _1x1=8, _3x3_reduce=4, _3x3=8, _5x5_reduce=4, _5x5=8, _pool_proj=8
    # NOTE: this toy shape is overhead-bound; perf tuning must be validated at
    # real Inception sizes (e.g. 28x28x192 -> 64/96/128/16/32/32).
    N, Cin, H, W = 2, 4, 16, 16
    cfg = dict(in_channels=Cin, _1x1=8, _3x3_reduce=4, _3x3=8,
               _5x5_reduce=4, _5x5=8, _pool_proj=8)

    key = jax.random.PRNGKey(0)
    kx, kp = jax.random.split(key)
    x = jax.random.normal(kx, (N, Cin, H, W), jnp.float32)
    params = init_params(kp, **cfg)

    out = jax.jit(inception_forward)(x, params)
    out = jax.block_until_ready(out)

    expected_channels = cfg["_1x1"] + cfg["_3x3"] + cfg["_5x5"] + cfg["_pool_proj"]
    assert out.shape == (N, expected_channels, H, W), out.shape

    ref = jax.block_until_ready(_ref_forward(x, params))
    assert jnp.allclose(out, ref, atol=1e-2, rtol=1e-2), \
        float(jnp.max(jnp.abs(out - ref)))

    print("KERNEL_OK")
</pallas_src>

<mosaic_0001>
module attributes {stable_mosaic.version = 11 : i64} {
  func.func @_inception_kernel(%arg0: i32, %arg1: memref<1x16x16x4xbf16, #tpu.memory_space<vmem>>, %arg2: memref<4x16xbf16, #tpu.memory_space<vmem>>, %arg3: memref<1x16xf32, #tpu.memory_space<vmem>>, %arg4: memref<9x4x8xbf16, #tpu.memory_space<vmem>>, %arg5: memref<1x8xf32, #tpu.memory_space<vmem>>, %arg6: memref<25x4x8xbf16, #tpu.memory_space<vmem>>, %arg7: memref<1x8xf32, #tpu.memory_space<vmem>>, %arg8: memref<4x8xbf16, #tpu.memory_space<vmem>>, %arg9: memref<1x8xf32, #tpu.memory_space<vmem>>, %arg10: memref<1x16x16x32xf32, #tpu.memory_space<vmem>>, %arg11: memref<1x18x18x4xf32, #tpu.memory_space<vmem>>, %arg12: memref<1x20x20x4xf32, #tpu.memory_space<vmem>>, %arg13: memref<1x18x18x4xf32, #tpu.memory_space<vmem>>) attributes {dimension_semantics = [#tpu.dimension_semantics<parallel>], iteration_bounds = array<i64: 2>, scalar_prefetch = 0 : i64, scratch_operands = 3 : i64, tpu.core_type = #tpu.core_type<tc>, window_params = [{transform_indices = @transform_0, window_bounds = array<i64: 1, 16, 16, 4>}, {pipeline_mode = #tpu.pipeline_mode<synchronous>, transform_indices = @transform_1, window_bounds = array<i64: 4, 16>}, {pipeline_mode = #tpu.pipeline_mode<synchronous>, transform_indices = @transform_2, window_bounds = array<i64: 1, 16>}, {pipeline_mode = #tpu.pipeline_mode<synchronous>, transform_indices = @transform_3, window_bounds = array<i64: 9, 4, 8>}, {pipeline_mode = #tpu.pipeline_mode<synchronous>, transform_indices = @transform_4, window_bounds = array<i64: 1, 8>}, {pipeline_mode = #tpu.pipeline_mode<synchronous>, transform_indices = @transform_5, window_bounds = array<i64: 25, 4, 8>}, {pipeline_mode = #tpu.pipeline_mode<synchronous>, transform_indices = @transform_6, window_bounds = array<i64: 1, 8>}, {pipeline_mode = #tpu.pipeline_mode<synchronous>, transform_indices = @transform_7, window_bounds = array<i64: 4, 8>}, {pipeline_mode = #tpu.pipeline_mode<synchronous>, transform_indices = @transform_8, window_bounds = array<i64: 1, 8>}, {transform_indices = @transform_9, window_bounds = array<i64: 1, 16, 16, 32>}]} {
    %c0 = arith.constant 0 : index
    %c0_0 = arith.constant 0 : index
    %c0_1 = arith.constant 0 : index
    %c0_2 = arith.constant 0 : index
    %0 = vector.load %arg1[%c0, %c0_0, %c0_1, %c0_2] : memref<1x16x16x4xbf16, #tpu.memory_space<vmem>>, vector<1x16x16x4xbf16>
    %1 = vector.shape_cast %0 : vector<1x16x16x4xbf16> to vector<256x4xbf16>
    %c0_3 = arith.constant 0 : index
    %c0_4 = arith.constant 0 : index
    %2 = vector.load %arg2[%c0_3, %c0_4] : memref<4x16xbf16, #tpu.memory_space<vmem>>, vector<4x16xbf16>
    %cst = arith.constant dense<0.000000e+00> : vector<256x16xf32>
    %3 = tpu.matmul %1, %2, %cst {dimension_numbers = #tpu.dot_dimension_numbers<[1], [0], [0], [1], [0, 0, 1, 1], [], []>} : vector<256x4xbf16>, vector<4x16xbf16>, vector<256x16xf32> -> vector<256x16xf32>
    %c0_5 = arith.constant 0 : index
    %c0_6 = arith.constant 0 : index
    %4 = vector.load %arg3[%c0_5, %c0_6] : memref<1x16xf32, #tpu.memory_space<vmem>>, vector<1x16xf32>
    %5 = vector.broadcast %4 : vector<1x16xf32> to vector<256x16xf32>
    %6 = arith.addf %3, %5 : vector<256x16xf32>
    %7 = vector.extract_strided_slice %6 {offsets = [0, 0], sizes = [256, 8], strides = [1, 1]} : vector<256x16xf32> to vector<256x8xf32>
    %8 = vector.shape_cast %7 : vector<256x8xf32> to vector<1x16x16x8xf32>
    %c0_7 = arith.constant 0 : index
    %c0_8 = arith.constant 0 : index
    %c0_9 = arith.constant 0 : index
    %c0_10 = arith.constant 0 : index
    %9 = vector.load %arg10[%c0_7, %c0_8, %c0_9, %c0_10] : memref<1x16x16x32xf32, #tpu.memory_space<vmem>>, vector<1x16x16x8xf32>
    tpu.vector_store %arg10[%c0_7, %c0_8, %c0_9, %c0_10], %8 {strides = array<i32>} : memref<1x16x16x32xf32, #tpu.memory_space<vmem>>, vector<1x16x16x8xf32>,
    %cst_11 = arith.constant 0.000000e+00 : f32
    %10 = vector.broadcast %cst_11 : f32 to vector<1x1x18x4xf32>
    %c0_12 = arith.constant 0 : index
    %c0_13 = arith.constant 0 : index
    %c0_14 = arith.constant 0 : index
    %c0_15 = arith.constant 0 : index
    %11 = vector.load %arg11[%c0_12, %c0_13, %c0_14, %c0_15] : memref<1x18x18x4xf32, #tpu.memory_space<vmem>>, vector<1x1x18x4xf32>
    tpu.vector_store %arg11[%c0_12, %c0_13, %c0_14, %c0_15], %10 {strides = array<i32>} : memref<1x18x18x4xf32, #tpu.memory_space<vmem>>, vector<1x1x18x4xf32>,
    %cst_16 = arith.constant 0.000000e+00 : f32
    %12 = vector.broadcast %cst_16 : f32 to vector<1x1x18x4xf32>
    %c0_17 = arith.constant 0 : index
    %c17 = arith.constant 17 : index
    %c0_18 = arith.constant 0 : index
    %c0_19 = arith.constant 0 : index
    %13 = vector.load %arg11[%c0_17, %c17, %c0_18, %c0_19] : memref<1x18x18x4xf32, #tpu.memory_space<vmem>>, vector<1x1x18x4xf32>
    tpu.vector_store %arg11[%c0_17, %c17, %c0_18, %c0_19], %12 {strides = array<i32>} : memref<1x18x18x4xf32, #tpu.memory_space<vmem>>, vector<1x1x18x4xf32>,
    %cst_20 = arith.constant 0.000000e+00 : f32
    %14 = vector.broadcast %cst_20 : f32 to vector<1x18x1x4xf32>
    %c0_21 = arith.constant 0 : index
    %c0_22 = arith.constant 0 : index
    %c0_23 = arith.constant 0 : index
    %c0_24 = arith.constant 0 : index
    %15 = vector.load %arg11[%c0_21, %c0_22, %c0_23, %c0_24] : memref<1x18x18x4xf32, #tpu.memory_space<vmem>>, vector<1x18x1x4xf32>
    tpu.vector_store %arg11[%c0_21, %c0_22, %c0_23, %c0_24], %14 {strides = array<i32>} : memref<1x18x18x4xf32, #tpu.memory_space<vmem>>, vector<1x18x1x4xf32>,
    %cst_25 = arith.constant 0.000000e+00 : f32
    %16 = vector.broadcast %cst_25 : f32 to vector<1x18x1x4xf32>
    %c0_26 = arith.constant 0 : index
    %c0_27 = arith.constant 0 : index
    %c17_28 = arith.constant 17 : index
    %c0_29 = arith.constant 0 : index
    %17 = vector.load %arg11[%c0_26, %c0_27, %c17_28, %c0_29] : memref<1x18x18x4xf32, #tpu.memory_space<vmem>>, vector<1x18x1x4xf32>
    tpu.vector_store %arg11[%c0_26, %c0_27, %c17_28, %c0_29], %16 {strides = array<i32>} : memref<1x18x18x4xf32, #tpu.memory_space<vmem>>, vector<1x18x1x4xf32>,
    %cst_30 = arith.constant 0.000000e+00 : f32
    %18 = vector.broadcast %cst_30 : f32 to vector<1x2x20x4xf32>
    %c0_31 = arith.constant 0 : index
    %c0_32 = arith.constant 0 : index
    %c0_33 = arith.constant 0 : index
    %c0_34 = arith.constant 0 : index
    %19 = vector.load %arg12[%c0_31, %c0_32, %c0_33, %c0_34] : memref<1x20x20x4xf32, #tpu.memory_space<vmem>>, vector<1x2x20x4xf32>
    tpu.vector_store %arg12[%c0_31, %c0_32, %c0_33, %c0_34], %18 {strides = array<i32>} : memref<1x20x20x4xf32, #tpu.memory_space<vmem>>, vector<1x2x20x4xf32>,
    %cst_35 = arith.constant 0.000000e+00 : f32
    %20 = vector.broadcast %cst_35 : f32 to vector<1x2x20x4xf32>
    %c0_36 = arith.constant 0 : index
    %c18 = arith.constant 18 : index
    %c0_37 = arith.constant 0 : index
    %c0_38 = arith.constant 0 : index
    %21 = vector.load %arg12[%c0_36, %c18, %c0_37, %c0_38] : memref<1x20x20x4xf32, #tpu.memory_space<vmem>>, vector<1x2x20x4xf32>
    tpu.vector_store %arg12[%c0_36, %c18, %c0_37, %c0_38], %20 {strides = array<i32>} : memref<1x20x20x4xf32, #tpu.memory_space<vmem>>, vector<1x2x20x4xf32>,
    %cst_39 = arith.constant 0.000000e+00 : f32
    %22 = vector.broadcast %cst_39 : f32 to vector<1x20x2x4xf32>
    %c0_40 = arith.constant 0 : index
    %c0_41 = arith.constant 0 : index
    %c0_42 = arith.constant 0 : index
    %c0_43 = arith.constant 0 : index
    %23 = vector.load %arg12[%c0_40, %c0_41, %c0_42, %c0_43] : memref<1x20x20x4xf32, #tpu.memory_space<vmem>>, vector<1x20x2x4xf32>
    tpu.vector_store %arg12[%c0_40, %c0_41, %c0_42, %c0_43], %22 {strides = array<i32>} : memref<1x20x20x4xf32, #tpu.memory_space<vmem>>, vector<1x20x2x4xf32>,
    %cst_44 = arith.constant 0.000000e+00 : f32
    %24 = vector.broadcast %cst_44 : f32 to vector<1x20x2x4xf32>
    %c0_45 = arith.constant 0 : index
    %c0_46 = arith.constant 0 : index
    %c18_47 = arith.constant 18 : index
    %c0_48 = arith.constant 0 : index
    %25 = vector.load %arg12[%c0_45, %c0_46, %c18_47, %c0_48] : memref<1x20x20x4xf32, #tpu.memory_space<vmem>>, vector<1x20x2x4xf32>
    tpu.vector_store %arg12[%c0_45, %c0_46, %c18_47, %c0_48], %24 {strides = array<i32>} : memref<1x20x20x4xf32, #tpu.memory_space<vmem>>, vector<1x20x2x4xf32>,
    %cst_49 = arith.constant -1.000000e+30 : f32
    %26 = vector.broadcast %cst_49 : f32 to vector<1x1x18x4xf32>
    %c0_50 = arith.constant 0 : index
    %c0_51 = arith.constant 0 : index
    %c0_52 = arith.constant 0 : index
    %c0_53 = arith.constant 0 : index
    %27 = vector.load %arg13[%c0_50, %c0_51, %c0_52, %c0_53] : memref<1x18x18x4xf32, #tpu.memory_space<vmem>>, vector<1x1x18x4xf32>
    tpu.vector_store %arg13[%c0_50, %c0_51, %c0_52, %c0_53], %26 {strides = array<i32>} : memref<1x18x18x4xf32, #tpu.memory_space<vmem>>, vector<1x1x18x4xf32>,
    %cst_54 = arith.constant -1.000000e+30 : f32
    %28 = vector.broadcast %cst_54 : f32 to vector<1x1x18x4xf32>
    %c0_55 = arith.constant 0 : index
    %c17_56 = arith.constant 17 : index
    %c0_57 = arith.constant 0 : index
    %c0_58 = arith.constant 0 : index
    %29 = vector.load %arg13[%c0_55, %c17_56, %c0_57, %c0_58] : memref<1x18x18x4xf32, #tpu.memory_space<vmem>>, vector<1x1x18x4xf32>
    tpu.vector_store %arg13[%c0_55, %c17_56, %c0_57, %c0_58], %28 {strides = array<i32>} : memref<1x18x18x4xf32, #tpu.memory_space<vmem>>, vector<1x1x18x4xf32>,
    %cst_59 = arith.constant -1.000000e+30 : f32
    %30 = vector.broadcast %cst_59 : f32 to vector<1x18x1x4xf32>
    %c0_60 = arith.constant 0 : index
    %c0_61 = arith.constant 0 : index
    %c0_62 = arith.constant 0 : index
    %c0_63 = arith.constant 0 : index
    %31 = vector.load %arg13[%c0_60, %c0_61, %c0_62, %c0_63] : memref<1x18x18x4xf32, #tpu.memory_space<vmem>>, vector<1x18x1x4xf32>
    tpu.vector_store %arg13[%c0_60, %c0_61, %c0_62, %c0_63], %30 {strides = array<i32>} : memref<1x18x18x4xf32, #tpu.memory_space<vmem>>, vector<1x18x1x4xf32>,
    %cst_64 = arith.constant -1.000000e+30 : f32
    %32 = vector.broadcast %cst_64 : f32 to vector<1x18x1x4xf32>
    %c0_65 = arith.constant 0 : index
    %c0_66 = arith.constant 0 : index
    %c17_67 = arith.constant 17 : index
    %c0_68 = arith.constant 0 : index
    %33 = vector.load %arg13[%c0_65, %c0_66, %c17_67, %c0_68] : memref<1x18x18x4xf32, #tpu.memory_space<vmem>>, vector<1x18x1x4xf32>
    tpu.vector_store %arg13[%c0_65, %c0_66, %c17_67, %c0_68], %32 {strides = array<i32>} : memref<1x18x18x4xf32, #tpu.memory_space<vmem>>, vector<1x18x1x4xf32>,
    %34 = vector.extract_strided_slice %6 {offsets = [0, 8], sizes = [256, 4], strides = [1, 1]} : vector<256x16xf32> to vector<256x4xf32>
    %cst_69 = arith.constant 0.000000e+00 : f32
    %35 = vector.broadcast %cst_69 : f32 to vector<256x4xf32>
    %36 = arith.maximumf %34, %35 : vector<256x4xf32>
    %37 = vector.shape_cast %36 : vector<256x4xf32> to vector<1x16x16x4xf32>
    %c0_70 = arith.constant 0 : index
    %c1 = arith.constant 1 : index
    %c1_71 = arith.constant 1 : index
    %c0_72 = arith.constant 0 : index
    %38 = vector.load %arg11[%c0_70, %c1, %c1_71, %c0_72] : memref<1x18x18x4xf32, #tpu.memory_space<vmem>>, vector<1x16x16x4xf32>
    tpu.vector_store %arg11[%c0_70, %c1, %c1_71, %c0_72], %37 {strides = array<i32>} : memref<1x18x18x4xf32, #tpu.memory_space<vmem>>, vector<1x16x16x4xf32>,
    %39 = vector.extract_strided_slice %6 {offsets = [0, 12], sizes = [256, 4], strides = [1, 1]} : vector<256x16xf32> to vector<256x4xf32>
    %cst_73 = arith.constant 0.000000e+00 : f32
    %40 = vector.broadcast %cst_73 : f32 to vector<256x4xf32>
    %41 = arith.maximumf %39, %40 : vector<256x4xf32>
    %42 = vector.shape_cast %41 : vector<256x4xf32> to vector<1x16x16x4xf32>
    %c0_74 = arith.constant 0 : index
    %c2 = arith.constant 2 : index
    %c2_75 = arith.constant 2 : index
    %c0_76 = arith.constant 0 : index
    %43 = vector.load %arg12[%c0_74, %c2, %c2_75, %c0_76] : memref<1x20x20x4xf32, #tpu.memory_space<vmem>>, vector<1x16x16x4xf32>
    tpu.vector_store %arg12[%c0_74, %c2, %c2_75, %c0_76], %42 {strides = array<i32>} : memref<1x20x20x4xf32, #tpu.memory_space<vmem>>, vector<1x16x16x4xf32>,
    %44 = arith.extf %0 : vector<1x16x16x4xbf16> to vector<1x16x16x4xf32>
    %c0_77 = arith.constant 0 : index
    %c1_78 = arith.constant 1 : index
    %c1_79 = arith.constant 1 : index
    %c0_80 = arith.constant 0 : index
    %45 = vector.load %arg13[%c0_77, %c1_78, %c1_79, %c0_80] : memref<1x18x18x4xf32, #tpu.memory_space<vmem>>, vector<1x16x16x4xf32>
    tpu.vector_store %arg13[%c0_77, %c1_78, %c1_79, %c0_80], %44 {strides = array<i32>} : memref<1x18x18x4xf32, #tpu.memory_space<vmem>>, vector<1x16x16x4xf32>,
    %c0_81 = arith.constant 0 : index
    %c0_82 = arith.constant 0 : index
    %c0_83 = arith.constant 0 : index
    %c0_84 = arith.constant 0 : index
    %46 = vector.load %arg11[%c0_81, %c0_82, %c0_83, %c0_84] : memref<1x18x18x4xf32, #tpu.memory_space<vmem>>, vector<1x16x16x4xf32>
    %47 = vector.shape_cast %46 : vector<1x16x16x4xf32> to vector<256x4xf32>
    %48 = arith.truncf %47 : vector<256x4xf32> to vector<256x4xbf16>
    %c0_85 = arith.constant 0 : index
    %c0_86 = arith.constant 0 : index
    %c0_87 = arith.constant 0 : index
    %49 = vector.load %arg4[%c0_85, %c0_86, %c0_87] : memref<9x4x8xbf16, #tpu.memory_space<vmem>>, vector<1x4x8xbf16>
    %50 = vector.shape_cast %49 : vector<1x4x8xbf16> to vector<4x8xbf16>
    %cst_88 = arith.constant dense<0.000000e+00> : vector<256x8xf32>
    %51 = tpu.matmul %48, %50, %cst_88 {dimension_numbers = #tpu.dot_dimension_numbers<[1], [0], [0], [1], [0, 0, 1, 1], [], []>} : vector<256x4xbf16>, vector<4x8xbf16>, vector<256x8xf32> -> vector<256x8xf32>
    %c0_89 = arith.constant 0 : index
    %c0_90 = arith.constant 0 : index
    %c1_91 = arith.constant 1 : index
    %c0_92 = arith.constant 0 : index
    %52 = vector.load %arg11[%c0_89, %c0_90, %c1_91, %c0_92] : memref<1x18x18x4xf32, #tpu.memory_space<vmem>>, vector<1x16x16x4xf32>
    %53 = vector.shape_cast %52 : vector<1x16x16x4xf32> to vector<256x4xf32>
    %54 = arith.truncf %53 : vector<256x4xf32> to vector<256x4xbf16>
    %c1_93 = arith.constant 1 : index
    %c0_94 = arith.constant 0 : index
    %c0_95 = arith.constant 0 : index
    %55 = vector.load %arg4[%c1_93, %c0_94, %c0_95] : memref<9x4x8xbf16, #tpu.memory_space<vmem>>, vector<1x4x8xbf16>
    %56 = vector.shape_cast %55 : vector<1x4x8xbf16> to vector<4x8xbf16>
    %cst_96 = arith.constant dense<0.000000e+00> : vector<256x8xf32>
    %57 = tpu.matmul %54, %56, %cst_96 {dimension_numbers = #tpu.dot_dimension_numbers<[1], [0], [0], [1], [0, 0, 1, 1], [], []>} : vector<256x4xbf16>, vector<4x8xbf16>, vector<256x8xf32> -> vector<256x8xf32>
    %58 = arith.addf %51, %57 : vector<256x8xf32>
    %c0_97 = arith.constant 0 : index
    %c0_98 = arith.constant 0 : index
    %c2_99 = arith.constant 2 : index
    %c0_100 = arith.constant 0 : index
    %59 = vector.load %arg11[%c0_97, %c0_98, %c2_99, %c0_100] : memref<1x18x18x4xf32, #tpu.memory_space<vmem>>, vector<1x16x16x4xf32>
    %60 = vector.shape_cast %59 : vector<1x16x16x4xf32> to vector<256x4xf32>
    %61 = arith.truncf %60 : vector<256x4xf32> to vector<256x4xbf16>
    %c2_101 = arith.constant 2 : index
    %c0_102 = arith.constant 0 : index
    %c0_103 = arith.constant 0 : index
    %62 = vector.load %arg4[%c2_101, %c0_102, %c0_103] : memref<9x4x8xbf16, #tpu.memory_space<vmem>>, vector<1x4x8xbf16>
    %63 = vector.shape_cast %62 : vector<1x4x8xbf16> to vector<4x8xbf16>
    %cst_104 = arith.constant dense<0.000000e+00> : vector<256x8xf32>
    %64 = tpu.matmul %61, %63, %cst_104 {dimension_numbers = #tpu.dot_dimension_numbers<[1], [0], [0], [1], [0, 0, 1, 1], [], []>} : vector<256x4xbf16>, vector<4x8xbf16>, vector<256x8xf32> -> vector<256x8xf32>
    %65 = arith.addf %58, %64 : vector<256x8xf32>
    %c0_105 = arith.constant 0 : index
    %c1_106 = arith.constant 1 : index
    %c0_107 = arith.constant 0 : index
    %c0_108 = arith.constant 0 : index
    %66 = vector.load %arg11[%c0_105, %c1_106, %c0_107, %c0_108] : memref<1x18x18x4xf32, #tpu.memory_space<vmem>>, vector<1x16x16x4xf32>
    %67 = vector.shape_cast %66 : vector<1x16x16x4xf32> to vector<256x4xf32>
    %68 = arith.truncf %67 : vector<256x4xf32> to vector<256x4xbf16>
    %c3 = arith.constant 3 : index
    %c0_109 = arith.constant 0 : index
    %c0_110 = arith.constant 0 : index
    %69 = vector.load %arg4[%c3, %c0_109, %c0_110] : memref<9x4x8xbf16, #tpu.memory_space<vmem>>, vector<1x4x8xbf16>
    %70 = vector.shape_cast %69 : vector<1x4x8xbf16> to vector<4x8xbf16>
    %cst_111 = arith.constant dense<0.000000e+00> : vector<256x8xf32>
    %71 = tpu.matmul %68, %70, %cst_111 {dimension_numbers = #tpu.dot_dimension_numbers<[1], [0], [0], [1], [0, 0, 1, 1], [], []>} : vector<256x4xbf16>, vector<4x8xbf16>, vector<256x8xf32> -> vector<256x8xf32>
    %72 = arith.addf %65, %71 : vector<256x8xf32>
    %c0_112 = arith.constant 0 : index
    %c1_113 = arith.constant 1 : index
    %c1_114 = arith.constant 1 : index
    %c0_115 = arith.constant 0 : index
    %73 = vector.load %arg11[%c0_112, %c1_113, %c1_114, %c0_115] : memref<1x18x18x4xf32, #tpu.memory_space<vmem>>, vector<1x16x16x4xf32>
    %74 = vector.shape_cast %73 : vector<1x16x16x4xf32> to vector<256x4xf32>
    %75 = arith.truncf %74 : vector<256x4xf32> to vector<256x4xbf16>
    %c4 = arith.constant 4 : index
    %c0_116 = arith.constant 0 : index
    %c0_117 = arith.constant 0 : index
    %76 = vector.load %arg4[%c4, %c0_116, %c0_117] : memref<9x4x8xbf16, #tpu.memory_space<vmem>>, vector<1x4x8xbf16>
    %77 = vector.shape_cast %76 : vector<1x4x8xbf16> to vector<4x8xbf16>
    %cst_118 = arith.constant dense<0.000000e+00> : vector<256x8xf32>
    %78 = tpu.matmul %75, %77, %cst_118 {dimension_numbers = #tpu.dot_dimension_numbers<[1], [0], [0], [1], [0, 0, 1, 1], [], []>} : vector<256x4xbf16>, vector<4x8xbf16>, vector<256x8xf32> -> vector<256x8xf32>
    %79 = arith.addf %72, %78 : vector<256x8xf32>
    %c0_119 = arith.constant 0 : index
    %c1_120 = arith.constant 1 : index
    %c2_121 = arith.constant 2 : index
    %c0_122 = arith.constant 0 : index
    %80 = vector.load %arg11[%c0_119, %c1_120, %c2_121, %c0_122] : memref<1x18x18x4xf32, #tpu.memory_space<vmem>>, vector<1x16x16x4xf32>
    %81 = vector.shape_cast %80 : vector<1x16x16x4xf32> to vector<256x4xf32>
    %82 = arith.truncf %81 : vector<256x4xf32> to vector<256x4xbf16>
    %c5 = arith.constant 5 : index
    %c0_123 = arith.constant 0 : index
    %c0_124 = arith.constant 0 : index
    %83 = vector.load %arg4[%c5, %c0_123, %c0_124] : memref<9x4x8xbf16, #tpu.memory_space<vmem>>, vector<1x4x8xbf16>
    %84 = vector.shape_cast %83 : vector<1x4x8xbf16> to vector<4x8xbf16>
    %cst_125 = arith.constant dense<0.000000e+00> : vector<256x8xf32>
    %85 = tpu.matmul %82, %84, %cst_125 {dimension_numbers = #tpu.dot_dimension_numbers<[1], [0], [0], [1], [0, 0, 1, 1], [], []>} : vector<256x4xbf16>, vector<4x8xbf16>, vector<256x8xf32> -> vector<256x8xf32>
    %86 = arith.addf %79, %85 : vector<256x8xf32>
    %c0_126 = arith.constant 0 : index
    %c2_127 = arith.constant 2 : index
    %c0_128 = arith.constant 0 : index
    %c0_129 = arith.constant 0 : index
    %87 = vector.load %arg11[%c0_126, %c2_127, %c0_128, %c0_129] : memref<1x18x18x4xf32, #tpu.memory_space<vmem>>, vector<1x16x16x4xf32>
    %88 = vector.shape_cast %87 : vector<1x16x16x4xf32> to vector<256x4xf32>
    %89 = arith.truncf %88 : vector<256x4xf32> to vector<256x4xbf16>
    %c6 = arith.constant 6 : index
    %c0_130 = arith.constant 0 : index
    %c0_131 = arith.constant 0 : index
    %90 = vector.load %arg4[%c6, %c0_130, %c0_131] : memref<9x4x8xbf16, #tpu.memory_space<vmem>>, vector<1x4x8xbf16>
    %91 = vector.shape_cast %90 : vector<1x4x8xbf16> to vector<4x8xbf16>
    %cst_132 = arith.constant dense<0.000000e+00> : vector<256x8xf32>
    %92 = tpu.matmul %89, %91, %cst_132 {dimension_numbers = #tpu.dot_dimension_numbers<[1], [0], [0], [1], [0, 0, 1, 1], [], []>} : vector<256x4xbf16>, vector<4x8xbf16>, vector<256x8xf32> -> vector<256x8xf32>
    %93 = arith.addf %86, %92 : vector<256x8xf32>
    %c0_133 = arith.constant 0 : index
    %c2_134 = arith.constant 2 : index
    %c1_135 = arith.constant 1 : index
    %c0_136 = arith.constant 0 : index
    %94 = vector.load %arg11[%c0_133, %c2_134, %c1_135, %c0_136] : memref<1x18x18x4xf32, #tpu.memory_space<vmem>>, vector<1x16x16x4xf32>
    %95 = vector.shape_cast %94 : vector<1x16x16x4xf32> to vector<256x4xf32>
    %96 = arith.truncf %95 : vector<256x4xf32> to vector<256x4xbf16>
    %c7 = arith.constant 7 : index
    %c0_137 = arith.constant 0 : index
    %c0_138 = arith.constant 0 : index
    %97 = vector.load %arg4[%c7, %c0_137, %c0_138] : memref<9x4x8xbf16, #tpu.memory_space<vmem>>, vector<1x4x8xbf16>
    %98 = vector.shape_cast %97 : vector<1x4x8xbf16> to vector<4x8xbf16>
    %cst_139 = arith.constant dense<0.000000e+00> : vector<256x8xf32>
    %99 = tpu.matmul %96, %98, %cst_139 {dimension_numbers = #tpu.dot_dimension_numbers<[1], [0], [0], [1], [0, 0, 1, 1], [], []>} : vector<256x4xbf16>, vector<4x8xbf16>, vector<256x8xf32> -> vector<256x8xf32>
    %100 = arith.addf %93, %99 : vector<256x8xf32>
    %c0_140 = arith.constant 0 : index
    %c2_141 = arith.constant 2 : index
    %c2_142 = arith.constant 2 : index
    %c0_143 = arith.constant 0 : index
    %101 = vector.load %arg11[%c0_140, %c2_141, %c2_142, %c0_143] : memref<1x18x18x4xf32, #tpu.memory_space<vmem>>, vector<1x16x16x4xf32>
    %102 = vector.shape_cast %101 : vector<1x16x16x4xf32> to vector<256x4xf32>
    %103 = arith.truncf %102 : vector<256x4xf32> to vector<256x4xbf16>
    %c8 = arith.constant 8 : index
    %c0_144 = arith.constant 0 : index
    %c0_145 = arith.constant 0 : index
    %104 = vector.load %arg4[%c8, %c0_144, %c0_145] : memref<9x4x8xbf16, #tpu.memory_space<vmem>>, vector<1x4x8xbf16>
    %105 = vector.shape_cast %104 : vector<1x4x8xbf16> to vector<4x8xbf16>
    %cst_146 = arith.constant dense<0.000000e+00> : vector<256x8xf32>
    %106 = tpu.matmul %103, %105, %cst_146 {dimension_numbers = #tpu.dot_dimension_numbers<[1], [0], [0], [1], [0, 0, 1, 1], [], []>} : vector<256x4xbf16>, vector<4x8xbf16>, vector<256x8xf32> -> vector<256x8xf32>
    %107 = arith.addf %100, %106 : vector<256x8xf32>
    %c0_147 = arith.constant 0 : index
    %c0_148 = arith.constant 0 : index
    %108 = vector.load %arg5[%c0_147, %c0_148] : memref<1x8xf32, #tpu.memory_space<vmem>>, vector<1x8xf32>
    %109 = vector.broadcast %108 : vector<1x8xf32> to vector<256x8xf32>
    %110 = arith.addf %107, %109 : vector<256x8xf32>
    %cst_149 = arith.constant 0.000000e+00 : f32
    %111 = vector.broadcast %cst_149 : f32 to vector<256x8xf32>
    %112 = arith.maximumf %110, %111 : vector<256x8xf32>
    %113 = vector.shape_cast %112 : vector<256x8xf32> to vector<1x16x16x8xf32>
    %c0_150 = arith.constant 0 : index
    %c0_151 = arith.constant 0 : index
    %c0_152 = arith.constant 0 : index
    %c8_153 = arith.constant 8 : index
    %114 = vector.load %arg10[%c0_150, %c0_151, %c0_152, %c8_153] : memref<1x16x16x32xf32, #tpu.memory_space<vmem>>, vector<1x16x16x8xf32>
    tpu.vector_store %arg10[%c0_150, %c0_151, %c0_152, %c8_153], %113 {strides = array<i32>} : memref<1x16x16x32xf32, #tpu.memory_space<vmem>>, vector<1x16x16x8xf32>,
    %c0_154 = arith.constant 0 : index
    %c0_155 = arith.constant 0 : index
    %c0_156 = arith.constant 0 : index
    %c0_157 = arith.constant 0 : index
    %115 = vector.load %arg12[%c0_154, %c0_155, %c0_156, %c0_157] : memref<1x20x20x4xf32, #tpu.memory_space<vmem>>, vector<1x16x16x4xf32>
    %116 = vector.shape_cast %115 : vector<1x16x16x4xf32> to vector<256x4xf32>
    %117 = arith.truncf %116 : vector<256x4xf32> to vector<256x4xbf16>
    %c0_158 = arith.constant 0 : index
    %c0_159 = arith.constant 0 : index
    %c0_160 = arith.constant 0 : index
    %118 = vector.load %arg6[%c0_158, %c0_159, %c0_160] : memref<25x4x8xbf16, #tpu.memory_space<vmem>>, vector<1x4x8xbf16>
    %119 = vector.shape_cast %118 : vector<1x4x8xbf16> to vector<4x8xbf16>
    %cst_161 = arith.constant dense<0.000000e+00> : vector<256x8xf32>
    %120 = tpu.matmul %117, %119, %cst_161 {dimension_numbers = #tpu.dot_dimension_numbers<[1], [0], [0], [1], [0, 0, 1, 1], [], []>} : vector<256x4xbf16>, vector<4x8xbf16>, vector<256x8xf32> -> vector<256x8xf32>
    %c0_162 = arith.constant 0 : index
    %c0_163 = arith.constant 0 : index
    %c1_164 = arith.constant 1 : index
    %c0_165 = arith.constant 0 : index
    %121 = vector.load %arg12[%c0_162, %c0_163, %c1_164, %c0_165] : memref<1x20x20x4xf32, #tpu.memory_space<vmem>>, vector<1x16x16x4xf32>
    %122 = vector.shape_cast %121 : vector<1x16x16x4xf32> to vector<256x4xf32>
    %123 = arith.truncf %122 : vector<256x4xf32> to vector<256x4xbf16>
    %c1_166 = arith.constant 1 : index
    %c0_167 = arith.constant 0 : index
    %c0_168 = arith.constant 0 : index
    %124 = vector.load %arg6[%c1_166, %c0_167, %c0_168] : memref<25x4x8xbf16, #tpu.memory_space<vmem>>, vector<1x4x8xbf16>
    %125 = vector.shape_cast %124 : vector<1x4x8xbf16> to vector<4x8xbf16>
    %cst_169 = arith.constant dense<0.000000e+00> : vector<256x8xf32>
    %126 = tpu.matmul %123, %125, %cst_169 {dimension_numbers = #tpu.dot_dimension_numbers<[1], [0], [0], [1], [0, 0, 1, 1], [], []>} : vector<256x4xbf16>, vector<4x8xbf16>, vector<256x8xf32> -> vector<256x8xf32>
    %127 = arith.addf %120, %126 : vector<256x8xf32>
    %c0_170 = arith.constant 0 : index
    %c0_171 = arith.constant 0 : index
    %c2_172 = arith.constant 2 : index
    %c0_173 = arith.constant 0 : index
    %128 = vector.load %arg12[%c0_170, %c0_171, %c2_172, %c0_173] : memref<1x20x20x4xf32, #tpu.memory_space<vmem>>, vector<1x16x16x4xf32>
    %129 = vector.shape_cast %128 : vector<1x16x16x4xf32> to vector<256x4xf32>
    %130 = arith.truncf %129 : vector<256x4xf32> to vector<256x4xbf16>
    %c2_174 = arith.constant 2 : index
    %c0_175 = arith.constant 0 : index
    %c0_176 = arith.constant 0 : index
    %131 = vector.load %arg6[%c2_174, %c0_175, %c0_176] : memref<25x4x8xbf16, #tpu.memory_space<vmem>>, vector<1x4x8xbf16>
    %132 = vector.shape_cast %131 : vector<1x4x8xbf16> to vector<4x8xbf16>
    %cst_177 = arith.constant dense<0.000000e+00> : vector<256x8xf32>
    %133 = tpu.matmul %130, %132, %cst_177 {dimension_numbers = #tpu.dot_dimension_numbers<[1], [0], [0], [1], [0, 0, 1, 1], [], []>} : vector<256x4xbf16>, vector<4x8xbf16>, vector<256x8xf32> -> vector<256x8xf32>
    %134 = arith.addf %127, %133 : vector<256x8xf32>
    %c0_178 = arith.constant 0 : index
    %c0_179 = arith.constant 0 : index
    %c3_180 = arith.constant 3 : index
    %c0_181 = arith.constant 0 : index
    %135 = vector.load %arg12[%c0_178, %c0_179, %c3_180, %c0_181] : memref<1x20x20x4xf32, #tpu.memory_space<vmem>>, vector<1x16x16x4xf32>
    %136 = vector.shape_cast %135 : vector<1x16x16x4xf32> to vector<256x4xf32>
    %137 = arith.truncf %136 : vector<256x4xf32> to vector<256x4xbf16>
    %c3_182 = arith.constant 3 : index
    %c0_183 = arith.constant 0 : index
    %c0_184 = arith.constant 0 : index
    %138 = vector.load %arg6[%c3_182, %c0_183, %c0_184] : memref<25x4x8xbf16, #tpu.memory_space<vmem>>, vector<1x4x8xbf16>
    %139 = vector.shape_cast %138 : vector<1x4x8xbf16> to vector<4x8xbf16>
    %cst_185 = arith.constant dense<0.000000e+00> : vector<256x8xf32>
    %140 = tpu.matmul %137, %139, %cst_185 {dimension_numbers = #tpu.dot_dimension_numbers<[1], [0], [0], [1], [0, 0, 1, 1], [], []>} : vector<256x4xbf16>, vector<4x8xbf16>, vector<256x8xf32> -> vector<256x8xf32>
    %141 = arith.addf %134, %140 : vector<256x8xf32>
    %c0_186 = arith.constant 0 : index
    %c0_187 = arith.constant 0 : index
    %c4_188 = arith.constant 4 : index
    %c0_189 = arith.constant 0 : index
    %142 = vector.load %arg12[%c0_186, %c0_187, %c4_188, %c0_189] : memref<1x20x20x4xf32, #tpu.memory_space<vmem>>, vector<1x16x16x4xf32>
    %143 = vector.shape_cast %142 : vector<1x16x16x4xf32> to vector<256x4xf32>
    %144 = arith.truncf %143 : vector<256x4xf32> to vector<256x4xbf16>
    %c4_190 = arith.constant 4 : index
    %c0_191 = arith.constant 0 : index
    %c0_192 = arith.constant 0 : index
    %145 = vector.load %arg6[%c4_190, %c0_191, %c0_192] : memref<25x4x8xbf16, #tpu.memory_space<vmem>>, vector<1x4x8xbf16>
    %146 = vector.shape_cast %145 : vector<1x4x8xbf16> to vector<4x8xbf16>
    %cst_193 = arith.constant dense<0.000000e+00> : vector<256x8xf32>
    %147 = tpu.matmul %144, %146, %cst_193 {dimension_numbers = #tpu.dot_dimension_numbers<[1], [0], [0], [1], [0, 0, 1, 1], [], []>} : vector<256x4xbf16>, vector<4x8xbf16>, vector<256x8xf32> -> vector<256x8xf32>
    %148 = arith.addf %141, %147 : vector<256x8xf32>
    %c0_194 = arith.constant 0 : index
    %c1_195 = arith.constant 1 : index
    %c0_196 = arith.constant 0 : index
    %c0_197 = arith.constant 0 : index
    %149 = vector.load %arg12[%c0_194, %c1_195, %c0_196, %c0_197] : memref<1x20x20x4xf32, #tpu.memory_space<vmem>>, vector<1x16x16x4xf32>
    %150 = vector.shape_cast %149 : vector<1x16x16x4xf32> to vector<256x4xf32>
    %151 = arith.truncf %150 : vector<256x4xf32> to vector<256x4xbf16>
    %c5_198 = arith.constant 5 : index
    %c0_199 = arith.constant 0 : index
    %c0_200 = arith.constant 0 : index
    %152 = vector.load %arg6[%c5_198, %c0_199, %c0_200] : memref<25x4x8xbf16, #tpu.memory_space<vmem>>, vector<1x4x8xbf16>
    %153 = vector.shape_cast %152 : vector<1x4x8xbf16> to vector<4x8xbf16>
    %cst_201 = arith.constant dense<0.000000e+00> : vector<256x8xf32>
    %154 = tpu.matmul %151, %153, %cst_201 {dimension_numbers = #tpu.dot_dimension_numbers<[1], [0], [0], [1], [0, 0, 1, 1], [], []>} : vector<256x4xbf16>, vector<4x8xbf16>, vector<256x8xf32> -> vector<256x8xf32>
    %155 = arith.addf %148, %154 : vector<256x8xf32>
    %c0_202 = arith.constant 0 : index
    %c1_203 = arith.constant 1 : index
    %c1_204 = arith.constant 1 : index
    %c0_205 = arith.constant 0 : index
    %156 = vector.load %arg12[%c0_202, %c1_203, %c1_204, %c0_205] : memref<1x20x20x4xf32, #tpu.memory_space<vmem>>, vector<1x16x16x4xf32>
    %157 = vector.shape_cast %156 : vector<1x16x16x4xf32> to vector<256x4xf32>
    %158 = arith.truncf %157 : vector<256x4xf32> to vector<256x4xbf16>
    %c6_206 = arith.constant 6 : index
    %c0_207 = arith.constant 0 : index
    %c0_208 = arith.constant 0 : index
    %159 = vector.load %arg6[%c6_206, %c0_207, %c0_208] : memref<25x4x8xbf16, #tpu.memory_space<vmem>>, vector<1x4x8xbf16>
    %160 = vector.shape_cast %159 : vector<1x4x8xbf16> to vector<4x8xbf16>
    %cst_209 = arith.constant dense<0.000000e+00> : vector<256x8xf32>
    %161 = tpu.matmul %158, %160, %cst_209 {dimension_numbers = #tpu.dot_dimension_numbers<[1], [0], [0], [1], [0, 0, 1, 1], [], []>} : vector<256x4xbf16>, vector<4x8xbf16>, vector<256x8xf32> -> vector<256x8xf32>
    %162 = arith.addf %155, %161 : vector<256x8xf32>
    %c0_210 = arith.constant 0 : index
    %c1_211 = arith.constant 1 : index
    %c2_212 = arith.constant 2 : index
    %c0_213 = arith.constant 0 : index
    %163 = vector.load %arg12[%c0_210, %c1_211, %c2_212, %c0_213] : memref<1x20x20x4xf32, #tpu.memory_space<vmem>>, vector<1x16x16x4xf32>
    %164 = vector.shape_cast %163 : vector<1x16x16x4xf32> to vector<256x4xf32>
    %165 = arith.truncf %164 : vector<256x4xf32> to vector<256x4xbf16>
    %c7_214 = arith.constant 7 : index
    %c0_215 = arith.constant 0 : index
    %c0_216 = arith.constant 0 : index
    %166 = vector.load %arg6[%c7_214, %c0_215, %c0_216] : memref<25x4x8xbf16, #tpu.memory_space<vmem>>, vector<1x4x8xbf16>
    %167 = vector.shape_cast %166 : vector<1x4x8xbf16> to vector<4x8xbf16>
    %cst_217 = arith.constant dense<0.000000e+00> : vector<256x8xf32>
    %168 = tpu.matmul %165, %167, %cst_217 {dimension_numbers = #tpu.dot_dimension_numbers<[1], [0], [0], [1], [0, 0, 1, 1], [], []>} : vector<256x4xbf16>, vector<4x8xbf16>, vector<256x8xf32> -> vector<256x8xf32>
    %169 = arith.addf %162, %168 : vector<256x8xf32>
    %c0_218 = arith.constant 0 : index
    %c1_219 = arith.constant 1 : index
    %c3_220 = arith.constant 3 : index
    %c0_221 = arith.constant 0 : index
    %170 = vector.load %arg12[%c0_218, %c1_219, %c3_220, %c0_221] : memref<1x20x20x4xf32, #tpu.memory_space<vmem>>, vector<1x16x16x4xf32>
    %171 = vector.shape_cast %170 : vector<1x16x16x4xf32> to vector<256x4xf32>
    %172 = arith.truncf %171 : vector<256x4xf32> to vector<256x4xbf16>
    %c8_222 = arith.constant 8 : index
    %c0_223 = arith.constant 0 : index
    %c0_224 = arith.constant 0 : index
    %173 = vector.load %arg6[%c8_222, %c0_223, %c0_224] : memref<25x4x8xbf16, #tpu.memory_space<vmem>>, vector<1x4x8xbf16>
    %174 = vector.shape_cast %173 : vector<1x4x8xbf16> to vector<4x8xbf16>
    %cst_225 = arith.constant dense<0.000000e+00> : vector<256x8xf32>
    %175 = tpu.matmul %172, %174, %cst_225 {dimension_numbers = #tpu.dot_dimension_numbers<[1], [0], [0], [1], [0, 0, 1, 1], [], []>} : vector<256x4xbf16>, vector<4x8xbf16>, vector<256x8xf32> -> vector<256x8xf32>
    %176 = arith.addf %169, %175 : vector<256x8xf32>
    %c0_226 = arith.constant 0 : index
    %c1_227 = arith.constant 1 : index
    %c4_228 = arith.constant 4 : index
    %c0_229 = arith.constant 0 : index
    %177 = vector.load %arg12[%c0_226, %c1_227, %c4_228, %c0_229] : memref<1x20x20x4xf32, #tpu.memory_space<vmem>>, vector<1x16x16x4xf32>
    %178 = vector.shape_cast %177 : vector<1x16x16x4xf32> to vector<256x4xf32>
    %179 = arith.truncf %178 : vector<256x4xf32> to vector<256x4xbf16>
    %c9 = arith.constant 9 : index
    %c0_230 = arith.constant 0 : index
    %c0_231 = arith.constant 0 : index
    %180 = vector.load %arg6[%c9, %c0_230, %c0_231] : memref<25x4x8xbf16, #tpu.memory_space<vmem>>, vector<1x4x8xbf16>
    %181 = vector.shape_cast %180 : vector<1x4x8xbf16> to vector<4x8xbf16>
    %cst_232 = arith.constant dense<0.000000e+00> : vector<256x8xf32>
    %182 = tpu.matmul %179, %181, %cst_232 {dimension_numbers = #tpu.dot_dimension_numbers<[1], [0], [0], [1], [0, 0, 1, 1], [], []>} : vector<256x4xbf16>, vector<4x8xbf16>, vector<256x8xf32> -> vector<256x8xf32>
    %183 = arith.addf %176, %182 : vector<256x8xf32>
    %c0_233 = arith.constant 0 : index
    %c2_234 = arith.constant 2 : index
    %c0_235 = arith.constant 0 : index
    %c0_236 = arith.constant 0 : index
    %184 = vector.load %arg12[%c0_233, %c2_234, %c0_235, %c0_236] : memref<1x20x20x4xf32, #tpu.memory_space<vmem>>, vector<1x16x16x4xf32>
    %185 = vector.shape_cast %184 : vector<1x16x16x4xf32> to vector<256x4xf32>
    %186 = arith.truncf %185 : vector<256x4xf32> to vector<256x4xbf16>
    %c10 = arith.constant 10 : index
    %c0_237 = arith.constant 0 : index
    %c0_238 = arith.constant 0 : index
    %187 = vector.load %arg6[%c10, %c0_237, %c0_238] : memref<25x4x8xbf16, #tpu.memory_space<vmem>>, vector<1x4x8xbf16>
    %188 = vector.shape_cast %187 : vector<1x4x8xbf16> to vector<4x8xbf16>
    %cst_239 = arith.constant dense<0.000000e+00> : vector<256x8xf32>
    %189 = tpu.matmul %186, %188, %cst_239 {dimension_numbers = #tpu.dot_dimension_numbers<[1], [0], [0], [1], [0, 0, 1, 1], [], []>} : vector<256x4xbf16>, vector<4x8xbf16>, vector<256x8xf32> -> vector<256x8xf32>
    %190 = arith.addf %183, %189 : vector<256x8xf32>
    %c0_240 = arith.constant 0 : index
    %c2_241 = arith.constant 2 : index
    %c1_242 = arith.constant 1 : index
    %c0_243 = arith.constant 0 : index
    %191 = vector.load %arg12[%c0_240, %c2_241, %c1_242, %c0_243] : memref<1x20x20x4xf32, #tpu.memory_space<vmem>>, vector<1x16x16x4xf32>
    %192 = vector.shape_cast %191 : vector<1x16x16x4xf32> to vector<256x4xf32>
    %193 = arith.truncf %192 : vector<256x4xf32> to vector<256x4xbf16>
    %c11 = arith.constant 11 : index
    %c0_244 = arith.constant 0 : index
    %c0_245 = arith.constant 0 : index
    %194 = vector.load %arg6[%c11, %c0_244, %c0_245] : memref<25x4x8xbf16, #tpu.memory_space<vmem>>, vector<1x4x8xbf16>
    %195 = vector.shape_cast %194 : vector<1x4x8xbf16> to vector<4x8xbf16>
    %cst_246 = arith.constant dense<0.000000e+00> : vector<256x8xf32>
    %196 = tpu.matmul %193, %195, %cst_246 {dimension_numbers = #tpu.dot_dimension_numbers<[1], [0], [0], [1], [0, 0, 1, 1], [], []>} : vector<256x4xbf16>, vector<4x8xbf16>, vector<256x8xf32> -> vector<256x8xf32>
    %197 = arith.addf %190, %196 : vector<256x8xf32>
    %c0_247 = arith.constant 0 : index
    %c2_248 = arith.constant 2 : index
    %c2_249 = arith.constant 2 : index
    %c0_250 = arith.constant 0 : index
    %198 = vector.load %arg12[%c0_247, %c2_248, %c2_249, %c0_250] : memref<1x20x20x4xf32, #tpu.memory_space<vmem>>, vector<1x16x16x4xf32>
    %199 = vector.shape_cast %198 : vector<1x16x16x4xf32> to vector<256x4xf32>
    %200 = arith.truncf %199 : vector<256x4xf32> to vector<256x4xbf16>
    %c12 = arith.constant 12 : index
    %c0_251 = arith.constant 0 : index
    %c0_252 = arith.constant 0 : index
    %201 = vector.load %arg6[%c12, %c0_251, %c0_252] : memref<25x4x8xbf16, #tpu.memory_space<vmem>>, vector<1x4x8xbf16>
    %202 = vector.shape_cast %201 : vector<1x4x8xbf16> to vector<4x8xbf16>
    %cst_253 = arith.constant dense<0.000000e+00> : vector<256x8xf32>
    %203 = tpu.matmul %200, %202, %cst_253 {dimension_numbers = #tpu.dot_dimension_numbers<[1], [0], [0], [1], [0, 0, 1, 1], [], []>} : vector<256x4xbf16>, vector<4x8xbf16>, vector<256x8xf32> -> vector<256x8xf32>
    %204 = arith.addf %197, %203 : vector<256x8xf32>
    %c0_254 = arith.constant 0 : index
    %c2_255 = arith.constant 2 : index
    %c3_256 = arith.constant 3 : index
    %c0_257 = arith.constant 0 : index
    %205 = vector.load %arg12[%c0_254, %c2_255, %c3_256, %c0_257] : memref<1x20x20x4xf32, #tpu.memory_space<vmem>>, vector<1x16x16x4xf32>
    %206 = vector.shape_cast %205 : vector<1x16x16x4xf32> to vector<256x4xf32>
    %207 = arith.truncf %206 : vector<256x4xf32> to vector<256x4xbf16>
    %c13 = arith.constant 13 : index
    %c0_258 = arith.constant 0 : index
    %c0_259 = arith.constant 0 : index
    %208 = vector.load %arg6[%c13, %c0_258, %c0_259] : memref<25x4x8xbf16, #tpu.memory_space<vmem>>, vector<1x4x8xbf16>
    %209 = vector.shape_cast %208 : vector<1x4x8xbf16> to vector<4x8xbf16>
    %cst_260 = arith.constant dense<0.000000e+00> : vector<256x8xf32>
    %210 = tpu.matmul %207, %209, %cst_260 {dimension_numbers = #tpu.dot_dimension_numbers<[1], [0], [0], [1], [0, 0, 1, 1], [], []>} : vector<256x4xbf16>, vector<4x8xbf16>, vector<256x8xf32> -> vector<256x8xf32>
    %211 = arith.addf %204, %210 : vector<256x8xf32>
    %c0_261 = arith.constant 0 : index
    %c2_262 = arith.constant 2 : index
    %c4_263 = arith.constant 4 : index
    %c0_264 = arith.constant 0 : index
    %212 = vector.load %arg12[%c0_261, %c2_262, %c4_263, %c0_264] : memref<1x20x20x4xf32, #tpu.memory_space<vmem>>, vector<1x16x16x4xf32>
    %213 = vector.shape_cast %212 : vector<1x16x16x4xf32> to vector<256x4xf32>
    %214 = arith.truncf %213 : vector<256x4xf32> to vector<256x4xbf16>
    %c14 = arith.constant 14 : index
    %c0_265 = arith.constant 0 : index
    %c0_266 = arith.constant 0 : index
    %215 = vector.load %arg6[%c14, %c0_265, %c0_266] : memref<25x4x8xbf16, #tpu.memory_space<vmem>>, vector<1x4x8xbf16>
    %216 = vector.shape_cast %215 : vector<1x4x8xbf16> to vector<4x8xbf16>
    %cst_267 = arith.constant dense<0.000000e+00> : vector<256x8xf32>
    %217 = tpu.matmul %214, %216, %cst_267 {dimension_numbers = #tpu.dot_dimension_numbers<[1], [0], [0], [1], [0, 0, 1, 1], [], []>} : vector<256x4xbf16>, vector<4x8xbf16>, vector<256x8xf32> -> vector<256x8xf32>
    %218 = arith.addf %211, %217 : vector<256x8xf32>
    %c0_268 = arith.constant 0 : index
    %c3_269 = arith.constant 3 : index
    %c0_270 = arith.constant 0 : index
    %c0_271 = arith.constant 0 : index
    %219 = vector.load %arg12[%c0_268, %c3_269, %c0_270, %c0_271] : memref<1x20x20x4xf32, #tpu.memory_space<vmem>>, vector<1x16x16x4xf32>
    %220 = vector.shape_cast %219 : vector<1x16x16x4xf32> to vector<256x4xf32>
    %221 = arith.truncf %220 : vector<256x4xf32> to vector<256x4xbf16>
    %c15 = arith.constant 15 : index
    %c0_272 = arith.constant 0 : index
    %c0_273 = arith.constant 0 : index
    %222 = vector.load %arg6[%c15, %c0_272, %c0_273] : memref<25x4x8xbf16, #tpu.memory_space<vmem>>, vector<1x4x8xbf16>
    %223 = vector.shape_cast %222 : vector<1x4x8xbf16> to vector<4x8xbf16>
    %cst_274 = arith.constant dense<0.000000e+00> : vector<256x8xf32>
    %224 = tpu.matmul %221, %223, %cst_274 {dimension_numbers = #tpu.dot_dimension_numbers<[1], [0], [0], [1], [0, 0, 1, 1], [], []>} : vector<256x4xbf16>, vector<4x8xbf16>, vector<256x8xf32> -> vector<256x8xf32>
    %225 = arith.addf %218, %224 : vector<256x8xf32>
    %c0_275 = arith.constant 0 : index
    %c3_276 = arith.constant 3 : index
    %c1_277 = arith.constant 1 : index
    %c0_278 = arith.constant 0 : index
    %226 = vector.load %arg12[%c0_275, %c3_276, %c1_277, %c0_278] : memref<1x20x20x4xf32, #tpu.memory_space<vmem>>, vector<1x16x16x4xf32>
    %227 = vector.shape_cast %226 : vector<1x16x16x4xf32> to vector<256x4xf32>
    %228 = arith.truncf %227 : vector<256x4xf32> to vector<256x4xbf16>
    %c16 = arith.constant 16 : index
    %c0_279 = arith.constant 0 : index
    %c0_280 = arith.constant 0 : index
    %229 = vector.load %arg6[%c16, %c0_279, %c0_280] : memref<25x4x8xbf16, #tpu.memory_space<vmem>>, vector<1x4x8xbf16>
    %230 = vector.shape_cast %229 : vector<1x4x8xbf16> to vector<4x8xbf16>
    %cst_281 = arith.constant dense<0.000000e+00> : vector<256x8xf32>
    %231 = tpu.matmul %228, %230, %cst_281 {dimension_numbers = #tpu.dot_dimension_numbers<[1], [0], [0], [1], [0, 0, 1, 1], [], []>} : vector<256x4xbf16>, vector<4x8xbf16>, vector<256x8xf32> -> vector<256x8xf32>
    %232 = arith.addf %225, %231 : vector<256x8xf32>
    %c0_282 = arith.constant 0 : index
    %c3_283 = arith.constant 3 : index
    %c2_284 = arith.constant 2 : index
    %c0_285 = arith.constant 0 : index
    %233 = vector.load %arg12[%c0_282, %c3_283, %c2_284, %c0_285] : memref<1x20x20x4xf32, #tpu.memory_space<vmem>>, vector<1x16x16x4xf32>
    %234 = vector.shape_cast %233 : vector<1x16x16x4xf32> to vector<256x4xf32>
    %235 = arith.truncf %234 : vector<256x4xf32> to vector<256x4xbf16>
    %c17_286 = arith.constant 17 : index
    %c0_287 = arith.constant 0 : index
    %c0_288 = arith.constant 0 : index
    %236 = vector.load %arg6[%c17_286, %c0_287, %c0_288] : memref<25x4x8xbf16, #tpu.memory_space<vmem>>, vector<1x4x8xbf16>
    %237 = vector.shape_cast %236 : vector<1x4x8xbf16> to vector<4x8xbf16>
    %cst_289 = arith.constant dense<0.000000e+00> : vector<256x8xf32>
    %238 = tpu.matmul %235, %237, %cst_289 {dimension_numbers = #tpu.dot_dimension_numbers<[1], [0], [0], [1], [0, 0, 1, 1], [], []>} : vector<256x4xbf16>, vector<4x8xbf16>, vector<256x8xf32> -> vector<256x8xf32>
    %239 = arith.addf %232, %238 : vector<256x8xf32>
    %c0_290 = arith.constant 0 : index
    %c3_291 = arith.constant 3 : index
    %c3_292 = arith.constant 3 : index
    %c0_293 = arith.constant 0 : index
    %240 = vector.load %arg12[%c0_290, %c3_291, %c3_292, %c0_293] : memref<1x20x20x4xf32, #tpu.memory_space<vmem>>, vector<1x16x16x4xf32>
    %241 = vector.shape_cast %240 : vector<1x16x16x4xf32> to vector<256x4xf32>
    %242 = arith.truncf %241 : vector<256x4xf32> to vector<256x4xbf16>
    %c18_294 = arith.constant 18 : index
    %c0_295 = arith.constant 0 : index
    %c0_296 = arith.constant 0 : index
    %243 = vector.load %arg6[%c18_294, %c0_295, %c0_296] : memref<25x4x8xbf16, #tpu.memory_space<vmem>>, vector<1x4x8xbf16>
    %244 = vector.shape_cast %243 : vector<1x4x8xbf16> to vector<4x8xbf16>
    %cst_297 = arith.constant dense<0.000000e+00> : vector<256x8xf32>
    %245 = tpu.matmul %242, %244, %cst_297 {dimension_numbers = #tpu.dot_dimension_numbers<[1], [0], [0], [1], [0, 0, 1, 1], [], []>} : vector<256x4xbf16>, vector<4x8xbf16>, vector<256x8xf32> -> vector<256x8xf32>
    %246 = arith.addf %239, %245 : vector<256x8xf32>
    %c0_298 = arith.constant 0 : index
    %c3_299 = arith.constant 3 : index
    %c4_300 = arith.constant 4 : index
    %c0_301 = arith.constant 0 : index
    %247 = vector.load %arg12[%c0_298, %c3_299, %c4_300, %c0_301] : memref<1x20x20x4xf32, #tpu.memory_space<vmem>>, vector<1x16x16x4xf32>
    %248 = vector.shape_cast %247 : vector<1x16x16x4xf32> to vector<256x4xf32>
    %249 = arith.truncf %248 : vector<256x4xf32> to vector<256x4xbf16>
    %c19 = arith.constant 19 : index
    %c0_302 = arith.constant 0 : index
    %c0_303 = arith.constant 0 : index
    %250 = vector.load %arg6[%c19, %c0_302, %c0_303] : memref<25x4x8xbf16, #tpu.memory_space<vmem>>, vector<1x4x8xbf16>
    %251 = vector.shape_cast %250 : vector<1x4x8xbf16> to vector<4x8xbf16>
    %cst_304 = arith.constant dense<0.000000e+00> : vector<256x8xf32>
    %252 = tpu.matmul %249, %251, %cst_304 {dimension_numbers = #tpu.dot_dimension_numbers<[1], [0], [0], [1], [0, 0, 1, 1], [], []>} : vector<256x4xbf16>, vector<4x8xbf16>, vector<256x8xf32> -> vector<256x8xf32>
    %253 = arith.addf %246, %252 : vector<256x8xf32>
    %c0_305 = arith.constant 0 : index
    %c4_306 = arith.constant 4 : index
    %c0_307 = arith.constant 0 : index
    %c0_308 = arith.constant 0 : index
    %254 = vector.load %arg12[%c0_305, %c4_306, %c0_307, %c0_308] : memref<1x20x20x4xf32, #tpu.memory_space<vmem>>, vector<1x16x16x4xf32>
    %255 = vector.shape_cast %254 : vector<1x16x16x4xf32> to vector<256x4xf32>
    %256 = arith.truncf %255 : vector<256x4xf32> to vector<256x4xbf16>
    %c20 = arith.constant 20 : index
    %c0_309 = arith.constant 0 : index
    %c0_310 = arith.constant 0 : index
    %257 = vector.load %arg6[%c20, %c0_309, %c0_310] : memref<25x4x8xbf16, #tpu.memory_space<vmem>>, vector<1x4x8xbf16>
    %258 = vector.shape_cast %257 : vector<1x4x8xbf16> to vector<4x8xbf16>
    %cst_311 = arith.constant dense<0.000000e+00> : vector<256x8xf32>
    %259 = tpu.matmul %256, %258, %cst_311 {dimension_numbers = #tpu.dot_dimension_numbers<[1], [0], [0], [1], [0, 0, 1, 1], [], []>} : vector<256x4xbf16>, vector<4x8xbf16>, vector<256x8xf32> -> vector<256x8xf32>
    %260 = arith.addf %253, %259 : vector<256x8xf32>
    %c0_312 = arith.constant 0 : index
    %c4_313 = arith.constant 4 : index
    %c1_314 = arith.constant 1 : index
    %c0_315 = arith.constant 0 : index
    %261 = vector.load %arg12[%c0_312, %c4_313, %c1_314, %c0_315] : memref<1x20x20x4xf32, #tpu.memory_space<vmem>>, vector<1x16x16x4xf32>
    %262 = vector.shape_cast %261 : vector<1x16x16x4xf32> to vector<256x4xf32>
    %263 = arith.truncf %262 : vector<256x4xf32> to vector<256x4xbf16>
    %c21 = arith.constant 21 : index
    %c0_316 = arith.constant 0 : index
    %c0_317 = arith.constant 0 : index
    %264 = vector.load %arg6[%c21, %c0_316, %c0_317] : memref<25x4x8xbf16, #tpu.memory_space<vmem>>, vector<1x4x8xbf16>
    %265 = vector.shape_cast %264 : vector<1x4x8xbf16> to vector<4x8xbf16>
    %cst_318 = arith.constant dense<0.000000e+00> : vector<256x8xf32>
    %266 = tpu.matmul %263, %265, %cst_318 {dimension_numbers = #tpu.dot_dimension_numbers<[1], [0], [0], [1], [0, 0, 1, 1], [], []>} : vector<256x4xbf16>, vector<4x8xbf16>, vector<256x8xf32> -> vector<256x8xf32>
    %267 = arith.addf %260, %266 : vector<256x8xf32>
    %c0_319 = arith.constant 0 : index
    %c4_320 = arith.constant 4 : index
    %c2_321 = arith.constant 2 : index
    %c0_322 = arith.constant 0 : index
    %268 = vector.load %arg12[%c0_319, %c4_320, %c2_321, %c0_322] : memref<1x20x20x4xf32, #tpu.memory_space<vmem>>, vector<1x16x16x4xf32>
    %269 = vector.shape_cast %268 : vector<1x16x16x4xf32> to vector<256x4xf32>
    %270 = arith.truncf %269 : vector<256x4xf32> to vector<256x4xbf16>
    %c22 = arith.constant 22 : index
    %c0_323 = arith.constant 0 : index
    %c0_324 = arith.constant 0 : index
    %271 = vector.load %arg6[%c22, %c0_323, %c0_324] : memref<25x4x8xbf16, #tpu.memory_space<vmem>>, vector<1x4x8xbf16>
    %272 = vector.shape_cast %271 : vector<1x4x8xbf16> to vector<4x8xbf16>
    %cst_325 = arith.constant dense<0.000000e+00> : vector<256x8xf32>
    %273 = tpu.matmul %270, %272, %cst_325 {dimension_numbers = #tpu.dot_dimension_numbers<[1], [0], [0], [1], [0, 0, 1, 1], [], []>} : vector<256x4xbf16>, vector<4x8xbf16>, vector<256x8xf32> -> vector<256x8xf32>
    %274 = arith.addf %267, %273 : vector<256x8xf32>
    %c0_326 = arith.constant 0 : index
    %c4_327 = arith.constant 4 : index
    %c3_328 = arith.constant 3 : index
    %c0_329 = arith.constant 0 : index
    %275 = vector.load %arg12[%c0_326, %c4_327, %c3_328, %c0_329] : memref<1x20x20x4xf32, #tpu.memory_space<vmem>>, vector<1x16x16x4xf32>
    %276 = vector.shape_cast %275 : vector<1x16x16x4xf32> to vector<256x4xf32>
    %277 = arith.truncf %276 : vector<256x4xf32> to vector<256x4xbf16>
    %c23 = arith.constant 23 : index
    %c0_330 = arith.constant 0 : index
    %c0_331 = arith.constant 0 : index
    %278 = vector.load %arg6[%c23, %c0_330, %c0_331] : memref<25x4x8xbf16, #tpu.memory_space<vmem>>, vector<1x4x8xbf16>
    %279 = vector.shape_cast %278 : vector<1x4x8xbf16> to vector<4x8xbf16>
    %cst_332 = arith.constant dense<0.000000e+00> : vector<256x8xf32>
    %280 = tpu.matmul %277, %279, %cst_332 {dimension_numbers = #tpu.dot_dimension_numbers<[1], [0], [0], [1], [0, 0, 1, 1], [], []>} : vector<256x4xbf16>, vector<4x8xbf16>, vector<256x8xf32> -> vector<256x8xf32>
    %281 = arith.addf %274, %280 : vector<256x8xf32>
    %c0_333 = arith.constant 0 : index
    %c4_334 = arith.constant 4 : index
    %c4_335 = arith.constant 4 : index
    %c0_336 = arith.constant 0 : index
    %282 = vector.load %arg12[%c0_333, %c4_334, %c4_335, %c0_336] : memref<1x20x20x4xf32, #tpu.memory_space<vmem>>, vector<1x16x16x4xf32>
    %283 = vector.shape_cast %282 : vector<1x16x16x4xf32> to vector<256x4xf32>
    %284 = arith.truncf %283 : vector<256x4xf32> to vector<256x4xbf16>
    %c24 = arith.constant 24 : index
    %c0_337 = arith.constant 0 : index
    %c0_338 = arith.constant 0 : index
    %285 = vector.load %arg6[%c24, %c0_337, %c0_338] : memref<25x4x8xbf16, #tpu.memory_space<vmem>>, vector<1x4x8xbf16>
    %286 = vector.shape_cast %285 : vector<1x4x8xbf16> to vector<4x8xbf16>
    %cst_339 = arith.constant dense<0.000000e+00> : vector<256x8xf32>
    %287 = tpu.matmul %284, %286, %cst_339 {dimension_numbers = #tpu.dot_dimension_numbers<[1], [0], [0], [1], [0, 0, 1, 1], [], []>} : vector<256x4xbf16>, vector<4x8xbf16>, vector<256x8xf32> -> vector<256x8xf32>
    %288 = arith.addf %281, %287 : vector<256x8xf32>
    %c0_340 = arith.constant 0 : index
    %c0_341 = arith.constant 0 : index
    %289 = vector.load %arg7[%c0_340, %c0_341] : memref<1x8xf32, #tpu.memory_space<vmem>>, vector<1x8xf32>
    %290 = vector.broadcast %289 : vector<1x8xf32> to vector<256x8xf32>
    %291 = arith.addf %288, %290 : vector<256x8xf32>
    %cst_342 = arith.constant 0.000000e+00 : f32
    %292 = vector.broadcast %cst_342 : f32 to vector<256x8xf32>
    %293 = arith.maximumf %291, %292 : vector<256x8xf32>
    %294 = vector.shape_cast %293 : vector<256x8xf32> to vector<1x16x16x8xf32>
    %c0_343 = arith.constant 0 : index
    %c0_344 = arith.constant 0 : index
    %c0_345 = arith.constant 0 : index
    %c16_346 = arith.constant 16 : index
    %295 = vector.load %arg10[%c0_343, %c0_344, %c0_345, %c16_346] : memref<1x16x16x32xf32, #tpu.memory_space<vmem>>, vector<1x16x16x8xf32>
    tpu.vector_store %arg10[%c0_343, %c0_344, %c0_345, %c16_346], %294 {strides = array<i32>} : memref<1x16x16x32xf32, #tpu.memory_space<vmem>>, vector<1x16x16x8xf32>,
    %c0_347 = arith.constant 0 : index
    %c0_348 = arith.constant 0 : index
    %c0_349 = arith.constant 0 : index
    %c0_350 = arith.constant 0 : index
    %296 = vector.load %arg13[%c0_347, %c0_348, %c0_349, %c0_350] : memref<1x18x18x4xf32, #tpu.memory_space<vmem>>, vector<1x16x16x4xf32>
    %c0_351 = arith.constant 0 : index
    %c0_352 = arith.constant 0 : index
    %c1_353 = arith.constant 1 : index
    %c0_354 = arith.constant 0 : index
    %297 = vector.load %arg13[%c0_351, %c0_352, %c1_353, %c0_354] : memref<1x18x18x4xf32, #tpu.memory_space<vmem>>, vector<1x16x16x4xf32>
    %298 = arith.maximumf %296, %297 : vector<1x16x16x4xf32>
    %c0_355 = arith.constant 0 : index
    %c0_356 = arith.constant 0 : index
    %c2_357 = arith.constant 2 : index
    %c0_358 = arith.constant 0 : index
    %299 = vector.load %arg13[%c0_355, %c0_356, %c2_357, %c0_358] : memref<1x18x18x4xf32, #tpu.memory_space<vmem>>, vector<1x16x16x4xf32>
    %300 = arith.maximumf %298, %299 : vector<1x16x16x4xf32>
    %c0_359 = arith.constant 0 : index
    %c1_360 = arith.constant 1 : index
    %c0_361 = arith.constant 0 : index
    %c0_362 = arith.constant 0 : index
    %301 = vector.load %arg13[%c0_359, %c1_360, %c0_361, %c0_362] : memref<1x18x18x4xf32, #tpu.memory_space<vmem>>, vector<1x16x16x4xf32>
    %302 = arith.maximumf %300, %301 : vector<1x16x16x4xf32>
    %c0_363 = arith.constant 0 : index
    %c1_364 = arith.constant 1 : index
    %c1_365 = arith.constant 1 : index
    %c0_366 = arith.constant 0 : index
    %303 = vector.load %arg13[%c0_363, %c1_364, %c1_365, %c0_366] : memref<1x18x18x4xf32, #tpu.memory_space<vmem>>, vector<1x16x16x4xf32>
    %304 = arith.maximumf %302, %303 : vector<1x16x16x4xf32>
    %c0_367 = arith.constant 0 : index
    %c1_368 = arith.constant 1 : index
    %c2_369 = arith.constant 2 : index
    %c0_370 = arith.constant 0 : index
    %305 = vector.load %arg13[%c0_367, %c1_368, %c2_369, %c0_370] : memref<1x18x18x4xf32, #tpu.memory_space<vmem>>, vector<1x16x16x4xf32>
    %306 = arith.maximumf %304, %305 : vector<1x16x16x4xf32>
    %c0_371 = arith.constant 0 : index
    %c2_372 = arith.constant 2 : index
    %c0_373 = arith.constant 0 : index
    %c0_374 = arith.constant 0 : index
    %307 = vector.load %arg13[%c0_371, %c2_372, %c0_373, %c0_374] : memref<1x18x18x4xf32, #tpu.memory_space<vmem>>, vector<1x16x16x4xf32>
    %308 = arith.maximumf %306, %307 : vector<1x16x16x4xf32>
    %c0_375 = arith.constant 0 : index
    %c2_376 = arith.constant 2 : index
    %c1_377 = arith.constant 1 : index
    %c0_378 = arith.constant 0 : index
    %309 = vector.load %arg13[%c0_375, %c2_376, %c1_377, %c0_378] : memref<1x18x18x4xf32, #tpu.memory_space<vmem>>, vector<1x16x16x4xf32>
    %310 = arith.maximumf %308, %309 : vector<1x16x16x4xf32>
    %c0_379 = arith.constant 0 : index
    %c2_380 = arith.constant 2 : index
    %c2_381 = arith.constant 2 : index
    %c0_382 = arith.constant 0 : index
    %311 = vector.load %arg13[%c0_379, %c2_380, %c2_381, %c0_382] : memref<1x18x18x4xf32, #tpu.memory_space<vmem>>, vector<1x16x16x4xf32>
    %312 = arith.maximumf %310, %311 : vector<1x16x16x4xf32>
    %313 = vector.shape_cast %312 : vector<1x16x16x4xf32> to vector<256x4xf32>
    %314 = arith.truncf %313 : vector<256x4xf32> to vector<256x4xbf16>
    %c0_383 = arith.constant 0 : index
    %c0_384 = arith.constant 0 : index
    %315 = vector.load %arg8[%c0_383, %c0_384] : memref<4x8xbf16, #tpu.memory_space<vmem>>, vector<4x8xbf16>
    %cst_385 = arith.constant dense<0.000000e+00> : vector<256x8xf32>
    %316 = tpu.matmul %314, %315, %cst_385 {dimension_numbers = #tpu.dot_dimension_numbers<[1], [0], [0], [1], [0, 0, 1, 1], [], []>} : vector<256x4xbf16>, vector<4x8xbf16>, vector<256x8xf32> -> vector<256x8xf32>
    %c0_386 = arith.constant 0 : index
    %c0_387 = arith.constant 0 : index
    %317 = vector.load %arg9[%c0_386, %c0_387] : memref<1x8xf32, #tpu.memory_space<vmem>>, vector<1x8xf32>
    %318 = vector.broadcast %317 : vector<1x8xf32> to vector<256x8xf32>
    %319 = arith.addf %316, %318 : vector<256x8xf32>
    %cst_388 = arith.constant 0.000000e+00 : f32
    %320 = vector.broadcast %cst_388 : f32 to vector<256x8xf32>
    %321 = arith.maximumf %319, %320 : vector<256x8xf32>
    %322 = vector.shape_cast %321 : vector<256x8xf32> to vector<1x16x16x8xf32>
    %c0_389 = arith.constant 0 : index
    %c0_390 = arith.constant 0 : index
    %c0_391 = arith.constant 0 : index
    %c24_392 = arith.constant 24 : index
    %323 = vector.load %arg10[%c0_389, %c0_390, %c0_391, %c24_392] : memref<1x16x16x32xf32, #tpu.memory_space<vmem>>, vector<1x16x16x8xf32>
    tpu.vector_store %arg10[%c0_389, %c0_390, %c0_391, %c24_392], %322 {strides = array<i32>} : memref<1x16x16x32xf32, #tpu.memory_space<vmem>>, vector<1x16x16x8xf32>,
    return
  }
  func.func @transform_0(%arg0: i32) -> (i32, i32, i32, i32) {
    %c0_i32 = arith.constant 0 : i32
    %c0_i32_0 = arith.constant 0 : i32
    %c0_i32_1 = arith.constant 0 : i32
    %c0_i32_2 = arith.constant 0 : i32
    return %arg0, %c0_i32, %c0_i32_0, %c0_i32_1 : i32, i32, i32, i32
  }
  func.func @transform_1(%arg0: i32) -> (i32, i32) {
    %c0_i32 = arith.constant 0 : i32
    %c0_i32_0 = arith.constant 0 : i32
    %c0_i32_1 = arith.constant 0 : i32
    return %c0_i32, %c0_i32_0 : i32, i32
  }
  func.func @transform_2(%arg0: i32) -> (i32, i32) {
    %c0_i32 = arith.constant 0 : i32
    %c0_i32_0 = arith.constant 0 : i32
    %c0_i32_1 = arith.constant 0 : i32
    return %c0_i32, %c0_i32_0 : i32, i32
  }
  func.func @transform_3(%arg0: i32) -> (i32, i32, i32) {
    %c0_i32 = arith.constant 0 : i32
    %c0_i32_0 = arith.constant 0 : i32
    %c0_i32_1 = arith.constant 0 : i32
    %c0_i32_2 = arith.constant 0 : i32
    return %c0_i32, %c0_i32_0, %c0_i32_1 : i32, i32, i32
  }
  func.func @transform_4(%arg0: i32) -> (i32, i32) {
    %c0_i32 = arith.constant 0 : i32
    %c0_i32_0 = arith.constant 0 : i32
    %c0_i32_1 = arith.constant 0 : i32
    return %c0_i32, %c0_i32_0 : i32, i32
  }
  func.func @transform_5(%arg0: i32) -> (i32, i32, i32) {
    %c0_i32 = arith.constant 0 : i32
    %c0_i32_0 = arith.constant 0 : i32
    %c0_i32_1 = arith.constant 0 : i32
    %c0_i32_2 = arith.constant 0 : i32
    return %c0_i32, %c0_i32_0, %c0_i32_1 : i32, i32, i32
  }
  func.func @transform_6(%arg0: i32) -> (i32, i32) {
    %c0_i32 = arith.constant 0 : i32
    %c0_i32_0 = arith.constant 0 : i32
    %c0_i32_1 = arith.constant 0 : i32
    return %c0_i32, %c0_i32_0 : i32, i32
  }
  func.func @transform_7(%arg0: i32) -> (i32, i32) {
    %c0_i32 = arith.constant 0 : i32
    %c0_i32_0 = arith.constant 0 : i32
    %c0_i32_1 = arith.constant 0 : i32
    return %c0_i32, %c0_i32_0 : i32, i32
  }
  func.func @transform_8(%arg0: i32) -> (i32, i32) {
    %c0_i32 = arith.constant 0 : i32
    %c0_i32_0 = arith.constant 0 : i32
    %c0_i32_1 = arith.constant 0 : i32
    return %c0_i32, %c0_i32_0 : i32, i32
  }
  func.func @transform_9(%arg0: i32) -> (i32, i32, i32, i32) {
    %c0_i32 = arith.constant 0 : i32
    %c0_i32_0 = arith.constant 0 : i32
    %c0_i32_1 = arith.constant 0 : i32
    %c0_i32_2 = arith.constant 0 : i32
    return %arg0, %c0_i32, %c0_i32_0, %c0_i32_1 : i32, i32, i32, i32
  }
}

</mosaic_0001>

<bundles_post_ra>
// kernel: inception_forward.1
= control target key start
LH: loop header
LB: loop body
LE: loop exit
PB: predicated region body
PF: predicated region fallthrough
CT: control target
= control target key end

     0   :  { %14 = vsyncpa [#allocation6], 0  ;;  %s19823_s0 = inlined_call_operand.vmem [shape: bf16[2,16,16,4], index: 0, kind: input, shape index: {}]   ;;  %s19824_s1 = inlined_call_operand.vmem [shape: bf16[4,16], index: 1, kind: input, shape index: {}]   ;;  %s19825_s2 = inlined_call_operand.vmem [shape: f32[1,16], index: 2, kind: input, shape index: {}]   ;;  %s19826_s3 = inlined_call_operand.vmem [shape: bf16[9,4,8], index: 3, kind: input, shape index: {}]   ;;  %s19827_s4 = inlined_call_operand.vmem [shape: f32[1,8], index: 4, kind: input, shape index: {}]   ;;  %s19828_s5 = inlined_call_operand.vmem [shape: bf16[25,4,8], index: 5, kind: input, shape index: {}]   ;;  %s19829_s6 = inlined_call_operand.vmem [shape: f32[1,8], index: 6, kind: input, shape index: {}]   ;;  %s19830_s7 = inlined_call_operand.vmem [shape: bf16[4,8], index: 7, kind: input, shape index: {}]   ;;  %s19831_s8 = inlined_call_operand.vmem [shape: f32[1,8], index: 8, kind: input, shape index: {}]   ;;  %s19832_s9 = inlined_call_operand.hbm [shape: f32[2,16,16,32], index: 9, kind: output, shape index: {}]  }
   0x1   :  { %16 = vsyncpa [#allocation6 + $0x1], 0  ;;  %s16352_s30 = smov 0   ;;  %s16354_s10 = smov 0  }
   0x2   :  { %s16356_s11 = smov 0   ;;  %s16358_s12 = smov 0  }
   0x3 LB: > { %s16373_s13 = sadd.s32 4294967295, %s16291_s12   ;;  %s12612_s14 = sadd.s32 4294967294, %s16291_s12   ;;  %s16291_s12 = sphi %s16358_s12, %s19869_s12   ;;  %s16287_s11 = sphi %s16356_s11, %s19868_s11   ;;  %s16283_s10 = sphi %s16354_s10, %s19867_s10   ;;  %s16279_s30 = sphi %s16352_s30, %s19866_s30  }
   0x4   : > { %s16377_s15 = sadd.s32 1, %s16291_s12   ;;  %s223_s16 = sadd.s32 1, %s16287_s11 }
   0x5   : > { %s220_s17 = ssub.s32 %s16291_s12, %s16377_s15  ;;  %p233_p0 = scmp.ne.s32.totalorder %s16287_s11, %s16283_s10 }
   0x6   : > { %p221_p1 = scmp.eq.s32.totalorder %s220_s17, 0  ;;  %p234_p2 = scmp.eq.s32.totalorder %s16373_s13, 1 }
   0x7   : > { %p239_p3 = scmp.ne.s32.totalorder %s16283_s10, %s16279_s30  ;;  %p240_p4 = scmp.eq.s32.totalorder %s12612_s14, 1 }
   0x8   : > { %s16388_s18 = scalar_select %p221_p1, %s16287_s11, %s223_s16  }
   0x9   : > { %p16390_p5 = por %p234_p2, %p233_p0  ;;  %p16394_p6 = por %p240_p4, %p239_p3 }
   0xa   : > { %p12615_p7 = scmp.ge.s32.totalorder %s16291_s12, 1  ;;  %p290_p8 = scmp.lt.s32.totalorder %s16291_s12, 3 }
   0xc   : > { %p291_p9 = pnand %p12615_p7, %p290_p8 }
   0xe   : > { %294 = sbr.rel (%p291_p9) target bundleno = 1930 (0x78a), region = 56 }
  0x15   : > { %v364_v0 = vld [vmem:[%s19824_s1] sm:$0x3]  ;;  %vm501_vm0 = vcmask 1041408   ;;  %p326_p10 = scmp.lt.s32.totalorder %s16373_s13, 1  ;;  %vm452_vm1 = vcmask 31744   ;;  %vm701_vm2 = vcmask 25600  }
  0x16   : > { %16114 = vmatprep.subr.msk.bf16.mxu1 %vm501_vm0, %v364_v0  ;;  %v503_v1 = vsel %vm501_vm0, %v364_v0, 0  ;;  %v16293_v50 = vmov 0.0   ;;  %s323_s28 = sand.u32 1, %s16283_s10   ;;  %vm746_vm3 = vcmask 27648   ;;  %v16614_v51 = vld [vmem:[%s19825_s2] ss:$0 sm:$0xff] }
  0x17   : > { %13867 = vmatpush3.bf16.msra.mxu1 %v503_v1  ;;  %s327_s23 = scalar_select %p326_p10, %s16373_s13, 1  ;;  %748 = vst.msk [vmem:[#allocation3 + $0x18] sm:$0xff] %vm452_vm1, %v16293_v50  ;;  %749 = vst.msk [vmem:[#allocation3 + $0x20] sm:$0xff] %vm452_vm1, %v16293_v50  ;;  %v12652_v52 = vld [vmem:[%s19826_s3 + $0x2] sm:$0x3]  ;;  %vm666_vm4 = vcmask 64512  }
  0x18   : > { %699 = vst.msk [vmem:[#allocation2] sm:$0xff] %vm452_vm1, %v16293_v50  ;;  %700 = vst.msk [vmem:[#allocation2 + $0x8] sm:$0xff] %vm452_vm1, %v16293_v50  ;;  %s12616_s29 = sshll.u32 %s323_s28, 8  ;;  %16115 = vmatprep.subr.msk.bf16.mxu1 %vm501_vm0, %v12652_v52  ;;  %v1376_v56 = vsel %vm501_vm0, %v12652_v52, 0  ;;  %v12923_v59 = vld [vmem:[%s19828_s5 + $0xe] sm:$0x3] }
  0x19   : > { %s13252_s24 = sshll.u32 %s327_s23, 7  ;;  %704 = vst.msk [vmem:[#allocation2 + $0x198] sm:$0xff] %vm452_vm1, %v16293_v50  ;;  %705 = vst.msk [vmem:[#allocation2 + $0x1a0] sm:$0xff] %vm452_vm1, %v16293_v50  ;;  %16131 = vmatprep.subr.msk.bf16.mxu0 %vm501_vm0, %v12923_v59  ;;  %v6135_v63 = vsel %vm501_vm0, %v12923_v59, 0  ;;  %s16294_s25 = smov 116   ;;  %vm707_vm5 = vcmask 24576  }
  0x1a   : > { %s16410_s27 = scalar_lea.vmem %s19823_s0, %s13252_s24  ;;  %744 = vst.msk [vmem:[#allocation3] sm:$0xff] %vm452_vm1, %v16293_v50  ;;  %745 = vst.msk [vmem:[#allocation3 + $0x8] sm:$0xff] %vm452_vm1, %v16293_v50  ;;  %s16630_s24 = scalar_lea.vmem [#allocation5], %s12616_s29  ;;  %14445 = vmatpush3.bf16.msra.mxu0 %v6135_v63  ;;  %vm4009_vm6 = vcmask 130112   ;;  %vm11529_vm7 = vcmask 195712   ;;  %vm12503_vm8 = vcmask 261312  }
  0x1b   : > { %v332_v2 = vld [vmem:[%s16410_s27] sm:$0xff]   ;;  %v334_v3 = vld [vmem:[%s16410_s27 + $0x8] sm:$0xff]   ;;  %v336_v4 = vld [vmem:[%s16410_s27 + $0x10] sm:$0xff]   ;;  %752 = vst.msk [vmem:[#allocation3 + $0x1b0] sm:$0xff] %vm452_vm1, %v16293_v50  ;;  %s16295_s16 = smov 120   ;;  %s16296_s22 = smov 8  }
  0x1c   : > { %v1163_v5 = vunpack.c.l.bf16 %v332_v2  ;;  %v1164_v6 = vunpack.c.h.bf16 %v332_v2  ;;  %v1165_v7 = vunpack.c.l.bf16 %v334_v3  ;;  %v1166_v8 = vunpack.c.h.bf16 %v334_v3  ;;  %v16416_v10 = vld [vmem:[%s16410_s27 + $0x18] sm:$0xff]   ;;  %13868 = vmatprep.mubr.msk.bf16.mxu1 %vm452_vm1, %v332_v2  ;;  %v16424_v14 = vld [vmem:[%s16410_s27 + $0x20] sm:$0xff]   ;;  %v16433_v17 = vld [vmem:[%s16410_s27 + $0x28] sm:$0xff]   ;;  %753 = vst.msk [vmem:[#allocation3 + $0x1b8] sm:$0xff] %vm452_vm1, %v16293_v50  ;;  %s16298_s14 = smov 24   ;;  %s16299_s21 = smov 16  }
  0x1d   : > { %v1167_v9 = vunpack.c.l.bf16 %v336_v4  ;;  %v1168_v11 = vunpack.c.h.bf16 %v336_v4  ;;  %v1169_v12 = vunpack.c.l.bf16 %v16416_v10  ;;  %v1170_v13 = vunpack.c.h.bf16 %v16416_v10  ;;  %13869 = vmatmul.mubr.msk.bf16.vlgmr.msra.gmra.mrb[0].mxu1 %vm452_vm1, %v334_v3  ;;  %v16436_v18 = vld [vmem:[%s16410_s27 + $0x30] sm:$0xff]   ;;  %v346_v22 = vld [vmem:[%s16410_s27 + $0x38] sm:$0xff]   ;;  %v348_v26 = vld [vmem:[%s16410_s27 + $0x40] sm:$0xff]   ;;  %755 = vst.msk [vmem:[#allocation3 + $0x1c8] sm:$0xff] %vm452_vm1, %v16293_v50  ;;  %s13253_s23 = sshll.u32 %s16373_s13, 12  ;;  %s19781_s13 = scalar_lea.sflag [#allocation6], %s323_s28 }
  0x1e   : > { %1196 = vst.msk [vmem:[#allocation4 + $0x19] sm:$0xff] %vm452_vm1, %v1163_v5  ;;  %1197 = vst.msk [vmem:[#allocation4 + $0x21] sm:$0xff] %vm452_vm1, %v1164_v6  ;;  %v1171_v15 = vunpack.c.l.bf16 %v16424_v14  ;;  %v1172_v16 = vunpack.c.h.bf16 %v16424_v14  ;;  %13872 = vmatprep.mubr.msk.bf16.mxu1 %vm452_vm1, %v336_v4  ;;  %v1173_v19 = vunpack.c.l.bf16 %v16433_v17  ;;  %v1174_v20 = vunpack.c.h.bf16 %v16433_v17  ;;  %v350_v29 = vld [vmem:[%s16410_s27 + $0x48] sm:$0xff]   ;;  %v352_v30 = vld [vmem:[%s16410_s27 + $0x50] sm:$0xff]   ;;  %13901 = vmatpush3.bf16.msra.mxu1 %v1376_v56  ;;  %s19771_s29 = scalar_lea.hbm %s19832_s9, %s13253_s23 }
  0x1f   : > { %1198 = vst.msk [vmem:[#allocation4 + $0x31] sm:$0xff] %vm452_vm1, %v1165_v7  ;;  %1199 = vst.msk [vmem:[#allocation4 + $0x39] sm:$0xff] %vm452_vm1, %v1166_v8  ;;  %v1175_v21 = vunpack.c.l.bf16 %v16436_v18  ;;  %v1176_v23 = vunpack.c.h.bf16 %v16436_v18  ;;  %v1177_v24 = vunpack.c.l.bf16 %v346_v22  ;;  %v1178_v25 = vunpack.c.h.bf16 %v346_v22  ;;  %v354_v34 = vld [vmem:[%s16410_s27 + $0x58] sm:$0xff]   ;;  %v356_v38 = vld [vmem:[%s16410_s27 + $0x60] sm:$0xff]  }
  0x20   : > { %1200 = vst.msk [vmem:[#allocation4 + $0x49] sm:$0xff] %vm452_vm1, %v1167_v9  ;;  %1201 = vst.msk [vmem:[#allocation4 + $0x51] sm:$0xff] %vm452_vm1, %v1168_v11  ;;  %v1179_v27 = vunpack.c.l.bf16 %v348_v26  ;;  %v1180_v28 = vunpack.c.h.bf16 %v348_v26  ;;  %v1181_v31 = vunpack.c.l.bf16 %v350_v29  ;;  %v1182_v32 = vunpack.c.h.bf16 %v350_v29  ;;  %v358_v41 = vld [vmem:[%s16410_s27 + $0x68] sm:$0xff]   ;;  %v360_v42 = vld [vmem:[%s16410_s27 + $0x70] sm:$0xff]  }
  0x21   : > { %1202 = vst.msk [vmem:[#allocation4 + $0x61] sm:$0xff] %vm452_vm1, %v1169_v12  ;;  %1203 = vst.msk [vmem:[#allocation4 + $0x69] sm:$0xff] %vm452_vm1, %v1170_v13  ;;  %v1183_v33 = vunpack.c.l.bf16 %v352_v30  ;;  %v1184_v35 = vunpack.c.h.bf16 %v352_v30  ;;  %v1185_v36 = vunpack.c.l.bf16 %v354_v34  ;;  %v1186_v37 = vunpack.c.h.bf16 %v354_v34  ;;  %v362_v46 = vld [vmem:[%s16410_s27 + $0x78] sm:$0xff]   ;;  %v6036_v0 = vld [vmem:[#allocation3 + $0x1a] sm:$0xff] }
  0x22   : > { %1204 = vst.msk [vmem:[#allocation4 + $0x79] sm:$0xff] %vm452_vm1, %v1171_v15  ;;  %1205 = vst.msk [vmem:[#allocation4 + $0x81] sm:$0xff] %vm452_vm1, %v1172_v16  ;;  %v1187_v39 = vunpack.c.l.bf16 %v356_v38  ;;  %v1188_v40 = vunpack.c.h.bf16 %v356_v38  ;;  %v1189_v43 = vunpack.c.l.bf16 %v358_v41  ;;  %v1190_v44 = vunpack.c.h.bf16 %v358_v41 }
  0x23   : > { %1206 = vst.msk [vmem:[#allocation4 + $0x91] sm:$0xff] %vm452_vm1, %v1173_v19  ;;  %1207 = vst.msk [vmem:[#allocation4 + $0x99] sm:$0xff] %vm452_vm1, %v1174_v20  ;;  %v1191_v45 = vunpack.c.l.bf16 %v360_v42  ;;  %v1192_v47 = vunpack.c.h.bf16 %v360_v42  ;;  %v1193_v48 = vunpack.c.l.bf16 %v362_v46  ;;  %v1194_v49 = vunpack.c.h.bf16 %v362_v46 }
  0x24   : > { %1208 = vst.msk [vmem:[#allocation4 + $0xa9] sm:$0xff] %vm452_vm1, %v1175_v21  ;;  %1209 = vst.msk [vmem:[#allocation4 + $0xb1] sm:$0xff] %vm452_vm1, %v1176_v23 }
  0x25   : > { %1210 = vst.msk [vmem:[#allocation4 + $0xc1] sm:$0xff] %vm452_vm1, %v1177_v24  ;;  %1211 = vst.msk [vmem:[#allocation4 + $0xc9] sm:$0xff] %vm452_vm1, %v1178_v25  ;;  %13873 = vmatmul.mubr.msk.bf16.gmra.mrb[4].mxu1 %vm452_vm1, %v16416_v10 }
  0x26   : > { %1212 = vst.msk [vmem:[#allocation4 + $0xd9] sm:$0xff] %vm452_vm1, %v1179_v27  ;;  %1213 = vst.msk [vmem:[#allocation4 + $0xe1] sm:$0xff] %vm452_vm1, %v1180_v28  ;;  %13876 = vmatprep.mubr.msk.bf16.mxu1 %vm452_vm1, %v16424_v14 }
  0x27   : > { %1214 = vst.msk [vmem:[#allocation4 + $0xf1] sm:$0xff] %vm452_vm1, %v1181_v31  ;;  %1215 = vst.msk [vmem:[#allocation4 + $0xf9] sm:$0xff] %vm452_vm1, %v1182_v32 }
  0x28   : > { %1216 = vst.msk [vmem:[#allocation4 + $0x109] sm:$0xff] %vm452_vm1, %v1183_v33  ;;  %1217 = vst.msk [vmem:[#allocation4 + $0x111] sm:$0xff] %vm452_vm1, %v1184_v35 }
  0x29   : > { %1218 = vst.msk [vmem:[#allocation4 + $0x121] sm:$0xff] %vm452_vm1, %v1185_v36  ;;  %1219 = vst.msk [vmem:[#allocation4 + $0x129] sm:$0xff] %vm452_vm1, %v1186_v37 }
  0x2a   : > { %1220 = vst.msk [vmem:[#allocation4 + $0x139] sm:$0xff] %vm452_vm1, %v1187_v39  ;;  %1221 = vst.msk [vmem:[#allocation4 + $0x141] sm:$0xff] %vm452_vm1, %v1188_v40 }
  0x2b   : > { %1222 = vst.msk [vmem:[#allocation4 + $0x151] sm:$0xff] %vm452_vm1, %v1189_v43  ;;  %1223 = vst.msk [vmem:[#allocation4 + $0x159] sm:$0xff] %vm452_vm1, %v1190_v44 }
  0x2c   : > { %1224 = vst.msk [vmem:[#allocation4 + $0x169] sm:$0xff] %vm452_vm1, %v1191_v45  ;;  %1225 = vst.msk [vmem:[#allocation4 + $0x171] sm:$0xff] %vm452_vm1, %v1192_v47 }
  0x2d   : > { %1226 = vst.msk [vmem:[#allocation4 + $0x181] sm:$0xff] %vm452_vm1, %v1193_v48  ;;  %1227 = vst.msk [vmem:[#allocation4 + $0x189] sm:$0xff] %vm452_vm1, %v1194_v49  ;;  %13877 = vmatmul.mubr.msk.bf16.gmra.mrb[8].mxu1 %vm452_vm1, %v16433_v17 }
  0x2e   : > { %13880 = vmatprep.mubr.msk.bf16.mxu1 %vm452_vm1, %v16436_v18  ;;  %756 = vst.msk [vmem:[#allocation3 + $0x1d0] sm:$0xff] %vm452_vm1, %v16293_v50 }
  0x2f   : > { %702 = vst.msk [vmem:[#allocation2 + $0x10] sm:$0x3] %vm701_vm2, %v16293_v50  ;;  %706 = vst.msk [vmem:[#allocation2 + $0x1a8] sm:$0x3] %vm701_vm2, %v16293_v50 }
  0x30   : > { %760 = vst.msk [vmem:[#allocation3 + $0x30] sm:$0x3] %vm701_vm2, %v16293_v50  ;;  %761 = vst.msk [vmem:[#allocation3 + $0x48] sm:$0x3] %vm701_vm2, %v16293_v50 }
  0x31   : > { %762 = vst.msk [vmem:[#allocation3 + $0x60] sm:$0x3] %vm701_vm2, %v16293_v50  ;;  %763 = vst.msk [vmem:[#allocation3 + $0x78] sm:$0x3] %vm701_vm2, %v16293_v50 }
  0x32   : > { %764 = vst.msk [vmem:[#allocation3 + $0x90] sm:$0x3] %vm701_vm2, %v16293_v50  ;;  %765 = vst.msk [vmem:[#allocation3 + $0xa8] sm:$0x3] %vm701_vm2, %v16293_v50 }
  0x33   : > { %766 = vst.msk [vmem:[#allocation3 + $0xc0] sm:$0x3] %vm701_vm2, %v16293_v50  ;;  %767 = vst.msk [vmem:[#allocation3 + $0xd8] sm:$0x3] %vm701_vm2, %v16293_v50 }
  0x34   : > { %768 = vst.msk [vmem:[#allocation3 + $0xf0] sm:$0x3] %vm701_vm2, %v16293_v50  ;;  %769 = vst.msk [vmem:[#allocation3 + $0x108] sm:$0x3] %vm701_vm2, %v16293_v50 }
  0x35   : > { %13881 = vmatmul.mubr.msk.bf16.gmra.mrb[12].mxu1 %vm452_vm1, %v346_v22  ;;  %770 = vst.msk [vmem:[#allocation3 + $0x120] sm:$0x3] %vm701_vm2, %v16293_v50  ;;  %771 = vst.msk [vmem:[#allocation3 + $0x138] sm:$0x3] %vm701_vm2, %v16293_v50 }
  0x36   : > { %13884 = vmatprep.mubr.msk.bf16.mxu1 %vm452_vm1, %v348_v26  ;;  %772 = vst.msk [vmem:[#allocation3 + $0x150] sm:$0x3] %vm701_vm2, %v16293_v50  ;;  %773 = vst.msk [vmem:[#allocation3 + $0x168] sm:$0x3] %vm701_vm2, %v16293_v50 }
  0x37   : > { %774 = vst.msk [vmem:[#allocation3 + $0x180] sm:$0x3] %vm701_vm2, %v16293_v50  ;;  %775 = vst.msk [vmem:[#allocation3 + $0x198] sm:$0x3] %vm701_vm2, %v16293_v50 }
  0x38   : > { %780 = vst.msk [vmem:[#allocation3 + $0x42] sm:$0x3] %vm701_vm2, %v16293_v50  ;;  %781 = vst.msk [vmem:[#allocation3 + $0x5a] sm:$0x3] %vm701_vm2, %v16293_v50 }
  0x39   : > { %782 = vst.msk [vmem:[#allocation3 + $0x72] sm:$0x3] %vm701_vm2, %v16293_v50  ;;  %783 = vst.msk [vmem:[#allocation3 + $0x8a] sm:$0x3] %vm701_vm2, %v16293_v50 }
  0x3a   : > { %784 = vst.msk [vmem:[#allocation3 + $0xa2] sm:$0x3] %vm701_vm2, %v16293_v50  ;;  %785 = vst.msk [vmem:[#allocation3 + $0xba] sm:$0x3] %vm701_vm2, %v16293_v50 }
  0x3b   : > { %786 = vst.msk [vmem:[#allocation3 + $0xd2] sm:$0x3] %vm701_vm2, %v16293_v50  ;;  %787 = vst.msk [vmem:[#allocation3 + $0xea] sm:$0x3] %vm701_vm2, %v16293_v50 }
  0x3c   : > { %788 = vst.msk [vmem:[#allocation3 + $0x102] sm:$0x3] %vm701_vm2, %v16293_v50  ;;  %789 = vst.msk [vmem:[#allocation3 + $0x11a] sm:$0x3] %vm701_vm2, %v16293_v50 }
  0x3d   : > { %13885 = vmatmul.mubr.msk.bf16.gmra.mrb[16].mxu1 %vm452_vm1, %v350_v29  ;;  %790 = vst.msk [vmem:[#allocation3 + $0x132] sm:$0x3] %vm701_vm2, %v16293_v50  ;;  %791 = vst.msk [vmem:[#allocation3 + $0x14a] sm:$0x3] %vm701_vm2, %v16293_v50 }
  0x3e   : > { %13888 = vmatprep.mubr.msk.bf16.mxu1 %vm452_vm1, %v352_v30  ;;  %792 = vst.msk [vmem:[#allocation3 + $0x162] sm:$0x3] %vm701_vm2, %v16293_v50  ;;  %793 = vst.msk [vmem:[#allocation3 + $0x17a] sm:$0x3] %vm701_vm2, %v16293_v50 }
  0x3f   : > { %794 = vst.msk [vmem:[#allocation3 + $0x192] sm:$0x3] %vm701_vm2, %v16293_v50  ;;  %795 = vst.msk [vmem:[#allocation3 + $0x1aa] sm:$0x3] %vm701_vm2, %v16293_v50 }
  0x40   : > { %758 = vst.msk [vmem:[#allocation3] sm:$0x3] %vm701_vm2, %v16293_v50  ;;  %759 = vst.msk [vmem:[#allocation3 + $0x18] sm:$0x3] %vm701_vm2, %v16293_v50 }
  0x41   : > { %776 = vst.msk [vmem:[#allocation3 + $0x1b0] sm:$0x3] %vm701_vm2, %v16293_v50  ;;  %777 = vst.msk [vmem:[#allocation3 + $0x1c8] sm:$0x3] %vm701_vm2, %v16293_v50 }
  0x42   : > { %750 = vst.msk [vmem:[#allocation3 + $0x28] sm:$0xf] %vm746_vm3, %v16293_v50  ;;  %747 = vst.msk [vmem:[#allocation3 + $0x10] sm:$0xf] %vm746_vm3, %v16293_v50 }
  0x43   : > { %754 = vst.msk [vmem:[#allocation3 + $0x1c0] sm:$0xf] %vm746_vm3, %v16293_v50  ;;  %757 = vst.msk [vmem:[#allocation3 + $0x1d8] sm:$0xf] %vm746_vm3, %v16293_v50 }
  0x44   : > { %778 = vst.msk [vmem:[#allocation3 + $0x12] sm:$0x3] %vm701_vm2, %v16293_v50  ;;  %779 = vst.msk [vmem:[#allocation3 + $0x2a] sm:$0x3] %vm701_vm2, %v16293_v50 }
  0x45   : > { %13889 = vmatmul.mubr.msk.bf16.gmra.mrb[20].mxu1 %vm452_vm1, %v354_v34  ;;  %796 = vst.msk [vmem:[#allocation3 + $0x1c2] sm:$0x3] %vm701_vm2, %v16293_v50  ;;  %797 = vst.msk [vmem:[#allocation3 + $0x1da] sm:$0x3] %vm701_vm2, %v16293_v50 }
  0x46   : > { %13892 = vmatprep.mubr.msk.bf16.mxu1 %vm452_vm1, %v356_v38  ;;  %708 = vst.msk [vmem:[#allocation2] sm:$0x1] %vm707_vm5, %v16293_v50  ;;  %709 = vst.msk [vmem:[#allocation2 + $0x18] sm:$0x1] %vm707_vm5, %v16293_v50 }
  0x47   : > { %710 = vst.msk [vmem:[#allocation2 + $0x30] sm:$0x1] %vm707_vm5, %v16293_v50  ;;  %711 = vst.msk [vmem:[#allocation2 + $0x48] sm:$0x1] %vm707_vm5, %v16293_v50 }
  0x48   : > { %712 = vst.msk [vmem:[#allocation2 + $0x60] sm:$0x1] %vm707_vm5, %v16293_v50  ;;  %713 = vst.msk [vmem:[#allocation2 + $0x78] sm:$0x1] %vm707_vm5, %v16293_v50 }
  0x49   : > { %v6037_v1 = vld [vmem:[#allocation3 + $0x22] sm:$0xff]  ;;  %714 = vst.msk [vmem:[#allocation2 + $0x90] sm:$0x1] %vm707_vm5, %v16293_v50  ;;  %715 = vst.msk [vmem:[#allocation2 + $0xa8] sm:$0x1] %vm707_vm5, %v16293_v50 }
  0x4a   : > { %v6068_v4 = vpack.c.bf16 %v6037_v1, %v6036_v0  ;;  %716 = vst.msk [vmem:[#allocation2 + $0xc0] sm:$0x1] %vm707_vm5, %v16293_v50  ;;  %717 = vst.msk [vmem:[#allocation2 + $0xd8] sm:$0x1] %vm707_vm5, %v16293_v50 }
  0x4b   : > { %718 = vst.msk [vmem:[#allocation2 + $0xf0] sm:$0x1] %vm707_vm5, %v16293_v50  ;;  %719 = vst.msk [vmem:[#allocation2 + $0x108] sm:$0x1] %vm707_vm5, %v16293_v50 }
  0x4c   : > { %14446 = vmatprep.mubr.msk.bf16.mxu0 %vm452_vm1, %v6068_v4  ;;  %720 = vst.msk [vmem:[#allocation2 + $0x120] sm:$0x1] %vm707_vm5, %v16293_v50  ;;  %721 = vst.msk [vmem:[#allocation2 + $0x138] sm:$0x1] %vm707_vm5, %v16293_v50 }
  0x4d   : > { %13893 = vmatmul.mubr.msk.bf16.gmra.mrb[24].mxu1 %vm452_vm1, %v358_v41  ;;  %722 = vst.msk [vmem:[#allocation2 + $0x150] sm:$0x1] %vm707_vm5, %v16293_v50  ;;  %723 = vst.msk [vmem:[#allocation2 + $0x168] sm:$0x1] %vm707_vm5, %v16293_v50 }
  0x4e   : > { %13896 = vmatprep.mubr.msk.bf16.mxu1 %vm452_vm1, %v360_v42  ;;  %724 = vst.msk [vmem:[#allocation2 + $0x180] sm:$0x1] %vm707_vm5, %v16293_v50  ;;  %725 = vst.msk [vmem:[#allocation2 + $0x198] sm:$0x1] %vm707_vm5, %v16293_v50 }
  0x4f   : > { %726 = vst.msk [vmem:[#allocation2 + $0x11] sm:$0x1] %vm707_vm5, %v16293_v50  ;;  %727 = vst.msk [vmem:[#allocation2 + $0x29] sm:$0x1] %vm707_vm5, %v16293_v50 }
  0x50   : > { %728 = vst.msk [vmem:[#allocation2 + $0x41] sm:$0x1] %vm707_vm5, %v16293_v50  ;;  %729 = vst.msk [vmem:[#allocation2 + $0x59] sm:$0x1] %vm707_vm5, %v16293_v50 }
  0x51   : > { %730 = vst.msk [vmem:[#allocation2 + $0x71] sm:$0x1] %vm707_vm5, %v16293_v50  ;;  %731 = vst.msk [vmem:[#allocation2 + $0x89] sm:$0x1] %vm707_vm5, %v16293_v50 }
  0x52   : > { %732 = vst.msk [vmem:[#allocation2 + $0xa1] sm:$0x1] %vm707_vm5, %v16293_v50  ;;  %733 = vst.msk [vmem:[#allocation2 + $0xb9] sm:$0x1] %vm707_vm5, %v16293_v50 }
  0x53   : > { %734 = vst.msk [vmem:[#allocation2 + $0xd1] sm:$0x1] %vm707_vm5, %v16293_v50  ;;  %735 = vst.msk [vmem:[#allocation2 + $0xe9] sm:$0x1] %vm707_vm5, %v16293_v50 }
  0x54   : > { %736 = vst.msk [vmem:[#allocation2 + $0x101] sm:$0x1] %vm707_vm5, %v16293_v50  ;;  %737 = vst.msk [vmem:[#allocation2 + $0x119] sm:$0x1] %vm707_vm5, %v16293_v50 }
  0x55   : > { %13897 = vmatmul.mubr.msk.bf16.gmra.mrb[28].mxu1 %vm452_vm1, %v362_v46  ;;  %738 = vst.msk [vmem:[#allocation2 + $0x131] sm:$0x1] %vm707_vm5, %v16293_v50  ;;  %739 = vst.msk [vmem:[#allocation2 + $0x149] sm:$0x1] %vm707_vm5, %v16293_v50 }
  0x56   : > { %740 = vst.msk [vmem:[#allocation2 + $0x161] sm:$0x1] %vm707_vm5, %v16293_v50  ;;  %741 = vst.msk [vmem:[#allocation2 + $0x179] sm:$0x1] %vm707_vm5, %v16293_v50 }
  0x57   : > { %742 = vst.msk [vmem:[#allocation2 + $0x191] sm:$0x1] %vm707_vm5, %v16293_v50  ;;  %743 = vst.msk [vmem:[#allocation2 + $0x1a9] sm:$0x1] %vm707_vm5, %v16293_v50 }
  0xf0   : > { %v13870_v53 = vpop.f32.mrb[0].mxu1 }
  0xf1   : > { %v16621_v54 = vadd.f32 %v13870_v53, %v16614_v51  ;;  %v539_v55 = vpop.f32.mrb[1].mxu1 }
  0xf2   : > { %v16625_v57 = vadd.f32 %v16614_v51, %v539_v55  ;;  %v13871_v58 = vpop.f32.mrb[2].mxu1 }
  0xf3   : > { %669 = vst.msk [vmem:[%s16630_s24 + $0x10] sm:$0xff] %vm666_vm4, %v16621_v54  ;;  %v16636_v60 = vadd.f32 %v13871_v58, %v16614_v51  ;;  %v542_v61 = vpop.f32.mrb[3].mxu1  ;;  %v843_v62 = vmax.f32 %v16621_v54, 0.0 }
  0xf4   : > { %667 = vst.msk [vmem:[%s16630_s24] sm:$0xff] %vm666_vm4, %v16625_v57  ;;  %v16645_v2 = vadd.f32 %v16614_v51, %v542_v61  ;;  %v841_v3 = vmax.f32 %v16625_v57, 0.0 }
  0xf5   : > { %670 = vst.msk [vmem:[%s16630_s24 + $0x18] sm:$0xff] %vm666_vm4, %v16636_v60  ;;  %1038 = vrot.lane.b32.xlu1 %v843_v62, %s16294_s25  ;;  %v844_v5 = vmax.f32 %v16636_v60, 0.0 }
  0xf6   : > { %668 = vst.msk [vmem:[%s16630_s24 + $0x8] sm:$0xff] %vm666_vm4, %v16645_v2  ;;  %1034 = vrot.lane.b32.xlu0 %v841_v3, %s16294_s25  ;;  %v842_v6 = vmax.f32 %v16645_v2, 0.0 }
  0xf8   : > { %v13874_v7 = vpop.f32.mrb[4].mxu1 }
  0xf9   : > { %v16664_v8 = vadd.f32 %v13874_v7, %v16614_v51  ;;  %1040 = vrot.lane.b32.xlu1 %v844_v5, %s16294_s25  ;;  %v555_v9 = vpop.f32.mrb[5].mxu1 }
  0xfa   : > { %v16670_v10 = vadd.f32 %v16614_v51, %v555_v9  ;;  %v13875_v11 = vpop.f32.mrb[6].mxu1  ;;  %1036 = vrot.lane.b32.xlu0 %v842_v6, %s16294_s25 }
  0xfb   : > { %673 = vst.msk [vmem:[%s16630_s24 + $0x30] sm:$0xff] %vm666_vm4, %v16664_v8  ;;  %v16679_v12 = vadd.f32 %v13875_v11, %v16614_v51  ;;  %v558_v13 = vpop.f32.mrb[7].mxu1  ;;  %v847_v17 = vmax.f32 %v16664_v8, 0.0 }
  0xfc   : > { %671 = vst.msk [vmem:[%s16630_s24 + $0x20] sm:$0xff] %vm666_vm4, %v16670_v10  ;;  %v845_v14 = vmax.f32 %v16670_v10, 0.0  ;;  %v16686_v15 = vadd.f32 %v16614_v51, %v558_v13 }
  0xfd   : > { %674 = vst.msk [vmem:[%s16630_s24 + $0x38] sm:$0xff] %vm666_vm4, %v16679_v12  ;;  %v848_v21 = vmax.f32 %v16679_v12, 0.0 }
  0xfe   : > { %672 = vst.msk [vmem:[%s16630_s24 + $0x28] sm:$0xff] %vm666_vm4, %v16686_v15  ;;  %v846_v16 = vmax.f32 %v16686_v15, 0.0  ;;  %1042 = vrot.lane.b32.xlu0 %v845_v14, %s16294_s25 }
 0x100   : > { %v13878_v18 = vpop.f32.mrb[8].mxu1  ;;  %1044 = vrot.lane.b32.xlu1 %v846_v16, %s16294_s25 }
 0x101   : > { %v16703_v19 = vadd.f32 %v13878_v18, %v16614_v51  ;;  %v571_v20 = vpop.f32.mrb[9].mxu1 }
 0x102   : > { %v16707_v22 = vadd.f32 %v16614_v51, %v571_v20  ;;  %v13879_v23 = vpop.f32.mrb[10].mxu1  ;;  %1046 = vrot.lane.b32.xlu0 %v847_v17, %s16294_s25 }
 0x103   : > { %677 = vst.msk [vmem:[%s16630_s24 + $0x50] sm:$0xff] %vm666_vm4, %v16703_v19  ;;  %v16716_v24 = vadd.f32 %v13879_v23, %v16614_v51  ;;  %v574_v25 = vpop.f32.mrb[11].mxu1  ;;  %v851_v29 = vmax.f32 %v16703_v19, 0.0 }
 0x104   : > { %675 = vst.msk [vmem:[%s16630_s24 + $0x40] sm:$0xff] %vm666_vm4, %v16707_v22  ;;  %v849_v26 = vmax.f32 %v16707_v22, 0.0  ;;  %v16723_v27 = vadd.f32 %v16614_v51, %v574_v25  ;;  %1048 = vrot.lane.b32.xlu1 %v848_v21, %s16294_s25 }
 0x105   : > { %678 = vst.msk [vmem:[%s16630_s24 + $0x58] sm:$0xff] %vm666_vm4, %v16716_v24  ;;  %v852_v33 = vmax.f32 %v16716_v24, 0.0  ;;  %v17108_v24 = vld [vmem:[%s19828_s5 + $0x12] sm:$0x3] }
 0x106   : > { %676 = vst.msk [vmem:[%s16630_s24 + $0x48] sm:$0xff] %vm666_vm4, %v16723_v27  ;;  %v850_v28 = vmax.f32 %v16723_v27, 0.0  ;;  %1050 = vrot.lane.b32.xlu0 %v849_v26, %s16294_s25 }
 0x108   : > { %v13882_v30 = vpop.f32.mrb[12].mxu1  ;;  %1052 = vrot.lane.b32.xlu1 %v850_v28, %s16294_s25 }
 0x109   : > { %v16743_v31 = vadd.f32 %v13882_v30, %v16614_v51  ;;  %v587_v32 = vpop.f32.mrb[13].mxu1 }
 0x10a   : > { %v16747_v34 = vadd.f32 %v16614_v51, %v587_v32  ;;  %v13883_v35 = vpop.f32.mrb[14].mxu1  ;;  %1054 = vrot.lane.b32.xlu0 %v851_v29, %s16294_s25 }
 0x10b   : > { %681 = vst.msk [vmem:[%s16630_s24 + $0x70] sm:$0xff] %vm666_vm4, %v16743_v31  ;;  %v16756_v36 = vadd.f32 %v13883_v35, %v16614_v51  ;;  %v590_v37 = vpop.f32.mrb[15].mxu1  ;;  %v855_v41 = vmax.f32 %v16743_v31, 0.0 }
 0x10c   : > { %679 = vst.msk [vmem:[%s16630_s24 + $0x60] sm:$0xff] %vm666_vm4, %v16747_v34  ;;  %v853_v38 = vmax.f32 %v16747_v34, 0.0  ;;  %v16763_v39 = vadd.f32 %v16614_v51, %v590_v37  ;;  %1056 = vrot.lane.b32.xlu1 %v852_v33, %s16294_s25 }
 0x10d   : > { %682 = vst.msk [vmem:[%s16630_s24 + $0x78] sm:$0xff] %vm666_vm4, %v16756_v36  ;;  %v856_v45 = vmax.f32 %v16756_v36, 0.0 }
 0x10e   : > { %680 = vst.msk [vmem:[%s16630_s24 + $0x68] sm:$0xff] %vm666_vm4, %v16763_v39  ;;  %v854_v40 = vmax.f32 %v16763_v39, 0.0  ;;  %1058 = vrot.lane.b32.xlu0 %v853_v38, %s16294_s25 }
 0x110   : > { %v13886_v42 = vpop.f32.mrb[16].mxu1  ;;  %1060 = vrot.lane.b32.xlu1 %v854_v40, %s16294_s25 }
 0x111   : > { %v16783_v43 = vadd.f32 %v13886_v42, %v16614_v51  ;;  %v603_v44 = vpop.f32.mrb[17].mxu1 }
 0x112   : > { %v16787_v46 = vadd.f32 %v16614_v51, %v603_v44  ;;  %v13887_v47 = vpop.f32.mrb[18].mxu1  ;;  %1062 = vrot.lane.b32.xlu0 %v855_v41, %s16294_s25 }
 0x113   : > { %685 = vst.msk [vmem:[%s16630_s24 + $0x90] sm:$0xff] %vm666_vm4, %v16783_v43  ;;  %v16796_v48 = vadd.f32 %v13887_v47, %v16614_v51  ;;  %v606_v49 = vpop.f32.mrb[19].mxu1  ;;  %v859_v56 = vmax.f32 %v16783_v43, 0.0 }
 0x114   : > { %683 = vst.msk [vmem:[%s16630_s24 + $0x80] sm:$0xff] %vm666_vm4, %v16787_v46  ;;  %v857_v52 = vmax.f32 %v16787_v46, 0.0  ;;  %v16803_v53 = vadd.f32 %v16614_v51, %v606_v49  ;;  %1064 = vrot.lane.b32.xlu1 %v856_v45, %s16294_s25 }
 0x115   : > { %686 = vst.msk [vmem:[%s16630_s24 + $0x98] sm:$0xff] %vm666_vm4, %v16796_v48  ;;  %v860_v63 = vmax.f32 %v16796_v48, 0.0 }
 0x116   : > { %684 = vst.msk [vmem:[%s16630_s24 + $0x88] sm:$0xff] %vm666_vm4, %v16803_v53  ;;  %v858_v55 = vmax.f32 %v16803_v53, 0.0  ;;  %1066 = vrot.lane.b32.xlu0 %v857_v52, %s16294_s25 }
 0x118   : > { %v13890_v58 = vpop.f32.mrb[20].mxu1  ;;  %1068 = vrot.lane.b32.xlu1 %v858_v55, %s16294_s25 }
 0x119   : > { %v16823_v59 = vadd.f32 %v13890_v58, %v16614_v51  ;;  %v619_v61 = vpop.f32.mrb[21].mxu1 }
 0x11a   : > { %v16827_v0 = vadd.f32 %v16614_v51, %v619_v61  ;;  %v13891_v1 = vpop.f32.mrb[22].mxu1  ;;  %1070 = vrot.lane.b32.xlu0 %v859_v56, %s16294_s25 }
 0x11b   : > { %689 = vst.msk [vmem:[%s16630_s24 + $0xb0] sm:$0xff] %vm666_vm4, %v16823_v59  ;;  %v16836_v4 = vadd.f32 %v13891_v1, %v16614_v51  ;;  %v622_v7 = vpop.f32.mrb[23].mxu1  ;;  %v863_v18 = vmax.f32 %v16823_v59, 0.0 }
 0x11c   : > { %687 = vst.msk [vmem:[%s16630_s24 + $0xa0] sm:$0xff] %vm666_vm4, %v16827_v0  ;;  %v861_v9 = vmax.f32 %v16827_v0, 0.0  ;;  %v16843_v11 = vadd.f32 %v16614_v51, %v622_v7  ;;  %1072 = vrot.lane.b32.xlu1 %v860_v63, %s16294_s25 }
 0x11d   : > { %690 = vst.msk [vmem:[%s16630_s24 + $0xb8] sm:$0xff] %vm666_vm4, %v16836_v4  ;;  %v864_v30 = vmax.f32 %v16836_v4, 0.0 }
 0x11e   : > { %688 = vst.msk [vmem:[%s16630_s24 + $0xa8] sm:$0xff] %vm666_vm4, %v16843_v11  ;;  %v862_v13 = vmax.f32 %v16843_v11, 0.0  ;;  %1074 = vrot.lane.b32.xlu0 %v861_v9, %s16294_s25 }
 0x120   : > { %v13894_v20 = vpop.f32.mrb[24].mxu1  ;;  %1076 = vrot.lane.b32.xlu1 %v862_v13, %s16294_s25 }
 0x121   : > { %v16863_v23 = vadd.f32 %v13894_v20, %v16614_v51  ;;  %v635_v25 = vpop.f32.mrb[25].mxu1 }
 0x122   : > { %v16867_v32 = vadd.f32 %v16614_v51, %v635_v25  ;;  %v13895_v35 = vpop.f32.mrb[26].mxu1  ;;  %1078 = vrot.lane.b32.xlu0 %v863_v18, %s16294_s25 }
 0x123   : > { %693 = vst.msk [vmem:[%s16630_s24 + $0xd0] sm:$0xff] %vm666_vm4, %v16863_v23  ;;  %v16876_v37 = vadd.f32 %v13895_v35, %v16614_v51  ;;  %v638_v42 = vpop.f32.mrb[27].mxu1  ;;  %v867_v58 = vmax.f32 %v16863_v23, 0.0 }
 0x124   : > { %691 = vst.msk [vmem:[%s16630_s24 + $0xc0] sm:$0xff] %vm666_vm4, %v16867_v32  ;;  %v19833_v44 = vmax.f32 %v16867_v32, 0.0  ;;  %v16883_v47 = vadd.f32 %v16614_v51, %v638_v42  ;;  %1080 = vrot.lane.b32.xlu1 %v864_v30, %s16294_s25  ;;  %v16987_v42 = vld [vmem:[%s19828_s5 + $0x10] sm:$0x3]  ;;  %v19843_v54 = vmax.f32 %v16867_v32, 0.0 }
 0x125   : > { %694 = vst.msk [vmem:[%s16630_s24 + $0xd8] sm:$0xff] %vm666_vm4, %v16876_v37  ;;  %v868_v7 = vmax.f32 %v16876_v37, 0.0  ;;  %16132 = vmatprep.subr.msk.bf16.mxu0 %vm501_vm0, %v16987_v42  ;;  %v6429_v19 = vsel %vm501_vm0, %v16987_v42, 0 }
 0x126   : > { %692 = vst.msk [vmem:[%s16630_s24 + $0xc8] sm:$0xff] %vm666_vm4, %v16883_v47  ;;  %v866_v49 = vmax.f32 %v16883_v47, 0.0  ;;  %1082 = vrot.lane.b32.xlu0 %v19833_v44, %s16294_s25 }
 0x128   : > { %v13898_v61 = vpop.f32.mrb[28].mxu1  ;;  %1084 = vrot.lane.b32.xlu1 %v866_v49, %s16294_s25 }
 0x129   : > { %v16973_v1 = vadd.f32 %v13898_v61, %v16614_v51  ;;  %v651_v50 = vpop.f32.mrb[29].mxu1  ;;  %v1277_v61 = vld [vmem:[#allocation2 + $0x1] sm:$0xff] }
 0x12a   : > { %v652_v20 = vadd.f32 %v16614_v51, %v651_v50  ;;  %v13899_v25 = vpop.f32.mrb[30].mxu1  ;;  %1086 = vrot.lane.b32.xlu0 %v867_v58, %s16294_s25  ;;  %v1278_v50 = vld [vmem:[#allocation2 + $0x9] sm:$0xff] }
 0x12b   : > { %697 = vst.msk [vmem:[%s16630_s24 + $0xf0] sm:$0xff] %vm666_vm4, %v16973_v1  ;;  %v16982_v23 = vadd.f32 %v13899_v25, %v16614_v51  ;;  %v654_v35 = vpop.f32.mrb[31].mxu1  ;;  %v1309_v44 = vpack.c.bf16 %v1278_v50, %v1277_v61  ;;  %v871_v2 = vmax.f32 %v16973_v1, 0.0 }
 0x12c   : > { %695 = vst.msk [vmem:[%s16630_s24 + $0xe0] sm:$0xff] %vm666_vm4, %v652_v20  ;;  %v869_v37 = vmax.f32 %v652_v20, 0.0  ;;  %v655_v47 = vadd.f32 %v16614_v51, %v654_v35  ;;  %1088 = vrot.lane.b32.xlu1 %v868_v7, %s16294_s25  ;;  %v17004_v51 = vld [vmem:[%s19826_s3] sm:$0x3] }
 0x12d   : > { %698 = vst.msk [vmem:[%s16630_s24 + $0xf8] sm:$0xff] %vm666_vm4, %v16982_v23  ;;  %13902 = vmatprep.mubr.msk.bf16.mxu1 %vm452_vm1, %v1309_v44  ;;  %16116 = vmatprep.subr.msk.bf16.mxu1 %vm501_vm0, %v17004_v51 }
 0x12e   : > { %696 = vst.msk [vmem:[%s16630_s24 + $0xe8] sm:$0xff] %vm666_vm4, %v655_v47  ;;  %v870_v25 = vmax.f32 %v655_v47, 0.0  ;;  %1090 = vrot.lane.b32.xlu0 %v869_v37, %s16294_s25 }
 0x130   : > { %1092 = vrot.lane.b32.xlu1 %v870_v25, %s16294_s25 }
 0x132   : > { %905 = vrot.lane.b32.xlu0 %v841_v3, %s16295_s16 }
 0x134   : > { %907 = vrot.lane.b32.xlu1 %v842_v6, %s16295_s16 }
 0x136   : > { %909 = vrot.lane.b32.xlu0 %v843_v62, %s16295_s16 }
 0x138   : > { %911 = vrot.lane.b32.xlu1 %v844_v5, %s16295_s16  ;;  %v872_v5 = vmax.f32 %v16982_v23, 0.0 }
 0x13a   : > { %913 = vrot.lane.b32.xlu0 %v845_v14, %s16295_s16 }
 0x13c   : > { %915 = vrot.lane.b32.xlu1 %v846_v16, %s16295_s16 }
 0x13e   : > { %917 = vrot.lane.b32.xlu0 %v847_v17, %s16295_s16 }
 0x140   : > { %919 = vrot.lane.b32.xlu1 %v848_v21, %s16295_s16 }
 0x142   : > { %921 = vrot.lane.b32.xlu0 %v849_v26, %s16295_s16 }
 0x144   : > { %923 = vrot.lane.b32.xlu1 %v850_v28, %s16295_s16 }
 0x146   : > { %925 = vrot.lane.b32.xlu0 %v851_v29, %s16295_s16 }
 0x148   : > { %927 = vrot.lane.b32.xlu1 %v852_v33, %s16295_s16 }
 0x14a   : > { %929 = vrot.lane.b32.xlu0 %v853_v38, %s16295_s16 }
 0x14c   : > { %931 = vrot.lane.b32.xlu1 %v854_v40, %s16295_s16 }
 0x14e   : > { %933 = vrot.lane.b32.xlu0 %v855_v41, %s16295_s16 }
 0x150   : > { %935 = vrot.lane.b32.xlu1 %v856_v45, %s16295_s16 }
 0x152   : > { %937 = vrot.lane.b32.xlu0 %v857_v52, %s16295_s16 }
 0x154   : > { %939 = vrot.lane.b32.xlu1 %v858_v55, %s16295_s16 }
 0x156   : > { %941 = vrot.lane.b32.xlu0 %v859_v56, %s16295_s16 }
 0x158   : > { %943 = vrot.lane.b32.xlu1 %v860_v63, %s16295_s16 }
 0x15a   : > { %945 = vrot.lane.b32.xlu0 %v861_v9, %s16295_s16 }
 0x15c   : > { %947 = vrot.lane.b32.xlu1 %v862_v13, %s16295_s16 }
 0x15e   : > { %949 = vrot.lane.b32.xlu0 %v863_v18, %s16295_s16 }
 0x160   : > { %951 = vrot.lane.b32.xlu1 %v864_v30, %s16295_s16 }
 0x162   : > { %953 = vrot.lane.b32.xlu0 %v19843_v54, %s16295_s16 }
 0x164   : > { %955 = vrot.lane.b32.xlu1 %v866_v49, %s16295_s16 }
 0x166   : > { %957 = vrot.lane.b32.xlu0 %v867_v58, %s16295_s16 }
 0x167   : > { %v1039_v57 = vpop.permute.xlu1 %1038 }
 0x168   : > { %1133 = vst.msk [vmem:[#allocation3 + $0x4a] sm:$0xff] %vm452_vm1, %v1039_v57  ;;  %959 = vrot.lane.b32.xlu1 %v868_v7, %s16295_s16  ;;  %v1035_v60 = vpop.permute.xlu0 %1034 }
 0x169   : > { %1131 = vst.msk [vmem:[#allocation3 + $0x32] sm:$0xff] %vm452_vm1, %v1035_v60 }
 0x16a   : > { %961 = vrot.lane.b32.xlu0 %v869_v37, %s16295_s16 }
 0x16b   : > { %v1041_v62 = vpop.permute.xlu1 %1040 }
 0x16c   : > { %1134 = vst.msk [vmem:[#allocation3 + $0x52] sm:$0xff] %vm452_vm1, %v1041_v62  ;;  %963 = vrot.lane.b32.xlu1 %v870_v25, %s16295_s16  ;;  %v1037_v3 = vpop.permute.xlu0 %1036 }
 0x16d   : > { %1132 = vst.msk [vmem:[#allocation3 + $0x3a] sm:$0xff] %vm452_vm1, %v1037_v3 }
 0x16e   : > { %1094 = vrot.lane.b32.xlu0 %v871_v2, %s16294_s25 }
 0x16f   : > { %v6040_v17 = vld [vmem:[#allocation3 + $0x4a] sm:$0xff] }
 0x170   : > { %1096 = vrot.lane.b32.xlu1 %v872_v5, %s16294_s25  ;;  %v1043_v6 = vpop.permute.xlu0 %1042  ;;  %v6038_v14 = vld [vmem:[#allocation3 + $0x32] sm:$0xff]  ;;  %s12550_s25 = sshll.u32 %s16630_s24, 4  ;;  %s19775_s25 = int_to_ptr.vmem [resolvable:$true] %s12550_s25 }
 0x171   : > { %1135 = vst.msk [vmem:[#allocation3 + $0x62] sm:$0xff] %vm452_vm1, %v1043_v6 }
 0x172   : > { %v1045_v8 = vpop.permute.xlu1 %1044  ;;  %965 = vrot.lane.b32.xlu0 %v871_v2, %s16295_s16 }
 0x173   : > { %1136 = vst.msk [vmem:[#allocation3 + $0x6a] sm:$0xff] %vm452_vm1, %v1045_v8  ;;  %v6041_v10 = vld [vmem:[#allocation3 + $0x52] sm:$0xff] }
 0x174   : > { %967 = vrot.lane.b32.xlu1 %v872_v5, %s16295_s16  ;;  %v1047_v12 = vpop.permute.xlu0 %1046  ;;  %v6039_v15 = vld [vmem:[#allocation3 + $0x3a] sm:$0xff]  ;;  %v6070_v22 = vpack.c.bf16 %v6041_v10, %v6040_v17  ;;  %s16300_s16 = smov [#allocation5]  }
 0x175   : > { %1137 = vst.msk [vmem:[#allocation3 + $0x7a] sm:$0xff] %vm452_vm1, %v1047_v12  ;;  %v6069_v16 = vpack.c.bf16 %v6039_v15, %v6038_v14  ;;  %s16233_s17 = sshll.u32 %s16300_s16, 4  ;;  %s16234_s17 = int_to_ptr.vmem [resolvable:$false] %s16233_s17 }
 0x176   : > { %v1049_v21 = vpop.permute.xlu1 %1048  ;;  %p16236_p0 = scmp.lt.s32.totalorder %s19775_s25, %s16234_s17 }
 0x177   : > { %1138 = vst.msk [vmem:[#allocation3 + $0x82] sm:$0xff] %vm452_vm1, %v1049_v21  ;;  %14447 = vmatmul.mubr.msk.bf16.vlgmr.msra.gmra.mrb[0].mxu0 %vm452_vm1, %v6069_v16 }
 0x178   : > { %14450 = vmatprep.mubr.msk.bf16.mxu0 %vm452_vm1, %v6070_v22  ;;  %v1051_v26 = vpop.permute.xlu0 %1050  ;;  %14479 = vmatpush3.bf16.msra.mxu0 %v6429_v19  ;;  %v6042_v31 = vld [vmem:[#allocation3 + $0x62] sm:$0xff] }
 0x179   : > { %1139 = vst.msk [vmem:[#allocation3 + $0x92] sm:$0xff] %vm452_vm1, %v1051_v26  ;;  %16133 = vmatprep.subr.msk.bf16.mxu0 %vm501_vm0, %v17108_v24  ;;  %v6330_v22 = vld [vmem:[#allocation3 + $0x1b] sm:$0xff]  ;;  %v6331_v26 = vld [vmem:[#allocation3 + $0x23] sm:$0xff] }
 0x17a   : > { %v1053_v27 = vpop.permute.xlu1 %1052  ;;  %v6043_v28 = vld [vmem:[#allocation3 + $0x6a] sm:$0xff] }
 0x17b   : > { %1140 = vst.msk [vmem:[#allocation3 + $0x9a] sm:$0xff] %vm452_vm1, %v1053_v27  ;;  %v6071_v33 = vpack.c.bf16 %v6043_v28, %v6042_v31 }
 0x17c   : > { %v1055_v29 = vpop.permute.xlu0 %1054  ;;  %v6044_v36 = vld [vmem:[#allocation3 + $0x7a] sm:$0xff] }
 0x17d   : > { %1141 = vst.msk [vmem:[#allocation3 + $0xaa] sm:$0xff] %vm452_vm1, %v1055_v29 }
 0x17e   : > { %v1057_v34 = vpop.permute.xlu1 %1056  ;;  %v6045_v38 = vld [vmem:[#allocation3 + $0x82] sm:$0xff] }
 0x17f   : > { %1142 = vst.msk [vmem:[#allocation3 + $0xb2] sm:$0xff] %vm452_vm1, %v1057_v34  ;;  %14451 = vmatmul.mubr.msk.bf16.gmra.mrb[4].mxu0 %vm452_vm1, %v6071_v33  ;;  %v6072_v39 = vpack.c.bf16 %v6045_v38, %v6044_v36  ;;  %v6362_v33 = vpack.c.bf16 %v6331_v26, %v6330_v22 }
 0x180   : > { %v1059_v40 = vpop.permute.xlu0 %1058  ;;  %v6046_v46 = vld [vmem:[#allocation3 + $0x92] sm:$0xff] }
 0x181   : > { %1143 = vst.msk [vmem:[#allocation3 + $0xc2] sm:$0xff] %vm452_vm1, %v1059_v40  ;;  %14454 = vmatprep.mubr.msk.bf16.mxu0 %vm452_vm1, %v6072_v39 }
 0x182   : > { %v1061_v41 = vpop.permute.xlu1 %1060  ;;  %v6047_v43 = vld [vmem:[#allocation3 + $0x9a] sm:$0xff] }
 0x183   : > { %1144 = vst.msk [vmem:[#allocation3 + $0xca] sm:$0xff] %vm452_vm1, %v1061_v41  ;;  %v6073_v48 = vpack.c.bf16 %v6047_v43, %v6046_v46  ;;  %v1588_v41 = vsel %vm501_vm0, %v17004_v51, 0  ;;  %v6332_v46 = vld [vmem:[#allocation3 + $0x33] sm:$0xff] }
 0x184   : > { %v1063_v45 = vpop.permute.xlu0 %1062  ;;  %v6048_v53 = vld [vmem:[#allocation3 + $0xaa] sm:$0xff] }
 0x185   : > { %1145 = vst.msk [vmem:[#allocation3 + $0xda] sm:$0xff] %vm452_vm1, %v1063_v45  ;;  %v17162_v45 = vld [vmem:[%s19826_s3 + $0x4] sm:$0x3] }
 0x186   : > { %v1065_v52 = vpop.permute.xlu1 %1064  ;;  %v6049_v55 = vld [vmem:[#allocation3 + $0xb2] sm:$0xff] }
 0x187   : > { %1146 = vst.msk [vmem:[#allocation3 + $0xe2] sm:$0xff] %vm452_vm1, %v1065_v52  ;;  %14455 = vmatmul.mubr.msk.bf16.gmra.mrb[8].mxu0 %vm452_vm1, %v6073_v48  ;;  %v6074_v56 = vpack.c.bf16 %v6049_v55, %v6048_v53  ;;  %v6333_v55 = vld [vmem:[#allocation3 + $0x3b] sm:$0xff] }
 0x188   : > { %v1067_v59 = vpop.permute.xlu0 %1066  ;;  %v6050_v9 = vld [vmem:[#allocation3 + $0xc2] sm:$0xff] }
 0x189   : > { %1147 = vst.msk [vmem:[#allocation3 + $0xf2] sm:$0xff] %vm452_vm1, %v1067_v59  ;;  %14458 = vmatprep.mubr.msk.bf16.mxu0 %vm452_vm1, %v6074_v56  ;;  %v6334_v56 = vld [vmem:[#allocation3 + $0x4b] sm:$0xff]  ;;  %v6335_v59 = vld [vmem:[#allocation3 + $0x53] sm:$0xff] }
 0x18a   : > { %v1069_v63 = vpop.permute.xlu1 %1068  ;;  %v6051_v0 = vld [vmem:[#allocation3 + $0xca] sm:$0xff] }
 0x18b   : > { %1148 = vst.msk [vmem:[#allocation3 + $0xfa] sm:$0xff] %vm452_vm1, %v1069_v63  ;;  %v6075_v11 = vpack.c.bf16 %v6051_v0, %v6050_v9  ;;  %v6363_v0 = vpack.c.bf16 %v6333_v55, %v6332_v46  ;;  %v6344_v26 = vld [vmem:[#allocation3 + $0xc3] sm:$0xff] }
 0x18c   : > { %v1071_v4 = vpop.permute.xlu0 %1070  ;;  %v6052_v18 = vld [vmem:[#allocation3 + $0xda] sm:$0xff] }
 0x18d   : > { %1149 = vst.msk [vmem:[#allocation3 + $0x10a] sm:$0xff] %vm452_vm1, %v1071_v4  ;;  %v6723_v4 = vsel %vm501_vm0, %v17108_v24, 0  ;;  %v6336_v24 = vld [vmem:[#allocation3 + $0x63] sm:$0xff] }
 0x18e   : > { %v1073_v13 = vpop.permute.xlu1 %1072  ;;  %v6053_v30 = vld [vmem:[#allocation3 + $0xe2] sm:$0xff] }
 0x18f   : > { %1150 = vst.msk [vmem:[#allocation3 + $0x112] sm:$0xff] %vm452_vm1, %v1073_v13  ;;  %14459 = vmatmul.mubr.msk.bf16.gmra.mrb[12].mxu0 %vm452_vm1, %v6075_v11  ;;  %v6076_v32 = vpack.c.bf16 %v6053_v30, %v6052_v18  ;;  %v6364_v11 = vpack.c.bf16 %v6335_v59, %v6334_v56  ;;  %v17176_v30 = vld [vmem:[%s19828_s5 + $0x14] sm:$0x3] }
 0x190   : > { %v1075_v44 = vpop.permute.xlu0 %1074  ;;  %v6054_v7 = vld [vmem:[#allocation3 + $0xf2] sm:$0xff] }
 0x191   : > { %1151 = vst.msk [vmem:[#allocation3 + $0x122] sm:$0xff] %vm452_vm1, %v1075_v44  ;;  %14462 = vmatprep.mubr.msk.bf16.mxu0 %vm452_vm1, %v6076_v32 }
 0x192   : > { %v1077_v49 = vpop.permute.xlu1 %1076  ;;  %v6055_v58 = vld [vmem:[#allocation3 + $0xfa] sm:$0xff] }
 0x193   : > { %1152 = vst.msk [vmem:[#allocation3 + $0x12a] sm:$0xff] %vm452_vm1, %v1077_v49  ;;  %v6077_v20 = vpack.c.bf16 %v6055_v58, %v6054_v7  ;;  %v6337_v7 = vld [vmem:[#allocation3 + $0x6b] sm:$0xff]  ;;  %v6349_v59 = vld [vmem:[#allocation3 + $0xfb] sm:$0xff] }
 0x194   : > { %v1079_v1 = vpop.permute.xlu0 %1078  ;;  %v6056_v35 = vld [vmem:[#allocation3 + $0x10a] sm:$0xff] }
 0x195   : > { %1153 = vst.msk [vmem:[#allocation3 + $0x13a] sm:$0xff] %vm452_vm1, %v1079_v1 }
 0x196   : > { %v1081_v23 = vpop.permute.xlu1 %1080  ;;  %v6057_v42 = vld [vmem:[#allocation3 + $0x112] sm:$0xff] }
 0x197   : > { %1154 = vst.msk [vmem:[#allocation3 + $0x142] sm:$0xff] %vm452_vm1, %v1081_v23  ;;  %14463 = vmatmul.mubr.msk.bf16.gmra.mrb[16].mxu0 %vm452_vm1, %v6077_v20  ;;  %v6078_v37 = vpack.c.bf16 %v6057_v42, %v6056_v35  ;;  %v6338_v23 = vld [vmem:[#allocation3 + $0x7b] sm:$0xff]  ;;  %v6339_v35 = vld [vmem:[#allocation3 + $0x83] sm:$0xff] }
 0x198   : > { %v1083_v47 = vpop.permute.xlu0 %1082  ;;  %v6058_v54 = vld [vmem:[#allocation3 + $0x122] sm:$0xff] }
 0x199   : > { %1155 = vst.msk [vmem:[#allocation3 + $0x152] sm:$0xff] %vm452_vm1, %v1083_v47  ;;  %14466 = vmatprep.mubr.msk.bf16.mxu0 %vm452_vm1, %v6078_v37  ;;  %v6365_v37 = vpack.c.bf16 %v6337_v7, %v6336_v24 }
 0x19a   : > { %v1085_v61 = vpop.permute.xlu1 %1084  ;;  %v6059_v50 = vld [vmem:[#allocation3 + $0x12a] sm:$0xff] }
 0x19b   : > { %1156 = vst.msk [vmem:[#allocation3 + $0x15a] sm:$0xff] %vm452_vm1, %v1085_v61  ;;  %v6079_v57 = vpack.c.bf16 %v6059_v50, %v6058_v54  ;;  %v6366_v61 = vpack.c.bf16 %v6339_v35, %v6338_v23  ;;  %v6353_v23 = vld [vmem:[#allocation3 + $0x12b] sm:$0xff] }
 0x19c   : > { %v1087_v25 = vpop.permute.xlu0 %1086  ;;  %v6060_v62 = vld [vmem:[#allocation3 + $0x13a] sm:$0xff] }
 0x19d   : > { %1157 = vst.msk [vmem:[#allocation3 + $0x16a] sm:$0xff] %vm452_vm1, %v1087_v25 }
 0x19e   : > { %v1089_v60 = vpop.permute.xlu1 %1088  ;;  %v6061_v2 = vld [vmem:[#allocation3 + $0x142] sm:$0xff] }
 0x19f   : > { %1158 = vst.msk [vmem:[#allocation3 + $0x172] sm:$0xff] %vm452_vm1, %v1089_v60  ;;  %14467 = vmatmul.mubr.msk.bf16.gmra.mrb[20].mxu0 %vm452_vm1, %v6079_v57  ;;  %v6080_v3 = vpack.c.bf16 %v6061_v2, %v6060_v62  ;;  %v6340_v60 = vld [vmem:[#allocation3 + $0x93] sm:$0xff] }
 0x1a0   : > { %v1091_v5 = vpop.permute.xlu0 %1090  ;;  %v6062_v12 = vld [vmem:[#allocation3 + $0x152] sm:$0xff] }
 0x1a1   : > { %1159 = vst.msk [vmem:[#allocation3 + $0x182] sm:$0xff] %vm452_vm1, %v1091_v5  ;;  %14470 = vmatprep.mubr.msk.bf16.mxu0 %vm452_vm1, %v6080_v3  ;;  %v6341_v5 = vld [vmem:[#allocation3 + $0x9b] sm:$0xff] }
 0x1a2   : > { %v1093_v6 = vpop.permute.xlu1 %1092  ;;  %v6063_v8 = vld [vmem:[#allocation3 + $0x15a] sm:$0xff] }
 0x1a3   : > { %1160 = vst.msk [vmem:[#allocation3 + $0x18a] sm:$0xff] %vm452_vm1, %v1093_v6  ;;  %v6081_v14 = vpack.c.bf16 %v6063_v8, %v6062_v12  ;;  %v6342_v8 = vld [vmem:[#allocation3 + $0xab] sm:$0xff] }
 0x1a4   : > { %v906_v10 = vpop.permute.xlu0 %905  ;;  %v6064_v16 = vld [vmem:[#allocation3 + $0x16a] sm:$0xff] }
 0x1a5   : > { %1002 = vst.msk [vmem:[#allocation2 + $0x19] sm:$0xff] %vm452_vm1, %v906_v10  ;;  %v6343_v10 = vld [vmem:[#allocation3 + $0xb3] sm:$0xff] }
 0x1a6   : > { %v908_v15 = vpop.permute.xlu1 %907  ;;  %v6065_v17 = vld [vmem:[#allocation3 + $0x172] sm:$0xff] }
 0x1a7   : > { %1003 = vst.msk [vmem:[#allocation2 + $0x21] sm:$0xff] %vm452_vm1, %v908_v15  ;;  %14471 = vmatmul.mubr.msk.bf16.gmra.mrb[24].mxu0 %vm452_vm1, %v6081_v14  ;;  %v6082_v19 = vpack.c.bf16 %v6065_v17, %v6064_v16  ;;  %v6367_v14 = vpack.c.bf16 %v6341_v5, %v6340_v60  ;;  %v6368_v16 = vpack.c.bf16 %v6343_v10, %v6342_v8  ;;  %v6357_v10 = vld [vmem:[#allocation3 + $0x15b] sm:$0xff] }
 0x1a8   : > { %v910_v21 = vpop.permute.xlu0 %909  ;;  %v6066_v31 = vld [vmem:[#allocation3 + $0x182] sm:$0xff] }
 0x1a9   : > { %1004 = vst.msk [vmem:[#allocation2 + $0x31] sm:$0xff] %vm452_vm1, %v910_v21  ;;  %14474 = vmatprep.mubr.msk.bf16.mxu0 %vm452_vm1, %v6082_v19 }
 0x1aa   : > { %v912_v27 = vpop.permute.xlu1 %911  ;;  %v6067_v28 = vld [vmem:[#allocation3 + $0x18a] sm:$0xff] }
 0x1ab   : > { %1005 = vst.msk [vmem:[#allocation2 + $0x39] sm:$0xff] %vm452_vm1, %v912_v27  ;;  %v6083_v34 = vpack.c.bf16 %v6067_v28, %v6066_v31  ;;  %v6345_v31 = vld [vmem:[#allocation3 + $0xcb] sm:$0xff] }
 0x1ac   : > { %v914_v29 = vpop.permute.xlu0 %913  ;;  %v1279_v38 = vld [vmem:[#allocation2 + $0x19] sm:$0xff] }
 0x1ad   : > { %1006 = vst.msk [vmem:[#allocation2 + $0x49] sm:$0xff] %vm452_vm1, %v914_v29 }
 0x1ae   : > { %v916_v36 = vpop.permute.xlu1 %915  ;;  %v1280_v39 = vld [vmem:[#allocation2 + $0x21] sm:$0xff] }
 0x1af   : > { %1007 = vst.msk [vmem:[#allocation2 + $0x51] sm:$0xff] %vm452_vm1, %v916_v36  ;;  %14475 = vmatmul.mubr.msk.bf16.gmra.mrb[28].mxu0 %vm452_vm1, %v6083_v34  ;;  %v1310_v40 = vpack.c.bf16 %v1280_v39, %v1279_v38  ;;  %v6346_v34 = vld [vmem:[#allocation3 + $0xdb] sm:$0xff]  ;;  %v6347_v36 = vld [vmem:[#allocation3 + $0xe3] sm:$0xff]  ;;  %v6369_v39 = vpack.c.bf16 %v6345_v31, %v6344_v26 }
 0x1b0   : > { %v918_v43 = vpop.permute.xlu0 %917  ;;  %14480 = vmatprep.mubr.msk.bf16.mxu0 %vm452_vm1, %v6362_v33  ;;  %v1281_v52 = vld [vmem:[#allocation2 + $0x31] sm:$0xff] }
 0x1b1   : > { %1008 = vst.msk [vmem:[#allocation2 + $0x61] sm:$0xff] %vm452_vm1, %v918_v43  ;;  %13903 = vmatmul.mubr.msk.bf16.vlgmr.msra.gmra.mrb[32].mxu1 %vm452_vm1, %v1310_v40  ;;  %v6624_v31 = vld [vmem:[#allocation3 + $0x1c] sm:$0xff] }
 0x1b2   : > { %13935 = vmatpush3.bf16.msra.mxu1 %v1588_v41  ;;  %v920_v48 = vpop.permute.xlu1 %919  ;;  %v1282_v53 = vld [vmem:[#allocation2 + $0x39] sm:$0xff]  ;;  %v6370_v41 = vpack.c.bf16 %v6347_v36, %v6346_v34 }
 0x1b3   : > { %1009 = vst.msk [vmem:[#allocation2 + $0x69] sm:$0xff] %vm452_vm1, %v920_v48  ;;  %v1311_v51 = vpack.c.bf16 %v1282_v53, %v1281_v52  ;;  %16117 = vmatprep.subr.msk.bf16.mxu1 %vm501_vm0, %v17162_v45  ;;  %v6348_v53 = vld [vmem:[#allocation3 + $0xf3] sm:$0xff]  ;;  %v6360_v34 = vld [vmem:[#allocation3 + $0x183] sm:$0xff]  ;;  %v6361_v36 = vld [vmem:[#allocation3 + $0x18b] sm:$0xff] }
 0x1b4   : > { %v922_v63 = vpop.permute.xlu0 %921  ;;  %v1283_v13 = vld [vmem:[#allocation2 + $0x49] sm:$0xff] }
 0x1b5   : > { %1010 = vst.msk [vmem:[#allocation2 + $0x79] sm:$0xff] %vm452_vm1, %v922_v63  ;;  %13906 = vmatprep.mubr.msk.bf16.mxu1 %vm452_vm1, %v1311_v51 }
 0x1b6   : > { %v924_v9 = vpop.permute.xlu1 %923  ;;  %v1284_v18 = vld [vmem:[#allocation2 + $0x51] sm:$0xff] }
 0x1b7   : > { %1011 = vst.msk [vmem:[#allocation2 + $0x81] sm:$0xff] %vm452_vm1, %v924_v9  ;;  %14481 = vmatmul.mubr.msk.bf16.vlgmr.msra.gmra.mrb[0].mxu0 %vm452_vm1, %v6363_v0  ;;  %v1312_v32 = vpack.c.bf16 %v1284_v18, %v1283_v13  ;;  %v6350_v0 = vld [vmem:[#allocation3 + $0x10b] sm:$0xff] }
 0x1b8   : > { %14484 = vmatprep.mubr.msk.bf16.mxu0 %vm452_vm1, %v6364_v11  ;;  %v926_v44 = vpop.permute.xlu0 %925  ;;  %14513 = vmatpush3.bf16.msra.mxu0 %v6723_v4  ;;  %v1285_v58 = vld [vmem:[#allocation2 + $0x61] sm:$0xff]  ;;  %v6371_v11 = vpack.c.bf16 %v6349_v59, %v6348_v53 }
 0x1b9   : > { %1012 = vst.msk [vmem:[#allocation2 + $0x91] sm:$0xff] %vm452_vm1, %v926_v44  ;;  %13907 = vmatmul.mubr.msk.bf16.gmra.mrb[36].mxu1 %vm452_vm1, %v1312_v32  ;;  %16134 = vmatprep.subr.msk.bf16.mxu0 %vm501_vm0, %v17176_v30  ;;  %v6351_v4 = vld [vmem:[#allocation3 + $0x113] sm:$0xff] }
 0x1ba   : > { %v928_v49 = vpop.permute.xlu1 %927  ;;  %v1286_v1 = vld [vmem:[#allocation2 + $0x69] sm:$0xff]  ;;  %v6372_v18 = vpack.c.bf16 %v6351_v4, %v6350_v0 }
 0x1bb   : > { %1013 = vst.msk [vmem:[#allocation2 + $0x99] sm:$0xff] %vm452_vm1, %v928_v49  ;;  %v1313_v20 = vpack.c.bf16 %v1286_v1, %v1285_v58  ;;  %v6352_v58 = vld [vmem:[#allocation3 + $0x123] sm:$0xff]  ;;  %v6629_v59 = vld [vmem:[#allocation3 + $0x54] sm:$0xff] }
 0x1bc   : > { %v930_v42 = vpop.permute.xlu0 %929  ;;  %v1287_v50 = vld [vmem:[#allocation2 + $0x79] sm:$0xff]  ;;  %v1237_v4 = vld [vmem:[#allocation2 + $0x68] sm:$0xff] }
 0x1bd   : > { %1014 = vst.msk [vmem:[#allocation2 + $0xa9] sm:$0xff] %vm452_vm1, %v930_v42  ;;  %13910 = vmatprep.mubr.msk.bf16.mxu1 %vm452_vm1, %v1313_v20  ;;  %v6354_v42 = vld [vmem:[#allocation3 + $0x13b] sm:$0xff] }
 0x1be   : > { %v932_v47 = vpop.permute.xlu1 %931  ;;  %v1288_v25 = vld [vmem:[#allocation2 + $0x81] sm:$0xff] }
 0x1bf   : > { %1015 = vst.msk [vmem:[#allocation2 + $0xb1] sm:$0xff] %vm452_vm1, %v932_v47  ;;  %14485 = vmatmul.mubr.msk.bf16.gmra.mrb[4].mxu0 %vm452_vm1, %v6365_v37  ;;  %v1314_v54 = vpack.c.bf16 %v1288_v25, %v1287_v50  ;;  %v6355_v37 = vld [vmem:[#allocation3 + $0x143] sm:$0xff] }
 0x1c0   : > { %14488 = vmatprep.mubr.msk.bf16.mxu0 %vm452_vm1, %v6366_v61  ;;  %v934_v57 = vpop.permute.xlu0 %933  ;;  %v1289_v2 = vld [vmem:[#allocation2 + $0x91] sm:$0xff]  ;;  %v6373_v61 = vpack.c.bf16 %v6353_v23, %v6352_v58  ;;  %v6374_v25 = vpack.c.bf16 %v6355_v37, %v6354_v42 }
 0x1c1   : > { %1016 = vst.msk [vmem:[#allocation2 + $0xc1] sm:$0xff] %vm452_vm1, %v934_v57  ;;  %13911 = vmatmul.mubr.msk.bf16.gmra.mrb[40].mxu1 %vm452_vm1, %v1314_v54  ;;  %v6632_v58 = vld [vmem:[#allocation3 + $0x7c] sm:$0xff]  ;;  %v1238_v42 = vld [vmem:[#allocation2 + $0x78] sm:$0xff] }
 0x1c2   : > { %v936_v62 = vpop.permute.xlu1 %935  ;;  %v1290_v3 = vld [vmem:[#allocation2 + $0x99] sm:$0xff] }
 0x1c3   : > { %1017 = vst.msk [vmem:[#allocation2 + $0xc9] sm:$0xff] %vm452_vm1, %v936_v62  ;;  %v1315_v6 = vpack.c.bf16 %v1290_v3, %v1289_v2  ;;  %v6356_v2 = vld [vmem:[#allocation3 + $0x153] sm:$0xff]  ;;  %v1241_v23 = vld [vmem:[#allocation2 + $0x98] sm:$0xff] }
 0x1c4   : > { %v938_v12 = vpop.permute.xlu0 %937  ;;  %v1291_v17 = vld [vmem:[#allocation2 + $0xa9] sm:$0xff]  ;;  %v1228_v3 = vld [vmem:[#allocation2] sm:$0xff] }
 0x1c5   : > { %1018 = vst.msk [vmem:[#allocation2 + $0xd9] sm:$0xff] %vm452_vm1, %v938_v12  ;;  %13914 = vmatprep.mubr.msk.bf16.mxu1 %vm452_vm1, %v1315_v6 }
 0x1c6   : > { %v940_v15 = vpop.permute.xlu1 %939  ;;  %v1292_v19 = vld [vmem:[#allocation2 + $0xb1] sm:$0xff] }
 0x1c7   : > { %1019 = vst.msk [vmem:[#allocation2 + $0xe1] sm:$0xff] %vm452_vm1, %v940_v15  ;;  %14489 = vmatmul.mubr.msk.bf16.gmra.mrb[8].mxu0 %vm452_vm1, %v6367_v14  ;;  %v1316_v21 = vpack.c.bf16 %v1292_v19, %v1291_v17  ;;  %v6358_v14 = vld [vmem:[#allocation3 + $0x16b] sm:$0xff]  ;;  %v6359_v15 = vld [vmem:[#allocation3 + $0x173] sm:$0xff]  ;;  %v6375_v19 = vpack.c.bf16 %v6357_v10, %v6356_v2 }
 0x1c8   : > { %14492 = vmatprep.mubr.msk.bf16.mxu0 %vm452_vm1, %v6368_v16  ;;  %v942_v22 = vpop.permute.xlu0 %941  ;;  %v1293_v28 = vld [vmem:[#allocation2 + $0xc1] sm:$0xff] }
 0x1c9   : > { %1020 = vst.msk [vmem:[#allocation2 + $0xf1] sm:$0xff] %vm452_vm1, %v942_v22  ;;  %13915 = vmatmul.mubr.msk.bf16.gmra.mrb[44].mxu1 %vm452_vm1, %v1316_v21  ;;  %v1229_v16 = vld [vmem:[#allocation2 + $0x8] sm:$0xff]  ;;  %v6376_v22 = vpack.c.bf16 %v6359_v15, %v6358_v14  ;;  %v6639_v14 = vld [vmem:[#allocation3 + $0xcc] sm:$0xff] }
 0x1ca   : > { %v944_v27 = vpop.permute.xlu1 %943  ;;  %v1294_v29 = vld [vmem:[#allocation2 + $0xc9] sm:$0xff] }
 0x1cb   : > { %1021 = vst.msk [vmem:[#allocation2 + $0xf9] sm:$0xff] %vm452_vm1, %v944_v27  ;;  %v1317_v33 = vpack.c.bf16 %v1294_v29, %v1293_v28  ;;  %v1260_v28 = vpack.c.bf16 %v1229_v16, %v1228_v3  ;;  %v1245_v2 = vld [vmem:[#allocation2 + $0xc8] sm:$0xff]  ;;  %v6641_v16 = vld [vmem:[#allocation3 + $0xe4] sm:$0xff] }
 0x1cc   : > { %v946_v38 = vpop.permute.xlu0 %945  ;;  %v1295_v43 = vld [vmem:[#allocation2 + $0xd9] sm:$0xff]  ;;  %v6640_v15 = vld [vmem:[#allocation3 + $0xdc] sm:$0xff] }
 0x1cd   : > { %1022 = vst.msk [vmem:[#allocation2 + $0x109] sm:$0xff] %vm452_vm1, %v946_v38  ;;  %13918 = vmatprep.mubr.msk.bf16.mxu1 %vm452_vm1, %v1317_v33  ;;  %v6625_v33 = vld [vmem:[#allocation3 + $0x24] sm:$0xff]  ;;  %v1231_v38 = vld [vmem:[#allocation2 + $0x20] sm:$0xff] }
 0x1ce   : > { %v948_v40 = vpop.permute.xlu1 %947  ;;  %v1296_v46 = vld [vmem:[#allocation2 + $0xe1] sm:$0xff] }
 0x1cf   : > { %1023 = vst.msk [vmem:[#allocation2 + $0x111] sm:$0xff] %vm452_vm1, %v948_v40  ;;  %14493 = vmatmul.mubr.msk.bf16.gmra.mrb[12].mxu0 %vm452_vm1, %v6369_v39  ;;  %v1318_v48 = vpack.c.bf16 %v1296_v46, %v1295_v43  ;;  %v6656_v39 = vpack.c.bf16 %v6625_v33, %v6624_v31  ;;  %v6377_v40 = vpack.c.bf16 %v6361_v36, %v6360_v34  ;;  %v1230_v43 = vld [vmem:[#allocation2 + $0x18] sm:$0xff]  ;;  %v6642_v31 = vld [vmem:[#allocation3 + $0xf4] sm:$0xff]  ;;  %v6643_v33 = vld [vmem:[#allocation3 + $0xfc] sm:$0xff] }
 0x1d0   : > { %14496 = vmatprep.mubr.msk.bf16.mxu0 %vm452_vm1, %v6370_v41  ;;  %v950_v52 = vpop.permute.xlu0 %949  ;;  %v1297_v51 = vld [vmem:[#allocation2 + $0xf1] sm:$0xff]  ;;  %v17234_v46 = vpack.c.bf16 %v1231_v38, %v1230_v43  ;;  %v6644_v34 = vld [vmem:[#allocation3 + $0x10c] sm:$0xff]  ;;  %v6645_v36 = vld [vmem:[#allocation3 + $0x114] sm:$0xff] }
 0x1d1   : > { %1024 = vst.msk [vmem:[#allocation2 + $0x121] sm:$0xff] %vm452_vm1, %v950_v52  ;;  %13919 = vmatmul.mubr.msk.bf16.gmra.mrb[48].mxu1 %vm452_vm1, %v1318_v48  ;;  %v1233_v41 = vld [vmem:[#allocation2 + $0x38] sm:$0xff]  ;;  %v1850_v48 = vsel %vm501_vm0, %v17162_v45, 0  ;;  %v1232_v52 = vld [vmem:[#allocation2 + $0x30] sm:$0xff] }
 0x1d2   : > { %v952_v55 = vpop.permute.xlu1 %951  ;;  %v1298_v56 = vld [vmem:[#allocation2 + $0xf9] sm:$0xff]  ;;  %v17238_v53 = vpack.c.bf16 %v1233_v41, %v1232_v52  ;;  %v6666_v41 = vpack.c.bf16 %v6645_v36, %v6644_v34  ;;  %v6922_v36 = vld [vmem:[#allocation3 + $0x60] sm:$0xff] }
 0x1d3   : > { %1025 = vst.msk [vmem:[#allocation2 + $0x129] sm:$0xff] %vm452_vm1, %v952_v55  ;;  %v1319_v63 = vpack.c.bf16 %v1298_v56, %v1297_v51  ;;  %v17244_v55 = vld [vmem:[%s19826_s3 + $0x6] sm:$0x3]  ;;  %v6627_v56 = vld [vmem:[#allocation3 + $0x3c] sm:$0xff]  ;;  %v6628_v45 = vld [vmem:[#allocation3 + $0x4c] sm:$0xff] }
 0x1d4   : > { %v954_v9 = vpop.permute.xlu0 %953  ;;  %v1299_v32 = vld [vmem:[#allocation2 + $0x109] sm:$0xff] }
 0x1d5   : > { %1026 = vst.msk [vmem:[#allocation2 + $0x139] sm:$0xff] %vm452_vm1, %v954_v9  ;;  %13922 = vmatprep.mubr.msk.bf16.mxu1 %vm452_vm1, %v1319_v63  ;;  %v6626_v51 = vld [vmem:[#allocation3 + $0x34] sm:$0xff]  ;;  %v1235_v63 = vld [vmem:[#allocation2 + $0x50] sm:$0xff]  ;;  %v7017_v9 = vsel %vm501_vm0, %v17176_v30, 0 }
 0x1d6   : > { %v956_v13 = vpop.permute.xlu1 %955  ;;  %v1300_v44 = vld [vmem:[#allocation2 + $0x111] sm:$0xff]  ;;  %v6657_v0 = vpack.c.bf16 %v6627_v56, %v6626_v51  ;;  %v1250_v43 = vld [vmem:[#allocation2 + $0x108] sm:$0xff] }
 0x1d7   : > { %1027 = vst.msk [vmem:[#allocation2 + $0x141] sm:$0xff] %vm452_vm1, %v956_v13  ;;  %14497 = vmatmul.mubr.msk.bf16.gmra.mrb[16].mxu0 %vm452_vm1, %v6371_v11  ;;  %v1320_v24 = vpack.c.bf16 %v1300_v44, %v1299_v32  ;;  %v6658_v11 = vpack.c.bf16 %v6629_v59, %v6628_v45  ;;  %v1234_v13 = vld [vmem:[#allocation2 + $0x48] sm:$0xff]  ;;  %v1236_v44 = vld [vmem:[#allocation2 + $0x60] sm:$0xff]  ;;  %v6630_v30 = vld [vmem:[#allocation3 + $0x64] sm:$0xff] }
 0x1d8   : > { %14500 = vmatprep.mubr.msk.bf16.mxu0 %vm452_vm1, %v6372_v18  ;;  %v958_v49 = vpop.permute.xlu0 %957  ;;  %v1301_v7 = vld [vmem:[#allocation2 + $0x121] sm:$0xff]  ;;  %v17257_v18 = vld [vmem:[%s19828_s5 + $0x16] sm:$0x3]  ;;  %v17260_v32 = vpack.c.bf16 %v1235_v63, %v1234_v13  ;;  %v6648_v59 = vld [vmem:[#allocation3 + $0x13c] sm:$0xff] }
 0x1d9   : > { %1028 = vst.msk [vmem:[#allocation2 + $0x151] sm:$0xff] %vm452_vm1, %v958_v49  ;;  %13923 = vmatmul.mubr.msk.bf16.gmra.mrb[52].mxu1 %vm452_vm1, %v1320_v24  ;;  %v17263_v24 = vpack.c.bf16 %v1237_v4, %v1236_v44  ;;  %v6631_v49 = vld [vmem:[#allocation3 + $0x6c] sm:$0xff]  ;;  %v1251_v38 = vld [vmem:[#allocation2 + $0x110] sm:$0xff] }
 0x1da   : > { %v960_v1 = vpop.permute.xlu1 %959  ;;  %v1302_v20 = vld [vmem:[#allocation2 + $0x129] sm:$0xff]  ;;  %v1252_v52 = vld [vmem:[#allocation2 + $0x120] sm:$0xff]  ;;  %v6646_v56 = vld [vmem:[#allocation3 + $0x124] sm:$0xff] }
 0x1db   : > { %1029 = vst.msk [vmem:[#allocation2 + $0x159] sm:$0xff] %vm452_vm1, %v960_v1  ;;  %v1321_v35 = vpack.c.bf16 %v1302_v20, %v1301_v7  ;;  %v6633_v1 = vld [vmem:[#allocation3 + $0x84] sm:$0xff]  ;;  %v1239_v7 = vld [vmem:[#allocation2 + $0x80] sm:$0xff]  ;;  %v6659_v20 = vpack.c.bf16 %v6631_v49, %v6630_v30 }
 0x1dc   : > { %v962_v47 = vpop.permute.xlu0 %961  ;;  %v1303_v54 = vld [vmem:[#allocation2 + $0x139] sm:$0xff]  ;;  %v17272_v37 = vpack.c.bf16 %v1239_v7, %v1238_v42 }
 0x1dd   : > { %1030 = vst.msk [vmem:[#allocation2 + $0x169] sm:$0xff] %vm452_vm1, %v962_v47  ;;  %13926 = vmatprep.mubr.msk.bf16.mxu1 %vm452_vm1, %v1321_v35  ;;  %v6660_v35 = vpack.c.bf16 %v6633_v1, %v6632_v58  ;;  %v1240_v47 = vld [vmem:[#allocation2 + $0x90] sm:$0xff]  ;;  %v6647_v45 = vld [vmem:[#allocation3 + $0x12c] sm:$0xff]  ;;  %v6650_v58 = vld [vmem:[#allocation3 + $0x154] sm:$0xff] }
 0x1de   : > { %v964_v50 = vpop.permute.xlu1 %963  ;;  %v1304_v57 = vld [vmem:[#allocation2 + $0x141] sm:$0xff]  ;;  %v6649_v63 = vld [vmem:[#allocation3 + $0x144] sm:$0xff]  ;;  %v6667_v4 = vpack.c.bf16 %v6647_v45, %v6646_v56  ;;  %v6651_v1 = vld [vmem:[#allocation3 + $0x15c] sm:$0xff] }
 0x1df   : > { %1031 = vst.msk [vmem:[#allocation2 + $0x171] sm:$0xff] %vm452_vm1, %v964_v50  ;;  %14501 = vmatmul.mubr.msk.bf16.gmra.mrb[20].mxu0 %vm452_vm1, %v6373_v61  ;;  %v1322_v60 = vpack.c.bf16 %v1304_v57, %v1303_v54  ;;  %v17275_v61 = vpack.c.bf16 %v1241_v23, %v1240_v47  ;;  %v6634_v50 = vld [vmem:[#allocation3 + $0x94] sm:$0xff]  ;;  %v6636_v54 = vld [vmem:[#allocation3 + $0xac] sm:$0xff]  ;;  %v6669_v47 = vpack.c.bf16 %v6651_v1, %v6650_v58 }
 0x1e0   : > { %14504 = vmatprep.mubr.msk.bf16.mxu0 %vm452_vm1, %v6374_v25  ;;  %v1095_v62 = vpop.permute.xlu0 %1094  ;;  %v1305_v6 = vld [vmem:[#allocation2 + $0x151] sm:$0xff]  ;;  %v6637_v57 = vld [vmem:[#allocation3 + $0xb4] sm:$0xff]  ;;  %v6652_v7 = vld [vmem:[#allocation3 + $0x16c] sm:$0xff] }
 0x1e1   : > { %1161 = vst.msk [vmem:[#allocation3 + $0x19a] sm:$0xff] %vm452_vm1, %v1095_v62  ;;  %13927 = vmatmul.mubr.msk.bf16.gmra.mrb[56].mxu1 %vm452_vm1, %v1322_v60  ;;  %v6635_v25 = vld [vmem:[#allocation3 + $0x9c] sm:$0xff]  ;;  %v6662_v3 = vpack.c.bf16 %v6637_v57, %v6636_v54  ;;  %v1254_v13 = vld [vmem:[#allocation2 + $0x138] sm:$0xff]  ;;  %v1751_v23 = vld [vmem:[#allocation2 + $0x2] sm:$0xff] }
 0x1e2   : > { %v1097_v5 = vpop.permute.xlu1 %1096  ;;  %v1306_v8 = vld [vmem:[#allocation2 + $0x159] sm:$0xff]  ;;  %v1243_v60 = vld [vmem:[#allocation2 + $0xb0] sm:$0xff]  ;;  %v6661_v62 = vpack.c.bf16 %v6635_v25, %v6634_v50  ;;  %v6927_v45 = vld [vmem:[#allocation3 + $0x98] sm:$0xff] }
 0x1e3   : > { %1162 = vst.msk [vmem:[#allocation3 + $0x1a2] sm:$0xff] %vm452_vm1, %v1097_v5  ;;  %v1323_v12 = vpack.c.bf16 %v1306_v8, %v1305_v6  ;;  %v1242_v5 = vld [vmem:[#allocation2 + $0xa8] sm:$0xff]  ;;  %v1244_v8 = vld [vmem:[#allocation2 + $0xc0] sm:$0xff]  ;;  %v1256_v30 = vld [vmem:[#allocation2 + $0x150] sm:$0xff] }
 0x1e4   : > { %v966_v17 = vpop.permute.xlu0 %965  ;;  %v1307_v26 = vld [vmem:[#allocation2 + $0x169] sm:$0xff]  ;;  %v17282_v6 = vpack.c.bf16 %v1243_v60, %v1242_v5  ;;  %v17285_v10 = vpack.c.bf16 %v1245_v2, %v1244_v8  ;;  %v6654_v60 = vld [vmem:[#allocation3 + $0x184] sm:$0xff] }
 0x1e5   : > { %1032 = vst.msk [vmem:[#allocation2 + $0x181] sm:$0xff] %vm452_vm1, %v966_v17  ;;  %13930 = vmatprep.mubr.msk.bf16.mxu1 %vm452_vm1, %v1323_v12  ;;  %v6638_v12 = vld [vmem:[#allocation3 + $0xc4] sm:$0xff]  ;;  %v1247_v17 = vld [vmem:[#allocation2 + $0xe0] sm:$0xff]  ;;  %v1258_v25 = vld [vmem:[#allocation2 + $0x168] sm:$0xff] }
 0x1e6   : > { %v968_v21 = vpop.permute.xlu1 %967  ;;  %v1308_v27 = vld [vmem:[#allocation2 + $0x171] sm:$0xff]  ;;  %v6919_v2 = vld [vmem:[#allocation3 + $0x38] sm:$0xff] }
 0x1e7   : > { %1033 = vst.msk [vmem:[#allocation2 + $0x189] sm:$0xff] %vm452_vm1, %v968_v21  ;;  %14505 = vmatmul.mubr.msk.bf16.gmra.mrb[24].mxu0 %vm452_vm1, %v6375_v19  ;;  %v1324_v29 = vpack.c.bf16 %v1308_v27, %v1307_v26  ;;  %v6663_v19 = vpack.c.bf16 %v6639_v14, %v6638_v12  ;;  %v1249_v21 = vld [vmem:[#allocation2 + $0xf8] sm:$0xff]  ;;  %v1259_v42 = vld [vmem:[#allocation2 + $0x170] sm:$0xff]  ;;  %v1754_v5 = vld [vmem:[#allocation2 + $0x22] sm:$0xff] }
 0x1e8   : > { %14508 = vmatprep.mubr.msk.bf16.mxu0 %vm452_vm1, %v6376_v22  ;;  %v6664_v22 = vpack.c.bf16 %v6641_v16, %v6640_v15  ;;  %v1246_v26 = vld [vmem:[#allocation2 + $0xd8] sm:$0xff]  ;;  %v17322_v57 = vpack.c.bf16 %v1259_v42, %v1258_v25  ;;  %v6918_v12 = vld [vmem:[#allocation3 + $0x30] sm:$0xff] }
 0x1e9   : > { %13931 = vmatmul.mubr.msk.bf16.gmra.mrb[60].mxu1 %vm452_vm1, %v1324_v29  ;;  %v17292_v27 = vpack.c.bf16 %v1247_v17, %v1246_v26  ;;  %v1755_v14 = vld [vmem:[#allocation2 + $0x32] sm:$0xff]  ;;  %v1756_v15 = vld [vmem:[#allocation2 + $0x3a] sm:$0xff]  ;;  %v6950_v16 = vpack.c.bf16 %v6919_v2, %v6918_v12  ;;  %v1767_v25 = vld [vmem:[#allocation2 + $0xc2] sm:$0xff] }
 0x1ea   : > { %13936 = vmatprep.mubr.msk.bf16.mxu1 %vm452_vm1, %v1260_v28  ;;  %v1248_v28 = vld [vmem:[#allocation2 + $0xf0] sm:$0xff]  ;;  %v6921_v26 = vld [vmem:[#allocation3 + $0x50] sm:$0xff] }
 0x1eb   : > { %v17295_v29 = vpack.c.bf16 %v1249_v21, %v1248_v28  ;;  %v17334_v21 = vpack.c.bf16 %v1756_v15, %v1755_v14  ;;  %v6923_v28 = vld [vmem:[#allocation3 + $0x68] sm:$0xff]  ;;  %v1770_v14 = vld [vmem:[#allocation2 + $0xe2] sm:$0xff] }
 0x1ec   : > { %v1766_v42 = vld [vmem:[#allocation2 + $0xb2] sm:$0xff]  ;;  %v1769_v12 = vld [vmem:[#allocation2 + $0xda] sm:$0xff] }
 0x1ef   : > { %14509 = vmatmul.mubr.msk.bf16.gmra.mrb[28].mxu0 %vm452_vm1, %v6377_v40  ;;  %v1253_v40 = vld [vmem:[#allocation2 + $0x128] sm:$0xff] }
 0x1f0   : > { %14514 = vmatprep.mubr.msk.bf16.mxu0 %vm452_vm1, %v6656_v39  ;;  %v6665_v39 = vpack.c.bf16 %v6643_v33, %v6642_v31  ;;  %v17305_v51 = vpack.c.bf16 %v1253_v40, %v1252_v52  ;;  %v1757_v31 = vld [vmem:[#allocation2 + $0x4a] sm:$0xff]  ;;  %v1758_v33 = vld [vmem:[#allocation2 + $0x52] sm:$0xff]  ;;  %v7311_v40 = vsel %vm501_vm0, %v17257_v18, 0 }
 0x1f1   : > { %13937 = vmatmul.mubr.msk.bf16.vlgmr.msra.gmra.mrb[32].mxu1 %vm452_vm1, %v17234_v46  ;;  %v17355_v52 = vpack.c.bf16 %v1758_v33, %v1757_v31  ;;  %v6937_v33 = vld [vmem:[#allocation3 + $0x110] sm:$0xff] }
 0x1f2   : > { %13969 = vmatpush3.bf16.msra.mxu1 %v1850_v48  ;;  %13940 = vmatprep.mubr.msk.bf16.mxu1 %vm452_vm1, %v17238_v53  ;;  %v17302_v48 = vpack.c.bf16 %v1251_v38, %v1250_v43  ;;  %v1759_v38 = vld [vmem:[#allocation2 + $0x62] sm:$0xff]  ;;  %v17352_v43 = vld [vmem:[%s19828_s5 + $0x18] sm:$0x3] }
 0x1f3   : > { %16118 = vmatprep.subr.msk.bf16.mxu1 %vm501_vm0, %v17244_v55 }
 0x1f7   : > { %14515 = vmatmul.mubr.msk.bf16.vlgmr.msra.gmra.mrb[0].mxu0 %vm452_vm1, %v6657_v0  ;;  %v1255_v0 = vld [vmem:[#allocation2 + $0x140] sm:$0xff] }
 0x1f8   : > { %14518 = vmatprep.mubr.msk.bf16.mxu0 %vm452_vm1, %v6658_v11  ;;  %14547 = vmatpush3.bf16.msra.mxu0 %v7017_v9  ;;  %v1257_v9 = vld [vmem:[#allocation2 + $0x158] sm:$0xff]  ;;  %v6668_v11 = vpack.c.bf16 %v6649_v63, %v6648_v59  ;;  %v17312_v44 = vpack.c.bf16 %v1255_v0, %v1254_v13  ;;  %v6924_v59 = vld [vmem:[#allocation3 + $0x78] sm:$0xff] }
 0x1f9   : > { %13941 = vmatmul.mubr.msk.bf16.gmra.mrb[36].mxu1 %vm452_vm1, %v17260_v32  ;;  %16135 = vmatprep.subr.msk.bf16.mxu0 %vm501_vm0, %v17257_v18  ;;  %v17315_v49 = vpack.c.bf16 %v1257_v9, %v1256_v30  ;;  %v6925_v18 = vld [vmem:[#allocation3 + $0x80] sm:$0xff]  ;;  %v1761_v63 = vld [vmem:[#allocation2 + $0x7a] sm:$0xff]  ;;  %v1762_v0 = vld [vmem:[#allocation2 + $0x82] sm:$0xff] }
 0x1fa   : > { %13944 = vmatprep.mubr.msk.bf16.mxu1 %vm452_vm1, %v17263_v24  ;;  %v6926_v9 = vld [vmem:[#allocation3 + $0x90] sm:$0xff]  ;;  %v17367_v58 = vpack.c.bf16 %v1762_v0, %v1761_v63 }
 0x1fb   : > { %v1764_v13 = vld [vmem:[#allocation2 + $0x9a] sm:$0xff]  ;;  %v6954_v30 = vpack.c.bf16 %v6927_v45, %v6926_v9  ;;  %v1776_v45 = vld [vmem:[#allocation2 + $0x12a] sm:$0xff] }
 0x1fc   : > { %v6943_v9 = vld [vmem:[#allocation3 + $0x158] sm:$0xff] }
 0x1ff   : > { %14519 = vmatmul.mubr.msk.bf16.gmra.mrb[4].mxu0 %vm452_vm1, %v6659_v20  ;;  %v6653_v20 = vld [vmem:[#allocation3 + $0x174] sm:$0xff] }
 0x200   : > { %14522 = vmatprep.mubr.msk.bf16.mxu0 %vm452_vm1, %v6660_v35  ;;  %v1752_v35 = vld [vmem:[#allocation2 + $0xa] sm:$0xff]  ;;  %v6670_v50 = vpack.c.bf16 %v6653_v20, %v6652_v7  ;;  %v6929_v7 = vld [vmem:[#allocation3 + $0xb0] sm:$0xff]  ;;  %v6931_v20 = vld [vmem:[#allocation3 + $0xc8] sm:$0xff] }
 0x201   : > { %13945 = vmatmul.mubr.msk.bf16.gmra.mrb[40].mxu1 %vm452_vm1, %v17272_v37  ;;  %v1783_v54 = vpack.c.bf16 %v1752_v35, %v1751_v23  ;;  %v6928_v23 = vld [vmem:[#allocation3 + $0xa8] sm:$0xff]  ;;  %v1765_v35 = vld [vmem:[#allocation2 + $0xaa] sm:$0xff] }
 0x202   : > { %13948 = vmatprep.mubr.msk.bf16.mxu1 %vm452_vm1, %v17275_v61 }
 0x207   : > { %14523 = vmatmul.mubr.msk.bf16.gmra.mrb[8].mxu0 %vm452_vm1, %v6661_v62  ;;  %v6655_v62 = vld [vmem:[#allocation3 + $0x18c] sm:$0xff] }
 0x208   : > { %14526 = vmatprep.mubr.msk.bf16.mxu0 %vm452_vm1, %v6662_v3  ;;  %v1753_v3 = vld [vmem:[#allocation2 + $0x1a] sm:$0xff]  ;;  %v6671_v8 = vpack.c.bf16 %v6655_v62, %v6654_v60  ;;  %v17377_v62 = vpack.c.bf16 %v1766_v42, %v1765_v35 }
 0x209   : > { %13949 = vmatmul.mubr.msk.bf16.gmra.mrb[44].mxu1 %vm452_vm1, %v17282_v6  ;;  %v17329_v17 = vpack.c.bf16 %v1754_v5, %v1753_v3  ;;  %v6933_v3 = vld [vmem:[#allocation3 + $0xe0] sm:$0xff]  ;;  %v6935_v5 = vld [vmem:[#allocation3 + $0xf8] sm:$0xff]  ;;  %v1780_v35 = vld [vmem:[#allocation2 + $0x15a] sm:$0xff] }
 0x20a   : > { %13952 = vmatprep.mubr.msk.bf16.mxu1 %vm452_vm1, %v17285_v10 }
 0x20f   : > { %14527 = vmatmul.mubr.msk.bf16.gmra.mrb[12].mxu0 %vm452_vm1, %v6663_v19  ;;  %v2144_v19 = vsel %vm501_vm0, %v17244_v55, 0  ;;  %v6920_v55 = vld [vmem:[#allocation3 + $0x48] sm:$0xff] }
 0x210   : > { %14530 = vmatprep.mubr.msk.bf16.mxu0 %vm452_vm1, %v6664_v22  ;;  %v17339_v22 = vld [vmem:[%s19826_s3 + $0x8] sm:$0x3]  ;;  %v6951_v34 = vpack.c.bf16 %v6921_v26, %v6920_v55  ;;  %v1772_v26 = vld [vmem:[#allocation2 + $0xfa] sm:$0xff]  ;;  %v17387_v55 = vpack.c.bf16 %v1770_v14, %v1769_v12  ;;  %v6946_v12 = vld [vmem:[#allocation3 + $0x180] sm:$0xff] }
 0x211   : > { %13953 = vmatmul.mubr.msk.bf16.gmra.mrb[48].mxu1 %vm452_vm1, %v17292_v27 }
 0x212   : > { %13956 = vmatprep.mubr.msk.bf16.mxu1 %vm452_vm1, %v17295_v29 }
 0x217   : > { %14531 = vmatmul.mubr.msk.bf16.gmra.mrb[16].mxu0 %vm452_vm1, %v6665_v39  ;;  %v1760_v39 = vld [vmem:[#allocation2 + $0x6a] sm:$0xff] }
 0x218   : > { %14534 = vmatprep.mubr.msk.bf16.mxu0 %vm452_vm1, %v6666_v41  ;;  %v6952_v41 = vpack.c.bf16 %v6923_v28, %v6922_v36  ;;  %v17358_v56 = vpack.c.bf16 %v1760_v39, %v1759_v38  ;;  %v6936_v36 = vld [vmem:[#allocation3 + $0x108] sm:$0xff]  ;;  %v1773_v38 = vld [vmem:[#allocation2 + $0x10a] sm:$0xff] }
 0x219   : > { %13957 = vmatmul.mubr.msk.bf16.gmra.mrb[52].mxu1 %vm452_vm1, %v17302_v48  ;;  %v1774_v39 = vld [vmem:[#allocation2 + $0x112] sm:$0xff] }
 0x21a   : > { %13960 = vmatprep.mubr.msk.bf16.mxu1 %vm452_vm1, %v17305_v51  ;;  %v17397_v63 = vpack.c.bf16 %v1774_v39, %v1773_v38  ;;  %v17431_v38 = vld [vmem:[%s19826_s3 + $0xa] sm:$0x3]  ;;  %v7217_v39 = vld [vmem:[#allocation3 + $0x69] sm:$0xff] }
 0x21f   : > { %14535 = vmatmul.mubr.msk.bf16.gmra.mrb[20].mxu0 %vm452_vm1, %v6667_v4  ;;  %v6953_v4 = vpack.c.bf16 %v6925_v18, %v6924_v59  ;;  %v1775_v18 = vld [vmem:[#allocation2 + $0x122] sm:$0xff] }
 0x220   : > { %14538 = vmatprep.mubr.msk.bf16.mxu0 %vm452_vm1, %v6668_v11  ;;  %v1763_v11 = vld [vmem:[#allocation2 + $0x92] sm:$0xff]  ;;  %v17400_v0 = vpack.c.bf16 %v1776_v45, %v1775_v18  ;;  %v7605_v18 = vsel %vm501_vm0, %v17352_v43, 0 }
 0x221   : > { %13961 = vmatmul.mubr.msk.bf16.gmra.mrb[56].mxu1 %vm452_vm1, %v17312_v44  ;;  %v17370_v1 = vpack.c.bf16 %v1764_v13, %v1763_v11  ;;  %v6940_v11 = vld [vmem:[#allocation3 + $0x138] sm:$0xff]  ;;  %v1777_v13 = vld [vmem:[#allocation2 + $0x13a] sm:$0xff] }
 0x222   : > { %13964 = vmatprep.mubr.msk.bf16.mxu1 %vm452_vm1, %v17315_v49 }
 0x227   : > { %14539 = vmatmul.mubr.msk.bf16.gmra.mrb[24].mxu0 %vm452_vm1, %v6669_v47  ;;  %v6955_v47 = vpack.c.bf16 %v6929_v7, %v6928_v23  ;;  %v1779_v23 = vld [vmem:[#allocation2 + $0x152] sm:$0xff] }
 0x228   : > { %14542 = vmatprep.mubr.msk.bf16.mxu0 %vm452_vm1, %v6670_v50  ;;  %v6930_v50 = vld [vmem:[#allocation3 + $0xc0] sm:$0xff] }
 0x229   : > { %13965 = vmatmul.mubr.msk.bf16.gmra.mrb[60].mxu1 %vm452_vm1, %v17322_v57  ;;  %v6956_v60 = vpack.c.bf16 %v6931_v20, %v6930_v50  ;;  %v6942_v20 = vld [vmem:[#allocation3 + $0x150] sm:$0xff]  ;;  %v17410_v50 = vpack.c.bf16 %v1780_v35, %v1779_v23  ;;  %v7229_v23 = vld [vmem:[#allocation3 + $0xf9] sm:$0xff] }
 0x22a   : > { %13970 = vmatprep.mubr.msk.bf16.mxu1 %vm452_vm1, %v1783_v54  ;;  %v1768_v54 = vld [vmem:[#allocation2 + $0xca] sm:$0xff]  ;;  %v6962_v42 = vpack.c.bf16 %v6943_v9, %v6942_v20  ;;  %v7220_v9 = vld [vmem:[#allocation3 + $0x91] sm:$0xff] }
 0x22b   : > { %v17380_v2 = vpack.c.bf16 %v1768_v54, %v1767_v25  ;;  %v6945_v25 = vld [vmem:[#allocation3 + $0x170] sm:$0xff]  ;;  %v6947_v54 = vld [vmem:[#allocation3 + $0x188] sm:$0xff]  ;;  %v7226_v35 = vld [vmem:[#allocation3 + $0xd9] sm:$0xff] }
 0x22c   : > { %v6964_v14 = vpack.c.bf16 %v6947_v54, %v6946_v12  ;;  %v7233_v54 = vld [vmem:[#allocation3 + $0x129] sm:$0xff]  ;;  %v7234_v12 = vld [vmem:[#allocation3 + $0x139] sm:$0xff] }
 0x22f   : > { %14543 = vmatmul.mubr.msk.bf16.gmra.mrb[28].mxu0 %vm452_vm1, %v6671_v8  ;;  %v6932_v8 = vld [vmem:[#allocation3 + $0xd8] sm:$0xff] }
 0x230   : > { %14548 = vmatprep.mubr.msk.bf16.mxu0 %vm452_vm1, %v6950_v16  ;;  %v6957_v15 = vpack.c.bf16 %v6933_v3, %v6932_v8  ;;  %v6934_v16 = vld [vmem:[#allocation3 + $0xf0] sm:$0xff]  ;;  %v1781_v3 = vld [vmem:[#allocation2 + $0x16a] sm:$0xff] }
 0x231   : > { %13971 = vmatmul.mubr.msk.bf16.vlgmr.msra.gmra.mrb[32].mxu1 %vm452_vm1, %v17329_v17  ;;  %v6958_v28 = vpack.c.bf16 %v6935_v5, %v6934_v16  ;;  %v1782_v5 = vld [vmem:[#allocation2 + $0x172] sm:$0xff] }
 0x232   : > { %14003 = vmatpush3.bf16.msra.mxu1 %v2144_v19  ;;  %13974 = vmatprep.mubr.msk.bf16.mxu1 %vm452_vm1, %v17334_v21  ;;  %v1771_v19 = vld [vmem:[#allocation2 + $0xf2] sm:$0xff] }
 0x233   : > { %16119 = vmatprep.subr.msk.bf16.mxu1 %vm501_vm0, %v17339_v22  ;;  %v17390_v31 = vpack.c.bf16 %v1772_v26, %v1771_v19  ;;  %v6949_v16 = vld [vmem:[#allocation3 + $0x1a0] sm:$0xff]  ;;  %v6948_v26 = vld [vmem:[#allocation3 + $0x198] sm:$0xff] }
 0x234   : > { %v7213_v19 = vld [vmem:[#allocation3 + $0x39] sm:$0xff] }
 0x237   : > { %14549 = vmatmul.mubr.msk.bf16.vlgmr.msra.gmra.mrb[0].mxu0 %vm452_vm1, %v6951_v34  ;;  %v6939_v34 = vld [vmem:[#allocation3 + $0x128] sm:$0xff] }
 0x238   : > { %14552 = vmatprep.mubr.msk.bf16.mxu0 %vm452_vm1, %v6952_v41  ;;  %14581 = vmatpush3.bf16.msra.mxu0 %v7311_v40  ;;  %v6959_v40 = vpack.c.bf16 %v6937_v33, %v6936_v36  ;;  %v6938_v41 = vld [vmem:[#allocation3 + $0x120] sm:$0xff]  ;;  %v7212_v33 = vld [vmem:[#allocation3 + $0x31] sm:$0xff]  ;;  %v2438_v36 = vsel %vm501_vm0, %v17339_v22, 0  ;;  %v7214_v22 = vld [vmem:[#allocation3 + $0x49] sm:$0xff] }
 0x239   : > { %13975 = vmatmul.mubr.msk.bf16.gmra.mrb[36].mxu1 %vm452_vm1, %v17355_v52  ;;  %16136 = vmatprep.subr.msk.bf16.mxu0 %vm501_vm0, %v17352_v43  ;;  %v6960_v59 = vpack.c.bf16 %v6939_v34, %v6938_v41  ;;  %v7244_v34 = vpack.c.bf16 %v7213_v19, %v7212_v33  ;;  %v7216_v41 = vld [vmem:[#allocation3 + $0x61] sm:$0xff]  ;;  %v7221_v43 = vld [vmem:[#allocation3 + $0x99] sm:$0xff]  ;;  %v7241_v19 = vld [vmem:[#allocation3 + $0x189] sm:$0xff] }
 0x23a   : > { %13978 = vmatprep.mubr.msk.bf16.mxu1 %vm452_vm1, %v17358_v56  ;;  %v7246_v45 = vpack.c.bf16 %v7217_v39, %v7216_v41  ;;  %v7240_v33 = vld [vmem:[#allocation3 + $0x181] sm:$0xff]  ;;  %v7242_v41 = vld [vmem:[#allocation3 + $0x199] sm:$0xff] }
 0x23f   : > { %14553 = vmatmul.mubr.msk.bf16.gmra.mrb[4].mxu0 %vm452_vm1, %v6953_v4  ;;  %v6941_v4 = vld [vmem:[#allocation3 + $0x140] sm:$0xff] }
 0x240   : > { %14556 = vmatprep.mubr.msk.bf16.mxu0 %vm452_vm1, %v6954_v30  ;;  %v1778_v30 = vld [vmem:[#allocation2 + $0x142] sm:$0xff]  ;;  %v6961_v7 = vpack.c.bf16 %v6941_v4, %v6940_v11  ;;  %v7248_v11 = vpack.c.bf16 %v7221_v43, %v7220_v9  ;;  %v2344_v43 = vld [vmem:[#allocation2 + $0x51] sm:$0xff] }
 0x241   : > { %13979 = vmatmul.mubr.msk.bf16.gmra.mrb[40].mxu1 %vm452_vm1, %v17367_v58 }
 0x242   : > { %13982 = vmatprep.mubr.msk.bf16.mxu1 %vm452_vm1, %v17370_v1 }
 0x247   : > { %14557 = vmatmul.mubr.msk.bf16.gmra.mrb[8].mxu0 %vm452_vm1, %v6955_v47  ;;  %v17407_v47 = vpack.c.bf16 %v1778_v30, %v1777_v13  ;;  %v7225_v13 = vld [vmem:[#allocation3 + $0xc9] sm:$0xff] }
 0x248   : > { %14560 = vmatprep.mubr.msk.bf16.mxu0 %vm452_vm1, %v6956_v60  ;;  %v6944_v60 = vld [vmem:[#allocation3 + $0x168] sm:$0xff] }
 0x249   : > { %13983 = vmatmul.mubr.msk.bf16.gmra.mrb[44].mxu1 %vm452_vm1, %v17377_v62  ;;  %v6963_v8 = vpack.c.bf16 %v6945_v25, %v6944_v60  ;;  %v7222_v30 = vld [vmem:[#allocation3 + $0xa9] sm:$0xff] }
 0x24a   : > { %13986 = vmatprep.mubr.msk.bf16.mxu1 %vm452_vm1, %v17380_v2  ;;  %v7230_v60 = vld [vmem:[#allocation3 + $0x109] sm:$0xff] }
 0x24f   : > { %14561 = vmatmul.mubr.msk.bf16.gmra.mrb[12].mxu0 %vm452_vm1, %v6957_v15  ;;  %v17417_v15 = vpack.c.bf16 %v1782_v5, %v1781_v3  ;;  %v7232_v3 = vld [vmem:[#allocation3 + $0x121] sm:$0xff] }
 0x250   : > { %14564 = vmatprep.mubr.msk.bf16.mxu0 %vm452_vm1, %v6958_v28  ;;  %v6965_v28 = vpack.c.bf16 %v6949_v16, %v6948_v26  ;;  %v7254_v5 = vpack.c.bf16 %v7233_v54, %v7232_v3  ;;  %v7238_v26 = vld [vmem:[#allocation3 + $0x169] sm:$0xff]  ;;  %v7515_v3 = vld [vmem:[#allocation3 + $0x9a] sm:$0xff] }
 0x251   : > { %13987 = vmatmul.mubr.msk.bf16.gmra.mrb[48].mxu1 %vm452_vm1, %v17387_v55 }
 0x252   : > { %13990 = vmatprep.mubr.msk.bf16.mxu1 %vm452_vm1, %v17390_v31 }
 0x257   : > { %14565 = vmatmul.mubr.msk.bf16.gmra.mrb[16].mxu0 %vm452_vm1, %v6959_v40 }
 0x258   : > { %14568 = vmatprep.mubr.msk.bf16.mxu0 %vm452_vm1, %v6960_v59  ;;  %v7218_v59 = vld [vmem:[#allocation3 + $0x79] sm:$0xff] }
 0x259   : > { %13991 = vmatmul.mubr.msk.bf16.gmra.mrb[52].mxu1 %vm452_vm1, %v17397_v63 }
 0x25a   : > { %13994 = vmatprep.mubr.msk.bf16.mxu1 %vm452_vm1, %v17400_v0 }
 0x25f   : > { %14569 = vmatmul.mubr.msk.bf16.gmra.mrb[20].mxu0 %vm452_vm1, %v6961_v7  ;;  %v7224_v7 = vld [vmem:[#allocation3 + $0xc1] sm:$0xff] }
 0x260   : > { %14572 = vmatprep.mubr.msk.bf16.mxu0 %vm452_vm1, %v6962_v42  ;;  %v7250_v20 = vpack.c.bf16 %v7225_v13, %v7224_v7  ;;  %v7228_v42 = vld [vmem:[#allocation3 + $0xf1] sm:$0xff] }
 0x261   : > { %13995 = vmatmul.mubr.msk.bf16.gmra.mrb[56].mxu1 %vm452_vm1, %v17407_v47  ;;  %v7252_v25 = vpack.c.bf16 %v7229_v23, %v7228_v42  ;;  %v7511_v7 = vld [vmem:[#allocation3 + $0x6a] sm:$0xff]  ;;  %v7510_v23 = vld [vmem:[#allocation3 + $0x62] sm:$0xff] }
 0x262   : > { %13998 = vmatprep.mubr.msk.bf16.mxu1 %vm452_vm1, %v17410_v50  ;;  %v7540_v42 = vpack.c.bf16 %v7511_v7, %v7510_v23  ;;  %v2357_v7 = vld [vmem:[#allocation2 + $0xf1] sm:$0xff]  ;;  %v7525_v23 = vld [vmem:[#allocation3 + $0x112] sm:$0xff] }
 0x267   : > { %14573 = vmatmul.mubr.msk.bf16.gmra.mrb[24].mxu0 %vm452_vm1, %v6963_v8  ;;  %v7237_v8 = vld [vmem:[#allocation3 + $0x159] sm:$0xff] }
 0x268   : > { %14576 = vmatprep.mubr.msk.bf16.mxu0 %vm452_vm1, %v6964_v14  ;;  %v7236_v14 = vld [vmem:[#allocation3 + $0x151] sm:$0xff] }
 0x269   : > { %13999 = vmatmul.mubr.msk.bf16.gmra.mrb[60].mxu1 %vm452_vm1, %v17417_v15  ;;  %v7256_v16 = vpack.c.bf16 %v7237_v8, %v7236_v14 }
 0x26a   : > { %14004 = vmatprep.mubr.msk.bf16.mxu1 %vm452_vm1, %v17234_v46  ;;  %v7215_v46 = vld [vmem:[#allocation3 + $0x51] sm:$0xff] }
 0x26b   : > { %v7245_v40 = vpack.c.bf16 %v7215_v46, %v7214_v22  ;;  %v2075_v46 = vld [vmem:[#allocation2 + $0x180] sm:$0xff] }
 0x26c   : > { %v2339_v22 = vld [vmem:[#allocation2 + $0x19] sm:$0xff] }
 0x26f   : > { %14577 = vmatmul.mubr.msk.bf16.gmra.mrb[28].mxu0 %vm452_vm1, %v6965_v28 }
 0x270   : > { %14582 = vmatprep.mubr.msk.bf16.mxu0 %vm452_vm1, %v7244_v34  ;;  %v2340_v34 = vld [vmem:[#allocation2 + $0x21] sm:$0xff] }
 0x271   : > { %14005 = vmatmul.mubr.msk.bf16.vlgmr.msra.gmra.mrb[32].mxu1 %vm452_vm1, %v17238_v53  ;;  %v17444_v53 = vld [vmem:[%s19828_s5 + $0x1a] sm:$0x3] }
 0x272   : > { %14037 = vmatpush3.bf16.msra.mxu1 %v2438_v36  ;;  %14008 = vmatprep.mubr.msk.bf16.mxu1 %vm452_vm1, %v17260_v32  ;;  %v7219_v32 = vld [vmem:[#allocation3 + $0x81] sm:$0xff]  ;;  %v7258_v36 = vpack.c.bf16 %v7241_v19, %v7240_v33  ;;  %v2351_v19 = vld [vmem:[#allocation2 + $0xa9] sm:$0xff]  ;;  %v7516_v33 = vld [vmem:[#allocation3 + $0xaa] sm:$0xff] }
 0x273   : > { %16120 = vmatprep.subr.msk.bf16.mxu1 %vm501_vm0, %v17431_v38  ;;  %v7247_v4 = vpack.c.bf16 %v7219_v32, %v7218_v59  ;;  %v7506_v32 = vld [vmem:[#allocation3 + $0x32] sm:$0xff] }
 0x277   : > { %14583 = vmatmul.mubr.msk.bf16.vlgmr.msra.gmra.mrb[0].mxu0 %vm452_vm1, %v7245_v40  ;;  %v7507_v40 = vld [vmem:[#allocation3 + $0x3a] sm:$0xff] }
 0x278   : > { %14586 = vmatprep.mubr.msk.bf16.mxu0 %vm452_vm1, %v7246_v45  ;;  %14615 = vmatpush3.bf16.msra.mxu0 %v7605_v18  ;;  %v2342_v18 = vld [vmem:[#allocation2 + $0x39] sm:$0xff]  ;;  %v7538_v59 = vpack.c.bf16 %v7507_v40, %v7506_v32  ;;  %v7523_v32 = vld [vmem:[#allocation3 + $0xfa] sm:$0xff] }
 0x279   : > { %14009 = vmatmul.mubr.msk.bf16.gmra.mrb[36].mxu1 %vm452_vm1, %v17263_v24  ;;  %16137 = vmatprep.subr.msk.bf16.mxu0 %vm501_vm0, %v17444_v53  ;;  %v7223_v24 = vld [vmem:[#allocation3 + $0xb1] sm:$0xff] }
 0x27a   : > { %14012 = vmatprep.mubr.msk.bf16.mxu1 %vm452_vm1, %v17272_v37  ;;  %v7249_v37 = vpack.c.bf16 %v7223_v24, %v7222_v30  ;;  %v2343_v24 = vld [vmem:[#allocation2 + $0x49] sm:$0xff] }
 0x27b   : > { %v17497_v13 = vpack.c.bf16 %v2344_v43, %v2343_v24  ;;  %v17502_v30 = vld [vmem:[%s19826_s3 + $0xc] sm:$0x3]  ;;  %v2360_v24 = vld [vmem:[#allocation2 + $0x111] sm:$0xff] }
 0x27c   : > { %v7520_v43 = vld [vmem:[#allocation3 + $0xda] sm:$0xff] }
 0x27f   : > { %14587 = vmatmul.mubr.msk.bf16.gmra.mrb[4].mxu0 %vm452_vm1, %v7247_v4  ;;  %v2341_v4 = vld [vmem:[#allocation2 + $0x31] sm:$0xff] }
 0x280   : > { %14590 = vmatprep.mubr.msk.bf16.mxu0 %vm452_vm1, %v7248_v11  ;;  %v17492_v9 = vpack.c.bf16 %v2342_v18, %v2341_v4  ;;  %v2732_v11 = vsel %vm501_vm0, %v17431_v38, 0  ;;  %v7508_v38 = vld [vmem:[#allocation3 + $0x4a] sm:$0xff] }
 0x281   : > { %14013 = vmatmul.mubr.msk.bf16.gmra.mrb[40].mxu1 %vm452_vm1, %v17275_v61  ;;  %v7227_v61 = vld [vmem:[#allocation3 + $0xe1] sm:$0xff] }
 0x282   : > { %14016 = vmatprep.mubr.msk.bf16.mxu1 %vm452_vm1, %v17282_v6  ;;  %v7251_v6 = vpack.c.bf16 %v7227_v61, %v7226_v35  ;;  %v2348_v35 = vld [vmem:[#allocation2 + $0x81] sm:$0xff] }
 0x287   : > { %14591 = vmatmul.mubr.msk.bf16.gmra.mrb[8].mxu0 %vm452_vm1, %v7249_v37  ;;  %v7509_v37 = vld [vmem:[#allocation3 + $0x52] sm:$0xff] }
 0x288   : > { %14594 = vmatprep.mubr.msk.bf16.mxu0 %vm452_vm1, %v7250_v20  ;;  %v2346_v20 = vld [vmem:[#allocation2 + $0x69] sm:$0xff]  ;;  %v7539_v61 = vpack.c.bf16 %v7509_v37, %v7508_v38 }
 0x289   : > { %14017 = vmatmul.mubr.msk.bf16.gmra.mrb[44].mxu1 %vm452_vm1, %v17285_v10  ;;  %v7231_v10 = vld [vmem:[#allocation3 + $0x111] sm:$0xff] }
 0x28a   : > { %14020 = vmatprep.mubr.msk.bf16.mxu1 %vm452_vm1, %v17292_v27  ;;  %v7253_v27 = vpack.c.bf16 %v7231_v10, %v7230_v60  ;;  %v17515_v10 = vld [vmem:[%s19828_s5 + $0x1c] sm:$0x3] }
 0x28b   : > { %v2347_v60 = vld [vmem:[#allocation2 + $0x79] sm:$0xff] }
 0x28f   : > { %14595 = vmatmul.mubr.msk.bf16.gmra.mrb[12].mxu0 %vm452_vm1, %v7251_v6  ;;  %v7899_v6 = vsel %vm501_vm0, %v17444_v53, 0  ;;  %v7513_v53 = vld [vmem:[#allocation3 + $0x82] sm:$0xff] }
 0x290   : > { %14598 = vmatprep.mubr.msk.bf16.mxu0 %vm452_vm1, %v7252_v25  ;;  %v2345_v25 = vld [vmem:[#allocation2 + $0x61] sm:$0xff] }
 0x291   : > { %14021 = vmatmul.mubr.msk.bf16.gmra.mrb[48].mxu1 %vm452_vm1, %v17295_v29  ;;  %v7235_v29 = vld [vmem:[#allocation3 + $0x141] sm:$0xff]  ;;  %v17518_v54 = vpack.c.bf16 %v2346_v20, %v2345_v25  ;;  %v2359_v20 = vld [vmem:[#allocation2 + $0x109] sm:$0xff] }
 0x292   : > { %14024 = vmatprep.mubr.msk.bf16.mxu1 %vm452_vm1, %v17302_v48  ;;  %v7255_v48 = vpack.c.bf16 %v7235_v29, %v7234_v12  ;;  %v2350_v29 = vld [vmem:[#allocation2 + $0x99] sm:$0xff]  ;;  %v7514_v12 = vld [vmem:[#allocation3 + $0x92] sm:$0xff] }
 0x293   : > { %v7542_v14 = vpack.c.bf16 %v7515_v3, %v7514_v12 }
 0x297   : > { %14599 = vmatmul.mubr.msk.bf16.gmra.mrb[16].mxu0 %vm452_vm1, %v7253_v27  ;;  %v17521_v27 = vpack.c.bf16 %v2348_v35, %v2347_v60  ;;  %v7527_v35 = vld [vmem:[#allocation3 + $0x12a] sm:$0xff]  ;;  %v7526_v60 = vld [vmem:[#allocation3 + $0x122] sm:$0xff] }
 0x298   : > { %14602 = vmatprep.mubr.msk.bf16.mxu0 %vm452_vm1, %v7254_v5  ;;  %v7512_v5 = vld [vmem:[#allocation3 + $0x7a] sm:$0xff]  ;;  %v7548_v3 = vpack.c.bf16 %v7527_v35, %v7526_v60 }
 0x299   : > { %14025 = vmatmul.mubr.msk.bf16.gmra.mrb[52].mxu1 %vm452_vm1, %v17305_v51  ;;  %v7239_v51 = vld [vmem:[#allocation3 + $0x171] sm:$0xff]  ;;  %v7541_v8 = vpack.c.bf16 %v7513_v53, %v7512_v5 }
 0x29a   : > { %14028 = vmatprep.mubr.msk.bf16.mxu1 %vm452_vm1, %v17312_v44  ;;  %v2076_v44 = vld [vmem:[#allocation2 + $0x188] sm:$0xff]  ;;  %v7257_v28 = vpack.c.bf16 %v7239_v51, %v7238_v26 }
 0x29b   : > { %v17485_v39 = vpack.c.bf16 %v2076_v44, %v2075_v46  ;;  %v7517_v44 = vld [vmem:[#allocation3 + $0xb2] sm:$0xff]  ;;  %v7518_v46 = vld [vmem:[#allocation3 + $0xc2] sm:$0xff] }
 0x29c   : > { %v2364_v53 = vld [vmem:[#allocation2 + $0x141] sm:$0xff] }
 0x29d   : > { %v2361_v5 = vld [vmem:[#allocation2 + $0x121] sm:$0xff] }
 0x29e   : > { %v7803_v60 = vld [vmem:[#allocation3 + $0x53] sm:$0xff] }
 0x29f   : > { %14603 = vmatmul.mubr.msk.bf16.gmra.mrb[20].mxu0 %vm452_vm1, %v7255_v48  ;;  %v2352_v48 = vld [vmem:[#allocation2 + $0xb1] sm:$0xff] }
 0x2a0   : > { %14606 = vmatprep.mubr.msk.bf16.mxu0 %vm452_vm1, %v7256_v16  ;;  %v2349_v16 = vld [vmem:[#allocation2 + $0x91] sm:$0xff]  ;;  %v17533_v26 = vpack.c.bf16 %v2352_v48, %v2351_v19  ;;  %v2366_v19 = vld [vmem:[#allocation2 + $0x159] sm:$0xff] }
 0x2a1   : > { %14029 = vmatmul.mubr.msk.bf16.gmra.mrb[56].mxu1 %vm452_vm1, %v17315_v49  ;;  %v2371_v49 = vpack.c.bf16 %v2340_v34, %v2339_v22  ;;  %v17530_v51 = vpack.c.bf16 %v2350_v29, %v2349_v16  ;;  %v2354_v34 = vld [vmem:[#allocation2 + $0xc9] sm:$0xff]  ;;  %v2356_v22 = vld [vmem:[#allocation2 + $0xe1] sm:$0xff]  ;;  %v7529_v48 = vld [vmem:[#allocation3 + $0x142] sm:$0xff] }
 0x2a2   : > { %14032 = vmatprep.mubr.msk.bf16.mxu1 %vm452_vm1, %v17322_v57  ;;  %v7243_v57 = vld [vmem:[#allocation3 + $0x1a1] sm:$0xff] }
 0x2a3   : > { %v7259_v45 = vpack.c.bf16 %v7243_v57, %v7242_v41  ;;  %v2353_v57 = vld [vmem:[#allocation2 + $0xc1] sm:$0xff]  ;;  %v2355_v41 = vld [vmem:[#allocation2 + $0xd9] sm:$0xff]  ;;  %v7528_v16 = vld [vmem:[#allocation3 + $0x13a] sm:$0xff] }
 0x2a4   : > { %v17540_v40 = vpack.c.bf16 %v2354_v34, %v2353_v57  ;;  %v17543_v18 = vpack.c.bf16 %v2356_v22, %v2355_v41  ;;  %v2367_v22 = vld [vmem:[#allocation2 + $0x169] sm:$0xff]  ;;  %v7535_v41 = vld [vmem:[#allocation3 + $0x18a] sm:$0xff] }
 0x2a5   : > { %v7533_v57 = vld [vmem:[#allocation3 + $0x172] sm:$0xff] }
 0x2a7   : > { %14607 = vmatmul.mubr.msk.bf16.gmra.mrb[24].mxu0 %vm452_vm1, %v7257_v28  ;;  %v7519_v28 = vld [vmem:[#allocation3 + $0xca] sm:$0xff] }
 0x2a8   : > { %14610 = vmatprep.mubr.msk.bf16.mxu0 %vm452_vm1, %v7258_v36  ;;  %v7543_v36 = vpack.c.bf16 %v7517_v44, %v7516_v33  ;;  %v7549_v44 = vpack.c.bf16 %v7529_v48, %v7528_v16  ;;  %v2368_v33 = vld [vmem:[#allocation2 + $0x171] sm:$0xff]  ;;  %v7808_v48 = vld [vmem:[#allocation3 + $0x93] sm:$0xff] }
 0x2a9   : > { %14033 = vmatmul.mubr.msk.bf16.gmra.mrb[60].mxu1 %vm452_vm1, %v17485_v39 }
 0x2aa   : > { %14038 = vmatprep.mubr.msk.bf16.mxu1 %vm452_vm1, %v2371_v49  ;;  %v7544_v49 = vpack.c.bf16 %v7519_v28, %v7518_v46  ;;  %v7530_v28 = vld [vmem:[#allocation3 + $0x152] sm:$0xff] }
 0x2af   : > { %14611 = vmatmul.mubr.msk.bf16.gmra.mrb[28].mxu0 %vm452_vm1, %v7259_v45  ;;  %v7521_v45 = vld [vmem:[#allocation3 + $0xe2] sm:$0xff] }
 0x2b0   : > { %14616 = vmatprep.mubr.msk.bf16.mxu0 %vm452_vm1, %v7538_v59  ;;  %v2358_v59 = vld [vmem:[#allocation2 + $0xf9] sm:$0xff]  ;;  %v7545_v4 = vpack.c.bf16 %v7521_v45, %v7520_v43 }
 0x2b1   : > { %14039 = vmatmul.mubr.msk.bf16.vlgmr.msra.gmra.mrb[32].mxu1 %vm452_vm1, %v17492_v9  ;;  %v17550_v38 = vpack.c.bf16 %v2358_v59, %v2357_v7  ;;  %v7532_v45 = vld [vmem:[#allocation3 + $0x16a] sm:$0xff]  ;;  %v7534_v59 = vld [vmem:[#allocation3 + $0x182] sm:$0xff]  ;;  %v7800_v7 = vld [vmem:[#allocation3 + $0x33] sm:$0xff] }
 0x2b2   : > { %14071 = vmatpush3.bf16.msra.mxu1 %v2732_v11  ;;  %14042 = vmatprep.mubr.msk.bf16.mxu1 %vm452_vm1, %v17497_v13  ;;  %v7522_v11 = vld [vmem:[#allocation3 + $0xf2] sm:$0xff]  ;;  %v7551_v43 = vpack.c.bf16 %v7533_v57, %v7532_v45 }
 0x2b3   : > { %16121 = vmatprep.subr.msk.bf16.mxu1 %vm501_vm0, %v17502_v30  ;;  %v7546_v37 = vpack.c.bf16 %v7523_v32, %v7522_v11  ;;  %v2370_v32 = vld [vmem:[#allocation2 + $0x189] sm:$0xff]  ;;  %v2369_v11 = vld [vmem:[#allocation2 + $0x181] sm:$0xff] }
 0x2b4   : > { %v7819_v45 = vld [vmem:[#allocation3 + $0x113] sm:$0xff] }
 0x2b7   : > { %14617 = vmatmul.mubr.msk.bf16.vlgmr.msra.gmra.mrb[0].mxu0 %vm452_vm1, %v7539_v61  ;;  %v17553_v61 = vpack.c.bf16 %v2360_v24, %v2359_v20  ;;  %v17580_v24 = vpack.c.bf16 %v2370_v32, %v2369_v11  ;;  %v7801_v20 = vld [vmem:[#allocation3 + $0x3b] sm:$0xff]  ;;  %v7820_v32 = vld [vmem:[#allocation3 + $0x123] sm:$0xff]  ;;  %v7824_v11 = vld [vmem:[#allocation3 + $0x153] sm:$0xff] }
 0x2b8   : > { %14620 = vmatprep.mubr.msk.bf16.mxu0 %vm452_vm1, %v7540_v42  ;;  %14649 = vmatpush3.bf16.msra.mxu0 %v7899_v6  ;;  %v7524_v6 = vld [vmem:[#allocation3 + $0x10a] sm:$0xff]  ;;  %v2362_v42 = vld [vmem:[#allocation2 + $0x129] sm:$0xff] }
 0x2b9   : > { %14043 = vmatmul.mubr.msk.bf16.gmra.mrb[36].mxu1 %vm452_vm1, %v17518_v54  ;;  %16138 = vmatprep.subr.msk.bf16.mxu0 %vm501_vm0, %v17515_v10  ;;  %v7547_v25 = vpack.c.bf16 %v7525_v23, %v7524_v6  ;;  %v17560_v29 = vpack.c.bf16 %v2362_v42, %v2361_v5  ;;  %v7536_v23 = vld [vmem:[#allocation3 + $0x19a] sm:$0xff]  ;;  %v7832_v6 = vpack.c.bf16 %v7801_v20, %v7800_v7  ;;  %v3027_v42 = vsel %vm501_vm0, %v17502_v30, 0 }
 0x2ba   : > { %14046 = vmatprep.mubr.msk.bf16.mxu1 %vm452_vm1, %v17521_v27  ;;  %v8193_v5 = vsel %vm501_vm0, %v17515_v10, 0  ;;  %v7807_v10 = vld [vmem:[#allocation3 + $0x83] sm:$0xff]  ;;  %v7827_v20 = vld [vmem:[#allocation3 + $0x173] sm:$0xff] }
 0x2bf   : > { %14621 = vmatmul.mubr.msk.bf16.gmra.mrb[4].mxu0 %vm452_vm1, %v7541_v8  ;;  %v2363_v8 = vld [vmem:[#allocation2 + $0x139] sm:$0xff] }
 0x2c0   : > { %14624 = vmatprep.mubr.msk.bf16.mxu0 %vm452_vm1, %v7542_v14  ;;  %v17563_v12 = vpack.c.bf16 %v2364_v53, %v2363_v8  ;;  %v7531_v14 = vld [vmem:[#allocation3 + $0x15a] sm:$0xff]  ;;  %v7804_v53 = vld [vmem:[#allocation3 + $0x63] sm:$0xff] }
 0x2c1   : > { %14047 = vmatmul.mubr.msk.bf16.gmra.mrb[40].mxu1 %vm452_vm1, %v17530_v51  ;;  %v7550_v34 = vpack.c.bf16 %v7531_v14, %v7530_v28  ;;  %v7809_v14 = vld [vmem:[#allocation3 + $0x9b] sm:$0xff]  ;;  %v7812_v28 = vld [vmem:[#allocation3 + $0xc3] sm:$0xff] }
 0x2c2   : > { %14050 = vmatprep.mubr.msk.bf16.mxu1 %vm452_vm1, %v17533_v26 }
 0x2c7   : > { %14625 = vmatmul.mubr.msk.bf16.gmra.mrb[8].mxu0 %vm452_vm1, %v7543_v36  ;;  %v2365_v36 = vld [vmem:[#allocation2 + $0x151] sm:$0xff] }
 0x2c8   : > { %14628 = vmatprep.mubr.msk.bf16.mxu0 %vm452_vm1, %v7544_v49  ;;  %v17570_v46 = vpack.c.bf16 %v2366_v19, %v2365_v36  ;;  %v17573_v49 = vpack.c.bf16 %v2368_v33, %v2367_v22  ;;  %v7836_v19 = vpack.c.bf16 %v7809_v14, %v7808_v48  ;;  %v7815_v36 = vld [vmem:[#allocation3 + $0xe3] sm:$0xff]  ;;  %v7816_v22 = vld [vmem:[#allocation3 + $0xf3] sm:$0xff] }
 0x2c9   : > { %14051 = vmatmul.mubr.msk.bf16.gmra.mrb[44].mxu1 %vm452_vm1, %v17540_v40  ;;  %v2933_v48 = vld [vmem:[#allocation2 + $0x68] sm:$0xff] }
 0x2ca   : > { %14054 = vmatprep.mubr.msk.bf16.mxu1 %vm452_vm1, %v17543_v18 }
 0x2cf   : > { %14629 = vmatmul.mubr.msk.bf16.gmra.mrb[12].mxu0 %vm452_vm1, %v7545_v4  ;;  %v7552_v4 = vpack.c.bf16 %v7535_v41, %v7534_v59 }
 0x2d0   : > { %14632 = vmatprep.mubr.msk.bf16.mxu0 %vm452_vm1, %v7546_v37  ;;  %v7537_v37 = vld [vmem:[#allocation3 + $0x1a2] sm:$0xff] }
 0x2d1   : > { %14055 = vmatmul.mubr.msk.bf16.gmra.mrb[48].mxu1 %vm452_vm1, %v17550_v38  ;;  %v7553_v35 = vpack.c.bf16 %v7537_v37, %v7536_v23  ;;  %v7828_v23 = vld [vmem:[#allocation3 + $0x183] sm:$0xff] }
 0x2d2   : > { %14058 = vmatprep.mubr.msk.bf16.mxu1 %vm452_vm1, %v17553_v61 }
 0x2d7   : > { %14633 = vmatmul.mubr.msk.bf16.gmra.mrb[16].mxu0 %vm452_vm1, %v7547_v25  ;;  %v17594_v25 = vld [vmem:[%s19826_s3 + $0xe] sm:$0x3] }
 0x2d8   : > { %14636 = vmatprep.mubr.msk.bf16.mxu0 %vm452_vm1, %v7548_v3  ;;  %v7805_v3 = vld [vmem:[#allocation3 + $0x6b] sm:$0xff] }
 0x2d9   : > { %14059 = vmatmul.mubr.msk.bf16.gmra.mrb[52].mxu1 %vm452_vm1, %v17560_v29  ;;  %v7834_v8 = vpack.c.bf16 %v7805_v3, %v7804_v53  ;;  %v2928_v3 = vld [vmem:[#allocation2 + $0x30] sm:$0xff] }
 0x2da   : > { %14062 = vmatprep.mubr.msk.bf16.mxu1 %vm452_vm1, %v17563_v12 }
 0x2df   : > { %14637 = vmatmul.mubr.msk.bf16.gmra.mrb[20].mxu0 %vm452_vm1, %v7549_v44  ;;  %v7811_v44 = vld [vmem:[#allocation3 + $0xb3] sm:$0xff] }
 0x2e0   : > { %14640 = vmatprep.mubr.msk.bf16.mxu0 %vm452_vm1, %v7550_v34 }
 0x2e1   : > { %14063 = vmatmul.mubr.msk.bf16.gmra.mrb[56].mxu1 %vm452_vm1, %v17570_v46 }
 0x2e2   : > { %14066 = vmatprep.mubr.msk.bf16.mxu1 %vm452_vm1, %v17573_v49 }
 0x2e7   : > { %14641 = vmatmul.mubr.msk.bf16.gmra.mrb[24].mxu0 %vm452_vm1, %v7551_v43 }
 0x2e8   : > { %14644 = vmatprep.mubr.msk.bf16.mxu0 %vm452_vm1, %v7552_v4  ;;  %v7823_v4 = vld [vmem:[#allocation3 + $0x143] sm:$0xff] }
 0x2e9   : > { %14067 = vmatmul.mubr.msk.bf16.gmra.mrb[60].mxu1 %vm452_vm1, %v17580_v24 }
 0x2ea   : > { %14072 = vmatprep.mubr.msk.bf16.mxu1 %vm452_vm1, %v17329_v17  ;;  %v7802_v17 = vld [vmem:[#allocation3 + $0x4b] sm:$0xff] }
 0x2eb   : > { %v7833_v30 = vpack.c.bf16 %v7803_v60, %v7802_v17  ;;  %v2929_v17 = vld [vmem:[#allocation2 + $0x38] sm:$0xff] }
 0x2ef   : > { %14645 = vmatmul.mubr.msk.bf16.gmra.mrb[28].mxu0 %vm452_vm1, %v7553_v35  ;;  %v2663_v35 = vld [vmem:[#allocation2 + $0x182] sm:$0xff] }
 0x2f0   : > { %14650 = vmatprep.mubr.msk.bf16.mxu0 %vm452_vm1, %v7832_v6  ;;  %v2664_v6 = vld [vmem:[#allocation2 + $0x18a] sm:$0xff] }
 0x2f1   : > { %14073 = vmatmul.mubr.msk.bf16.vlgmr.msra.gmra.mrb[32].mxu1 %vm452_vm1, %v17334_v21  ;;  %v17607_v21 = vld [vmem:[%s19828_s5 + $0x1e] sm:$0x3]  ;;  %v17648_v53 = vpack.c.bf16 %v2664_v6, %v2663_v35  ;;  %v8105_v6 = vld [vmem:[#allocation3 + $0xb4] sm:$0xff] }
 0x2f2   : > { %14105 = vmatpush3.bf16.msra.mxu1 %v3027_v42  ;;  %14076 = vmatprep.mubr.msk.bf16.mxu1 %vm452_vm1, %v17355_v52  ;;  %v7806_v52 = vld [vmem:[#allocation3 + $0x7b] sm:$0xff]  ;;  %v8104_v35 = vld [vmem:[#allocation3 + $0xac] sm:$0xff] }
 0x2f3   : > { %16122 = vmatprep.subr.msk.bf16.mxu1 %vm501_vm0, %v17594_v25  ;;  %v7835_v16 = vpack.c.bf16 %v7807_v10, %v7806_v52  ;;  %v2931_v52 = vld [vmem:[#allocation2 + $0x50] sm:$0xff] }
 0x2f7   : > { %14651 = vmatmul.mubr.msk.bf16.vlgmr.msra.gmra.mrb[0].mxu0 %vm452_vm1, %v7833_v30  ;;  %v7831_v30 = vld [vmem:[#allocation3 + $0x1a3] sm:$0xff] }
 0x2f8   : > { %14654 = vmatprep.mubr.msk.bf16.mxu0 %vm452_vm1, %v7834_v8  ;;  %14683 = vmatpush3.bf16.msra.mxu0 %v8193_v5  ;;  %v8094_v5 = vld [vmem:[#allocation3 + $0x34] sm:$0xff]  ;;  %v8095_v8 = vld [vmem:[#allocation3 + $0x3c] sm:$0xff] }
 0x2f9   : > { %14077 = vmatmul.mubr.msk.bf16.gmra.mrb[36].mxu1 %vm452_vm1, %v17358_v56  ;;  %16139 = vmatprep.subr.msk.bf16.mxu0 %vm501_vm0, %v17607_v21  ;;  %v7810_v56 = vld [vmem:[#allocation3 + $0xab] sm:$0xff]  ;;  %v8126_v14 = vpack.c.bf16 %v8095_v8, %v8094_v5  ;;  %v2944_v8 = vld [vmem:[#allocation2 + $0xf0] sm:$0xff] }
 0x2fa   : > { %14080 = vmatprep.mubr.msk.bf16.mxu1 %vm452_vm1, %v17367_v58  ;;  %v7813_v58 = vld [vmem:[#allocation3 + $0xcb] sm:$0xff]  ;;  %v7837_v33 = vpack.c.bf16 %v7811_v44, %v7810_v56  ;;  %v3321_v56 = vsel %vm501_vm0, %v17594_v25, 0 }
 0x2fb   : > { %v7838_v34 = vpack.c.bf16 %v7813_v58, %v7812_v28  ;;  %v2932_v44 = vld [vmem:[#allocation2 + $0x60] sm:$0xff]  ;;  %v17661_v58 = vld [vmem:[%s19826_s3 + $0x10] sm:$0x3] }
 0x2fc   : > { %v2962_v28 = vpack.c.bf16 %v2933_v48, %v2932_v44  ;;  %v2935_v25 = vld [vmem:[#allocation2 + $0x80] sm:$0xff]  ;;  %v8109_v48 = vld [vmem:[#allocation3 + $0xe4] sm:$0xff]  ;;  %v2949_v44 = vld [vmem:[#allocation2 + $0x128] sm:$0xff] }
 0x2ff   : > { %14655 = vmatmul.mubr.msk.bf16.gmra.mrb[4].mxu0 %vm452_vm1, %v7835_v16  ;;  %v2930_v16 = vld [vmem:[#allocation2 + $0x48] sm:$0xff] }
 0x300   : > { %14658 = vmatprep.mubr.msk.bf16.mxu0 %vm452_vm1, %v7836_v19  ;;  %v2961_v19 = vpack.c.bf16 %v2931_v52, %v2930_v16  ;;  %v8111_v16 = vld [vmem:[#allocation3 + $0xfc] sm:$0xff] }
 0x301   : > { %14081 = vmatmul.mubr.msk.bf16.gmra.mrb[40].mxu1 %vm452_vm1, %v17370_v1  ;;  %v7814_v1 = vld [vmem:[#allocation3 + $0xdb] sm:$0xff] }
 0x302   : > { %14084 = vmatprep.mubr.msk.bf16.mxu1 %vm452_vm1, %v17377_v62  ;;  %v7817_v62 = vld [vmem:[#allocation3 + $0xfb] sm:$0xff]  ;;  %v7839_v57 = vpack.c.bf16 %v7815_v36, %v7814_v1  ;;  %v8098_v1 = vld [vmem:[#allocation3 + $0x64] sm:$0xff]  ;;  %v8099_v36 = vld [vmem:[#allocation3 + $0x6c] sm:$0xff] }
 0x303   : > { %v7840_v41 = vpack.c.bf16 %v7817_v62, %v7816_v22  ;;  %v2937_v62 = vld [vmem:[#allocation2 + $0x98] sm:$0xff] }
 0x307   : > { %14659 = vmatmul.mubr.msk.bf16.gmra.mrb[8].mxu0 %vm452_vm1, %v7837_v33  ;;  %v8096_v33 = vld [vmem:[#allocation3 + $0x4c] sm:$0xff] }
 0x308   : > { %14662 = vmatprep.mubr.msk.bf16.mxu0 %vm452_vm1, %v7838_v34  ;;  %v8097_v34 = vld [vmem:[#allocation3 + $0x54] sm:$0xff] }
 0x309   : > { %14085 = vmatmul.mubr.msk.bf16.gmra.mrb[44].mxu1 %vm452_vm1, %v17380_v2  ;;  %v7818_v2 = vld [vmem:[#allocation3 + $0x10b] sm:$0xff]  ;;  %v8127_v22 = vpack.c.bf16 %v8097_v34, %v8096_v33  ;;  %v2946_v33 = vld [vmem:[#allocation2 + $0x108] sm:$0xff] }
 0x30a   : > { %14088 = vmatprep.mubr.msk.bf16.mxu1 %vm452_vm1, %v17387_v55  ;;  %v7821_v55 = vld [vmem:[#allocation3 + $0x12b] sm:$0xff]  ;;  %v7841_v43 = vpack.c.bf16 %v7819_v45, %v7818_v2 }
 0x30b   : > { %v7842_v59 = vpack.c.bf16 %v7821_v55, %v7820_v32  ;;  %v2934_v2 = vld [vmem:[#allocation2 + $0x78] sm:$0xff]  ;;  %v17672_v45 = vld [vmem:[%s19828_s5 + $0x20] sm:$0x3]  ;;  %v2936_v55 = vld [vmem:[#allocation2 + $0x90] sm:$0xff] }
 0x30c   : > { %v2963_v32 = vpack.c.bf16 %v2935_v25, %v2934_v2  ;;  %v8112_v25 = vld [vmem:[#allocation3 + $0x10c] sm:$0xff] }
 0x30f   : > { %14663 = vmatmul.mubr.msk.bf16.gmra.mrb[12].mxu0 %vm452_vm1, %v7839_v57  ;;  %v8488_v57 = vsel %vm501_vm0, %v17607_v21, 0  ;;  %v8100_v21 = vld [vmem:[#allocation3 + $0x7c] sm:$0xff] }
 0x310   : > { %14666 = vmatprep.mubr.msk.bf16.mxu0 %vm452_vm1, %v7840_v41  ;;  %v8128_v41 = vpack.c.bf16 %v8099_v36, %v8098_v1  ;;  %v2948_v1 = vld [vmem:[#allocation2 + $0x120] sm:$0xff] }
 0x311   : > { %14089 = vmatmul.mubr.msk.bf16.gmra.mrb[48].mxu1 %vm452_vm1, %v17390_v31  ;;  %v7822_v31 = vld [vmem:[#allocation3 + $0x13b] sm:$0xff]  ;;  %v2970_v36 = vpack.c.bf16 %v2949_v44, %v2948_v1 }
 0x312   : > { %14092 = vmatprep.mubr.msk.bf16.mxu1 %vm452_vm1, %v17397_v63  ;;  %v7825_v63 = vld [vmem:[#allocation3 + $0x15b] sm:$0xff]  ;;  %v7843_v37 = vpack.c.bf16 %v7823_v4, %v7822_v31 }
 0x313   : > { %v7844_v7 = vpack.c.bf16 %v7825_v63, %v7824_v11  ;;  %v8102_v31 = vld [vmem:[#allocation3 + $0x94] sm:$0xff]  ;;  %v8103_v4 = vld [vmem:[#allocation3 + $0x9c] sm:$0xff] }
 0x314   : > { %v2939_v11 = vld [vmem:[#allocation2 + $0xb0] sm:$0xff]  ;;  %v8393_v44 = vld [vmem:[#allocation3 + $0x78] sm:$0xff] }
 0x317   : > { %14667 = vmatmul.mubr.msk.bf16.gmra.mrb[16].mxu0 %vm452_vm1, %v7841_v43  ;;  %v2964_v43 = vpack.c.bf16 %v2937_v62, %v2936_v55  ;;  %v8114_v62 = vld [vmem:[#allocation3 + $0x124] sm:$0xff] }
 0x318   : > { %14670 = vmatprep.mubr.msk.bf16.mxu0 %vm452_vm1, %v7842_v59  ;;  %v8101_v59 = vld [vmem:[#allocation3 + $0x84] sm:$0xff] }
 0x319   : > { %14093 = vmatmul.mubr.msk.bf16.gmra.mrb[52].mxu1 %vm452_vm1, %v17400_v0  ;;  %v7826_v0 = vld [vmem:[#allocation3 + $0x16b] sm:$0xff]  ;;  %v8129_v63 = vpack.c.bf16 %v8101_v59, %v8100_v21  ;;  %v2952_v59 = vld [vmem:[#allocation2 + $0x150] sm:$0xff] }
 0x31a   : > { %14096 = vmatprep.mubr.msk.bf16.mxu1 %vm452_vm1, %v17407_v47  ;;  %v7829_v47 = vld [vmem:[#allocation3 + $0x18b] sm:$0xff]  ;;  %v7845_v42 = vpack.c.bf16 %v7827_v20, %v7826_v0  ;;  %v2938_v0 = vld [vmem:[#allocation2 + $0xa8] sm:$0xff] }
 0x31b   : > { %v7846_v60 = vpack.c.bf16 %v7829_v47, %v7828_v23  ;;  %v2965_v20 = vpack.c.bf16 %v2939_v11, %v2938_v0  ;;  %v2940_v23 = vld [vmem:[#allocation2 + $0xc0] sm:$0xff]  ;;  %v8117_v11 = vld [vmem:[#allocation3 + $0x144] sm:$0xff] }
 0x31f   : > { %14671 = vmatmul.mubr.msk.bf16.gmra.mrb[20].mxu0 %vm452_vm1, %v7843_v37  ;;  %v2941_v37 = vld [vmem:[#allocation2 + $0xc8] sm:$0xff] }
 0x320   : > { %14674 = vmatprep.mubr.msk.bf16.mxu0 %vm452_vm1, %v7844_v7  ;;  %v8130_v7 = vpack.c.bf16 %v8103_v4, %v8102_v31  ;;  %v2966_v47 = vpack.c.bf16 %v2941_v37, %v2940_v23  ;;  %v8116_v4 = vld [vmem:[#allocation3 + $0x13c] sm:$0xff] }
 0x321   : > { %14097 = vmatmul.mubr.msk.bf16.gmra.mrb[56].mxu1 %vm452_vm1, %v17410_v50  ;;  %v2960_v50 = vpack.c.bf16 %v2929_v17, %v2928_v3  ;;  %v8107_v17 = vld [vmem:[#allocation3 + $0xcc] sm:$0xff]  ;;  %v8131_v3 = vpack.c.bf16 %v8105_v6, %v8104_v35  ;;  %v8119_v37 = vld [vmem:[#allocation3 + $0x15c] sm:$0xff]  ;;  %v8137_v0 = vpack.c.bf16 %v8117_v11, %v8116_v4  ;;  %v8121_v6 = vld [vmem:[#allocation3 + $0x174] sm:$0xff] }
 0x322   : > { %14100 = vmatprep.mubr.msk.bf16.mxu1 %vm452_vm1, %v17417_v15  ;;  %v7830_v15 = vld [vmem:[#allocation3 + $0x19b] sm:$0xff]  ;;  %v8120_v35 = vld [vmem:[#allocation3 + $0x16c] sm:$0xff] }
 0x323   : > { %v7847_v10 = vpack.c.bf16 %v7831_v30, %v7830_v15  ;;  %v2942_v30 = vld [vmem:[#allocation2 + $0xd8] sm:$0xff]  ;;  %v2954_v23 = vld [vmem:[#allocation2 + $0x168] sm:$0xff]  ;;  %v8411_v11 = vld [vmem:[#allocation3 + $0x150] sm:$0xff] }
 0x327   : > { %14675 = vmatmul.mubr.msk.bf16.gmra.mrb[24].mxu0 %vm452_vm1, %v7845_v42  ;;  %v8106_v42 = vld [vmem:[#allocation3 + $0xc4] sm:$0xff] }
 0x328   : > { %14678 = vmatprep.mubr.msk.bf16.mxu0 %vm452_vm1, %v7846_v60  ;;  %v2943_v60 = vld [vmem:[#allocation2 + $0xe0] sm:$0xff]  ;;  %v8132_v15 = vpack.c.bf16 %v8107_v17, %v8106_v42  ;;  %v2958_v42 = vld [vmem:[#allocation2 + $0x198] sm:$0xff] }
 0x329   : > { %14101 = vmatmul.mubr.msk.bf16.gmra.mrb[60].mxu1 %vm452_vm1, %v17648_v53  ;;  %v2967_v5 = vpack.c.bf16 %v2943_v60, %v2942_v30  ;;  %v2959_v17 = vld [vmem:[#allocation2 + $0x1a0] sm:$0xff]  ;;  %v8122_v60 = vld [vmem:[#allocation3 + $0x184] sm:$0xff] }
 0x32a   : > { %14106 = vmatprep.mubr.msk.bf16.mxu1 %vm452_vm1, %v2960_v50  ;;  %v2945_v50 = vld [vmem:[#allocation2 + $0xf8] sm:$0xff] }
 0x32b   : > { %v2968_v52 = vpack.c.bf16 %v2945_v50, %v2944_v8  ;;  %v8139_v50 = vpack.c.bf16 %v8121_v6, %v8120_v35  ;;  %v8125_v8 = vld [vmem:[#allocation3 + $0x1a4] sm:$0xff]  ;;  %v8417_v35 = vld [vmem:[#allocation3 + $0x198] sm:$0xff] }
 0x32f   : > { %14679 = vmatmul.mubr.msk.bf16.gmra.mrb[28].mxu0 %vm452_vm1, %v7847_v10  ;;  %v8108_v10 = vld [vmem:[#allocation3 + $0xdc] sm:$0xff] }
 0x330   : > { %14684 = vmatprep.mubr.msk.bf16.mxu0 %vm452_vm1, %v8126_v14  ;;  %v8110_v14 = vld [vmem:[#allocation3 + $0xf4] sm:$0xff] }
 0x331   : > { %14107 = vmatmul.mubr.msk.bf16.vlgmr.msra.gmra.mrb[32].mxu1 %vm452_vm1, %v2961_v19  ;;  %v2947_v19 = vld [vmem:[#allocation2 + $0x110] sm:$0xff] }
 0x332   : > { %14139 = vmatpush3.bf16.msra.mxu1 %v3321_v56  ;;  %14110 = vmatprep.mubr.msk.bf16.mxu1 %vm452_vm1, %v2962_v28  ;;  %v8133_v56 = vpack.c.bf16 %v8109_v48, %v8108_v10  ;;  %v8134_v28 = vpack.c.bf16 %v8111_v16, %v8110_v14  ;;  %v2969_v34 = vpack.c.bf16 %v2947_v19, %v2946_v33  ;;  %v8389_v10 = vld [vmem:[#allocation3 + $0x48] sm:$0xff]  ;;  %v3615_v14 = vsel %vm501_vm0, %v17661_v58, 0  ;;  %v17716_v16 = vld [vmem:[%s19828_s5 + $0x2] sm:$0x3]  ;;  %v8394_v19 = vld [vmem:[#allocation3 + $0x80] sm:$0xff] }
 0x333   : > { %16123 = vmatprep.subr.msk.bf16.mxu1 %vm501_vm0, %v17661_v58  ;;  %v8391_v58 = vld [vmem:[#allocation3 + $0x60] sm:$0xff]  ;;  %v17728_v33 = vpack.c.bf16 %v8394_v19, %v8393_v44  ;;  %v8686_v44 = vld [vmem:[#allocation3 + $0x69] sm:$0xff] }
 0x337   : > { %14685 = vmatmul.mubr.msk.bf16.vlgmr.msra.gmra.mrb[0].mxu0 %vm452_vm1, %v8127_v22  ;;  %v8113_v22 = vld [vmem:[#allocation3 + $0x114] sm:$0xff] }
 0x338   : > { %14688 = vmatprep.mubr.msk.bf16.mxu0 %vm452_vm1, %v8128_v41  ;;  %14717 = vmatpush3.bf16.msra.mxu0 %v8488_v57  ;;  %v8115_v57 = vld [vmem:[#allocation3 + $0x12c] sm:$0xff]  ;;  %v8135_v2 = vpack.c.bf16 %v8113_v22, %v8112_v25  ;;  %v8399_v22 = vld [vmem:[#allocation3 + $0xc0] sm:$0xff] }
 0x339   : > { %14111 = vmatmul.mubr.msk.bf16.gmra.mrb[36].mxu1 %vm452_vm1, %v2963_v32  ;;  %16140 = vmatprep.subr.msk.bf16.mxu0 %vm501_vm0, %v17672_v45  ;;  %v2951_v41 = vld [vmem:[#allocation2 + $0x140] sm:$0xff]  ;;  %v2953_v32 = vld [vmem:[#allocation2 + $0x158] sm:$0xff]  ;;  %v8136_v55 = vpack.c.bf16 %v8115_v57, %v8114_v62  ;;  %v8401_v57 = vld [vmem:[#allocation3 + $0xd8] sm:$0xff] }
 0x33a   : > { %14114 = vmatprep.mubr.msk.bf16.mxu1 %vm452_vm1, %v2964_v43  ;;  %v2950_v43 = vld [vmem:[#allocation2 + $0x138] sm:$0xff]  ;;  %v2972_v31 = vpack.c.bf16 %v2953_v32, %v2952_v59 }
 0x33b   : > { %v2971_v21 = vpack.c.bf16 %v2951_v41, %v2950_v43 }
 0x33f   : > { %14689 = vmatmul.mubr.msk.bf16.gmra.mrb[4].mxu0 %vm452_vm1, %v8129_v63  ;;  %v8118_v63 = vld [vmem:[#allocation3 + $0x154] sm:$0xff] }
 0x340   : > { %14692 = vmatprep.mubr.msk.bf16.mxu0 %vm452_vm1, %v8130_v7  ;;  %v2955_v7 = vld [vmem:[#allocation2 + $0x170] sm:$0xff] }
 0x341   : > { %14115 = vmatmul.mubr.msk.bf16.gmra.mrb[40].mxu1 %vm452_vm1, %v2965_v20  ;;  %v8138_v20 = vpack.c.bf16 %v8119_v37, %v8118_v63  ;;  %v8413_v37 = vld [vmem:[#allocation3 + $0x168] sm:$0xff] }
 0x342   : > { %14118 = vmatprep.mubr.msk.bf16.mxu1 %vm452_vm1, %v2966_v47  ;;  %v2973_v47 = vpack.c.bf16 %v2955_v7, %v2954_v23  ;;  %v8415_v23 = vld [vmem:[#allocation3 + $0x180] sm:$0xff] }
 0x347   : > { %14693 = vmatmul.mubr.msk.bf16.gmra.mrb[8].mxu0 %vm452_vm1, %v8131_v3  ;;  %v8123_v3 = vld [vmem:[#allocation3 + $0x18c] sm:$0xff] }
 0x348   : > { %14696 = vmatprep.mubr.msk.bf16.mxu0 %vm452_vm1, %v8132_v15  ;;  %v2975_v15 = vpack.c.bf16 %v2959_v17, %v2958_v42  ;;  %v8140_v30 = vpack.c.bf16 %v8123_v3, %v8122_v60  ;;  %v3516_v42 = vld [vmem:[#allocation2 + $0x32] sm:$0xff]  ;;  %v3517_v17 = vld [vmem:[#allocation2 + $0x3a] sm:$0xff] }
 0x349   : > { %14119 = vmatmul.mubr.msk.bf16.gmra.mrb[44].mxu1 %vm452_vm1, %v2967_v5  ;;  %v8124_v5 = vld [vmem:[#allocation3 + $0x19c] sm:$0xff]  ;;  %v3548_v3 = vpack.c.bf16 %v3517_v17, %v3516_v42 }
 0x34a   : > { %14122 = vmatprep.mubr.msk.bf16.mxu1 %vm452_vm1, %v2968_v52  ;;  %v8141_v52 = vpack.c.bf16 %v8125_v8, %v8124_v5  ;;  %v3519_v5 = vld [vmem:[#allocation2 + $0x52] sm:$0xff]  ;;  %v8695_v42 = vld [vmem:[#allocation3 + $0xd9] sm:$0xff] }
 0x34b   : > { %v8683_v8 = vld [vmem:[#allocation3 + $0x49] sm:$0xff] }
 0x34c   : > { %v3532_v17 = vld [vmem:[#allocation2 + $0xf2] sm:$0xff] }
 0x34f   : > { %14697 = vmatmul.mubr.msk.bf16.gmra.mrb[12].mxu0 %vm452_vm1, %v8133_v56 }
 0x350   : > { %14700 = vmatprep.mubr.msk.bf16.mxu0 %vm452_vm1, %v8134_v28  ;;  %v8782_v28 = vsel %vm501_vm0, %v17672_v45, 0  ;;  %v8398_v45 = vld [vmem:[#allocation3 + $0xb0] sm:$0xff] }
 0x351   : > { %14123 = vmatmul.mubr.msk.bf16.gmra.mrb[48].mxu1 %vm452_vm1, %v2969_v34  ;;  %v8395_v34 = vld [vmem:[#allocation3 + $0x90] sm:$0xff] }
 0x352   : > { %14126 = vmatprep.mubr.msk.bf16.mxu1 %vm452_vm1, %v2970_v36  ;;  %v8397_v36 = vld [vmem:[#allocation3 + $0xa8] sm:$0xff] }
 0x353   : > { %v17747_v25 = vpack.c.bf16 %v8398_v45, %v8397_v36  ;;  %v3523_v45 = vld [vmem:[#allocation2 + $0x82] sm:$0xff] }
 0x354   : > { %v8687_v36 = vld [vmem:[#allocation3 + $0x79] sm:$0xff] }
 0x357   : > { %14701 = vmatmul.mubr.msk.bf16.gmra.mrb[16].mxu0 %vm452_vm1, %v8135_v2  ;;  %v8403_v2 = vld [vmem:[#allocation3 + $0xf0] sm:$0xff] }
 0x358   : > { %14704 = vmatprep.mubr.msk.bf16.mxu0 %vm452_vm1, %v8136_v55  ;;  %v8405_v55 = vld [vmem:[#allocation3 + $0x108] sm:$0xff] }
 0x359   : > { %14127 = vmatmul.mubr.msk.bf16.gmra.mrb[52].mxu1 %vm452_vm1, %v2971_v21  ;;  %v8407_v21 = vld [vmem:[#allocation3 + $0x120] sm:$0xff] }
 0x35a   : > { %14130 = vmatprep.mubr.msk.bf16.mxu1 %vm452_vm1, %v2972_v31  ;;  %v8409_v31 = vld [vmem:[#allocation3 + $0x138] sm:$0xff] }
 0x35f   : > { %14705 = vmatmul.mubr.msk.bf16.gmra.mrb[20].mxu0 %vm452_vm1, %v8137_v0  ;;  %v3253_v0 = vld [vmem:[#allocation2 + $0x1a1] sm:$0xff] }
 0x360   : > { %14708 = vmatprep.mubr.msk.bf16.mxu0 %vm452_vm1, %v8138_v20  ;;  %v8418_v20 = vld [vmem:[#allocation3 + $0x1a0] sm:$0xff] }
 0x361   : > { %14131 = vmatmul.mubr.msk.bf16.gmra.mrb[56].mxu1 %vm452_vm1, %v2973_v47  ;;  %v8435_v60 = vpack.c.bf16 %v8418_v20, %v8417_v35  ;;  %v8696_v20 = vld [vmem:[#allocation3 + $0xe1] sm:$0xff]  ;;  %v3531_v35 = vld [vmem:[#allocation2 + $0xe2] sm:$0xff] }
 0x362   : > { %14134 = vmatprep.mubr.msk.bf16.mxu1 %vm452_vm1, %v17485_v39  ;;  %v8390_v39 = vld [vmem:[#allocation3 + $0x50] sm:$0xff] }
 0x363   : > { %v17706_v48 = vpack.c.bf16 %v8390_v39, %v8389_v10  ;;  %v3520_v39 = vld [vmem:[#allocation2 + $0x62] sm:$0xff] }
 0x367   : > { %14709 = vmatmul.mubr.msk.bf16.gmra.mrb[24].mxu0 %vm452_vm1, %v8139_v50  ;;  %v8420_v50 = vld [vmem:[#allocation3 + $0x1b8] sm:$0xff] }
 0x368   : > { %14712 = vmatprep.mubr.msk.bf16.mxu0 %vm452_vm1, %v8140_v30  ;;  %v3518_v30 = vld [vmem:[#allocation2 + $0x4a] sm:$0xff] }
 0x369   : > { %14135 = vmatmul.mubr.msk.bf16.gmra.mrb[60].mxu1 %vm452_vm1, %v2975_v15  ;;  %v8684_v15 = vld [vmem:[#allocation3 + $0x51] sm:$0xff] }
 0x36a   : > { %14140 = vmatprep.mubr.msk.bf16.mxu1 %vm452_vm1, %v17492_v9  ;;  %v8392_v9 = vld [vmem:[#allocation3 + $0x68] sm:$0xff]  ;;  %v17809_v10 = vpack.c.bf16 %v8684_v15, %v8683_v8  ;;  %v8700_v15 = vld [vmem:[#allocation3 + $0x111] sm:$0xff] }
 0x36b   : > { %v17724_v56 = vpack.c.bf16 %v8392_v9, %v8391_v58  ;;  %v4190_v9 = vsel %vm501_vm0, %v17716_v16, 0  ;;  %v17819_v58 = vld [vmem:[%s19828_s5] sm:$0x3]  ;;  %v3535_v8 = vld [vmem:[#allocation2 + $0x112] sm:$0xff] }
 0x36f   : > { %14713 = vmatmul.mubr.msk.bf16.gmra.mrb[28].mxu0 %vm452_vm1, %v8141_v52  ;;  %v3521_v52 = vld [vmem:[#allocation2 + $0x6a] sm:$0xff] }
 0x370   : > { %14718 = vmatprep.mubr.msk.bf16.mxu0 %vm452_vm1, %v17706_v48  ;;  %v3550_v19 = vpack.c.bf16 %v3521_v52, %v3520_v39  ;;  %v8699_v52 = vld [vmem:[#allocation3 + $0x109] sm:$0xff] }
 0x371   : > { %14141 = vmatmul.mubr.msk.bf16.vlgmr.msra.gmra.mrb[32].mxu1 %vm452_vm1, %v17497_v13  ;;  %v17733_v13 = vld [vmem:[%s19828_s5 + $0x22] sm:$0x3] }
 0x372   : > { %14173 = vmatpush3.bf16.msra.mxu1 %v3615_v14  ;;  %14144 = vmatprep.mubr.msk.bf16.mxu1 %vm452_vm1, %v17518_v54  ;;  %v8396_v54 = vld [vmem:[#allocation3 + $0x98] sm:$0xff]  ;;  %v3549_v14 = vpack.c.bf16 %v3519_v5, %v3518_v30 }
 0x373   : > { %16124 = vmatprep.subr.msk.bf16.mxu1 %vm501_vm0, %v17716_v16  ;;  %v17745_v1 = vpack.c.bf16 %v8396_v54, %v8395_v34  ;;  %v8685_v16 = vld [vmem:[#allocation3 + $0x61] sm:$0xff]  ;;  %v3522_v54 = vld [vmem:[#allocation2 + $0x7a] sm:$0xff] }
 0x374   : > { %v17825_v34 = vpack.c.bf16 %v8686_v44, %v8685_v16  ;;  %v8697_v30 = vld [vmem:[#allocation3 + $0xf1] sm:$0xff]  ;;  %v3534_v5 = vld [vmem:[#allocation2 + $0x10a] sm:$0xff]  ;;  %v8702_v16 = vld [vmem:[#allocation3 + $0x129] sm:$0xff] }
 0x375   : > { %v3557_v44 = vpack.c.bf16 %v3535_v8, %v3534_v5  ;;  %v8713_v8 = vld [vmem:[#allocation3 + $0x1b1] sm:$0xff] }
 0x377   : > { %14719 = vmatmul.mubr.msk.bf16.vlgmr.msra.gmra.mrb[0].mxu0 %vm452_vm1, %v17724_v56 }
 0x378   : > { %14722 = vmatprep.mubr.msk.bf16.mxu0 %vm452_vm1, %v17728_v33  ;;  %14751 = vmatpush3.bf16.msra.mxu0 %v8782_v28  ;;  %v8688_v28 = vld [vmem:[#allocation3 + $0x81] sm:$0xff] }
 0x379   : > { %14145 = vmatmul.mubr.msk.bf16.gmra.mrb[36].mxu1 %vm452_vm1, %v17521_v27  ;;  %16141 = vmatprep.subr.msk.bf16.mxu0 %vm501_vm0, %v17733_v13  ;;  %v8400_v27 = vld [vmem:[#allocation3 + $0xc8] sm:$0xff] }
 0x37a   : > { %14148 = vmatprep.mubr.msk.bf16.mxu1 %vm452_vm1, %v17530_v51  ;;  %v8402_v51 = vld [vmem:[#allocation3 + $0xe0] sm:$0xff]  ;;  %v17757_v62 = vpack.c.bf16 %v8400_v27, %v8399_v22  ;;  %v9076_v22 = vsel %vm501_vm0, %v17733_v13, 0 }
 0x37b   : > { %v17759_v41 = vpack.c.bf16 %v8402_v51, %v8401_v57  ;;  %v3524_v27 = vld [vmem:[#allocation2 + $0x92] sm:$0xff]  ;;  %v3525_v51 = vld [vmem:[#allocation2 + $0x9a] sm:$0xff]  ;;  %v17829_v57 = vpack.c.bf16 %v8688_v28, %v8687_v36  ;;  %v8690_v13 = vld [vmem:[#allocation3 + $0x99] sm:$0xff] }
 0x37c   : > { %v3538_v36 = vld [vmem:[#allocation2 + $0x13a] sm:$0xff] }
 0x37f   : > { %14723 = vmatmul.mubr.msk.bf16.gmra.mrb[4].mxu0 %vm452_vm1, %v17745_v1 }
 0x380   : > { %14726 = vmatprep.mubr.msk.bf16.mxu0 %vm452_vm1, %v17747_v25 }
 0x381   : > { %14149 = vmatmul.mubr.msk.bf16.gmra.mrb[40].mxu1 %vm452_vm1, %v17533_v26  ;;  %v8404_v26 = vld [vmem:[#allocation3 + $0xf8] sm:$0xff] }
 0x382   : > { %14152 = vmatprep.mubr.msk.bf16.mxu1 %vm452_vm1, %v17540_v40  ;;  %v8406_v40 = vld [vmem:[#allocation3 + $0x110] sm:$0xff]  ;;  %v17769_v32 = vpack.c.bf16 %v8404_v26, %v8403_v2  ;;  %v3552_v2 = vpack.c.bf16 %v3525_v51, %v3524_v27 }
 0x383   : > { %v17771_v43 = vpack.c.bf16 %v8406_v40, %v8405_v55  ;;  %v17834_v26 = vld [vmem:[%s19828_s5 + $0x24] sm:$0x3]  ;;  %v3551_v40 = vpack.c.bf16 %v3523_v45, %v3522_v54  ;;  %v8704_v54 = vld [vmem:[#allocation3 + $0x141] sm:$0xff] }
 0x384   : > { %v8692_v55 = vld [vmem:[#allocation3 + $0xb1] sm:$0xff]  ;;  %v8701_v45 = vld [vmem:[#allocation3 + $0x121] sm:$0xff] }
 0x385   : > { %v3539_v27 = vld [vmem:[#allocation2 + $0x142] sm:$0xff]  ;;  %v17874_v51 = vpack.c.bf16 %v8702_v16, %v8701_v45 }
 0x387   : > { %14727 = vmatmul.mubr.msk.bf16.gmra.mrb[8].mxu0 %vm452_vm1, %v17757_v62 }
 0x388   : > { %14730 = vmatprep.mubr.msk.bf16.mxu0 %vm452_vm1, %v17759_v41 }
 0x389   : > { %14153 = vmatmul.mubr.msk.bf16.gmra.mrb[44].mxu1 %vm452_vm1, %v17543_v18  ;;  %v8408_v18 = vld [vmem:[#allocation3 + $0x128] sm:$0xff] }
 0x38a   : > { %14156 = vmatprep.mubr.msk.bf16.mxu1 %vm452_vm1, %v17550_v38  ;;  %v8410_v38 = vld [vmem:[#allocation3 + $0x140] sm:$0xff]  ;;  %v17781_v59 = vpack.c.bf16 %v8408_v18, %v8407_v21  ;;  %v8689_v18 = vld [vmem:[#allocation3 + $0x91] sm:$0xff] }
 0x38b   : > { %v17783_v4 = vpack.c.bf16 %v8410_v38, %v8409_v31  ;;  %v3526_v38 = vld [vmem:[#allocation2 + $0xaa] sm:$0xff]  ;;  %v3527_v21 = vld [vmem:[#allocation2 + $0xb2] sm:$0xff]  ;;  %v17844_v31 = vpack.c.bf16 %v8690_v13, %v8689_v18 }
 0x38f   : > { %14731 = vmatmul.mubr.msk.bf16.gmra.mrb[12].mxu0 %vm452_vm1, %v17769_v32 }
 0x390   : > { %14734 = vmatprep.mubr.msk.bf16.mxu0 %vm452_vm1, %v17771_v43 }
 0x391   : > { %14157 = vmatmul.mubr.msk.bf16.gmra.mrb[48].mxu1 %vm452_vm1, %v17553_v61  ;;  %v8412_v61 = vld [vmem:[#allocation3 + $0x158] sm:$0xff] }
 0x392   : > { %14160 = vmatprep.mubr.msk.bf16.mxu1 %vm452_vm1, %v17560_v29  ;;  %v8414_v29 = vld [vmem:[#allocation3 + $0x170] sm:$0xff]  ;;  %v17793_v63 = vpack.c.bf16 %v8412_v61, %v8411_v11  ;;  %v3529_v11 = vld [vmem:[#allocation2 + $0xca] sm:$0xff] }
 0x393   : > { %v17795_v7 = vpack.c.bf16 %v8414_v29, %v8413_v37  ;;  %v8691_v61 = vld [vmem:[#allocation3 + $0xa9] sm:$0xff]  ;;  %v3528_v29 = vld [vmem:[#allocation2 + $0xc2] sm:$0xff] }
 0x394   : > { %v17846_v37 = vpack.c.bf16 %v8692_v55, %v8691_v61  ;;  %v3559_v55 = vpack.c.bf16 %v3539_v27, %v3538_v36  ;;  %v8705_v61 = vld [vmem:[#allocation3 + $0x151] sm:$0xff]  ;;  %v4402_v36 = vsel %vm501_vm0, %v17819_v58, 0 }
 0x395   : > { %v4095_v27 = vld [vmem:[#allocation3 + $0x31] sm:$0xff] }
 0x397   : > { %14735 = vmatmul.mubr.msk.bf16.gmra.mrb[16].mxu0 %vm452_vm1, %v17781_v59 }
 0x398   : > { %14738 = vmatprep.mubr.msk.bf16.mxu0 %vm452_vm1, %v17783_v4 }
 0x399   : > { %14161 = vmatmul.mubr.msk.bf16.gmra.mrb[52].mxu1 %vm452_vm1, %v17563_v12  ;;  %v8416_v12 = vld [vmem:[#allocation3 + $0x188] sm:$0xff] }
 0x39a   : > { %14164 = vmatprep.mubr.msk.bf16.mxu1 %vm452_vm1, %v17570_v46  ;;  %v3252_v46 = vld [vmem:[#allocation2 + $0x199] sm:$0xff]  ;;  %v8434_v47 = vpack.c.bf16 %v8416_v12, %v8415_v23  ;;  %v3553_v12 = vpack.c.bf16 %v3527_v21, %v3526_v38  ;;  %v8693_v23 = vld [vmem:[#allocation3 + $0xc1] sm:$0xff]  ;;  %v8706_v38 = vld [vmem:[#allocation3 + $0x159] sm:$0xff] }
 0x39b   : > { %v3269_v6 = vpack.c.bf16 %v3253_v0, %v3252_v46  ;;  %v3554_v46 = vpack.c.bf16 %v3529_v11, %v3528_v29  ;;  %v8694_v0 = vld [vmem:[#allocation3 + $0xc9] sm:$0xff]  ;;  %v8708_v21 = vld [vmem:[#allocation3 + $0x171] sm:$0xff]  ;;  %v3542_v29 = vld [vmem:[#allocation2 + $0x16a] sm:$0xff] }
 0x39c   : > { %v3543_v11 = vld [vmem:[#allocation2 + $0x172] sm:$0xff] }
 0x39f   : > { %14739 = vmatmul.mubr.msk.bf16.gmra.mrb[20].mxu0 %vm452_vm1, %v17793_v63 }
 0x3a0   : > { %14742 = vmatprep.mubr.msk.bf16.mxu0 %vm452_vm1, %v17795_v7 }
 0x3a1   : > { %14165 = vmatmul.mubr.msk.bf16.gmra.mrb[56].mxu1 %vm452_vm1, %v17573_v49  ;;  %v8419_v49 = vld [vmem:[#allocation3 + $0x1b0] sm:$0xff] }
 0x3a2   : > { %14168 = vmatprep.mubr.msk.bf16.mxu1 %vm452_vm1, %v17580_v24  ;;  %v8436_v24 = vpack.c.bf16 %v8420_v50, %v8419_v49 }
 0x3a7   : > { %14743 = vmatmul.mubr.msk.bf16.gmra.mrb[24].mxu0 %vm452_vm1, %v8434_v47  ;;  %v3530_v47 = vld [vmem:[#allocation2 + $0xda] sm:$0xff] }
 0x3a8   : > { %14746 = vmatprep.mubr.msk.bf16.mxu0 %vm452_vm1, %v8435_v60  ;;  %v3533_v60 = vld [vmem:[#allocation2 + $0xfa] sm:$0xff]  ;;  %v3555_v49 = vpack.c.bf16 %v3531_v35, %v3530_v47  ;;  %v3547_v35 = vld [vmem:[#allocation2 + $0x1a2] sm:$0xff] }
 0x3a9   : > { %14169 = vmatmul.mubr.msk.bf16.gmra.mrb[60].mxu1 %vm452_vm1, %v3269_v6  ;;  %v17854_v6 = vpack.c.bf16 %v8694_v0, %v8693_v23  ;;  %v3556_v50 = vpack.c.bf16 %v3533_v60, %v3532_v17  ;;  %v8710_v23 = vld [vmem:[#allocation3 + $0x189] sm:$0xff]  ;;  %v4091_v17 = vld [vmem:[#allocation3 + $0x1] sm:$0xff] }
 0x3aa   : > { %14174 = vmatprep.mubr.msk.bf16.mxu1 %vm452_vm1, %v3548_v3  ;;  %v17856_v3 = vpack.c.bf16 %v8696_v20, %v8695_v42  ;;  %v3561_v20 = vpack.c.bf16 %v3543_v11, %v3542_v29  ;;  %v3546_v47 = vld [vmem:[#allocation2 + $0x19a] sm:$0xff]  ;;  %v8712_v42 = vld [vmem:[#allocation3 + $0x1a1] sm:$0xff]  ;;  %v17924_v29 = vld [vmem:[%s19828_s5 + $0x26] sm:$0x3] }
 0x3ab   : > { %v4092_v60 = vld [vmem:[#allocation3 + $0x9] sm:$0xff]  ;;  %v8986_v11 = vld [vmem:[#allocation3 + $0xb2] sm:$0xff] }
 0x3ac   : > { %v4123_v5 = vpack.c.bf16 %v4092_v60, %v4091_v17  ;;  %v8989_v17 = vld [vmem:[#allocation3 + $0xda] sm:$0xff] }
 0x3af   : > { %14747 = vmatmul.mubr.msk.bf16.gmra.mrb[28].mxu0 %vm452_vm1, %v8436_v24  ;;  %v8698_v24 = vld [vmem:[#allocation3 + $0xf9] sm:$0xff] }
 0x3b0   : > { %14752 = vmatprep.mubr.msk.bf16.mxu0 %vm452_vm1, %v17809_v10  ;;  %v17864_v39 = vpack.c.bf16 %v8698_v24, %v8697_v30  ;;  %v8711_v24 = vld [vmem:[#allocation3 + $0x199] sm:$0xff] }
 0x3b1   : > { %14175 = vmatmul.mubr.msk.bf16.vlgmr.msra.gmra.mrb[32].mxu1 %vm452_vm1, %v3549_v14  ;;  %v3536_v14 = vld [vmem:[#allocation2 + $0x122] sm:$0xff]  ;;  %v8729_v30 = vpack.c.bf16 %v8712_v42, %v8711_v24  ;;  %v8993_v24 = vld [vmem:[#allocation3 + $0x10a] sm:$0xff] }
 0x3b2   : > { %14207 = vmatpush3.bf16.msra.mxu1 %v4190_v9  ;;  %14178 = vmatprep.mubr.msk.bf16.mxu1 %vm452_vm1, %v3550_v19  ;;  %v3537_v9 = vld [vmem:[#allocation2 + $0x12a] sm:$0xff]  ;;  %v17866_v19 = vpack.c.bf16 %v8700_v15, %v8699_v52  ;;  %v3563_v15 = vpack.c.bf16 %v3547_v35, %v3546_v47  ;;  %v8987_v35 = vld [vmem:[#allocation3 + $0xc2] sm:$0xff] }
 0x3b3   : > { %16125 = vmatprep.subr.msk.bf16.mxu1 %vm501_vm0, %v17819_v58  ;;  %v3558_v28 = vpack.c.bf16 %v3537_v9, %v3536_v14  ;;  %v8714_v52 = vld [vmem:[#allocation3 + $0x1b9] sm:$0xff]  ;;  %v4094_v14 = vld [vmem:[#allocation3 + $0x21] sm:$0xff] }
 0x3b4   : > { %v8730_v9 = vpack.c.bf16 %v8714_v52, %v8713_v8  ;;  %v8979_v58 = vld [vmem:[#allocation3 + $0x62] sm:$0xff]  ;;  %v8997_v8 = vld [vmem:[#allocation3 + $0x13a] sm:$0xff] }
 0x3b7   : > { %14753 = vmatmul.mubr.msk.bf16.vlgmr.msra.gmra.mrb[0].mxu0 %vm452_vm1, %v17825_v34 }
 0x3b8   : > { %14756 = vmatprep.mubr.msk.bf16.mxu0 %vm452_vm1, %v17829_v57  ;;  %14785 = vmatpush3.bf16.msra.mxu0 %v9076_v22  ;;  %v8703_v22 = vld [vmem:[#allocation3 + $0x139] sm:$0xff] }
 0x3b9   : > { %14179 = vmatmul.mubr.msk.bf16.gmra.mrb[36].mxu1 %vm452_vm1, %v3551_v40  ;;  %16142 = vmatprep.subr.msk.bf16.mxu0 %vm501_vm0, %v17834_v26  ;;  %v3540_v40 = vld [vmem:[#allocation2 + $0x152] sm:$0xff]  ;;  %v17876_v13 = vpack.c.bf16 %v8704_v54, %v8703_v22  ;;  %v4096_v54 = vld [vmem:[#allocation3 + $0x39] sm:$0xff] }
 0x3ba   : > { %14182 = vmatprep.mubr.msk.bf16.mxu1 %vm452_vm1, %v3552_v2  ;;  %v3541_v2 = vld [vmem:[#allocation2 + $0x15a] sm:$0xff]  ;;  %v4125_v22 = vpack.c.bf16 %v4096_v54, %v4095_v27  ;;  %v9003_v54 = vld [vmem:[#allocation3 + $0x182] sm:$0xff]  ;;  %v9005_v27 = vld [vmem:[#allocation3 + $0x19a] sm:$0xff] }
 0x3bb   : > { %v3560_v18 = vpack.c.bf16 %v3541_v2, %v3540_v40  ;;  %v17909_v40 = vld [vmem:[%s19828_s5 + $0x4] sm:$0x3]  ;;  %v8980_v2 = vld [vmem:[#allocation3 + $0x6a] sm:$0xff] }
 0x3bf   : > { %14757 = vmatmul.mubr.msk.bf16.gmra.mrb[4].mxu0 %vm452_vm1, %v17844_v31 }
 0x3c0   : > { %14760 = vmatprep.mubr.msk.bf16.mxu0 %vm452_vm1, %v17846_v37 }
 0x3c1   : > { %14183 = vmatmul.mubr.msk.bf16.gmra.mrb[40].mxu1 %vm452_vm1, %v3553_v12  ;;  %v17884_v12 = vpack.c.bf16 %v8706_v38, %v8705_v61  ;;  %v8981_v38 = vld [vmem:[#allocation3 + $0x7a] sm:$0xff] }
 0x3c2   : > { %14186 = vmatprep.mubr.msk.bf16.mxu1 %vm452_vm1, %v3554_v46  ;;  %v8707_v46 = vld [vmem:[#allocation3 + $0x169] sm:$0xff] }
 0x3c3   : > { %v17886_v0 = vpack.c.bf16 %v8708_v21, %v8707_v46  ;;  %v9370_v21 = vsel %vm501_vm0, %v17834_v26, 0  ;;  %v8984_v26 = vld [vmem:[#allocation3 + $0x9a] sm:$0xff]  ;;  %v8983_v46 = vld [vmem:[#allocation3 + $0x92] sm:$0xff] }
 0x3c7   : > { %14761 = vmatmul.mubr.msk.bf16.gmra.mrb[8].mxu0 %vm452_vm1, %v17854_v6 }
 0x3c8   : > { %14764 = vmatprep.mubr.msk.bf16.mxu0 %vm452_vm1, %v17856_v3 }
 0x3c9   : > { %14187 = vmatmul.mubr.msk.bf16.gmra.mrb[44].mxu1 %vm452_vm1, %v3555_v49  ;;  %v8709_v49 = vld [vmem:[#allocation3 + $0x181] sm:$0xff] }
 0x3ca   : > { %14190 = vmatprep.mubr.msk.bf16.mxu1 %vm452_vm1, %v3556_v50  ;;  %v8728_v50 = vpack.c.bf16 %v8710_v23, %v8709_v49  ;;  %v8985_v23 = vld [vmem:[#allocation3 + $0xaa] sm:$0xff]  ;;  %v8991_v49 = vld [vmem:[#allocation3 + $0xf2] sm:$0xff] }
 0x3cb   : > { %v17938_v47 = vpack.c.bf16 %v8986_v11, %v8985_v23 }
 0x3cf   : > { %14765 = vmatmul.mubr.msk.bf16.gmra.mrb[12].mxu0 %vm452_vm1, %v17864_v39 }
 0x3d0   : > { %14768 = vmatprep.mubr.msk.bf16.mxu0 %vm452_vm1, %v17866_v19 }
 0x3d1   : > { %14191 = vmatmul.mubr.msk.bf16.gmra.mrb[48].mxu1 %vm452_vm1, %v3557_v44  ;;  %v8978_v44 = vld [vmem:[#allocation3 + $0x52] sm:$0xff] }
 0x3d2   : > { %14194 = vmatprep.mubr.msk.bf16.mxu1 %vm452_vm1, %v3558_v28  ;;  %v8977_v28 = vld [vmem:[#allocation3 + $0x4a] sm:$0xff] }
 0x3d3   : > { %v17899_v45 = vpack.c.bf16 %v8978_v44, %v8977_v28  ;;  %v4042_v28 = vld [vmem:[#allocation3] sm:$0xff] }
 0x3d7   : > { %14769 = vmatmul.mubr.msk.bf16.gmra.mrb[16].mxu0 %vm452_vm1, %v17874_v51 }
 0x3d8   : > { %14772 = vmatprep.mubr.msk.bf16.mxu0 %vm452_vm1, %v17876_v13 }
 0x3d9   : > { %14195 = vmatmul.mubr.msk.bf16.gmra.mrb[52].mxu1 %vm452_vm1, %v3559_v55  ;;  %v8982_v55 = vld [vmem:[#allocation3 + $0x82] sm:$0xff] }
 0x3da   : > { %14198 = vmatprep.mubr.msk.bf16.mxu1 %vm452_vm1, %v3560_v18  ;;  %v17915_v18 = vpack.c.bf16 %v8980_v2, %v8979_v58  ;;  %v17919_v61 = vpack.c.bf16 %v8982_v55, %v8981_v38  ;;  %v9007_v55 = vld [vmem:[#allocation3 + $0x1b2] sm:$0xff]  ;;  %v9008_v58 = vld [vmem:[#allocation3 + $0x1ba] sm:$0xff] }
 0x3db   : > { %v9024_v38 = vpack.c.bf16 %v9008_v58, %v9007_v55 }
 0x3df   : > { %14773 = vmatmul.mubr.msk.bf16.gmra.mrb[20].mxu0 %vm452_vm1, %v17884_v12 }
 0x3e0   : > { %14776 = vmatprep.mubr.msk.bf16.mxu0 %vm452_vm1, %v17886_v0 }
 0x3e1   : > { %14199 = vmatmul.mubr.msk.bf16.gmra.mrb[56].mxu1 %vm452_vm1, %v3561_v20  ;;  %v17936_v20 = vpack.c.bf16 %v8984_v26, %v8983_v46  ;;  %v9272_v26 = vld [vmem:[#allocation3 + $0x53] sm:$0xff] }
 0x3e2   : > { %14202 = vmatprep.mubr.msk.bf16.mxu1 %vm452_vm1, %v17648_v53  ;;  %v4093_v53 = vld [vmem:[#allocation3 + $0x19] sm:$0xff] }
 0x3e3   : > { %v4124_v16 = vpack.c.bf16 %v4094_v14, %v4093_v53  ;;  %v8999_v53 = vld [vmem:[#allocation3 + $0x152] sm:$0xff] }
 0x3e4   : > { %v4047_v46 = vld [vmem:[#allocation3 + $0x38] sm:$0xff] }
 0x3e7   : > { %14777 = vmatmul.mubr.msk.bf16.gmra.mrb[24].mxu0 %vm452_vm1, %v8728_v50 }
 0x3e8   : > { %14780 = vmatprep.mubr.msk.bf16.mxu0 %vm452_vm1, %v8729_v30  ;;  %v8995_v30 = vld [vmem:[#allocation3 + $0x122] sm:$0xff] }
 0x3e9   : > { %14203 = vmatmul.mubr.msk.bf16.gmra.mrb[60].mxu1 %vm452_vm1, %v3563_v15 }
 0x3ea   : > { %14208 = vmatprep.mubr.msk.bf16.mxu1 %vm452_vm1, %v4123_v5 }
 0x3ef   : > { %14781 = vmatmul.mubr.msk.bf16.gmra.mrb[28].mxu0 %vm452_vm1, %v8730_v9  ;;  %v9001_v9 = vld [vmem:[#allocation3 + $0x16a] sm:$0xff] }
 0x3f0   : > { %14786 = vmatprep.mubr.msk.bf16.mxu0 %vm452_vm1, %v17899_v45 }
 0x3f1   : > { %14209 = vmatmul.mubr.msk.bf16.vlgmr.msra.gmra.mrb[64].mxu1 %vm452_vm1, %v4124_v16  ;;  %v4043_v16 = vld [vmem:[#allocation3 + $0x8] sm:$0xff] }
 0x3f2   : > { %14241 = vmatpush3.bf16.msra.mxu1 %v4402_v36  ;;  %14212 = vmatprep.mubr.msk.bf16.mxu1 %vm452_vm1, %v4125_v22  ;;  %v4074_v2 = vpack.c.bf16 %v4043_v16, %v4042_v28  ;;  %v9287_v16 = vld [vmem:[#allocation3 + $0x10b] sm:$0xff] }
 0x3f3   : > { %16126 = vmatprep.subr.msk.bf16.mxu1 %vm501_vm0, %v17909_v40 }
 0x3f7   : > { %14787 = vmatmul.mubr.msk.bf16.vlgmr.msra.gmra.mrb[0].mxu0 %vm452_vm1, %v17915_v18 }
 0x3f8   : > { %14790 = vmatprep.mubr.msk.bf16.mxu0 %vm452_vm1, %v17919_v61  ;;  %14819 = vmatpush3.bf16.msra.mxu0 %v9370_v21  ;;  %v9271_v21 = vld [vmem:[#allocation3 + $0x4b] sm:$0xff] }
 0x3f9   : > { %14213 = vmatmul.mubr.msk.bf16.gmra.mrb[68].mxu1 %vm452_vm1, %v17809_v10  ;;  %16143 = vmatprep.subr.msk.bf16.mxu0 %vm501_vm0, %v17924_v29  ;;  %v8988_v10 = vld [vmem:[#allocation3 + $0xca] sm:$0xff]  ;;  %v18001_v23 = vpack.c.bf16 %v9272_v26, %v9271_v21  ;;  %v9299_v26 = vld [vmem:[#allocation3 + $0x19b] sm:$0xff] }
 0x3fa   : > { %14216 = vmatprep.mubr.msk.bf16.mxu1 %vm452_vm1, %v17825_v34  ;;  %v8990_v34 = vld [vmem:[#allocation3 + $0xe2] sm:$0xff]  ;;  %v17948_v42 = vpack.c.bf16 %v8988_v10, %v8987_v35  ;;  %v4664_v10 = vsel %vm501_vm0, %v17909_v40, 0  ;;  %v18011_v35 = vld [vmem:[%s19828_s5 + $0x6] sm:$0x3] }
 0x3fb   : > { %v17950_v60 = vpack.c.bf16 %v8990_v34, %v8989_v17  ;;  %v4046_v34 = vld [vmem:[#allocation3 + $0x30] sm:$0xff]  ;;  %v9273_v17 = vld [vmem:[#allocation3 + $0x63] sm:$0xff] }
 0x3ff   : > { %14791 = vmatmul.mubr.msk.bf16.gmra.mrb[4].mxu0 %vm452_vm1, %v17936_v20 }
 0x400   : > { %14794 = vmatprep.mubr.msk.bf16.mxu0 %vm452_vm1, %v17938_v47 }
 0x401   : > { %14217 = vmatmul.mubr.msk.bf16.gmra.mrb[72].mxu1 %vm452_vm1, %v17829_v57  ;;  %v8992_v57 = vld [vmem:[#allocation3 + $0xfa] sm:$0xff] }
 0x402   : > { %14220 = vmatprep.mubr.msk.bf16.mxu1 %vm452_vm1, %v17844_v31  ;;  %v8994_v31 = vld [vmem:[#allocation3 + $0x112] sm:$0xff]  ;;  %v17960_v50 = vpack.c.bf16 %v8992_v57, %v8991_v49  ;;  %v9276_v49 = vld [vmem:[#allocation3 + $0x83] sm:$0xff] }
 0x403   : > { %v17962_v15 = vpack.c.bf16 %v8994_v31, %v8993_v24  ;;  %v9274_v57 = vld [vmem:[#allocation3 + $0x6b] sm:$0xff]  ;;  %v9275_v31 = vld [vmem:[#allocation3 + $0x7b] sm:$0xff]  ;;  %v9664_v24 = vsel %vm501_vm0, %v17924_v29, 0  ;;  %v9277_v29 = vld [vmem:[#allocation3 + $0x93] sm:$0xff] }
 0x404   : > { %v18017_v40 = vpack.c.bf16 %v9274_v57, %v9273_v17  ;;  %v9301_v57 = vld [vmem:[#allocation3 + $0x1b3] sm:$0xff] }
 0x407   : > { %14795 = vmatmul.mubr.msk.bf16.gmra.mrb[8].mxu0 %vm452_vm1, %v17948_v42 }
 0x408   : > { %14798 = vmatprep.mubr.msk.bf16.mxu0 %vm452_vm1, %v17950_v60 }
 0x409   : > { %14221 = vmatmul.mubr.msk.bf16.gmra.mrb[76].mxu1 %vm452_vm1, %v17846_v37  ;;  %v8996_v37 = vld [vmem:[#allocation3 + $0x12a] sm:$0xff] }
 0x40a   : > { %14224 = vmatprep.mubr.msk.bf16.mxu1 %vm452_vm1, %v17854_v6  ;;  %v8998_v6 = vld [vmem:[#allocation3 + $0x142] sm:$0xff]  ;;  %v17972_v5 = vpack.c.bf16 %v8996_v37, %v8995_v30  ;;  %v18021_v37 = vpack.c.bf16 %v9276_v49, %v9275_v31 }
 0x40b   : > { %v17974_v52 = vpack.c.bf16 %v8998_v6, %v8997_v8  ;;  %v18026_v6 = vld [vmem:[%s19828_s5 + $0x28] sm:$0x3]  ;;  %v9278_v30 = vld [vmem:[#allocation3 + $0x9b] sm:$0xff]  ;;  %v9279_v8 = vld [vmem:[#allocation3 + $0xab] sm:$0xff] }
 0x40c   : > { %v9302_v31 = vld [vmem:[#allocation3 + $0x1bb] sm:$0xff] }
 0x40d   : > { %v9318_v49 = vpack.c.bf16 %v9302_v31, %v9301_v57 }
 0x40f   : > { %14799 = vmatmul.mubr.msk.bf16.gmra.mrb[12].mxu0 %vm452_vm1, %v17960_v50 }
 0x410   : > { %14802 = vmatprep.mubr.msk.bf16.mxu0 %vm452_vm1, %v17962_v15 }
 0x411   : > { %14225 = vmatmul.mubr.msk.bf16.gmra.mrb[80].mxu1 %vm452_vm1, %v17856_v3  ;;  %v9000_v3 = vld [vmem:[#allocation3 + $0x15a] sm:$0xff] }
 0x412   : > { %14228 = vmatprep.mubr.msk.bf16.mxu1 %vm452_vm1, %v17864_v39  ;;  %v9002_v39 = vld [vmem:[#allocation3 + $0x172] sm:$0xff]  ;;  %v17984_v14 = vpack.c.bf16 %v9000_v3, %v8999_v53 }
 0x413   : > { %v17986_v44 = vpack.c.bf16 %v9002_v39, %v9001_v9  ;;  %v9280_v3 = vld [vmem:[#allocation3 + $0xb3] sm:$0xff]  ;;  %v18038_v39 = vpack.c.bf16 %v9278_v30, %v9277_v29  ;;  %v9283_v9 = vld [vmem:[#allocation3 + $0xdb] sm:$0xff] }
 0x414   : > { %v18040_v53 = vpack.c.bf16 %v9280_v3, %v9279_v8  ;;  %v9566_v29 = vld [vmem:[#allocation3 + $0x54] sm:$0xff] }
 0x415   : > { %v4570_v8 = vld [vmem:[#allocation3 + $0x3a] sm:$0xff] }
 0x417   : > { %14803 = vmatmul.mubr.msk.bf16.gmra.mrb[16].mxu0 %vm452_vm1, %v17972_v5 }
 0x418   : > { %14806 = vmatprep.mubr.msk.bf16.mxu0 %vm452_vm1, %v17974_v52 }
 0x419   : > { %14229 = vmatmul.mubr.msk.bf16.gmra.mrb[84].mxu1 %vm452_vm1, %v17866_v19  ;;  %v9004_v19 = vld [vmem:[#allocation3 + $0x18a] sm:$0xff] }
 0x41a   : > { %14232 = vmatprep.mubr.msk.bf16.mxu1 %vm452_vm1, %v17874_v51  ;;  %v9006_v51 = vld [vmem:[#allocation3 + $0x1a2] sm:$0xff]  ;;  %v9022_v36 = vpack.c.bf16 %v9004_v19, %v9003_v54  ;;  %v9288_v54 = vld [vmem:[#allocation3 + $0x113] sm:$0xff] }
 0x41b   : > { %v9023_v22 = vpack.c.bf16 %v9006_v51, %v9005_v27  ;;  %v9284_v19 = vld [vmem:[#allocation3 + $0xe3] sm:$0xff]  ;;  %v18064_v27 = vpack.c.bf16 %v9288_v54, %v9287_v16  ;;  %v9959_v54 = vsel %vm501_vm0, %v18026_v6, 0 }
 0x41c   : > { %v18052_v28 = vpack.c.bf16 %v9284_v19, %v9283_v9  ;;  %v18113_v9 = vld [vmem:[%s19828_s5 + $0x8] sm:$0x3]  ;;  %v9567_v19 = vld [vmem:[#allocation3 + $0x64] sm:$0xff] }
 0x41d   : > { %v9570_v16 = vld [vmem:[#allocation3 + $0x84] sm:$0xff] }
 0x41f   : > { %14807 = vmatmul.mubr.msk.bf16.gmra.mrb[20].mxu0 %vm452_vm1, %v17984_v14 }
 0x420   : > { %14810 = vmatprep.mubr.msk.bf16.mxu0 %vm452_vm1, %v17986_v44 }
 0x421   : > { %14233 = vmatmul.mubr.msk.bf16.gmra.mrb[88].mxu1 %vm452_vm1, %v17876_v13  ;;  %v4044_v13 = vld [vmem:[#allocation3 + $0x18] sm:$0xff] }
 0x422   : > { %14236 = vmatprep.mubr.msk.bf16.mxu1 %vm452_vm1, %v17884_v12  ;;  %v4045_v12 = vld [vmem:[#allocation3 + $0x20] sm:$0xff] }
 0x423   : > { %v4075_v11 = vpack.c.bf16 %v4045_v12, %v4044_v13  ;;  %v9295_v13 = vld [vmem:[#allocation3 + $0x16b] sm:$0xff]  ;;  %v9296_v12 = vld [vmem:[#allocation3 + $0x173] sm:$0xff] }
 0x424   : > { %v18088_v21 = vpack.c.bf16 %v9296_v12, %v9295_v13  ;;  %v9576_v12 = vld [vmem:[#allocation3 + $0xcc] sm:$0xff] }
 0x427   : > { %14811 = vmatmul.mubr.msk.bf16.gmra.mrb[24].mxu0 %vm452_vm1, %v9022_v36 }
 0x428   : > { %14814 = vmatprep.mubr.msk.bf16.mxu0 %vm452_vm1, %v9023_v22  ;;  %v9291_v22 = vld [vmem:[#allocation3 + $0x13b] sm:$0xff] }
 0x429   : > { %14237 = vmatmul.mubr.msk.bf16.gmra.mrb[92].mxu1 %vm452_vm1, %v17886_v0  ;;  %v4076_v0 = vpack.c.bf16 %v4047_v46, %v4046_v34  ;;  %v4565_v46 = vld [vmem:[#allocation3 + $0x2] sm:$0xff] }
 0x42a   : > { %14242 = vmatprep.mubr.msk.bf16.mxu1 %vm452_vm1, %v4074_v2  ;;  %v9292_v2 = vld [vmem:[#allocation3 + $0x143] sm:$0xff] }
 0x42b   : > { %v18076_v58 = vpack.c.bf16 %v9292_v2, %v9291_v22  ;;  %v9572_v22 = vld [vmem:[#allocation3 + $0x9c] sm:$0xff]  ;;  %v9573_v2 = vld [vmem:[#allocation3 + $0xac] sm:$0xff] }
 0x42f   : > { %14815 = vmatmul.mubr.msk.bf16.gmra.mrb[28].mxu0 %vm452_vm1, %v9024_v38 }
 0x430   : > { %14820 = vmatprep.mubr.msk.bf16.mxu0 %vm452_vm1, %v18001_v23 }
 0x431   : > { %14243 = vmatmul.mubr.msk.bf16.vlgmr.msra.gmra.mrb[64].mxu1 %vm452_vm1, %v4075_v11  ;;  %v9300_v11 = vld [vmem:[#allocation3 + $0x1a3] sm:$0xff] }
 0x432   : > { %14275 = vmatpush3.bf16.msra.mxu1 %v4664_v10  ;;  %14246 = vmatprep.mubr.msk.bf16.mxu1 %vm452_vm1, %v4076_v0  ;;  %v4566_v10 = vld [vmem:[#allocation3 + $0xa] sm:$0xff]  ;;  %v9317_v0 = vpack.c.bf16 %v9300_v11, %v9299_v26 }
 0x433   : > { %16127 = vmatprep.subr.msk.bf16.mxu1 %vm501_vm0, %v18011_v35  ;;  %v4597_v17 = vpack.c.bf16 %v4566_v10, %v4565_v46 }
 0x437   : > { %14821 = vmatmul.mubr.msk.bf16.vlgmr.msra.gmra.mrb[0].mxu0 %vm452_vm1, %v18017_v40 }
 0x438   : > { %14824 = vmatprep.mubr.msk.bf16.mxu0 %vm452_vm1, %v18021_v37  ;;  %14853 = vmatpush3.bf16.msra.mxu0 %v9664_v24  ;;  %v9565_v24 = vld [vmem:[#allocation3 + $0x4c] sm:$0xff] }
 0x439   : > { %14247 = vmatmul.mubr.msk.bf16.gmra.mrb[68].mxu1 %vm452_vm1, %v17706_v48  ;;  %16144 = vmatprep.subr.msk.bf16.mxu0 %vm501_vm0, %v18026_v6  ;;  %v9281_v48 = vld [vmem:[#allocation3 + $0xc3] sm:$0xff]  ;;  %v18103_v3 = vpack.c.bf16 %v9566_v29, %v9565_v24  ;;  %v9571_v6 = vld [vmem:[#allocation3 + $0x94] sm:$0xff]  ;;  %v9581_v29 = vld [vmem:[#allocation3 + $0x10c] sm:$0xff] }
 0x43a   : > { %14250 = vmatprep.mubr.msk.bf16.mxu1 %vm452_vm1, %v17724_v56  ;;  %v9282_v56 = vld [vmem:[#allocation3 + $0xcb] sm:$0xff] }
 0x43b   : > { %v18050_v51 = vpack.c.bf16 %v9282_v56, %v9281_v48  ;;  %v4958_v48 = vsel %vm501_vm0, %v18011_v35, 0  ;;  %v4569_v56 = vld [vmem:[#allocation3 + $0x32] sm:$0xff] }
 0x43f   : > { %14825 = vmatmul.mubr.msk.bf16.gmra.mrb[4].mxu0 %vm452_vm1, %v18038_v39 }
 0x440   : > { %14828 = vmatprep.mubr.msk.bf16.mxu0 %vm452_vm1, %v18040_v53 }
 0x441   : > { %14251 = vmatmul.mubr.msk.bf16.gmra.mrb[72].mxu1 %vm452_vm1, %v17728_v33  ;;  %v9285_v33 = vld [vmem:[#allocation3 + $0xf3] sm:$0xff] }
 0x442   : > { %14254 = vmatprep.mubr.msk.bf16.mxu1 %vm452_vm1, %v17745_v1  ;;  %v9286_v1 = vld [vmem:[#allocation3 + $0xfb] sm:$0xff] }
 0x443   : > { %v18062_v36 = vpack.c.bf16 %v9286_v1, %v9285_v33  ;;  %v9568_v33 = vld [vmem:[#allocation3 + $0x6c] sm:$0xff]  ;;  %v9569_v1 = vld [vmem:[#allocation3 + $0x7c] sm:$0xff] }
 0x444   : > { %v18119_v35 = vpack.c.bf16 %v9568_v33, %v9567_v19 }
 0x447   : > { %14829 = vmatmul.mubr.msk.bf16.gmra.mrb[8].mxu0 %vm452_vm1, %v18050_v51 }
 0x448   : > { %14832 = vmatprep.mubr.msk.bf16.mxu0 %vm452_vm1, %v18052_v28 }
 0x449   : > { %14255 = vmatmul.mubr.msk.bf16.gmra.mrb[76].mxu1 %vm452_vm1, %v17747_v25  ;;  %v9289_v25 = vld [vmem:[#allocation3 + $0x123] sm:$0xff] }
 0x44a   : > { %14258 = vmatprep.mubr.msk.bf16.mxu1 %vm452_vm1, %v17757_v62  ;;  %v9290_v62 = vld [vmem:[#allocation3 + $0x12b] sm:$0xff] }
 0x44b   : > { %v18074_v55 = vpack.c.bf16 %v9290_v62, %v9289_v25  ;;  %v18123_v25 = vpack.c.bf16 %v9570_v16, %v9569_v1  ;;  %v18128_v62 = vld [vmem:[%s19828_s5 + $0x2a] sm:$0x3] }
 0x44f   : > { %14833 = vmatmul.mubr.msk.bf16.gmra.mrb[12].mxu0 %vm452_vm1, %v18062_v36 }
 0x450   : > { %14836 = vmatprep.mubr.msk.bf16.mxu0 %vm452_vm1, %v18064_v27 }
 0x451   : > { %14259 = vmatmul.mubr.msk.bf16.gmra.mrb[80].mxu1 %vm452_vm1, %v17759_v41  ;;  %v9293_v41 = vld [vmem:[#allocation3 + $0x153] sm:$0xff] }
 0x452   : > { %14262 = vmatprep.mubr.msk.bf16.mxu1 %vm452_vm1, %v17769_v32  ;;  %v9294_v32 = vld [vmem:[#allocation3 + $0x15b] sm:$0xff] }
 0x453   : > { %v18086_v38 = vpack.c.bf16 %v9294_v32, %v9293_v41  ;;  %v9574_v41 = vld [vmem:[#allocation3 + $0xb4] sm:$0xff]  ;;  %v18140_v32 = vpack.c.bf16 %v9572_v22, %v9571_v6 }
 0x454   : > { %v18142_v13 = vpack.c.bf16 %v9574_v41, %v9573_v2  ;;  %v9583_v2 = vld [vmem:[#allocation3 + $0x124] sm:$0xff]  ;;  %v9584_v41 = vld [vmem:[#allocation3 + $0x12c] sm:$0xff] }
 0x457   : > { %14837 = vmatmul.mubr.msk.bf16.gmra.mrb[16].mxu0 %vm452_vm1, %v18074_v55 }
 0x458   : > { %14840 = vmatprep.mubr.msk.bf16.mxu0 %vm452_vm1, %v18076_v58 }
 0x459   : > { %14263 = vmatmul.mubr.msk.bf16.gmra.mrb[84].mxu1 %vm452_vm1, %v17771_v43  ;;  %v9297_v43 = vld [vmem:[#allocation3 + $0x183] sm:$0xff] }
 0x45a   : > { %14266 = vmatprep.mubr.msk.bf16.mxu1 %vm452_vm1, %v17781_v59  ;;  %v9298_v59 = vld [vmem:[#allocation3 + $0x18b] sm:$0xff] }
 0x45b   : > { %v9316_v34 = vpack.c.bf16 %v9298_v59, %v9297_v43  ;;  %v9577_v43 = vld [vmem:[#allocation3 + $0xdc] sm:$0xff]  ;;  %v9578_v59 = vld [vmem:[#allocation3 + $0xe4] sm:$0xff] }
 0x45f   : > { %14841 = vmatmul.mubr.msk.bf16.gmra.mrb[20].mxu0 %vm452_vm1, %v18086_v38 }
 0x460   : > { %14844 = vmatprep.mubr.msk.bf16.mxu0 %vm452_vm1, %v18088_v21 }
 0x461   : > { %14267 = vmatmul.mubr.msk.bf16.gmra.mrb[88].mxu1 %vm452_vm1, %v17783_v4  ;;  %v4567_v4 = vld [vmem:[#allocation3 + $0x1a] sm:$0xff] }
 0x462   : > { %14270 = vmatprep.mubr.msk.bf16.mxu1 %vm452_vm1, %v17793_v63  ;;  %v4568_v63 = vld [vmem:[#allocation3 + $0x22] sm:$0xff] }
 0x463   : > { %v4598_v30 = vpack.c.bf16 %v4568_v63, %v4567_v4  ;;  %v9579_v63 = vld [vmem:[#allocation3 + $0xf4] sm:$0xff] }
 0x467   : > { %14845 = vmatmul.mubr.msk.bf16.gmra.mrb[24].mxu0 %vm452_vm1, %v9316_v34 }
 0x468   : > { %14848 = vmatprep.mubr.msk.bf16.mxu0 %vm452_vm1, %v9317_v0 }
 0x469   : > { %14271 = vmatmul.mubr.msk.bf16.gmra.mrb[92].mxu1 %vm452_vm1, %v17795_v7  ;;  %v4599_v7 = vpack.c.bf16 %v4570_v8, %v4569_v56 }
 0x46a   : > { %14276 = vmatprep.mubr.msk.bf16.mxu1 %vm452_vm1, %v4597_v17 }
 0x46f   : > { %14849 = vmatmul.mubr.msk.bf16.gmra.mrb[28].mxu0 %vm452_vm1, %v9318_v49  ;;  %v9580_v49 = vld [vmem:[#allocation3 + $0xfc] sm:$0xff] }
 0x470   : > { %14854 = vmatprep.mubr.msk.bf16.mxu0 %vm452_vm1, %v18103_v3 }
 0x471   : > { %14277 = vmatmul.mubr.msk.bf16.vlgmr.msra.gmra.mrb[64].mxu1 %vm452_vm1, %v4598_v30  ;;  %v9582_v30 = vld [vmem:[#allocation3 + $0x114] sm:$0xff] }
 0x472   : > { %14309 = vmatpush3.bf16.msra.mxu1 %v4958_v48  ;;  %14280 = vmatprep.mubr.msk.bf16.mxu1 %vm452_vm1, %v4599_v7  ;;  %v18177_v7 = vpack.c.bf16 %v9580_v49, %v9579_v63  ;;  %v18179_v33 = vpack.c.bf16 %v9582_v30, %v9581_v29  ;;  %v9587_v63 = vld [vmem:[#allocation3 + $0x154] sm:$0xff]  ;;  %v9588_v49 = vld [vmem:[#allocation3 + $0x15c] sm:$0xff]  ;;  %v9589_v29 = vld [vmem:[#allocation3 + $0x16c] sm:$0xff] }
 0x473   : > { %16128 = vmatprep.subr.msk.bf16.mxu1 %vm501_vm0, %v18113_v9  ;;  %v9590_v30 = vld [vmem:[#allocation3 + $0x174] sm:$0xff] }
 0x477   : > { %14855 = vmatmul.mubr.msk.bf16.vlgmr.msra.gmra.mrb[0].mxu0 %vm452_vm1, %v18119_v35 }
 0x478   : > { %14858 = vmatprep.mubr.msk.bf16.mxu0 %vm452_vm1, %v18123_v25  ;;  %14887 = vmatpush3.bf16.msra.mxu0 %v9959_v54 }
 0x479   : > { %14281 = vmatmul.mubr.msk.bf16.gmra.mrb[68].mxu1 %vm452_vm1, %v17899_v45  ;;  %16145 = vmatprep.subr.msk.bf16.mxu0 %vm501_vm0, %v18128_v62  ;;  %v18155_v45 = vld [vmem:[%s19827_s4] ss:$0 sm:$0xff] }
 0x47a   : > { %14284 = vmatprep.mubr.msk.bf16.mxu1 %vm452_vm1, %v17915_v18  ;;  %v9575_v18 = vld [vmem:[#allocation3 + $0xc4] sm:$0xff] }
 0x47b   : > { %v18158_v10 = vpack.c.bf16 %v9576_v12, %v9575_v18  ;;  %v9585_v12 = vld [vmem:[#allocation3 + $0x13c] sm:$0xff] }
 0x47f   : > { %14859 = vmatmul.mubr.msk.bf16.gmra.mrb[4].mxu0 %vm452_vm1, %v18140_v32 }
 0x480   : > { %14862 = vmatprep.mubr.msk.bf16.mxu0 %vm452_vm1, %v18142_v13 }
 0x481   : > { %14285 = vmatmul.mubr.msk.bf16.gmra.mrb[72].mxu1 %vm452_vm1, %v17919_v61  ;;  %v18160_v61 = vpack.c.bf16 %v9578_v59, %v9577_v43  ;;  %v9586_v43 = vld [vmem:[#allocation3 + $0x144] sm:$0xff] }
 0x482   : > { %14288 = vmatprep.mubr.msk.bf16.mxu1 %vm452_vm1, %v17936_v20 }
 0x484   : > { %v14176_v26 = vpop.f32.mrb[32].mxu1 }
 0x485   : > { %v3819_v11 = vadd.f32 %v14176_v26, %v18155_v45  ;;  %v3651_v46 = vpop.f32.mrb[33].mxu1 }
 0x486   : > { %v14177_v34 = vpop.f32.mrb[34].mxu1  ;;  %v3817_v20 = vadd.f32 %v18155_v45, %v3651_v46 }
 0x487   : > { %v3851_v0 = vmax.f32 %v3819_v11, 0.0  ;;  %v3820_v17 = vadd.f32 %v14177_v34, %v18155_v45  ;;  %v3654_v57 = vpop.f32.mrb[35].mxu1  ;;  %14863 = vmatmul.mubr.msk.bf16.gmra.mrb[8].mxu0 %vm452_vm1, %v18158_v10 }
 0x488   : > { %14866 = vmatprep.mubr.msk.bf16.mxu0 %vm452_vm1, %v18160_v61  ;;  %v3818_v4 = vadd.f32 %v18155_v45, %v3654_v57  ;;  %v3849_v24 = vmax.f32 %v3817_v20, 0.0 }
 0x489   : > { %v3852_v31 = vmax.f32 %v3820_v17, 0.0  ;;  %14289 = vmatmul.mubr.msk.bf16.gmra.mrb[76].mxu1 %vm452_vm1, %v17938_v47  ;;  %3917 = vrot.lane.b32.xlu0 %v3851_v0, %s16296_s22  ;;  %v18199_v0 = vpack.c.bf16 %v9586_v43, %v9585_v12  ;;  %v9594_v43 = vld [vmem:[#allocation3 + $0x1a4] sm:$0xff] }
 0x48a   : > { %14292 = vmatprep.mubr.msk.bf16.mxu1 %vm452_vm1, %v17948_v42  ;;  %v3850_v48 = vmax.f32 %v3818_v4, 0.0 }
 0x48b   : > { %3919 = vrot.lane.b32.xlu1 %v3852_v31, %s16296_s22 }
 0x48c   : > { %v14180_v8 = vpop.f32.mrb[36].mxu1 }
 0x48d   : > { %v3823_v56 = vadd.f32 %v14180_v8, %v18155_v45  ;;  %3913 = vrot.lane.b32.xlu0 %v3849_v24, %s16296_s22  ;;  %v3667_v47 = vpop.f32.mrb[37].mxu1 }
 0x48e   : > { %v14181_v19 = vpop.f32.mrb[38].mxu1  ;;  %v3821_v1 = vadd.f32 %v18155_v45, %v3667_v47 }
 0x48f   : > { %v3855_v42 = vmax.f32 %v3823_v56, 0.0  ;;  %v3824_v16 = vadd.f32 %v14181_v19, %v18155_v45  ;;  %14867 = vmatmul.mubr.msk.bf16.gmra.mrb[12].mxu0 %vm452_vm1, %v18177_v7  ;;  %3915 = vrot.lane.b32.xlu1 %v3850_v48, %s16296_s22  ;;  %v3670_v54 = vpop.f32.mrb[39].mxu1 }
 0x490   : > { %14870 = vmatprep.mubr.msk.bf16.mxu0 %vm452_vm1, %v18179_v33  ;;  %v3822_v22 = vadd.f32 %v18155_v45, %v3670_v54  ;;  %v3853_v18 = vmax.f32 %v3821_v1, 0.0 }
 0x491   : > { %v3856_v6 = vmax.f32 %v3824_v16, 0.0  ;;  %14293 = vmatmul.mubr.msk.bf16.gmra.mrb[80].mxu1 %vm452_vm1, %v17950_v60  ;;  %3925 = vrot.lane.b32.xlu0 %v3855_v42, %s16296_s22  ;;  %v18197_v60 = vpack.c.bf16 %v9584_v41, %v9583_v2  ;;  %v18219_v42 = vpack.c.bf16 %v9590_v30, %v9589_v29  ;;  %v9591_v2 = vld [vmem:[#allocation3 + $0x184] sm:$0xff]  ;;  %v9592_v41 = vld [vmem:[#allocation3 + $0x18c] sm:$0xff] }
 0x492   : > { %14296 = vmatprep.mubr.msk.bf16.mxu1 %vm452_vm1, %v17960_v50  ;;  %v3854_v26 = vmax.f32 %v3822_v22, 0.0 }
 0x493   : > { %3927 = vrot.lane.b32.xlu1 %v3856_v6, %s16296_s22 }
 0x494   : > { %v14184_v59 = vpop.f32.mrb[40].mxu1 }
 0x495   : > { %v3827_v11 = vadd.f32 %v14184_v59, %v18155_v45  ;;  %3921 = vrot.lane.b32.xlu0 %v3853_v18, %s16296_s22  ;;  %v3683_v46 = vpop.f32.mrb[41].mxu1  ;;  %v9593_v18 = vld [vmem:[#allocation3 + $0x19c] sm:$0xff] }
 0x496   : > { %v14185_v34 = vpop.f32.mrb[42].mxu1  ;;  %v3825_v20 = vadd.f32 %v18155_v45, %v3683_v46  ;;  %v4859_v59 = vld [vmem:[#allocation3 + $0x3] sm:$0xff] }
 0x497   : > { %v3859_v50 = vmax.f32 %v3827_v11, 0.0  ;;  %v3828_v17 = vadd.f32 %v14185_v34, %v18155_v45  ;;  %14871 = vmatmul.mubr.msk.bf16.gmra.mrb[16].mxu0 %vm452_vm1, %v18197_v60  ;;  %3923 = vrot.lane.b32.xlu1 %v3854_v26, %s16296_s22  ;;  %v3686_v57 = vpop.f32.mrb[43].mxu1  ;;  %v4860_v26 = vld [vmem:[#allocation3 + $0xb] sm:$0xff] }
 0x498   : > { %14874 = vmatprep.mubr.msk.bf16.mxu0 %vm452_vm1, %v18199_v0  ;;  %v3826_v4 = vadd.f32 %v18155_v45, %v3686_v57  ;;  %v3857_v24 = vmax.f32 %v3825_v20, 0.0 }
 0x499   : > { %v3860_v31 = vmax.f32 %v3828_v17, 0.0  ;;  %14297 = vmatmul.mubr.msk.bf16.gmra.mrb[84].mxu1 %vm452_vm1, %v17962_v15  ;;  %3933 = vrot.lane.b32.xlu0 %v3859_v50, %s16296_s22  ;;  %v18217_v15 = vpack.c.bf16 %v9588_v49, %v9587_v63  ;;  %v9610_v50 = vpack.c.bf16 %v9592_v41, %v9591_v2  ;;  %v9611_v17 = vpack.c.bf16 %v9594_v43, %v9593_v18  ;;  %v9595_v49 = vld [vmem:[#allocation3 + $0x1b4] sm:$0xff] }
 0x49a   : > { %14300 = vmatprep.mubr.msk.bf16.mxu1 %vm452_vm1, %v17972_v5  ;;  %v3858_v48 = vmax.f32 %v3826_v4, 0.0  ;;  %v4864_v2 = vld [vmem:[#allocation3 + $0x3b] sm:$0xff] }
 0x49b   : > { %3935 = vrot.lane.b32.xlu1 %v3860_v31, %s16296_s22 }
 0x49c   : > { %v14188_v8 = vpop.f32.mrb[44].mxu1 }
 0x49d   : > { %v3831_v56 = vadd.f32 %v14188_v8, %v18155_v45  ;;  %3929 = vrot.lane.b32.xlu0 %v3857_v24, %s16296_s22  ;;  %v3699_v47 = vpop.f32.mrb[45].mxu1  ;;  %v9596_v24 = vld [vmem:[#allocation3 + $0x1bc] sm:$0xff] }
 0x49e   : > { %v14189_v19 = vpop.f32.mrb[46].mxu1  ;;  %v3829_v1 = vadd.f32 %v18155_v45, %v3699_v47  ;;  %v4861_v8 = vld [vmem:[#allocation3 + $0x1b] sm:$0xff]  ;;  %v9612_v47 = vpack.c.bf16 %v9596_v24, %v9595_v49  ;;  %v9864_v24 = vld [vmem:[#allocation3 + $0x90] sm:$0xff] }
 0x49f   : > { %v3863_v5 = vmax.f32 %v3831_v56, 0.0  ;;  %v3832_v16 = vadd.f32 %v14189_v19, %v18155_v45  ;;  %14875 = vmatmul.mubr.msk.bf16.gmra.mrb[20].mxu0 %vm452_vm1, %v18217_v15  ;;  %3931 = vrot.lane.b32.xlu1 %v3858_v48, %s16296_s22  ;;  %v3702_v54 = vpop.f32.mrb[47].mxu1  ;;  %v4862_v48 = vld [vmem:[#allocation3 + $0x23] sm:$0xff] }
 0x4a0   : > { %14878 = vmatprep.mubr.msk.bf16.mxu0 %vm452_vm1, %v18219_v42  ;;  %v3830_v22 = vadd.f32 %v18155_v45, %v3702_v54  ;;  %v3861_v12 = vmax.f32 %v3829_v1, 0.0  ;;  %v9861_v19 = vld [vmem:[#allocation3 + $0x68] sm:$0xff] }
 0x4a1   : > { %v3864_v6 = vmax.f32 %v3832_v16, 0.0  ;;  %14301 = vmatmul.mubr.msk.bf16.gmra.mrb[88].mxu1 %vm452_vm1, %v17974_v52  ;;  %3941 = vrot.lane.b32.xlu0 %v3863_v5, %s16296_s22 }
 0x4a2   : > { %14304 = vmatprep.mubr.msk.bf16.mxu1 %vm452_vm1, %v17984_v14  ;;  %v3862_v46 = vmax.f32 %v3830_v22, 0.0  ;;  %v4891_v14 = vpack.c.bf16 %v4860_v26, %v4859_v59  ;;  %v4863_v22 = vld [vmem:[#allocation3 + $0x33] sm:$0xff] }
 0x4a3   : > { %3943 = vrot.lane.b32.xlu1 %v3864_v6, %s16296_s22  ;;  %v9860_v6 = vld [vmem:[#allocation3 + $0x60] sm:$0xff] }
 0x4a4   : > { %v14192_v11 = vpop.f32.mrb[48].mxu1  ;;  %v18250_v18 = vpack.c.bf16 %v9861_v19, %v9860_v6  ;;  %v9869_v6 = vld [vmem:[#allocation3 + $0xc8] sm:$0xff] }
 0x4a5   : > { %v3835_v34 = vadd.f32 %v14192_v11, %v18155_v45  ;;  %3937 = vrot.lane.b32.xlu0 %v3861_v12, %s16296_s22  ;;  %v3715_v52 = vpop.f32.mrb[49].mxu1  ;;  %v5252_v11 = vsel %vm501_vm0, %v18113_v9, 0  ;;  %v9863_v9 = vld [vmem:[#allocation3 + $0x80] sm:$0xff] }
 0x4a6   : > { %v14193_v20 = vpop.f32.mrb[50].mxu1  ;;  %v3833_v31 = vadd.f32 %v18155_v45, %v3715_v52 }
 0x4a7   : > { %v3867_v57 = vmax.f32 %v3835_v34, 0.0  ;;  %v3836_v4 = vadd.f32 %v14193_v20, %v18155_v45  ;;  %14879 = vmatmul.mubr.msk.bf16.gmra.mrb[24].mxu0 %vm452_vm1, %v9610_v50  ;;  %3939 = vrot.lane.b32.xlu1 %v3862_v46, %s16296_s22  ;;  %v3718_v63 = vpop.f32.mrb[51].mxu1  ;;  %v4893_v46 = vpack.c.bf16 %v4864_v2, %v4863_v22  ;;  %v18263_v34 = vld [vmem:[%s19828_s5 + $0xa] sm:$0x3]  ;;  %v9866_v22 = vld [vmem:[#allocation3 + $0xa8] sm:$0xff] }
 0x4a8   : > { %14882 = vmatprep.mubr.msk.bf16.mxu0 %vm452_vm1, %v9611_v17  ;;  %v3834_v30 = vadd.f32 %v18155_v45, %v3718_v63  ;;  %v3865_v56 = vmax.f32 %v3833_v31, 0.0  ;;  %v9865_v17 = vld [vmem:[#allocation3 + $0x98] sm:$0xff] }
 0x4a9   : > { %v3868_v29 = vmax.f32 %v3836_v4, 0.0  ;;  %14305 = vmatmul.mubr.msk.bf16.gmra.mrb[92].mxu1 %vm452_vm1, %v17986_v44  ;;  %3949 = vrot.lane.b32.xlu0 %v3867_v57, %s16296_s22  ;;  %v4892_v44 = vpack.c.bf16 %v4862_v48, %v4861_v8  ;;  %v9862_v57 = vld [vmem:[#allocation3 + $0x78] sm:$0xff]  ;;  %v18278_v8 = vpack.c.bf16 %v9865_v17, %v9864_v24  ;;  %v9874_v24 = vld [vmem:[#allocation3 + $0x108] sm:$0xff] }
 0x4aa   : > { %14310 = vmatprep.mubr.msk.bf16.mxu1 %vm452_vm1, %v4891_v14  ;;  %v3866_v1 = vmax.f32 %v3834_v30, 0.0  ;;  %v18274_v49 = vpack.c.bf16 %v9863_v9, %v9862_v57  ;;  %v9870_v57 = vld [vmem:[#allocation3 + $0xd8] sm:$0xff] }
 0x4ab   : > { %3951 = vrot.lane.b32.xlu1 %v3868_v29, %s16296_s22  ;;  %v10253_v29 = vsel %vm501_vm0, %v18128_v62, 0 }
 0x4ac   : > { %v14196_v5 = vpop.f32.mrb[52].mxu1 }
 0x4ad   : > { %v3839_v16 = vadd.f32 %v14196_v5, %v18155_v45  ;;  %3945 = vrot.lane.b32.xlu0 %v3865_v56, %s16296_s22  ;;  %v3731_v54 = vpop.f32.mrb[53].mxu1  ;;  %v18288_v5 = vld [vmem:[%s19828_s5 + $0x2c] sm:$0x3] }
 0x4ae   : > { %v14197_v41 = vpop.f32.mrb[54].mxu1  ;;  %v3837_v43 = vadd.f32 %v18155_v45, %v3731_v54 }
 0x4af   : > { %v3871_v12 = vmax.f32 %v3839_v16, 0.0  ;;  %v3840_v59 = vadd.f32 %v14197_v41, %v18155_v45  ;;  %14883 = vmatmul.mubr.msk.bf16.gmra.mrb[28].mxu0 %vm452_vm1, %v9612_v47  ;;  %3947 = vrot.lane.b32.xlu1 %v3866_v1, %s16296_s22  ;;  %v3734_v26 = vpop.f32.mrb[55].mxu1  ;;  %v9867_v16 = vld [vmem:[#allocation3 + $0xb0] sm:$0xff] }
 0x4b0   : > { %14888 = vmatprep.mubr.msk.bf16.mxu0 %vm452_vm1, %v18250_v18  ;;  %v3838_v50 = vadd.f32 %v18155_v45, %v3734_v26  ;;  %v3869_v20 = vmax.f32 %v3837_v43, 0.0  ;;  %v9868_v43 = vld [vmem:[#allocation3 + $0xc0] sm:$0xff] }
 0x4b1   : > { %v3872_v52 = vmax.f32 %v3840_v59, 0.0  ;;  %14311 = vmatmul.mubr.msk.bf16.vlgmr.msra.gmra.mrb[64].mxu1 %vm452_vm1, %v4892_v44  ;;  %3957 = vrot.lane.b32.xlu0 %v3871_v12, %s16296_s22  ;;  %v18303_v12 = vpack.c.bf16 %v9867_v16, %v9866_v22  ;;  %v18305_v59 = vpack.c.bf16 %v9869_v6, %v9868_v43  ;;  %v5153_v22 = vld [vmem:[#allocation3 + $0x4] sm:$0xff] }
 0x4b2   : > { %14343 = vmatpush3.bf16.msra.mxu1 %v5252_v11  ;;  %14314 = vmatprep.mubr.msk.bf16.mxu1 %vm452_vm1, %v4893_v46  ;;  %v3870_v31 = vmax.f32 %v3838_v50, 0.0 }
 0x4b3   : > { %3959 = vrot.lane.b32.xlu1 %v3872_v52, %s16296_s22  ;;  %16129 = vmatprep.subr.msk.bf16.mxu1 %vm501_vm0, %v18263_v34 }
 0x4b4   : > { %v14200_v14 = vpop.f32.mrb[56].mxu1 }
 0x4b5   : > { %v3843_v4 = vadd.f32 %v14200_v14, %v18155_v45  ;;  %3953 = vrot.lane.b32.xlu0 %v3869_v20, %s16296_s22  ;;  %v3747_v63 = vpop.f32.mrb[57].mxu1  ;;  %v9871_v20 = vld [vmem:[#allocation3 + $0xe0] sm:$0xff]  ;;  %v9873_v14 = vld [vmem:[#allocation3 + $0xf8] sm:$0xff] }
 0x4b6   : > { %v14201_v30 = vpop.f32.mrb[58].mxu1  ;;  %v3841_v56 = vadd.f32 %v18155_v45, %v3747_v63 }
 0x4b7   : > { %v3875_v48 = vmax.f32 %v3843_v4, 0.0  ;;  %v3844_v47 = vadd.f32 %v14201_v30, %v18155_v45  ;;  %14889 = vmatmul.mubr.msk.bf16.vlgmr.msra.gmra.mrb[0].mxu0 %vm452_vm1, %v18274_v49  ;;  %3955 = vrot.lane.b32.xlu1 %v3870_v31, %s16296_s22  ;;  %v3750_v19 = vpop.f32.mrb[59].mxu1  ;;  %v18322_v4 = vpack.c.bf16 %v9871_v20, %v9870_v57  ;;  %v9876_v30 = vld [vmem:[#allocation3 + $0x120] sm:$0xff]  ;;  %v5157_v20 = vld [vmem:[#allocation3 + $0x34] sm:$0xff]  ;;  %v5547_v57 = vsel %vm501_vm0, %v18263_v34, 0 }
 0x4b8   : > { %14892 = vmatprep.mubr.msk.bf16.mxu0 %vm452_vm1, %v18278_v8  ;;  %14921 = vmatpush3.bf16.msra.mxu0 %v10253_v29  ;;  %v3842_v1 = vadd.f32 %v18155_v45, %v3750_v19  ;;  %v3873_v54 = vmax.f32 %v3841_v56, 0.0  ;;  %v9878_v56 = vld [vmem:[#allocation3 + $0x138] sm:$0xff]  ;;  %v9880_v19 = vld [vmem:[#allocation3 + $0x150] sm:$0xff] }
 0x4b9   : > { %v3876_v62 = vmax.f32 %v3844_v47, 0.0  ;;  %14315 = vmatmul.mubr.msk.bf16.gmra.mrb[68].mxu1 %vm452_vm1, %v18001_v23  ;;  %3965 = vrot.lane.b32.xlu0 %v3875_v48, %s16296_s22  ;;  %v10156_v34 = vld [vmem:[#allocation3 + $0x79] sm:$0xff] }
 0x4ba   : > { %14318 = vmatprep.mubr.msk.bf16.mxu1 %vm452_vm1, %v18017_v40  ;;  %16146 = vmatprep.subr.msk.bf16.mxu0 %vm501_vm0, %v18288_v5  ;;  %v3874_v2 = vmax.f32 %v3842_v1, 0.0  ;;  %v9882_v1 = vld [vmem:[#allocation3 + $0x168] sm:$0xff] }
 0x4bb   : > { %3967 = vrot.lane.b32.xlu1 %v3876_v62, %s16296_s22 }
 0x4bc   : > { %v14204_v44 = vpop.f32.mrb[60].mxu1 }
 0x4bd   : > { %v3847_v41 = vadd.f32 %v14204_v44, %v18155_v45  ;;  %3961 = vrot.lane.b32.xlu0 %v3873_v54, %s16296_s22  ;;  %v3763_v23 = vpop.f32.mrb[61].mxu1  ;;  %v9884_v54 = vld [vmem:[#allocation3 + $0x180] sm:$0xff]  ;;  %v9889_v44 = vld [vmem:[#allocation3 + $0x1b8] sm:$0xff] }
 0x4be   : > { %v14205_v40 = vpop.f32.mrb[62].mxu1  ;;  %v3845_v11 = vadd.f32 %v18155_v45, %v3763_v23 }
 0x4bf   : > { %v3879_v26 = vmax.f32 %v3847_v41, 0.0  ;;  %v3848_v46 = vadd.f32 %v14205_v40, %v18155_v45  ;;  %14893 = vmatmul.mubr.msk.bf16.gmra.mrb[4].mxu0 %vm452_vm1, %v18303_v12  ;;  %3963 = vrot.lane.b32.xlu1 %v3874_v2, %s16296_s22  ;;  %v3766_v52 = vpop.f32.mrb[63].mxu1  ;;  %v5154_v2 = vld [vmem:[#allocation3 + $0xc] sm:$0xff]  ;;  %v9886_v41 = vld [vmem:[#allocation3 + $0x198] sm:$0xff] }
 0x4c0   : > { %14896 = vmatprep.mubr.msk.bf16.mxu0 %vm452_vm1, %v18305_v59  ;;  %v3846_v9 = vadd.f32 %v18155_v45, %v3766_v52  ;;  %v3877_v17 = vmax.f32 %v3845_v11, 0.0  ;;  %v9872_v45 = vld [vmem:[#allocation3 + $0xf0] sm:$0xff]  ;;  %v5185_v40 = vpack.c.bf16 %v5154_v2, %v5153_v22  ;;  %v10167_v22 = vld [vmem:[#allocation3 + $0xf9] sm:$0xff] }
 0x4c1   : > { %v3880_v50 = vmax.f32 %v3848_v46, 0.0  ;;  %14319 = vmatmul.mubr.msk.bf16.gmra.mrb[72].mxu1 %vm452_vm1, %v18021_v37  ;;  %3973 = vrot.lane.b32.xlu0 %v3879_v26, %s16296_s22  ;;  %v18324_v63 = vpack.c.bf16 %v9873_v14, %v9872_v45  ;;  %v9875_v37 = vld [vmem:[#allocation3 + $0x110] sm:$0xff]  ;;  %v9890_v26 = vld [vmem:[#allocation3 + $0x1c8] sm:$0xff]  ;;  %v10164_v2 = vld [vmem:[#allocation3 + $0xd9] sm:$0xff] }
 0x4c2   : > { %14322 = vmatprep.mubr.msk.bf16.mxu1 %vm452_vm1, %v18038_v39  ;;  %v3878_v31 = vmax.f32 %v3846_v9, 0.0  ;;  %v9877_v39 = vld [vmem:[#allocation3 + $0x128] sm:$0xff]  ;;  %v18335_v29 = vpack.c.bf16 %v9875_v37, %v9874_v24  ;;  %v9891_v11 = vld [vmem:[#allocation3 + $0x1d0] sm:$0xff]  ;;  %v10159_v37 = vld [vmem:[#allocation3 + $0x99] sm:$0xff] }
 0x4c3   : > { %3975 = vrot.lane.b32.xlu1 %v3880_v50, %s16296_s22  ;;  %v18337_v48 = vpack.c.bf16 %v9877_v39, %v9876_v30  ;;  %v9907_v46 = vpack.c.bf16 %v9891_v11, %v9890_v26  ;;  %v10155_v52 = vld [vmem:[#allocation3 + $0x69] sm:$0xff]  ;;  %v10154_v50 = vld [vmem:[#allocation3 + $0x61] sm:$0xff]  ;;  %v10158_v24 = vld [vmem:[#allocation3 + $0x91] sm:$0xff]  ;;  %v10547_v30 = vsel %vm501_vm0, %v18288_v5, 0 }
 0x4c4   : > { %v18376_v14 = vpack.c.bf16 %v10155_v52, %v10154_v50  ;;  %v10157_v45 = vld [vmem:[#allocation3 + $0x81] sm:$0xff]  ;;  %v10161_v5 = vld [vmem:[#allocation3 + $0xb1] sm:$0xff] }
 0x4c5   : > { %3969 = vrot.lane.b32.xlu0 %v3877_v17, %s16296_s22  ;;  %v5158_v17 = vld [vmem:[#allocation3 + $0x3c] sm:$0xff]  ;;  %v18392_v39 = vpack.c.bf16 %v10157_v45, %v10156_v34  ;;  %v10169_v26 = vld [vmem:[#allocation3 + $0x111] sm:$0xff] }
 0x4c6   : > { %v10170_v50 = vld [vmem:[#allocation3 + $0x121] sm:$0xff]  ;;  %v10174_v34 = vld [vmem:[#allocation3 + $0x151] sm:$0xff] }
 0x4c7   : > { %14897 = vmatmul.mubr.msk.bf16.gmra.mrb[8].mxu0 %vm452_vm1, %v18322_v4  ;;  %3971 = vrot.lane.b32.xlu1 %v3878_v31, %s16296_s22  ;;  %v18386_v31 = vld [vmem:[%s19828_s5 + $0xc] sm:$0x3] }
 0x4c8   : > { %14900 = vmatprep.mubr.msk.bf16.mxu0 %vm452_vm1, %v18324_v63 }
 0x4c9   : > { %14323 = vmatmul.mubr.msk.bf16.gmra.mrb[76].mxu1 %vm452_vm1, %v18040_v53  ;;  %v9879_v53 = vld [vmem:[#allocation3 + $0x140] sm:$0xff] }
 0x4ca   : > { %14326 = vmatprep.mubr.msk.bf16.mxu1 %vm452_vm1, %v18050_v51  ;;  %v9881_v51 = vld [vmem:[#allocation3 + $0x158] sm:$0xff]  ;;  %v18347_v47 = vpack.c.bf16 %v9879_v53, %v9878_v56  ;;  %v18396_v53 = vpack.c.bf16 %v10159_v37, %v10158_v24 }
 0x4cb   : > { %v18349_v62 = vpack.c.bf16 %v9881_v51, %v9880_v19  ;;  %v18401_v51 = vld [vmem:[%s19828_s5 + $0x2e] sm:$0x3]  ;;  %v10163_v19 = vld [vmem:[#allocation3 + $0xc9] sm:$0xff] }
 0x4cf   : > { %14901 = vmatmul.mubr.msk.bf16.gmra.mrb[12].mxu0 %vm452_vm1, %v18335_v29 }
 0x4d0   : > { %14904 = vmatprep.mubr.msk.bf16.mxu0 %vm452_vm1, %v18337_v48 }
 0x4d1   : > { %14327 = vmatmul.mubr.msk.bf16.gmra.mrb[80].mxu1 %vm452_vm1, %v18052_v28  ;;  %v9883_v28 = vld [vmem:[#allocation3 + $0x170] sm:$0xff] }
 0x4d2   : > { %14330 = vmatprep.mubr.msk.bf16.mxu1 %vm452_vm1, %v18062_v36  ;;  %v9885_v36 = vld [vmem:[#allocation3 + $0x188] sm:$0xff]  ;;  %v18359_v16 = vpack.c.bf16 %v9883_v28, %v9882_v1 }
 0x4d3   : > { %v18361_v6 = vpack.c.bf16 %v9885_v36, %v9884_v54  ;;  %v10160_v28 = vld [vmem:[#allocation3 + $0xa9] sm:$0xff] }
 0x4d4   : > { %v18415_v1 = vpack.c.bf16 %v10161_v5, %v10160_v28 }
 0x4d7   : > { %14905 = vmatmul.mubr.msk.bf16.gmra.mrb[16].mxu0 %vm452_vm1, %v18347_v47 }
 0x4d8   : > { %14908 = vmatprep.mubr.msk.bf16.mxu0 %vm452_vm1, %v18349_v62 }
 0x4d9   : > { %14331 = vmatmul.mubr.msk.bf16.gmra.mrb[84].mxu1 %vm452_vm1, %v18064_v27  ;;  %v9888_v27 = vld [vmem:[#allocation3 + $0x1b0] sm:$0xff] }
 0x4da   : > { %14334 = vmatprep.mubr.msk.bf16.mxu1 %vm452_vm1, %v18074_v55  ;;  %v9887_v55 = vld [vmem:[#allocation3 + $0x1a0] sm:$0xff]  ;;  %v9906_v23 = vpack.c.bf16 %v9889_v44, %v9888_v27 }
 0x4db   : > { %v9905_v43 = vpack.c.bf16 %v9887_v55, %v9886_v41  ;;  %v10165_v44 = vld [vmem:[#allocation3 + $0xe1] sm:$0xff] }
 0x4df   : > { %14909 = vmatmul.mubr.msk.bf16.gmra.mrb[20].mxu0 %vm452_vm1, %v18359_v16 }
 0x4e0   : > { %14912 = vmatprep.mubr.msk.bf16.mxu0 %vm452_vm1, %v18361_v6 }
 0x4e1   : > { %14335 = vmatmul.mubr.msk.bf16.gmra.mrb[88].mxu1 %vm452_vm1, %v18076_v58  ;;  %v5155_v58 = vld [vmem:[#allocation3 + $0x1c] sm:$0xff] }
 0x4e2   : > { %14338 = vmatprep.mubr.msk.bf16.mxu1 %vm452_vm1, %v18086_v38  ;;  %v5156_v38 = vld [vmem:[#allocation3 + $0x24] sm:$0xff] }
 0x4e3   : > { %v5186_v9 = vpack.c.bf16 %v5156_v38, %v5155_v58  ;;  %v10171_v58 = vld [vmem:[#allocation3 + $0x129] sm:$0xff] }
 0x4e4   : > { %v10168_v38 = vld [vmem:[#allocation3 + $0x109] sm:$0xff] }
 0x4e5   : > { %v18455_v52 = vpack.c.bf16 %v10169_v26, %v10168_v38 }
 0x4e7   : > { %14913 = vmatmul.mubr.msk.bf16.gmra.mrb[24].mxu0 %vm452_vm1, %v9905_v43  ;;  %v10166_v43 = vld [vmem:[#allocation3 + $0xf1] sm:$0xff] }
 0x4e8   : > { %14916 = vmatprep.mubr.msk.bf16.mxu0 %vm452_vm1, %v9906_v23  ;;  %v18435_v23 = vpack.c.bf16 %v10165_v44, %v10164_v2  ;;  %v10183_v44 = vld [vmem:[#allocation3 + $0x1b9] sm:$0xff] }
 0x4e9   : > { %14339 = vmatmul.mubr.msk.bf16.gmra.mrb[92].mxu1 %vm452_vm1, %v18088_v21  ;;  %v5187_v21 = vpack.c.bf16 %v5158_v17, %v5157_v20  ;;  %v10173_v20 = vld [vmem:[#allocation3 + $0x141] sm:$0xff]  ;;  %v5448_v2 = vld [vmem:[#allocation3 + $0x18] sm:$0xff] }
 0x4ea   : > { %14344 = vmatprep.mubr.msk.bf16.mxu1 %vm452_vm1, %v5185_v40 }
 0x4ef   : > { %14917 = vmatmul.mubr.msk.bf16.gmra.mrb[28].mxu0 %vm452_vm1, %v9907_v46 }
 0x4f0   : > { %14922 = vmatprep.mubr.msk.bf16.mxu0 %vm452_vm1, %v18376_v14 }
 0x4f1   : > { %14345 = vmatmul.mubr.msk.bf16.vlgmr.msra.gmra.mrb[64].mxu1 %vm452_vm1, %v5186_v9 }
 0x4f2   : > { %14377 = vmatpush3.bf16.msra.mxu1 %v5547_v57  ;;  %14348 = vmatprep.mubr.msk.bf16.mxu1 %vm452_vm1, %v5187_v21  ;;  %v10175_v57 = vld [vmem:[#allocation3 + $0x159] sm:$0xff] }
 0x4f3   : > { %16130 = vmatprep.subr.msk.bf16.mxu1 %vm501_vm0, %v18386_v31  ;;  %v10172_v21 = vld [vmem:[#allocation3 + $0x139] sm:$0xff] }
 0x4f4   : > { %v18475_v37 = vpack.c.bf16 %v10173_v20, %v10172_v21 }
 0x4f7   : > { %14923 = vmatmul.mubr.msk.bf16.vlgmr.msra.gmra.mrb[0].mxu0 %vm452_vm1, %v18392_v39 }
 0x4f8   : > { %14926 = vmatprep.mubr.msk.bf16.mxu0 %vm452_vm1, %v18396_v53  ;;  %14955 = vmatpush3.bf16.msra.mxu0 %v10547_v30  ;;  %v10177_v30 = vld [vmem:[#allocation3 + $0x171] sm:$0xff] }
 0x4f9   : > { %14349 = vmatmul.mubr.msk.bf16.gmra.mrb[68].mxu1 %vm452_vm1, %v18103_v3  ;;  %16147 = vmatprep.subr.msk.bf16.mxu0 %vm501_vm0, %v18401_v51  ;;  %v10162_v3 = vld [vmem:[#allocation3 + $0xc1] sm:$0xff] }
 0x4fa   : > { %14352 = vmatprep.mubr.msk.bf16.mxu1 %vm452_vm1, %v18119_v35  ;;  %v18419_v54 = vpack.c.bf16 %v10163_v19, %v10162_v3  ;;  %v10176_v19 = vld [vmem:[#allocation3 + $0x169] sm:$0xff]  ;;  %v10178_v3 = vld [vmem:[#allocation3 + $0x181] sm:$0xff] }
 0x4fb   : > { %v3918_v56 = vpop.permute.xlu0 %3917 }
 0x4fc   : > { %4012 = vst.msk [vmem:[%s16630_s24 + $0x10] sm:$0xff] %vm4009_vm6, %v3918_v56  ;;  %v10179_v56 = vld [vmem:[#allocation3 + $0x189] sm:$0xff] }
 0x4fd   : > { %v3920_v36 = vpop.permute.xlu1 %3919 }
 0x4fe   : > { %4013 = vst.msk [vmem:[%s16630_s24 + $0x18] sm:$0xff] %vm4009_vm6, %v3920_v36  ;;  %v18495_v36 = vpack.c.bf16 %v10177_v30, %v10176_v19  ;;  %v16297_v19 = vmov -1e+30  }
 0x4ff   : > { %14927 = vmatmul.mubr.msk.bf16.gmra.mrb[4].mxu0 %vm452_vm1, %v18415_v1  ;;  %v3914_v35 = vpop.permute.xlu0 %3913  ;;  %798 = vst.msk [vmem:[#allocation4] sm:$0xff] %vm452_vm1, %v16297_v19  ;;  %799 = vst.msk [vmem:[#allocation4 + $0x8] sm:$0xff] %vm452_vm1, %v16297_v19 }
 0x500   : > { %4010 = vst.msk [vmem:[%s16630_s24] sm:$0xff] %vm4009_vm6, %v3914_v35  ;;  %14930 = vmatprep.mubr.msk.bf16.mxu0 %vm452_vm1, %v18419_v54 }
 0x501   : > { %14353 = vmatmul.mubr.msk.bf16.gmra.mrb[72].mxu1 %vm452_vm1, %v18123_v25  ;;  %v3916_v27 = vpop.permute.xlu1 %3915  ;;  %v18439_v25 = vpack.c.bf16 %v10167_v22, %v10166_v43  ;;  %v10180_v43 = vld [vmem:[#allocation3 + $0x199] sm:$0xff]  ;;  %800 = vst.msk [vmem:[#allocation4 + $0x10] sm:$0x3] %vm701_vm2, %v16297_v19  ;;  %804 = vst.msk [vmem:[#allocation4 + $0x1a8] sm:$0x3] %vm701_vm2, %v16297_v19 }
 0x502   : > { %4011 = vst.msk [vmem:[%s16630_s24 + $0x8] sm:$0xff] %vm4009_vm6, %v3916_v27  ;;  %14356 = vmatprep.mubr.msk.bf16.mxu1 %vm452_vm1, %v18140_v32  ;;  %v10182_v27 = vld [vmem:[#allocation3 + $0x1b1] sm:$0xff] }
 0x503   : > { %v3926_v55 = vpop.permute.xlu0 %3925  ;;  %806 = vst.msk [vmem:[#allocation4 + $0x18] sm:$0x1] %vm707_vm5, %v16297_v19  ;;  %807 = vst.msk [vmem:[#allocation4 + $0x30] sm:$0x1] %vm707_vm5, %v16297_v19 }
 0x504   : > { %4016 = vst.msk [vmem:[%s16630_s24 + $0x30] sm:$0xff] %vm4009_vm6, %v3926_v55  ;;  %v10181_v55 = vld [vmem:[#allocation3 + $0x1a1] sm:$0xff] }
 0x505   : > { %v3928_v41 = vpop.permute.xlu1 %3927  ;;  %824 = vst.msk [vmem:[#allocation4 + $0x29] sm:$0x1] %vm707_vm5, %v16297_v19  ;;  %825 = vst.msk [vmem:[#allocation4 + $0x41] sm:$0x1] %vm707_vm5, %v16297_v19 }
 0x506   : > { %4017 = vst.msk [vmem:[%s16630_s24 + $0x38] sm:$0xff] %vm4009_vm6, %v3928_v41  ;;  %v5449_v41 = vld [vmem:[#allocation3 + $0x20] sm:$0xff] }
 0x507   : > { %14931 = vmatmul.mubr.msk.bf16.gmra.mrb[8].mxu0 %vm452_vm1, %v18435_v23  ;;  %v3922_v32 = vpop.permute.xlu0 %3921  ;;  %v5480_v26 = vpack.c.bf16 %v5449_v41, %v5448_v2  ;;  %802 = vst.msk [vmem:[#allocation4 + $0x198] sm:$0xff] %vm452_vm1, %v16297_v19  ;;  %803 = vst.msk [vmem:[#allocation4 + $0x1a0] sm:$0xff] %vm452_vm1, %v16297_v19  ;;  %v18598_v2 = vld [vmem:[%s19828_s5 + $0x30] sm:$0x3] }
 0x508   : > { %4014 = vst.msk [vmem:[%s16630_s24 + $0x20] sm:$0xff] %vm4009_vm6, %v3922_v32  ;;  %14934 = vmatprep.mubr.msk.bf16.mxu0 %vm452_vm1, %v18439_v25  ;;  %v10200_v32 = vpack.c.bf16 %v10183_v44, %v10182_v27  ;;  %v10452_v44 = vld [vmem:[#allocation3 + $0x92] sm:$0xff] }
 0x509   : > { %14357 = vmatmul.mubr.msk.bf16.gmra.mrb[76].mxu1 %vm452_vm1, %v18142_v13  ;;  %v3924_v40 = vpop.permute.xlu1 %3923  ;;  %v18459_v13 = vpack.c.bf16 %v10171_v58, %v10170_v50  ;;  %v10185_v58 = vld [vmem:[#allocation3 + $0x1d1] sm:$0xff]  ;;  %808 = vst.msk [vmem:[#allocation4 + $0x48] sm:$0x1] %vm707_vm5, %v16297_v19  ;;  %809 = vst.msk [vmem:[#allocation4 + $0x60] sm:$0x1] %vm707_vm5, %v16297_v19 }
 0x50a   : > { %4015 = vst.msk [vmem:[%s16630_s24 + $0x28] sm:$0xff] %vm4009_vm6, %v3924_v40  ;;  %14360 = vmatprep.mubr.msk.bf16.mxu1 %vm452_vm1, %v18158_v10 }
 0x50b   : > { %v3934_v11 = vpop.permute.xlu0 %3933  ;;  %810 = vst.msk [vmem:[#allocation4 + $0x78] sm:$0x1] %vm707_vm5, %v16297_v19  ;;  %811 = vst.msk [vmem:[#allocation4 + $0x90] sm:$0x1] %vm707_vm5, %v16297_v19 }
 0x50c   : > { %4020 = vst.msk [vmem:[%s16630_s24 + $0x50] sm:$0xff] %vm4009_vm6, %v3934_v11 }
 0x50d   : > { %v3936_v46 = vpop.permute.xlu1 %3935  ;;  %812 = vst.msk [vmem:[#allocation4 + $0xa8] sm:$0x1] %vm707_vm5, %v16297_v19  ;;  %813 = vst.msk [vmem:[#allocation4 + $0xc0] sm:$0x1] %vm707_vm5, %v16297_v19 }
 0x50e   : > { %4021 = vst.msk [vmem:[%s16630_s24 + $0x58] sm:$0xff] %vm4009_vm6, %v3936_v46 }
 0x50f   : > { %14935 = vmatmul.mubr.msk.bf16.gmra.mrb[12].mxu0 %vm452_vm1, %v18455_v52  ;;  %v3930_v10 = vpop.permute.xlu0 %3929  ;;  %814 = vst.msk [vmem:[#allocation4 + $0xd8] sm:$0x1] %vm707_vm5, %v16297_v19  ;;  %815 = vst.msk [vmem:[#allocation4 + $0xf0] sm:$0x1] %vm707_vm5, %v16297_v19 }
 0x510   : > { %4018 = vst.msk [vmem:[%s16630_s24 + $0x40] sm:$0xff] %vm4009_vm6, %v3930_v10  ;;  %14938 = vmatprep.mubr.msk.bf16.mxu0 %vm452_vm1, %v18459_v13  ;;  %v10449_v10 = vld [vmem:[#allocation3 + $0x6a] sm:$0xff] }
 0x511   : > { %14361 = vmatmul.mubr.msk.bf16.gmra.mrb[80].mxu1 %vm452_vm1, %v18160_v61  ;;  %v3932_v9 = vpop.permute.xlu1 %3931  ;;  %v18479_v61 = vpack.c.bf16 %v10175_v57, %v10174_v34  ;;  %v5453_v57 = vld [vmem:[#allocation3 + $0x50] sm:$0xff]  ;;  %816 = vst.msk [vmem:[#allocation4 + $0x108] sm:$0x1] %vm707_vm5, %v16297_v19  ;;  %817 = vst.msk [vmem:[#allocation4 + $0x120] sm:$0x1] %vm707_vm5, %v16297_v19 }
 0x512   : > { %4019 = vst.msk [vmem:[%s16630_s24 + $0x48] sm:$0xff] %vm4009_vm6, %v3932_v9  ;;  %14364 = vmatprep.mubr.msk.bf16.mxu1 %vm452_vm1, %v18177_v7  ;;  %v5451_v9 = vld [vmem:[#allocation3 + $0x38] sm:$0xff] }
 0x513   : > { %v3942_v17 = vpop.permute.xlu0 %3941  ;;  %818 = vst.msk [vmem:[#allocation4 + $0x138] sm:$0x1] %vm707_vm5, %v16297_v19  ;;  %819 = vst.msk [vmem:[#allocation4 + $0x150] sm:$0x1] %vm707_vm5, %v16297_v19 }
 0x514   : > { %4024 = vst.msk [vmem:[%s16630_s24 + $0x70] sm:$0xff] %vm4009_vm6, %v3942_v17  ;;  %v10448_v17 = vld [vmem:[#allocation3 + $0x62] sm:$0xff] }
 0x515   : > { %v3944_v45 = vpop.permute.xlu1 %3943  ;;  %v10480_v21 = vpack.c.bf16 %v10449_v10, %v10448_v17  ;;  %820 = vst.msk [vmem:[#allocation4 + $0x168] sm:$0x1] %vm707_vm5, %v16297_v19  ;;  %821 = vst.msk [vmem:[#allocation4 + $0x180] sm:$0x1] %vm707_vm5, %v16297_v19  ;;  %v10462_v10 = vld [vmem:[#allocation3 + $0x10a] sm:$0xff]  ;;  %v10469_v17 = vld [vmem:[#allocation3 + $0x15a] sm:$0xff] }
 0x516   : > { %4025 = vst.msk [vmem:[%s16630_s24 + $0x78] sm:$0xff] %vm4009_vm6, %v3944_v45  ;;  %v5450_v45 = vld [vmem:[#allocation3 + $0x30] sm:$0xff] }
 0x517   : > { %14939 = vmatmul.mubr.msk.bf16.gmra.mrb[16].mxu0 %vm452_vm1, %v18475_v37  ;;  %v3938_v7 = vpop.permute.xlu0 %3937  ;;  %v5481_v34 = vpack.c.bf16 %v5451_v9, %v5450_v45  ;;  %826 = vst.msk [vmem:[#allocation4 + $0x59] sm:$0x1] %vm707_vm5, %v16297_v19  ;;  %827 = vst.msk [vmem:[#allocation4 + $0x71] sm:$0x1] %vm707_vm5, %v16297_v19  ;;  %v10464_v9 = vld [vmem:[#allocation3 + $0x122] sm:$0xff] }
 0x518   : > { %4022 = vst.msk [vmem:[%s16630_s24 + $0x60] sm:$0xff] %vm4009_vm6, %v3938_v7  ;;  %14942 = vmatprep.mubr.msk.bf16.mxu0 %vm452_vm1, %v18479_v61  ;;  %v5841_v7 = vsel %vm501_vm0, %v18386_v31, 0  ;;  %v10451_v31 = vld [vmem:[#allocation3 + $0x82] sm:$0xff] }
 0x519   : > { %14365 = vmatmul.mubr.msk.bf16.gmra.mrb[84].mxu1 %vm452_vm1, %v18179_v33  ;;  %v3940_v24 = vpop.permute.xlu1 %3939  ;;  %v18499_v33 = vpack.c.bf16 %v10179_v56, %v10178_v3  ;;  %828 = vst.msk [vmem:[#allocation4 + $0x89] sm:$0x1] %vm707_vm5, %v16297_v19  ;;  %829 = vst.msk [vmem:[#allocation4 + $0xa1] sm:$0x1] %vm707_vm5, %v16297_v19  ;;  %v10453_v3 = vld [vmem:[#allocation3 + $0x9a] sm:$0xff] }
 0x51a   : > { %4023 = vst.msk [vmem:[%s16630_s24 + $0x68] sm:$0xff] %vm4009_vm6, %v3940_v24  ;;  %14368 = vmatprep.mubr.msk.bf16.mxu1 %vm452_vm1, %v18197_v60  ;;  %v5452_v24 = vld [vmem:[#allocation3 + $0x48] sm:$0xff] }
 0x51b   : > { %v3950_v5 = vpop.permute.xlu0 %3949  ;;  %v5482_v30 = vpack.c.bf16 %v5453_v57, %v5452_v24  ;;  %830 = vst.msk [vmem:[#allocation4 + $0xb9] sm:$0x1] %vm707_vm5, %v16297_v19  ;;  %831 = vst.msk [vmem:[#allocation4 + $0xd1] sm:$0x1] %vm707_vm5, %v16297_v19  ;;  %v10466_v57 = vld [vmem:[#allocation3 + $0x13a] sm:$0xff] }
 0x51c   : > { %4028 = vst.msk [vmem:[%s16630_s24 + $0x90] sm:$0xff] %vm4009_vm6, %v3950_v5  ;;  %v18539_v5 = vld [vmem:[%s19830_s7] sm:$0x3] }
 0x51d   : > { %v3952_v28 = vpop.permute.xlu1 %3951  ;;  %832 = vst.msk [vmem:[#allocation4 + $0xe9] sm:$0x1] %vm707_vm5, %v16297_v19  ;;  %833 = vst.msk [vmem:[#allocation4 + $0x101] sm:$0x1] %vm707_vm5, %v16297_v19 }
 0x51e   : > { %4029 = vst.msk [vmem:[%s16630_s24 + $0x98] sm:$0xff] %vm4009_vm6, %v3952_v28 }
 0x51f   : > { %14943 = vmatmul.mubr.msk.bf16.gmra.mrb[20].mxu0 %vm452_vm1, %v18495_v36  ;;  %v3946_v60 = vpop.permute.xlu0 %3945  ;;  %834 = vst.msk [vmem:[#allocation4 + $0x119] sm:$0x1] %vm707_vm5, %v16297_v19  ;;  %835 = vst.msk [vmem:[#allocation4 + $0x131] sm:$0x1] %vm707_vm5, %v16297_v19 }
 0x520   : > { %4026 = vst.msk [vmem:[%s16630_s24 + $0x80] sm:$0xff] %vm4009_vm6, %v3946_v60  ;;  %14946 = vmatprep.mubr.msk.bf16.mxu0 %vm452_vm1, %v18499_v33  ;;  %v10450_v60 = vld [vmem:[#allocation3 + $0x7a] sm:$0xff] }
 0x521   : > { %14369 = vmatmul.mubr.msk.bf16.gmra.mrb[88].mxu1 %vm452_vm1, %v18199_v0  ;;  %v3948_v35 = vpop.permute.xlu1 %3947  ;;  %v10199_v0 = vpack.c.bf16 %v10181_v55, %v10180_v43  ;;  %836 = vst.msk [vmem:[#allocation4 + $0x149] sm:$0x1] %vm707_vm5, %v16297_v19  ;;  %837 = vst.msk [vmem:[#allocation4 + $0x161] sm:$0x1] %vm707_vm5, %v16297_v19  ;;  %v10481_v27 = vpack.c.bf16 %v10451_v31, %v10450_v60  ;;  %v10841_v55 = vsel %vm501_vm0, %v18401_v51, 0  ;;  %v10455_v43 = vld [vmem:[#allocation3 + $0xb2] sm:$0xff] }
 0x522   : > { %4027 = vst.msk [vmem:[%s16630_s24 + $0x88] sm:$0xff] %vm4009_vm6, %v3948_v35  ;;  %14372 = vmatprep.mubr.msk.bf16.mxu1 %vm452_vm1, %v18217_v15  ;;  %v10184_v15 = vld [vmem:[#allocation3 + $0x1c9] sm:$0xff]  ;;  %v10474_v31 = vld [vmem:[#allocation3 + $0x19a] sm:$0xff] }
 0x523   : > { %v3958_v22 = vpop.permute.xlu0 %3957  ;;  %v10201_v50 = vpack.c.bf16 %v10185_v58, %v10184_v15  ;;  %838 = vst.msk [vmem:[#allocation4 + $0x179] sm:$0x1] %vm707_vm5, %v16297_v19  ;;  %839 = vst.msk [vmem:[#allocation4 + $0x191] sm:$0x1] %vm707_vm5, %v16297_v19  ;;  %v10461_v15 = vld [vmem:[#allocation3 + $0xfa] sm:$0xff] }
 0x524   : > { %4032 = vst.msk [vmem:[%s16630_s24 + $0xb0] sm:$0xff] %vm4009_vm6, %v3958_v22  ;;  %v10482_v22 = vpack.c.bf16 %v10453_v3, %v10452_v44  ;;  %v10458_v58 = vld [vmem:[#allocation3 + $0xda] sm:$0xff]  ;;  %v10743_v44 = vld [vmem:[#allocation3 + $0x6b] sm:$0xff] }
 0x525   : > { %v3960_v40 = vpop.permute.xlu1 %3959  ;;  %805 = vst.msk [vmem:[#allocation4] sm:$0x1] %vm707_vm5, %v16297_v19  ;;  %823 = vst.msk [vmem:[#allocation4 + $0x11] sm:$0x1] %vm707_vm5, %v16297_v19 }
 0x526   : > { %4033 = vst.msk [vmem:[%s16630_s24 + $0xb8] sm:$0xff] %vm4009_vm6, %v3960_v40  ;;  %v10454_v40 = vld [vmem:[#allocation3 + $0xaa] sm:$0xff] }
 0x527   : > { %14947 = vmatmul.mubr.msk.bf16.gmra.mrb[24].mxu0 %vm452_vm1, %v10199_v0  ;;  %v3954_v11 = vpop.permute.xlu0 %3953  ;;  %822 = vst.msk [vmem:[#allocation4 + $0x198] sm:$0x1] %vm707_vm5, %v16297_v19  ;;  %840 = vst.msk [vmem:[#allocation4 + $0x1a9] sm:$0x1] %vm707_vm5, %v16297_v19  ;;  %v10483_v0 = vpack.c.bf16 %v10455_v43, %v10454_v40  ;;  %v5743_v19 = vld [vmem:[#allocation3 + $0x21] sm:$0xff]  ;;  %v5746_v40 = vld [vmem:[#allocation3 + $0x49] sm:$0xff] }
 0x528   : > { %4030 = vst.msk [vmem:[%s16630_s24 + $0xa0] sm:$0xff] %vm4009_vm6, %v3954_v11  ;;  %14950 = vmatprep.mubr.msk.bf16.mxu0 %vm452_vm1, %v10200_v32  ;;  %v10457_v32 = vld [vmem:[#allocation3 + $0xca] sm:$0xff] }
 0x529   : > { %14373 = vmatmul.mubr.msk.bf16.gmra.mrb[92].mxu1 %vm452_vm1, %v18219_v42  ;;  %v3956_v38 = vpop.permute.xlu1 %3955 }
 0x52a   : > { %4031 = vst.msk [vmem:[%s16630_s24 + $0xa8] sm:$0xff] %vm4009_vm6, %v3956_v38  ;;  %14378 = vmatprep.mubr.msk.bf16.mxu1 %vm452_vm1, %v5480_v26  ;;  %v10456_v26 = vld [vmem:[#allocation3 + $0xc2] sm:$0xff]  ;;  %v10460_v38 = vld [vmem:[#allocation3 + $0xf2] sm:$0xff] }
 0x52b   : > { %v3966_v46 = vpop.permute.xlu0 %3965  ;;  %v10484_v11 = vpack.c.bf16 %v10457_v32, %v10456_v26  ;;  %v12180_v32 = vsel %vm501_vm0, %v18539_v5, 0  ;;  %v10745_v26 = vld [vmem:[#allocation3 + $0x83] sm:$0xff] }
 0x52c   : > { %4036 = vst.msk [vmem:[%s16630_s24 + $0xd0] sm:$0xff] %vm4009_vm6, %v3966_v46  ;;  %v10486_v46 = vpack.c.bf16 %v10461_v15, %v10460_v38  ;;  %v10749_v38 = vld [vmem:[#allocation3 + $0xb3] sm:$0xff] }
 0x52d   : > { %v3968_v20 = vpop.permute.xlu1 %3967 }
 0x52e   : > { %4037 = vst.msk [vmem:[%s16630_s24 + $0xd8] sm:$0xff] %vm4009_vm6, %v3968_v20 }
 0x52f   : > { %14951 = vmatmul.mubr.msk.bf16.gmra.mrb[28].mxu0 %vm452_vm1, %v10201_v50  ;;  %v3962_v42 = vpop.permute.xlu0 %3961  ;;  %v10465_v50 = vld [vmem:[#allocation3 + $0x12a] sm:$0xff] }
 0x530   : > { %4034 = vst.msk [vmem:[%s16630_s24 + $0xc0] sm:$0xff] %vm4009_vm6, %v3962_v42  ;;  %14956 = vmatprep.mubr.msk.bf16.mxu0 %vm452_vm1, %v10480_v21  ;;  %v10488_v20 = vpack.c.bf16 %v10465_v50, %v10464_v9  ;;  %v10468_v21 = vld [vmem:[#allocation3 + $0x152] sm:$0xff]  ;;  %v10473_v42 = vld [vmem:[#allocation3 + $0x18a] sm:$0xff]  ;;  %v11594_v9 = vld [vmem:[#allocation4 + $0x1] sm:$0xff] }
 0x531   : > { %14379 = vmatmul.mubr.msk.bf16.vlgmr.msra.gmra.mrb[64].mxu1 %vm452_vm1, %v5481_v34  ;;  %v3964_v56 = vpop.permute.xlu1 %3963  ;;  %v10490_v45 = vpack.c.bf16 %v10469_v17, %v10468_v21  ;;  %v10470_v34 = vld [vmem:[#allocation3 + $0x16a] sm:$0xff]  ;;  %v10755_v17 = vld [vmem:[#allocation3 + $0xfb] sm:$0xff] }
 0x532   : > { %14411 = vmatpush3.bf16.msra.mxu1 %v5841_v7  ;;  %4035 = vst.msk [vmem:[%s16630_s24 + $0xc8] sm:$0xff] %vm4009_vm6, %v3964_v56  ;;  %14382 = vmatprep.mubr.msk.bf16.mxu1 %vm452_vm1, %v5482_v30  ;;  %v10472_v7 = vld [vmem:[#allocation3 + $0x182] sm:$0xff]  ;;  %v10476_v30 = vld [vmem:[#allocation3 + $0x1b2] sm:$0xff]  ;;  %v10477_v56 = vld [vmem:[#allocation3 + $0x1ba] sm:$0xff] }
 0x533   : > { %v3974_v28 = vpop.permute.xlu0 %3973  ;;  %16149 = vmatprep.subr.msk.bf16.mxu1 %vm501_vm0, %v18539_v5  ;;  %v10492_v24 = vpack.c.bf16 %v10473_v42, %v10472_v7  ;;  %v10748_v5 = vld [vmem:[#allocation3 + $0xab] sm:$0xff]  ;;  %v11723_v21 = vld [vmem:[#allocation4 + $0x20] sm:$0xff] }
 0x534   : > { %4040 = vst.msk [vmem:[%s16630_s24 + $0xf0] sm:$0xff] %vm4009_vm6, %v3974_v28  ;;  %v10494_v28 = vpack.c.bf16 %v10477_v56, %v10476_v30  ;;  %v10777_v50 = vpack.c.bf16 %v10749_v38, %v10748_v5  ;;  %v11659_v42 = vld [vmem:[#allocation4 + $0xa] sm:$0xff] }
 0x535   : > { %v3976_v35 = vpop.permute.xlu1 %3975  ;;  %v18668_v7 = vld [vmem:[#allocation4 + $0x31] sm:$0xff] }
 0x536   : > { %4041 = vst.msk [vmem:[%s16630_s24 + $0xf8] sm:$0xff] %vm4009_vm6, %v3976_v35  ;;  %v10478_v35 = vld [vmem:[#allocation3 + $0x1ca] sm:$0xff] }
 0x537   : > { %14957 = vmatmul.mubr.msk.bf16.vlgmr.msra.gmra.mrb[0].mxu0 %vm452_vm1, %v10481_v27  ;;  %v3970_v41 = vpop.permute.xlu0 %3969  ;;  %v10479_v27 = vld [vmem:[#allocation3 + $0x1d2] sm:$0xff] }
 0x538   : > { %4038 = vst.msk [vmem:[%s16630_s24 + $0xe0] sm:$0xff] %vm4009_vm6, %v3970_v41  ;;  %14960 = vmatprep.mubr.msk.bf16.mxu0 %vm452_vm1, %v10482_v22  ;;  %14989 = vmatpush3.bf16.msra.mxu0 %v10841_v55  ;;  %v5745_v55 = vld [vmem:[#allocation3 + $0x39] sm:$0xff]  ;;  %v5747_v22 = vld [vmem:[#allocation3 + $0x51] sm:$0xff] }
 0x539   : > { %14383 = vmatmul.mubr.msk.bf16.gmra.mrb[68].mxu1 %vm452_vm1, %v18250_v18  ;;  %v3972_v51 = vpop.permute.xlu1 %3971  ;;  %16148 = vmatprep.subr.msk.bf16.mxu0 %vm501_vm0, %v18598_v2  ;;  %v10459_v18 = vld [vmem:[#allocation3 + $0xe2] sm:$0xff] }
 0x53a   : > { %4039 = vst.msk [vmem:[%s16630_s24 + $0xe8] sm:$0xff] %vm4009_vm6, %v3972_v51  ;;  %14386 = vmatprep.mubr.msk.bf16.mxu1 %vm452_vm1, %v18274_v49  ;;  %v10485_v49 = vpack.c.bf16 %v10459_v18, %v10458_v58  ;;  %v5744_v51 = vld [vmem:[#allocation3 + $0x31] sm:$0xff]  ;;  %v10747_v18 = vld [vmem:[#allocation3 + $0x9b] sm:$0xff]  ;;  %v11135_v58 = vsel %vm501_vm0, %v18598_v2, 0  ;;  %v11563_v2 = vld [vmem:[#allocation4 + $0x8] sm:$0xff] }
 0x53b   : > { %v5775_v43 = vpack.c.bf16 %v5745_v55, %v5744_v51  ;;  %v18691_v55 = vld [vmem:[#allocation4 + $0x1a] sm:$0xff] }
 0x53f   : > { %14961 = vmatmul.mubr.msk.bf16.gmra.mrb[4].mxu0 %vm452_vm1, %v10483_v0  ;;  %v5776_v0 = vpack.c.bf16 %v5747_v22, %v5746_v40  ;;  %v18701_v40 = vld [vmem:[#allocation4 + $0x3a] sm:$0xff] }
 0x540   : > { %14964 = vmatprep.mubr.msk.bf16.mxu0 %vm452_vm1, %v10484_v11  ;;  %v10746_v11 = vld [vmem:[#allocation3 + $0x93] sm:$0xff] }
 0x541   : > { %14387 = vmatmul.mubr.msk.bf16.gmra.mrb[72].mxu1 %vm452_vm1, %v18278_v8  ;;  %v10463_v8 = vld [vmem:[#allocation3 + $0x112] sm:$0xff] }
 0x542   : > { %14390 = vmatprep.mubr.msk.bf16.mxu1 %vm452_vm1, %v18303_v12  ;;  %v10487_v12 = vpack.c.bf16 %v10463_v8, %v10462_v10  ;;  %v10751_v8 = vld [vmem:[#allocation3 + $0xcb] sm:$0xff] }
 0x547   : > { %14965 = vmatmul.mubr.msk.bf16.gmra.mrb[8].mxu0 %vm452_vm1, %v10485_v49  ;;  %v10776_v49 = vpack.c.bf16 %v10747_v18, %v10746_v11  ;;  %v18708_v18 = vld [vmem:[#allocation4 + $0x4a] sm:$0xff] }
 0x548   : > { %14968 = vmatprep.mubr.msk.bf16.mxu0 %vm452_vm1, %v10486_v46  ;;  %v10750_v46 = vld [vmem:[#allocation3 + $0xc3] sm:$0xff] }
 0x549   : > { %14391 = vmatmul.mubr.msk.bf16.gmra.mrb[76].mxu1 %vm452_vm1, %v18305_v59  ;;  %v10467_v59 = vld [vmem:[#allocation3 + $0x142] sm:$0xff]  ;;  %v10778_v10 = vpack.c.bf16 %v10751_v8, %v10750_v46 }
 0x54a   : > { %14394 = vmatprep.mubr.msk.bf16.mxu1 %vm452_vm1, %v18322_v4  ;;  %v10489_v4 = vpack.c.bf16 %v10467_v59, %v10466_v57  ;;  %v10754_v59 = vld [vmem:[#allocation3 + $0xf3] sm:$0xff]  ;;  %v10760_v46 = vld [vmem:[#allocation3 + $0x13b] sm:$0xff]  ;;  %v10761_v8 = vld [vmem:[#allocation3 + $0x143] sm:$0xff] }
 0x54f   : > { %14969 = vmatmul.mubr.msk.bf16.gmra.mrb[12].mxu0 %vm452_vm1, %v10487_v12  ;;  %v11562_v12 = vld [vmem:[#allocation4] sm:$0xff] }
 0x550   : > { %14972 = vmatprep.mubr.msk.bf16.mxu0 %vm452_vm1, %v10488_v20  ;;  %v10753_v20 = vld [vmem:[#allocation3 + $0xe3] sm:$0xff]  ;;  %v11626_v57 = vmax.f32 %v11562_v12, %v11594_v9  ;;  %v18718_v12 = vld [vmem:[#allocation3 + $0x173] sm:$0xff] }
 0x551   : > { %14395 = vmatmul.mubr.msk.bf16.gmra.mrb[80].mxu1 %vm452_vm1, %v18324_v63  ;;  %v10471_v63 = vld [vmem:[#allocation3 + $0x172] sm:$0xff] }
 0x552   : > { %14398 = vmatprep.mubr.msk.bf16.mxu1 %vm452_vm1, %v18335_v29  ;;  %v10491_v29 = vpack.c.bf16 %v10471_v63, %v10470_v34  ;;  %v11658_v63 = vld [vmem:[#allocation4 + $0x2] sm:$0xff] }
 0x553   : > { %v11787_v34 = vld [vmem:[#allocation4 + $0x21] sm:$0xff]  ;;  %v11690_v30 = vmax.f32 %v11626_v57, %v11658_v63  ;;  %v18728_v57 = vld [vmem:[#allocation3 + $0x18b] sm:$0xff] }
 0x554   : > { %v18738_v63 = vld [vmem:[#allocation4 + $0x61] sm:$0xff] }
 0x557   : > { %14973 = vmatmul.mubr.msk.bf16.gmra.mrb[16].mxu0 %vm452_vm1, %v10489_v4 }
 0x558   : > { %14976 = vmatprep.mubr.msk.bf16.mxu0 %vm452_vm1, %v10490_v45 }
 0x559   : > { %14399 = vmatmul.mubr.msk.bf16.gmra.mrb[84].mxu1 %vm452_vm1, %v18337_v48  ;;  %v10475_v48 = vld [vmem:[#allocation3 + $0x1a2] sm:$0xff] }
 0x55a   : > { %14402 = vmatprep.mubr.msk.bf16.mxu1 %vm452_vm1, %v18347_v47  ;;  %v5742_v47 = vld [vmem:[#allocation3 + $0x19] sm:$0xff]  ;;  %v10493_v3 = vpack.c.bf16 %v10475_v48, %v10474_v31  ;;  %v18675_v31 = vld [vmem:[#allocation4 + $0x51] sm:$0xff] }
 0x55b   : > { %v5774_v60 = vpack.c.bf16 %v5743_v19, %v5742_v47  ;;  %v11722_v48 = vld [vmem:[#allocation4 + $0x18] sm:$0xff]  ;;  %v11629_v47 = vmax.f32 %v11723_v21, %v11787_v34  ;;  %v18673_v19 = vld [vmem:[#allocation4 + $0x50] sm:$0xff] }
 0x55c   : > { %v11633_v51 = vmax.f32 %v18673_v19, %v18675_v31 }
 0x55f   : > { %14977 = vmatmul.mubr.msk.bf16.gmra.mrb[20].mxu0 %vm452_vm1, %v10491_v29  ;;  %v10780_v29 = vpack.c.bf16 %v10755_v17, %v10754_v59  ;;  %v18726_v17 = vld [vmem:[#allocation3 + $0x183] sm:$0xff] }
 0x560   : > { %14980 = vmatprep.mubr.msk.bf16.mxu0 %vm452_vm1, %v10492_v24  ;;  %v18670_v24 = vld [vmem:[#allocation4 + $0x39] sm:$0xff] }
 0x561   : > { %14403 = vmatmul.mubr.msk.bf16.gmra.mrb[88].mxu1 %vm452_vm1, %v18349_v62  ;;  %v10495_v62 = vpack.c.bf16 %v10479_v27, %v10478_v35  ;;  %v10757_v35 = vld [vmem:[#allocation3 + $0x113] sm:$0xff] }
 0x562   : > { %14406 = vmatprep.mubr.msk.bf16.mxu1 %vm452_vm1, %v18359_v16  ;;  %v10742_v16 = vld [vmem:[#allocation3 + $0x63] sm:$0xff]  ;;  %v18687_v27 = vld [vmem:[#allocation4 + $0x30] sm:$0xff] }
 0x563   : > { %v10774_v41 = vpack.c.bf16 %v10743_v44, %v10742_v16  ;;  %v10758_v16 = vld [vmem:[#allocation3 + $0x123] sm:$0xff]  ;;  %v10759_v44 = vld [vmem:[#allocation3 + $0x12b] sm:$0xff] }
 0x567   : > { %14981 = vmatmul.mubr.msk.bf16.gmra.mrb[24].mxu0 %vm452_vm1, %v10493_v3  ;;  %v18681_v3 = vld [vmem:[#allocation4 + $0x48] sm:$0xff] }
 0x568   : > { %14984 = vmatprep.mubr.msk.bf16.mxu0 %vm452_vm1, %v10494_v28  ;;  %v18679_v28 = vld [vmem:[#allocation4 + $0x22] sm:$0xff] }
 0x569   : > { %14407 = vmatmul.mubr.msk.bf16.gmra.mrb[92].mxu1 %vm452_vm1, %v18361_v6  ;;  %v10744_v6 = vld [vmem:[#allocation3 + $0x7b] sm:$0xff] }
 0x56a   : > { %14412 = vmatprep.mubr.msk.bf16.mxu1 %vm452_vm1, %v5774_v60  ;;  %v10775_v15 = vpack.c.bf16 %v10745_v26, %v10744_v6  ;;  %v18683_v60 = vld [vmem:[#allocation4 + $0x49] sm:$0xff]  ;;  %v18704_v6 = vld [vmem:[#allocation4 + $0x52] sm:$0xff] }
 0x56b   : > { %v11632_v26 = vmax.f32 %v18681_v3, %v18683_v60  ;;  %v11697_v38 = vmax.f32 %v11633_v51, %v18704_v6  ;;  %v18835_v51 = vld [vmem:[#allocation4 + $0xa8] sm:$0xff] }
 0x56d   : > { %v11696_v59 = vmax.f32 %v11632_v26, %v18708_v18  ;;  %v18774_v26 = vld [vmem:[#allocation3 + $0x1bb] sm:$0xff] }
 0x56f   : > { %14985 = vmatmul.mubr.msk.bf16.gmra.mrb[28].mxu0 %vm452_vm1, %v10495_v62  ;;  %v18689_v62 = vld [vmem:[#allocation4 + $0x38] sm:$0xff] }
 0x570   : > { %14990 = vmatprep.mubr.msk.bf16.mxu0 %vm452_vm1, %v10774_v41  ;;  %v11631_v41 = vmax.f32 %v18689_v62, %v18670_v24 }
 0x571   : > { %14413 = vmatmul.mubr.msk.bf16.vlgmr.msra.gmra.mrb[64].mxu1 %vm452_vm1, %v5775_v43 }
 0x572   : > { %15057 = vmatpush3.bf16.msra.mxu1 %v12180_v32  ;;  %14416 = vmatprep.mubr.msk.bf16.mxu1 %vm452_vm1, %v5776_v0  ;;  %v18699_v32 = vld [vmem:[#allocation4 + $0x32] sm:$0xff]  ;;  %v11693_v0 = vmax.f32 %v11629_v47, %v18679_v28  ;;  %v11695_v5 = vmax.f32 %v11631_v41, %v18701_v40 }
 0x577   : > { %14991 = vmatmul.mubr.msk.bf16.vlgmr.msra.gmra.mrb[0].mxu0 %vm452_vm1, %v10775_v15  ;;  %v10782_v15 = vpack.c.bf16 %v10759_v44, %v10758_v16  ;;  %v18757_v16 = vld [vmem:[#allocation3 + $0x7c] sm:$0xff]  ;;  %v18759_v44 = vld [vmem:[#allocation3 + $0x84] sm:$0xff] }
 0x578   : > { %14994 = vmatprep.mubr.msk.bf16.mxu0 %vm452_vm1, %v10776_v49  ;;  %15023 = vmatpush3.bf16.msra.mxu0 %v11135_v58  ;;  %19846 = vst [vmem:[#allocation10_spill] sm:$0xff] %v18757_v16  ;;  %19847 = vst [vmem:[#allocation11_spill] sm:$0xff] %v18759_v44 }
 0x579   : > { %14417 = vmatmul.mubr.msk.bf16.gmra.mrb[68].mxu1 %vm452_vm1, %v18376_v14  ;;  %v11595_v14 = vld [vmem:[#allocation4 + $0x9] sm:$0xff] }
 0x57a   : > { %14420 = vmatprep.mubr.msk.bf16.mxu1 %vm452_vm1, %v18392_v39  ;;  %v10752_v39 = vld [vmem:[#allocation3 + $0xdb] sm:$0xff]  ;;  %v11627_v4 = vmax.f32 %v11563_v2, %v11595_v14  ;;  %v18716_v2 = vld [vmem:[#allocation3 + $0x16b] sm:$0xff] }
 0x57b   : > { %v10779_v45 = vpack.c.bf16 %v10753_v20, %v10752_v39  ;;  %v11757_v39 = vmax.f32 %v11693_v0, %v18689_v62  ;;  %v18721_v20 = vld [vmem:[#allocation4 + $0x68] sm:$0xff] }
 0x57c   : > { %v11691_v56 = vmax.f32 %v11627_v4, %v11659_v42  ;;  %v18730_v4 = vld [vmem:[#allocation4 + $0x60] sm:$0xff] }
 0x57e   : > { %v11755_v43 = vmax.f32 %v11691_v56, %v11723_v21  ;;  %v18734_v21 = vld [vmem:[#allocation3 + $0x19b] sm:$0xff]  ;;  %v18752_v56 = vld [vmem:[#allocation3 + $0x6c] sm:$0xff] }
 0x57f   : > { %14995 = vmatmul.mubr.msk.bf16.gmra.mrb[4].mxu0 %vm452_vm1, %v10777_v50  ;;  %v10762_v50 = vld [vmem:[#allocation3 + $0x153] sm:$0xff]  ;;  %19845 = vst [vmem:[#allocation9_spill] sm:$0xff] %v18752_v56  ;;  %v19852_v56 = vpack.c.bf16 %v18728_v57, %v18726_v17  ;;  %v18888_v17 = vld [vmem:[#allocation4 + $0xc1] sm:$0xff]  ;;  %v18890_v57 = vld [vmem:[#allocation4 + $0xc9] sm:$0xff] }
 0x580   : > { %14998 = vmatprep.mubr.msk.bf16.mxu0 %vm452_vm1, %v10778_v10  ;;  %v10763_v10 = vld [vmem:[#allocation3 + $0x15b] sm:$0xff]  ;;  %v11819_v14 = vmax.f32 %v11755_v43, %v11787_v34  ;;  %v18766_v43 = vld [vmem:[#allocation3 + $0x1b3] sm:$0xff] }
 0x581   : > { %14421 = vmatmul.mubr.msk.bf16.gmra.mrb[72].mxu1 %vm452_vm1, %v18396_v53  ;;  %v11786_v53 = vld [vmem:[#allocation4 + $0x19] sm:$0xff]  ;;  %v10784_v41 = vpack.c.bf16 %v10763_v10, %v10762_v50  ;;  %v18790_v50 = vld [vmem:[#allocation4 + $0x62] sm:$0xff]  ;;  %v18792_v10 = vld [vmem:[#allocation4 + $0x6a] sm:$0xff] }
 0x582   : > { %14424 = vmatprep.mubr.msk.bf16.mxu1 %vm452_vm1, %v18415_v1  ;;  %v10756_v1 = vld [vmem:[#allocation3 + $0x10b] sm:$0xff]  ;;  %v11628_v22 = vmax.f32 %v11722_v48, %v11786_v53  ;;  %v11883_v47 = vmax.f32 %v11819_v14, %v18679_v28  ;;  %v18770_v28 = vld [vmem:[#allocation3 + $0x9c] sm:$0xff] }
 0x583   : > { %v10781_v11 = vpack.c.bf16 %v10757_v35, %v10756_v1  ;;  %v18746_v1 = vld [vmem:[#allocation4 + $0x78] sm:$0xff]  ;;  %v11821_v35 = vmax.f32 %v11757_v39, %v18670_v24  ;;  %19849 = vst [vmem:[#allocation13_spill] sm:$0xff] %v18770_v28 }
 0x584   : > { %v11692_v58 = vmax.f32 %v11628_v22, %v18691_v55  ;;  %v11760_v22 = vmax.f32 %v11696_v59, %v18730_v4  ;;  %v18795_v14 = vld [vmem:[#allocation4 + $0x7a] sm:$0xff]  ;;  %v11948_v59 = vmax.f32 %v11883_v47, %v18689_v62 }
 0x585   : > { %v18843_v28 = vld [vmem:[#allocation4 + $0x98] sm:$0xff] }
 0x586   : > { %v11756_v42 = vmax.f32 %v11692_v58, %v18687_v27  ;;  %v11634_v58 = vmax.f32 %v18730_v4, %v18738_v63 }
 0x587   : > { %14999 = vmatmul.mubr.msk.bf16.gmra.mrb[8].mxu0 %vm452_vm1, %v10779_v45  ;;  %v18736_v45 = vld [vmem:[#allocation3 + $0x1a3] sm:$0xff] }
 0x588   : > { %15002 = vmatprep.mubr.msk.bf16.mxu0 %vm452_vm1, %v10780_v29  ;;  %v18743_v29 = vld [vmem:[#allocation4 + $0x69] sm:$0xff]  ;;  %v11698_v47 = vmax.f32 %v11634_v58, %v18790_v50 }
 0x589   : > { %14425 = vmatmul.mubr.msk.bf16.gmra.mrb[76].mxu1 %vm452_vm1, %v18419_v54  ;;  %v11630_v54 = vmax.f32 %v18687_v27, %v18668_v7  ;;  %v18837_v58 = vld [vmem:[#allocation4 + $0xa9] sm:$0xff] }
 0x58a   : > { %14428 = vmatprep.mubr.msk.bf16.mxu1 %vm452_vm1, %v18435_v23  ;;  %v11754_v23 = vmax.f32 %v11690_v30, %v11722_v48  ;;  %v18748_v30 = vld [vmem:[#allocation4 + $0x79] sm:$0xff] }
 0x58b   : > { %v11694_v49 = vmax.f32 %v11630_v54, %v18699_v32  ;;  %v10783_v54 = vpack.c.bf16 %v10761_v8, %v10760_v46 }
 0x58c   : > { %v11818_v9 = vmax.f32 %v11754_v23, %v11786_v53  ;;  %v11761_v53 = vmax.f32 %v11697_v38, %v18721_v20  ;;  %v11820_v38 = vmax.f32 %v11756_v42, %v18668_v7  ;;  %v11885_v42 = vmax.f32 %v11821_v35, %v18701_v40  ;;  %v18833_v23 = vld [vmem:[#allocation4 + $0x90] sm:$0xff] }
 0x58d   : > { %v11758_v34 = vmax.f32 %v11694_v49, %v18681_v3  ;;  %v11635_v49 = vmax.f32 %v18721_v20, %v18743_v29 }
 0x58e   : > { %v11882_v48 = vmax.f32 %v11818_v9, %v18691_v55  ;;  %v18768_v55 = vld [vmem:[#allocation3 + $0x94] sm:$0xff]  ;;  %v11825_v9 = vmax.f32 %v11761_v53, %v18743_v29  ;;  %v11884_v53 = vmax.f32 %v11820_v38, %v18699_v32 }
 0x58f   : > { %15003 = vmatmul.mubr.msk.bf16.gmra.mrb[12].mxu0 %vm452_vm1, %v10781_v11  ;;  %19848 = vst [vmem:[#allocation12_spill] sm:$0xff] %v18768_v55  ;;  %v18776_v11 = vld [vmem:[#allocation4 + $0x80] sm:$0xff]  ;;  %v11822_v46 = vmax.f32 %v11758_v34, %v18683_v60  ;;  %v11824_v34 = vmax.f32 %v11760_v22, %v18738_v63  ;;  %v11699_v35 = vmax.f32 %v11635_v49, %v18792_v10  ;;  %v18824_v22 = vld [vmem:[#allocation4 + $0x91] sm:$0xff] }
 0x590   : > { %15006 = vmatprep.mubr.msk.bf16.mxu0 %vm452_vm1, %v10782_v15  ;;  %v18778_v15 = vld [vmem:[#allocation4 + $0x81] sm:$0xff]  ;;  %v11947_v39 = vmax.f32 %v11882_v48, %v18687_v27  ;;  %v12012_v55 = vmax.f32 %v11948_v59, %v18670_v24  ;;  %v11638_v16 = vmax.f32 %v18833_v23, %v18824_v22  ;;  %v11762_v24 = vmax.f32 %v11698_v47, %v18746_v1 }
 0x591   : > { %14429 = vmatmul.mubr.msk.bf16.gmra.mrb[80].mxu1 %vm452_vm1, %v18439_v25  ;;  %v11759_v25 = vmax.f32 %v11695_v5, %v18673_v19  ;;  %v11636_v5 = vmax.f32 %v18746_v1, %v18748_v30  ;;  %v11637_v62 = vmax.f32 %v18776_v11, %v18778_v15  ;;  %v18820_v48 = vld [vmem:[#allocation4 + $0x82] sm:$0xff]  ;;  %v11886_v0 = vmax.f32 %v11822_v46, %v18708_v18 }
 0x592   : > { %14432 = vmatprep.mubr.msk.bf16.mxu1 %vm452_vm1, %v18455_v52  ;;  %v18750_v52 = vld [vmem:[#allocation3 + $0x64] sm:$0xff]  ;;  %v12011_v49 = vmax.f32 %v11947_v39, %v18668_v7  ;;  %v11888_v38 = vmax.f32 %v11824_v34, %v18790_v50  ;;  %v18856_v39 = vld [vmem:[#allocation4 + $0x9a] sm:$0xff]  ;;  %v18861_v34 = vld [vmem:[#allocation4 + $0xb1] sm:$0xff]  ;;  %v19851_v46 = vpack.c.bf16 %v18718_v12, %v18716_v2  ;;  %v11949_v47 = vmax.f32 %v11884_v53, %v18681_v3 }
 0x593   : > { %19844 = vst [vmem:[#allocation8_spill] sm:$0xff] %v18750_v52  ;;  %v11823_v8 = vmax.f32 %v11759_v25, %v18675_v31  ;;  %v18804_v25 = vld [vmem:[#allocation3 + $0x1cb] sm:$0xff]  ;;  %v11700_v27 = vmax.f32 %v11636_v5, %v18795_v14  ;;  %v11950_v5 = vmax.f32 %v11885_v42, %v18673_v19  ;;  %v11763_v19 = vmax.f32 %v11699_v35, %v18776_v11 }
 0x594   : > { %19850 = vst [vmem:[#allocation14_spill] sm:$0xff] %v18804_v25  ;;  %v18859_v42 = vld [vmem:[#allocation4 + $0xb0] sm:$0xff]  ;;  %v11951_v35 = vmax.f32 %v11886_v0, %v18730_v4  ;;  %v12075_v25 = vmax.f32 %v12011_v49, %v18699_v32  ;;  %v12076_v2 = vmax.f32 %v12012_v55, %v18701_v40  ;;  %v11953_v3 = vmax.f32 %v11888_v38, %v18746_v1 }
 0x595   : > { %v11764_v59 = vmax.f32 %v11700_v27, %v18833_v23  ;;  %v18873_v52 = vld [vmem:[#allocation4 + $0xaa] sm:$0xff]  ;;  %v12014_v12 = vmax.f32 %v11950_v5, %v18675_v31  ;;  %v11641_v32 = vmax.f32 %v18859_v42, %v18861_v34  ;;  %v11826_v31 = vmax.f32 %v11762_v24, %v18748_v30  ;;  %v18899_v1 = vld [vmem:[#allocation4 + $0xb2] sm:$0xff] }
 0x596   : > { %v12015_v55 = vmax.f32 %v11951_v35, %v18738_v63  ;;  %v12017_v49 = vmax.f32 %v11953_v3, %v18748_v30  ;;  %v19853_v24 = vpack.c.bf16 %v18736_v45, %v18734_v21  ;;  %v18939_v35 = vld [vmem:[#allocation4 + $0xd8] sm:$0xff]  ;;  %v18953_v45 = vld [vmem:[#allocation4 + $0xe1] sm:$0xff] }
 0x597   : > { %15007 = vmatmul.mubr.msk.bf16.gmra.mrb[16].mxu0 %vm452_vm1, %v10783_v54  ;;  %v18806_v54 = vld [vmem:[#allocation3 + $0x1d3] sm:$0xff]  ;;  %v11828_v40 = vmax.f32 %v11764_v59, %v18824_v22  ;;  %v11890_v30 = vmax.f32 %v11826_v31, %v18795_v14  ;;  %v12078_v59 = vmax.f32 %v12014_v12, %v18704_v6 }
 0x598   : > { %15010 = vmatprep.mubr.msk.bf16.mxu0 %vm452_vm1, %v10784_v41  ;;  %v18826_v41 = vld [vmem:[#allocation4 + $0x99] sm:$0xff]  ;;  %v12079_v21 = vmax.f32 %v12015_v55, %v18790_v50  ;;  %v18957_v12 = vld [vmem:[#allocation4 + $0xf1] sm:$0xff] }
 0x599   : > { %14433 = vmatmul.mubr.msk.bf16.gmra.mrb[84].mxu1 %vm452_vm1, %v18459_v13  ;;  %v11889_v13 = vmax.f32 %v11825_v9, %v18792_v10  ;;  %v11701_v9 = vmax.f32 %v11637_v62, %v18820_v48  ;;  %v11639_v7 = vmax.f32 %v18843_v28, %v18826_v41  ;;  %v11640_v62 = vmax.f32 %v18835_v51, %v18837_v58  ;;  %v18965_v3 = vld [vmem:[#allocation4 + $0xf9] sm:$0xff] }
 0x59a   : > { %14436 = vmatprep.mubr.msk.bf16.mxu1 %vm452_vm1, %v18475_v37  ;;  %v11887_v37 = vmax.f32 %v11823_v8, %v18704_v6  ;;  %v18847_v8 = vld [vmem:[#allocation4 + $0x92] sm:$0xff]  ;;  %v18987_v55 = vld [vmem:[#allocation4 + $0xda] sm:$0xff] }
 0x59b   : > { %v11954_v27 = vmax.f32 %v11889_v13, %v18776_v11  ;;  %v11702_v4 = vmax.f32 %v11638_v16, %v18847_v8  ;;  %v11703_v0 = vmax.f32 %v11639_v7, %v18856_v39  ;;  %v12013_v16 = vmax.f32 %v11949_v47, %v18683_v60  ;;  %v18906_v13 = vld [vmem:[#allocation4 + $0xc0] sm:$0xff] }
 0x59c   : > { %v11952_v44 = vmax.f32 %v11887_v37, %v18721_v20  ;;  %v11765_v20 = vmax.f32 %v11701_v9, %v18843_v28  ;;  %v12107_v37 = vpack.c.bf16 %v12076_v2, %v12075_v25  ;;  %v11642_v5 = vmax.f32 %v18906_v13, %v18888_v17  ;;  %v18951_v6 = vld [vmem:[#allocation4 + $0xd9] sm:$0xff] }
 0x59d   : > { %v12018_v53 = vmax.f32 %v11954_v27, %v18778_v15  ;;  %v11766_v63 = vmax.f32 %v11702_v4, %v18835_v51  ;;  %v11705_v25 = vmax.f32 %v11641_v32, %v18899_v1  ;;  %v11892_v9 = vmax.f32 %v11828_v40, %v18847_v8  ;;  %v18941_v27 = vld [vmem:[#allocation4 + $0xe0] sm:$0xff]  ;;  %v18972_v32 = vld [vmem:[#allocation4 + $0xf0] sm:$0xff] }
 0x59e   : > { %v12016_v11 = vmax.f32 %v11952_v44, %v18743_v29  ;;  %v11829_v60 = vmax.f32 %v11765_v20, %v18826_v41  ;;  %v11767_v29 = vmax.f32 %v11703_v0, %v18859_v42  ;;  %v18918_v44 = vld [vmem:[#allocation4 + $0xc2] sm:$0xff]  ;;  %v19854_v2 = vpack.c.bf16 %v18774_v26, %v18766_v43  ;;  %v18976_v40 = vld [vmem:[#allocation3 + $0xb4] sm:$0xff] }
 0x59f   : > { %15011 = vmatmul.mubr.msk.bf16.gmra.mrb[20].mxu0 %vm452_vm1, %v19851_v46  ;;  %v18937_v47 = vmax.f32 %v12018_v53, %v18820_v48  ;;  %v11830_v26 = vmax.f32 %v11766_v63, %v18837_v58  ;;  %v11955_v20 = vmax.f32 %v11890_v30, %v18833_v23  ;;  %v11957_v0 = vmax.f32 %v11892_v9, %v18835_v51 }
 0x5a0   : > { %15014 = vmatprep.mubr.msk.bf16.mxu0 %vm452_vm1, %v19852_v56  ;;  %v11704_v56 = vmax.f32 %v11640_v62, %v18873_v52  ;;  %v18934_v62 = vmax.f32 %v12016_v11, %v18792_v10  ;;  %v11706_v10 = vmax.f32 %v11642_v5, %v18918_v44  ;;  %v11893_v43 = vmax.f32 %v11829_v60, %v18856_v39  ;;  %v18989_v11 = vld [vmem:[#allocation4 + $0xe2] sm:$0xff] }
 0x5a1   : > { %14437 = vmatmul.mubr.msk.bf16.gmra.mrb[88].mxu1 %vm452_vm1, %v18479_v61  ;;  %v11827_v61 = vmax.f32 %v11763_v19, %v18778_v15  ;;  %v18920_v15 = vld [vmem:[#allocation4 + $0xca] sm:$0xff]  ;;  %v12077_v19 = vmax.f32 %v12013_v16, %v18708_v18  ;;  %v18949_v18 = vmax.f32 %v12017_v49, %v18795_v14  ;;  %v11831_v50 = vmax.f32 %v11767_v29, %v18861_v34  ;;  %v18993_v49 = vld [vmem:[#allocation4 + $0xf2] sm:$0xff] }
 0x5a2   : > { %14440 = vmatprep.mubr.msk.bf16.mxu1 %vm452_vm1, %v18495_v36  ;;  %v18908_v36 = vld [vmem:[#allocation4 + $0xc8] sm:$0xff]  ;;  %v11768_v7 = vmax.f32 %v11704_v56, %v18906_v13  ;;  %v18978_v56 = vld [vmem:[#allocation4 + $0xf8] sm:$0xff]  ;;  %v11644_v16 = vmax.f32 %v18939_v35, %v18951_v6  ;;  %v11645_v23 = vmax.f32 %v18941_v27, %v18953_v45  ;;  %v11646_v51 = vmax.f32 %v18972_v32, %v18957_v12 }
 0x5a3   : > { %v11643_v38 = vmax.f32 %v18908_v36, %v18890_v57  ;;  %v11891_v46 = vmax.f32 %v11827_v61, %v18820_v48  ;;  %v11769_v14 = vmax.f32 %v11705_v25, %v18908_v36  ;;  %v12108_v31 = vpack.c.bf16 %v12078_v59, %v12077_v19  ;;  %v18974_v61 = vld [vmem:[#allocation3 + $0xac] sm:$0xff]  ;;  %v19001_v25 = vld [vmem:[#allocation4 + $0xfa] sm:$0xff] }
 0x5a4   : > { %v11770_v53 = vmax.f32 %v11706_v10, %v18939_v35  ;;  %v11647_v5 = vmax.f32 %v18978_v56, %v18965_v3  ;;  %v11894_v60 = vmax.f32 %v11830_v26, %v18873_v52  ;;  %v11895_v63 = vmax.f32 %v11831_v50, %v18899_v1 }
 0x5a5   : > { %v11707_v48 = vmax.f32 %v11643_v38, %v18920_v15  ;;  %v11956_v4 = vmax.f32 %v11891_v46, %v18843_v28  ;;  %v12109_v28 = vpack.c.bf16 %v18934_v62, %v12079_v21  ;;  %v11958_v38 = vmax.f32 %v11893_v43, %v18859_v42  ;;  %v19026_v43 = vld [vmem:[#allocation4 + $0x109] sm:$0xff] }
 0x5a6   : > { %v11833_v29 = vmax.f32 %v11769_v14, %v18890_v57  ;;  %v12019_v30 = vmax.f32 %v11955_v20, %v18824_v22  ;;  %v12021_v9 = vmax.f32 %v11957_v0, %v18837_v58  ;;  %v11071_v42 = vpack.c.bf16 %v18976_v40, %v18974_v61 }
 0x5a7   : > { %15015 = vmatmul.mubr.msk.bf16.gmra.mrb[24].mxu0 %vm452_vm1, %v19853_v24  ;;  %v12020_v46 = vmax.f32 %v11956_v4, %v18826_v41  ;;  %v19855_v24 = vld [vmem:[#allocation14_spill] sm:$0xff]  ;;  %v11708_v59 = vmax.f32 %v11644_v16, %v18987_v55  ;;  %v11709_v62 = vmax.f32 %v11645_v23, %v18989_v11  ;;  %v11710_v22 = vmax.f32 %v11646_v51, %v18993_v49  ;;  %v19858_v41 = vld [vmem:[#allocation8_spill] sm:$0xff] }
 0x5a8   : > { %15018 = vmatprep.mubr.msk.bf16.mxu0 %vm452_vm1, %v19854_v2  ;;  %v19856_v19 = vpack.c.bf16 %v18806_v54, %v19855_v24  ;;  %v19857_v2 = vld [vmem:[#allocation9_spill] sm:$0xff]  ;;  %v12110_v58 = vpack.c.bf16 %v18937_v47, %v18949_v18  ;;  %v11834_v54 = vmax.f32 %v11770_v53, %v18951_v6  ;;  %v11711_v26 = vmax.f32 %v11647_v5, %v19001_v25  ;;  %v19034_v18 = vld [vmem:[#allocation4 + $0x110] sm:$0xff]  ;;  %v19048_v23 = vld [vmem:[#allocation4 + $0x121] sm:$0xff] }
 0x5a9   : > { %14441 = vmatmul.mubr.msk.bf16.gmra.mrb[92].mxu1 %vm452_vm1, %v18499_v33  ;;  %v11832_v33 = vmax.f32 %v11768_v7, %v18888_v17  ;;  %v19859_v21 = vpack.c.bf16 %v19857_v2, %v19858_v41  ;;  %v12022_v50 = vmax.f32 %v11958_v38, %v18861_v34  ;;  %v11959_v14 = vmax.f32 %v11894_v60, %v18906_v13  ;;  %v19036_v4 = vld [vmem:[#allocation4 + $0x111] sm:$0xff]  ;;  %v19050_v51 = vld [vmem:[#allocation4 + $0x129] sm:$0xff]  ;;  %v19861_v24 = vld [vmem:[#allocation10_spill] sm:$0xff] }
 0x5aa   : > { %15058 = vmatprep.mubr.msk.bf16.mxu1 %vm452_vm1, %v12107_v37  ;;  %v11771_v37 = vmax.f32 %v11707_v48, %v18941_v27  ;;  %v19024_v48 = vld [vmem:[#allocation4 + $0x108] sm:$0xff]  ;;  %v11960_v20 = vmax.f32 %v11895_v63, %v18908_v36  ;;  %v11897_v47 = vmax.f32 %v11833_v29, %v18920_v15  ;;  %v12083_v0 = vmax.f32 %v12019_v30, %v18847_v8  ;;  %v19067_v63 = vld [vmem:[#allocation4 + $0x112] sm:$0xff]  ;;  %v19069_v29 = vld [vmem:[#allocation4 + $0x120] sm:$0xff] }
 0x5ab   : > { %v11896_v7 = vmax.f32 %v11832_v33, %v18918_v44  ;;  %v12084_v33 = vmax.f32 %v12020_v46, %v18856_v39  ;;  %v11772_v13 = vmax.f32 %v11708_v59, %v18972_v32  ;;  %v11773_v36 = vmax.f32 %v11709_v62, %v18978_v56  ;;  %v19071_v30 = vld [vmem:[#allocation4 + $0x128] sm:$0xff] }
 0x5ac   : > { %v11835_v10 = vmax.f32 %v11771_v37, %v18953_v45  ;;  %v11774_v16 = vmax.f32 %v11710_v22, %v19024_v48  ;;  %v11648_v8 = vmax.f32 %v19024_v48, %v19026_v43  ;;  %v11898_v39 = vmax.f32 %v11834_v54, %v18987_v55  ;;  %v19073_v46 = vld [vmem:[#allocation3 + $0xc4] sm:$0xff]  ;;  %v19864_v54 = vld [vmem:[#allocation12_spill] sm:$0xff] }
 0x5ad   : > { %v11961_v34 = vmax.f32 %v11896_v7, %v18939_v35  ;;  %v11775_v35 = vmax.f32 %v11711_v26, %v19034_v18  ;;  %v11649_v53 = vmax.f32 %v19034_v18, %v19036_v4  ;;  %v19062_v37 = vmax.f32 %v12022_v50, %v18899_v1  ;;  %v19089_v2 = vld [vmem:[#allocation4 + $0x122] sm:$0xff] }
 0x5ae   : > { %v12023_v5 = vmax.f32 %v11959_v14, %v18888_v17  ;;  %v12024_v38 = vmax.f32 %v11960_v20, %v18890_v57  ;;  %v11962_v60 = vmax.f32 %v11897_v47, %v18941_v27  ;;  %v12111_v7 = vpack.c.bf16 %v12084_v33, %v12083_v0  ;;  %v19860_v27 = vld [vmem:[#allocation11_spill] sm:$0xff] }
 0x5af   : > { %15019 = vmatmul.mubr.msk.bf16.gmra.mrb[28].mxu0 %vm452_vm1, %v19856_v19  ;;  %v12025_v1 = vmax.f32 %v11961_v34, %v18951_v6  ;;  %v11650_v17 = vmax.f32 %v19069_v29, %v19048_v23  ;;  %v11651_v57 = vmax.f32 %v19071_v30, %v19050_v51  ;;  %v19862_v19 = vpack.c.bf16 %v19860_v27, %v19861_v24  ;;  %v19091_v6 = vld [vmem:[#allocation4 + $0x12a] sm:$0xff]  ;;  %v19153_v27 = vld [vmem:[#allocation4 + $0x13a] sm:$0xff]  ;;  %v19155_v24 = vld [vmem:[#allocation4 + $0x142] sm:$0xff] }
 0x5b0   : > { %15024 = vmatprep.mubr.msk.bf16.mxu0 %vm452_vm1, %v19859_v21  ;;  %v11836_v59 = vmax.f32 %v11772_v13, %v18957_v12  ;;  %v11837_v62 = vmax.f32 %v11773_v36, %v18965_v3  ;;  %v11838_v22 = vmax.f32 %v11774_v16, %v19026_v43  ;;  %v19863_v21 = vld [vmem:[#allocation13_spill] sm:$0xff]  ;;  %v11963_v26 = vmax.f32 %v11898_v39, %v18972_v32  ;;  %v19120_v16 = vld [vmem:[#allocation4 + $0x141] sm:$0xff] }
 0x5b1   : > { %15059 = vmatmul.mubr.msk.bf16.vlgmr.msra.gmra.mrb[96].mxu1 %vm452_vm1, %v12108_v31  ;;  %v19042_v31 = vmax.f32 %v12021_v9, %v18873_v52  ;;  %v11899_v52 = vmax.f32 %v11835_v10, %v18989_v11  ;;  %v19075_v9 = vld [vmem:[#allocation3 + $0xcc] sm:$0xff]  ;;  %v19865_v10 = vpack.c.bf16 %v19863_v21, %v19864_v54  ;;  %v11839_v14 = vmax.f32 %v11775_v35, %v19036_v4  ;;  %v19108_v13 = vld [vmem:[#allocation4 + $0x138] sm:$0xff] }
 0x5b2   : > { %15062 = vmatprep.mubr.msk.bf16.mxu1 %vm452_vm1, %v12109_v28  ;;  %v19056_v28 = vld [vmem:[#allocation4 + $0x10a] sm:$0xff]  ;;  %v11713_v20 = vmax.f32 %v11649_v53, %v19067_v63  ;;  %v11072_v47 = vpack.c.bf16 %v19075_v9, %v19073_v46  ;;  %v12087_v0 = vmax.f32 %v12023_v5, %v18918_v44  ;;  %v12088_v33 = vmax.f32 %v12024_v38, %v18920_v15  ;;  %v19118_v36 = vld [vmem:[#allocation4 + $0x139] sm:$0xff] }
 0x5b3   : > { %v11712_v41 = vmax.f32 %v11648_v8, %v19056_v28  ;;  %v11964_v50 = vmax.f32 %v11899_v52, %v18978_v56  ;;  %v12026_v34 = vmax.f32 %v11962_v60, %v18953_v45  ;;  %v12112_v32 = vpack.c.bf16 %v19062_v37, %v19042_v31  ;;  %v19130_v52 = vld [vmem:[#allocation4 + $0x159] sm:$0xff]  ;;  %v19134_v53 = vld [vmem:[#allocation3 + $0xe4] sm:$0xff] }
 0x5b4   : > { %v19114_v56 = vmax.f32 %v12025_v1, %v18987_v55  ;;  %v11714_v44 = vmax.f32 %v11650_v17, %v19089_v2  ;;  %v11715_v15 = vmax.f32 %v11651_v57, %v19091_v6  ;;  %v11900_v45 = vmax.f32 %v11836_v59, %v18993_v49  ;;  %v19128_v55 = vld [vmem:[#allocation4 + $0x151] sm:$0xff]  ;;  %v19132_v35 = vld [vmem:[#allocation3 + $0xdc] sm:$0xff] }
 0x5b5   : > { %v11901_v8 = vmax.f32 %v11837_v62, %v19001_v25  ;;  %v11902_v39 = vmax.f32 %v11838_v22, %v19056_v28  ;;  %v11776_v31 = vmax.f32 %v11712_v41, %v19069_v29  ;;  %v12027_v37 = vmax.f32 %v11963_v26, %v18957_v12  ;;  %v19140_v46 = vld [vmem:[#allocation3 + $0xf4] sm:$0xff] }
 0x5b6   : > { %v12028_v5 = vmax.f32 %v11964_v50, %v18965_v3  ;;  %v11903_v38 = vmax.f32 %v11839_v14, %v19067_v63  ;;  %v11777_v60 = vmax.f32 %v11713_v20, %v19071_v30  ;;  %v12113_v9 = vpack.c.bf16 %v12088_v33, %v12087_v0  ;;  %v19145_v1 = vld [vmem:[#allocation4 + $0x150] sm:$0xff]  ;;  %v19147_v17 = vld [vmem:[#allocation4 + $0x158] sm:$0xff]  ;;  %v19186_v20 = vld [vmem:[#allocation4 + $0x168] sm:$0xff] }
 0x5b7   : > { %15025 = vmatmul.mubr.msk.bf16.vlgmr.msra.gmra.mrb[0].mxu0 %vm452_vm1, %v19862_v19  ;;  %v11652_v57 = vmax.f32 %v19108_v13, %v19118_v36  ;;  %v11049_v3 = vld [vmem:[#allocation3 + $0xfc] sm:$0xff]  ;;  %v11778_v19 = vmax.f32 %v11714_v44, %v19108_v13  ;;  %v11654_v59 = vmax.f32 %v19145_v1, %v19128_v55  ;;  %v11655_v62 = vmax.f32 %v19147_v17, %v19130_v52  ;;  %v19195_v0 = vld [vmem:[#allocation4 + $0x171] sm:$0xff] }
 0x5b8   : > { %15028 = vmatprep.mubr.msk.bf16.mxu0 %vm452_vm1, %v19865_v10  ;;  %v11965_v22 = vmax.f32 %v11900_v45, %v19024_v48  ;;  %v11966_v41 = vmax.f32 %v11901_v8, %v19034_v18  ;;  %v11967_v21 = vmax.f32 %v11902_v39, %v19069_v29  ;;  %v11840_v54 = vmax.f32 %v11776_v31, %v19048_v23  ;;  %v19171_v10 = vld [vmem:[#allocation4 + $0x152] sm:$0xff]  ;;  %v19173_v26 = vld [vmem:[#allocation4 + $0x15a] sm:$0xff] }
 0x5b9   : > { %15063 = vmatmul.mubr.msk.bf16.gmra.mrb[100].mxu1 %vm452_vm1, %v12110_v58  ;;  %v19116_v58 = vld [vmem:[#allocation4 + $0x140] sm:$0xff]  ;;  %v12091_v50 = vmax.f32 %v12027_v37, %v18993_v49  ;;  %v12092_v61 = vmax.f32 %v12028_v5, %v19001_v25  ;;  %v11968_v40 = vmax.f32 %v11903_v38, %v19071_v30  ;;  %v11073_v48 = vpack.c.bf16 %v19134_v53, %v19132_v35  ;;  %v19191_v30 = vld [vmem:[#allocation4 + $0x170] sm:$0xff] }
 0x5ba   : > { %15066 = vmatprep.mubr.msk.bf16.mxu1 %vm452_vm1, %v12111_v7  ;;  %v19143_v7 = vmax.f32 %v12026_v34, %v18989_v11  ;;  %v11653_v12 = vmax.f32 %v19116_v58, %v19120_v16  ;;  %v11779_v11 = vmax.f32 %v11715_v15, %v19116_v58  ;;  %v11074_v18 = vpack.c.bf16 %v11049_v3, %v19140_v46  ;;  %v19215_v38 = vld [vmem:[#allocation4 + $0x16a] sm:$0xff] }
 0x5bb   : > { %v11716_v29 = vmax.f32 %v11652_v57, %v19153_v27  ;;  %v11842_v49 = vmax.f32 %v11778_v19, %v19118_v36  ;;  %v11718_v33 = vmax.f32 %v11654_v59, %v19171_v10  ;;  %v11719_v34 = vmax.f32 %v11655_v62, %v19173_v26  ;;  %v11050_v46 = vld [vmem:[#allocation3 + $0x10c] sm:$0xff]  ;;  %v11051_v57 = vld [vmem:[#allocation3 + $0x114] sm:$0xff] }
 0x5bc   : > { %v11717_v14 = vmax.f32 %v11653_v12, %v19155_v24  ;;  %v11843_v25 = vmax.f32 %v11779_v11, %v19120_v16  ;;  %v12029_v44 = vmax.f32 %v11965_v22, %v19026_v43  ;;  %v12030_v15 = vmax.f32 %v11966_v41, %v19036_v4  ;;  %v11052_v12 = vld [vmem:[#allocation3 + $0x124] sm:$0xff]  ;;  %v11053_v3 = vld [vmem:[#allocation3 + $0x12c] sm:$0xff] }
 0x5bd   : > { %v11904_v45 = vmax.f32 %v11840_v54, %v19089_v2  ;;  %v12115_v8 = vpack.c.bf16 %v12092_v61, %v12091_v50  ;;  %v12031_v39 = vmax.f32 %v11967_v21, %v19048_v23  ;;  %v12032_v31 = vmax.f32 %v11968_v40, %v19050_v51  ;;  %v19217_v23 = vld [vmem:[#allocation4 + $0x172] sm:$0xff]  ;;  %v11943_v21 = vld [vmem:[#allocation4 + $0x180] sm:$0xff]  ;;  %v11944_v54 = vld [vmem:[#allocation4 + $0x188] sm:$0xff] }
 0x5be   : > { %v11780_v53 = vmax.f32 %v11716_v29, %v19145_v1  ;;  %v11781_v37 = vmax.f32 %v11717_v14, %v19147_v17  ;;  %v11657_v43 = vmax.f32 %v19191_v30, %v19195_v0  ;;  %v11906_v4 = vmax.f32 %v11842_v49, %v19153_v27 }
 0x5bf   : > { %15029 = vmatmul.mubr.msk.bf16.gmra.mrb[4].mxu0 %vm452_vm1, %v11071_v42  ;;  %v11841_v42 = vmax.f32 %v11777_v60, %v19050_v51  ;;  %v11907_v5 = vmax.f32 %v11843_v25, %v19155_v24  ;;  %v11782_v51 = vmax.f32 %v11718_v33, %v19186_v20  ;;  %v11783_v60 = vmax.f32 %v11719_v34, %v19191_v30 }
 0x5c0   : > { %15032 = vmatprep.mubr.msk.bf16.mxu0 %vm452_vm1, %v11072_v47  ;;  %v19193_v47 = vld [vmem:[#allocation4 + $0x169] sm:$0xff]  ;;  %v12094_v19 = vmax.f32 %v12030_v15, %v19067_v63  ;;  %v12095_v11 = vmax.f32 %v12031_v39, %v19089_v2  ;;  %v12096_v59 = vmax.f32 %v12032_v31, %v19091_v6  ;;  %v11844_v22 = vmax.f32 %v11780_v53, %v19128_v55  ;;  %v11054_v15 = vld [vmem:[#allocation3 + $0x13c] sm:$0xff] }
 0x5c1   : > { %15067 = vmatmul.mubr.msk.bf16.gmra.mrb[104].mxu1 %vm452_vm1, %v12112_v32  ;;  %v12114_v32 = vpack.c.bf16 %v19143_v7, %v19114_v56  ;;  %v11905_v35 = vmax.f32 %v11841_v42, %v19091_v6  ;;  %v11656_v56 = vmax.f32 %v19186_v20, %v19193_v47  ;;  %v11969_v7 = vmax.f32 %v11904_v45, %v19108_v13 }
 0x5c2   : > { %15070 = vmatprep.mubr.msk.bf16.mxu1 %vm452_vm1, %v12113_v9  ;;  %v12093_v9 = vmax.f32 %v12029_v44, %v19056_v28  ;;  %v11845_v28 = vmax.f32 %v11781_v37, %v19130_v52  ;;  %v11721_v41 = vmax.f32 %v11657_v43, %v19217_v23  ;;  %v11971_v63 = vmax.f32 %v11906_v4, %v19145_v1  ;;  %v12008_v44 = vld [vmem:[#allocation4 + $0x189] sm:$0xff]  ;;  %v11057_v43 = vld [vmem:[#allocation3 + $0x15c] sm:$0xff] }
 0x5c3   : > { %v11970_v62 = vmax.f32 %v11905_v35, %v19116_v58  ;;  %v11720_v13 = vmax.f32 %v11656_v56, %v19215_v38  ;;  %v11972_v2 = vmax.f32 %v11907_v5, %v19147_v17  ;;  %v11846_v6 = vmax.f32 %v11782_v51, %v19193_v47  ;;  %v12071_v37 = vld [vmem:[#allocation4 + $0x182] sm:$0xff]  ;;  %v11056_v56 = vld [vmem:[#allocation3 + $0x154] sm:$0xff] }
 0x5c4   : > { %v11847_v58 = vmax.f32 %v11783_v60, %v19195_v0  ;;  %v11075_v50 = vpack.c.bf16 %v11051_v57, %v11050_v46  ;;  %v11076_v61 = vpack.c.bf16 %v11053_v3, %v11052_v12  ;;  %v12116_v40 = vpack.c.bf16 %v12094_v19, %v12093_v9  ;;  %v11945_v57 = vld [vmem:[#allocation4 + $0x198] sm:$0xff]  ;;  %v11058_v12 = vld [vmem:[#allocation3 + $0x16c] sm:$0xff] }
 0x5c5   : > { %v12117_v42 = vpack.c.bf16 %v12096_v59, %v12095_v11  ;;  %v11908_v29 = vmax.f32 %v11844_v22, %v19171_v10  ;;  %v11909_v1 = vmax.f32 %v11845_v28, %v19173_v26  ;;  %v11784_v14 = vmax.f32 %v11720_v13, %v11943_v21  ;;  %v11059_v11 = vld [vmem:[#allocation3 + $0x174] sm:$0xff]  ;;  %v12010_v28 = vld [vmem:[#allocation4 + $0x1a1] sm:$0xff] }
 0x5c6   : > { %v11785_v17 = vmax.f32 %v11721_v41, %v11944_v54  ;;  %v12035_v49 = vmax.f32 %v11971_v63, %v19128_v55  ;;  %v12036_v25 = vmax.f32 %v11972_v2, %v19130_v52  ;;  %v11910_v33 = vmax.f32 %v11846_v6, %v19215_v38  ;;  %v11055_v55 = vld [vmem:[#allocation3 + $0x144] sm:$0xff]  ;;  %v12009_v22 = vld [vmem:[#allocation4 + $0x199] sm:$0xff]  ;;  %v11061_v41 = vld [vmem:[#allocation3 + $0x18c] sm:$0xff] }
 0x5c7   : > { %15033 = vmatmul.mubr.msk.bf16.gmra.mrb[8].mxu0 %vm452_vm1, %v11073_v48  ;;  %v12033_v48 = vmax.f32 %v11969_v7, %v19118_v36  ;;  %v11911_v34 = vmax.f32 %v11847_v58, %v19217_v23  ;;  %v11973_v52 = vmax.f32 %v11908_v29, %v19186_v20  ;;  %v11974_v45 = vmax.f32 %v11909_v1, %v19191_v30  ;;  %v11060_v13 = vld [vmem:[#allocation3 + $0x184] sm:$0xff] }
 0x5c8   : > { %15036 = vmatprep.mubr.msk.bf16.mxu0 %vm452_vm1, %v11074_v18  ;;  %v12034_v18 = vmax.f32 %v11970_v62, %v19120_v16  ;;  %v11849_v39 = vmax.f32 %v11785_v17, %v12008_v44  ;;  %v12099_v31 = vmax.f32 %v12035_v49, %v19171_v10  ;;  %v12100_v35 = vmax.f32 %v12036_v25, %v19173_v26  ;;  %v11946_v26 = vld [vmem:[#allocation4 + $0x1a0] sm:$0xff]  ;;  %v11066_v17 = vld [vmem:[#allocation3 + $0x1cc] sm:$0xff]  ;;  %v11067_v49 = vld [vmem:[#allocation3 + $0x1d4] sm:$0xff] }
 0x5c9   : > { %15071 = vmatmul.mubr.msk.bf16.gmra.mrb[108].mxu1 %vm452_vm1, %v12114_v32  ;;  %v12007_v32 = vld [vmem:[#allocation4 + $0x181] sm:$0xff]  ;;  %v12097_v36 = vmax.f32 %v12033_v48, %v19153_v27  ;;  %v11975_v53 = vmax.f32 %v11910_v33, %v11943_v21  ;;  %v11976_v27 = vmax.f32 %v11911_v34, %v11944_v54  ;;  %v11077_v4 = vpack.c.bf16 %v11055_v55, %v11054_v15 }
 0x5ca   : > { %15074 = vmatprep.mubr.msk.bf16.mxu1 %vm452_vm1, %v12115_v8  ;;  %v12098_v16 = vmax.f32 %v12034_v18, %v19155_v24  ;;  %v11848_v8 = vmax.f32 %v11784_v14, %v12007_v32  ;;  %v12072_v24 = vld [vmem:[#allocation4 + $0x18a] sm:$0xff]  ;;  %v12037_v20 = vmax.f32 %v11973_v52, %v19193_v47  ;;  %v12038_v30 = vmax.f32 %v11974_v45, %v19195_v0  ;;  %v11062_v48 = vld [vmem:[#allocation3 + $0x19c] sm:$0xff] }
 0x5cb   : > { %v11913_v60 = vmax.f32 %v11849_v39, %v12072_v24  ;;  %v11078_v46 = vpack.c.bf16 %v11057_v43, %v11056_v56  ;;  %v12119_v9 = vpack.c.bf16 %v12100_v35, %v12099_v31  ;;  %v12039_v7 = vmax.f32 %v11975_v53, %v12007_v32  ;;  %v11063_v18 = vld [vmem:[#allocation3 + $0x1a4] sm:$0xff] }
 0x5cc   : > { %v12118_v5 = vpack.c.bf16 %v12098_v16, %v12097_v36  ;;  %v11912_v51 = vmax.f32 %v11848_v8, %v12071_v37  ;;  %v12040_v10 = vmax.f32 %v11976_v27, %v12008_v44  ;;  %v12101_v3 = vmax.f32 %v12037_v20, %v19215_v38  ;;  %v12073_v38 = vld [vmem:[#allocation4 + $0x19a] sm:$0xff] }
 0x5cd   : > { %v12102_v47 = vmax.f32 %v12038_v30, %v19217_v23  ;;  %v11978_v19 = vmax.f32 %v11913_v60, %v11946_v26  ;;  %v12103_v59 = vmax.f32 %v12039_v7, %v12071_v37  ;;  %v11079_v63 = vpack.c.bf16 %v11059_v11, %v11058_v12  ;;  %v19332_v12 = vld [vmem:[%s19831_s8] ss:$0 sm:$0xff] }
 0x5ce   : > { %v11977_v0 = vmax.f32 %v11912_v51, %v11945_v57  ;;  %v12104_v62 = vmax.f32 %v12040_v10, %v12072_v24  ;;  %v11080_v21 = vpack.c.bf16 %v11061_v41, %v11060_v13  ;;  %v11081_v1 = vpack.c.bf16 %v11063_v18, %v11062_v48 }
 0x5cf   : > { %15037 = vmatmul.mubr.msk.bf16.gmra.mrb[12].mxu0 %vm452_vm1, %v11075_v50  ;;  %v12120_v2 = vpack.c.bf16 %v12102_v47, %v12101_v3  ;;  %v12042_v58 = vmax.f32 %v11978_v19, %v12010_v28  ;;  %v12074_v50 = vld [vmem:[#allocation4 + $0x1a2] sm:$0xff]  ;;  %v11083_v25 = vpack.c.bf16 %v11067_v49, %v11066_v17 }
 0x5d0   : > { %15040 = vmatprep.mubr.msk.bf16.mxu0 %vm452_vm1, %v11076_v61  ;;  %v12041_v6 = vmax.f32 %v11977_v0, %v12009_v22  ;;  %v12121_v54 = vpack.c.bf16 %v12104_v62, %v12103_v59 }
 0x5d1   : > { %15075 = vmatmul.mubr.msk.bf16.gmra.mrb[112].mxu1 %vm452_vm1, %v12116_v40  ;;  %v12106_v61 = vmax.f32 %v12042_v58, %v12074_v50  ;;  %v11064_v40 = vld [vmem:[#allocation3 + $0x1b4] sm:$0xff] }
 0x5d2   : > { %15078 = vmatprep.mubr.msk.bf16.mxu1 %vm452_vm1, %v12117_v42  ;;  %v12105_v23 = vmax.f32 %v12041_v6, %v12073_v38  ;;  %v11065_v42 = vld [vmem:[#allocation3 + $0x1bc] sm:$0xff] }
 0x5d3   : > { %v11082_v29 = vpack.c.bf16 %v11065_v42, %v11064_v40 }
 0x5d4   : > { %v12122_v14 = vpack.c.bf16 %v12106_v61, %v12105_v23 }
 0x5d7   : > { %15041 = vmatmul.mubr.msk.bf16.gmra.mrb[16].mxu0 %vm452_vm1, %v11077_v4 }
 0x5d8   : > { %15044 = vmatprep.mubr.msk.bf16.mxu0 %vm452_vm1, %v11078_v46 }
 0x5d9   : > { %15079 = vmatmul.mubr.msk.bf16.gmra.mrb[116].mxu1 %vm452_vm1, %v12118_v5 }
 0x5da   : > { %15082 = vmatprep.mubr.msk.bf16.mxu1 %vm452_vm1, %v12119_v9 }
 0x5df   : > { %15045 = vmatmul.mubr.msk.bf16.gmra.mrb[20].mxu0 %vm452_vm1, %v11079_v63 }
 0x5e0   : > { %15048 = vmatprep.mubr.msk.bf16.mxu0 %vm452_vm1, %v11080_v21 }
 0x5e1   : > { %15083 = vmatmul.mubr.msk.bf16.gmra.mrb[120].mxu1 %vm452_vm1, %v12120_v2 }
 0x5e2   : > { %15086 = vmatprep.mubr.msk.bf16.mxu1 %vm452_vm1, %v12121_v54 }
 0x5e7   : > { %15049 = vmatmul.mubr.msk.bf16.gmra.mrb[24].mxu0 %vm452_vm1, %v11081_v1 }
 0x5e8   : > { %15052 = vmatprep.mubr.msk.bf16.mxu0 %vm452_vm1, %v11082_v29 }
 0x5e9   : > { %15087 = vmatmul.mubr.msk.bf16.gmra.mrb[124].mxu1 %vm452_vm1, %v12122_v14 }
 0x5ef   : > { %15053 = vmatmul.mubr.msk.bf16.gmra.mrb[28].mxu0 %vm452_vm1, %v11083_v25 }
 0x644   : > { %v14414_v33 = vpop.f32.mrb[64].mxu1 }
 0x645   : > { %v5877_v34 = vpop.f32.mrb[65].mxu1 }
 0x646   : > { %v14415_v32 = vpop.f32.mrb[66].mxu1 }
 0x647   : > { %v5880_v44 = vpop.f32.mrb[67].mxu1 }
 0x64c   : > { %v19273_v36 = vpop.f32.mrb[68].mxu1 }
 0x64d   : > { %v19275_v16 = vpop.f32.mrb[69].mxu1 }
 0x64e   : > { %v19277_v15 = vpop.f32.mrb[70].mxu1 }
 0x64f   : > { %v19279_v55 = vpop.f32.mrb[71].mxu1 }
 0x654   : > { %v19281_v52 = vpop.f32.mrb[72].mxu1 }
 0x655   : > { %v19283_v45 = vpop.f32.mrb[73].mxu1 }
 0x656   : > { %v19285_v8 = vpop.f32.mrb[74].mxu1 }
 0x657   : > { %v19287_v39 = vpop.f32.mrb[75].mxu1 }
 0x65c   : > { %v19289_v31 = vpop.f32.mrb[76].mxu1 }
 0x65d   : > { %v19291_v35 = vpop.f32.mrb[77].mxu1 }
 0x65e   : > { %v19293_v53 = vpop.f32.mrb[78].mxu1 }
 0x65f   : > { %v19295_v27 = vpop.f32.mrb[79].mxu1 }
 0x664   : > { %v19297_v37 = vpop.f32.mrb[80].mxu1 }
 0x665   : > { %v19299_v24 = vpop.f32.mrb[81].mxu1 }
 0x666   : > { %v19301_v56 = vpop.f32.mrb[82].mxu1 }
 0x667   : > { %v19303_v43 = vpop.f32.mrb[83].mxu1 }
 0x66c   : > { %v19305_v4 = vpop.f32.mrb[84].mxu1 }
 0x66d   : > { %v19307_v5 = vpop.f32.mrb[85].mxu1 }
 0x66e   : > { %v19309_v20 = vpop.f32.mrb[86].mxu1 }
 0x66f   : > { %v19311_v30 = vpop.f32.mrb[87].mxu1 }
 0x674   : > { %v19313_v51 = vpop.f32.mrb[88].mxu1 }
 0x675   : > { %v19315_v60 = vpop.f32.mrb[89].mxu1 }
 0x676   : > { %v19317_v46 = vpop.f32.mrb[90].mxu1 }
 0x677   : > { %v19319_v9 = vpop.f32.mrb[91].mxu1 }
 0x67c   : > { %v19321_v7 = vpop.f32.mrb[92].mxu1 }
 0x67d   : > { %v19323_v10 = vpop.f32.mrb[93].mxu1 }
 0x67e   : > { %v19325_v57 = vpop.f32.mrb[94].mxu1 }
 0x67f   : > { %v19327_v26 = vpop.f32.mrb[95].mxu1 }
 0x684   : > { %v15060_v3 = vpop.f32.mrb[96].mxu1 }
 0x685   : > { %v12225_v47 = vadd.f32 %v15060_v3, %v19332_v12  ;;  %v12216_v0 = vpop.f32.mrb[97].mxu1 }
 0x686   : > { %v15061_v19 = vpop.f32.mrb[98].mxu1  ;;  %v12217_v59 = vadd.f32 %v19332_v12, %v12216_v0 }
 0x687   : > { %v12345_v11 = vmax.f32 %v12225_v47, 0.0  ;;  %v12228_v62 = vadd.f32 %v15061_v19, %v19332_v12  ;;  %v12219_v22 = vpop.f32.mrb[99].mxu1 }
 0x688   : > { %v12220_v13 = vadd.f32 %v19332_v12, %v12219_v22  ;;  %v12343_v63 = vmax.f32 %v12217_v59, 0.0 }
 0x689   : > { %v12346_v28 = vmax.f32 %v12228_v62, 0.0  ;;  %12411 = vrot.lane.b32.xlu0 %v12345_v11, %s16298_s14 }
 0x68a   : > { %v15026_v41 = vpop.f32.mrb[0].mxu0  ;;  %v12344_v38 = vmax.f32 %v12220_v13, 0.0 }
 0x68b   : > { %v19339_v2 = vadd.f32 %v15026_v41, %v14414_v33  ;;  %v11171_v6 = vpop.f32.mrb[1].mxu0  ;;  %12413 = vrot.lane.b32.xlu1 %v12346_v28, %s16298_s14 }
 0x68c   : > { %v19342_v58 = vadd.f32 %v11171_v6, %v5877_v34  ;;  %v15027_v21 = vpop.f32.mrb[2].mxu0  ;;  %v15064_v54 = vpop.f32.mrb[100].mxu1 }
 0x68d   : > { %v19344_v50 = vadd.f32 %v15027_v21, %v14415_v32  ;;  %v12241_v23 = vadd.f32 %v15064_v54, %v19332_v12  ;;  %v11174_v61 = vpop.f32.mrb[3].mxu0  ;;  %v12232_v40 = vpop.f32.mrb[101].mxu1  ;;  %12407 = vrot.lane.b32.xlu0 %v12343_v63, %s16298_s14 }
 0x68e   : > { %v19348_v42 = vadd.f32 %v11174_v61, %v5880_v44  ;;  %v15065_v48 = vpop.f32.mrb[102].mxu1  ;;  %v12233_v29 = vadd.f32 %v19332_v12, %v12232_v40 }
 0x68f   : > { %v12349_v18 = vmax.f32 %v12241_v23, 0.0  ;;  %v12244_v1 = vadd.f32 %v15065_v48, %v19332_v12  ;;  %v12235_v14 = vpop.f32.mrb[103].mxu1  ;;  %12409 = vrot.lane.b32.xlu1 %v12344_v38, %s16298_s14 }
 0x690   : > { %v12236_v49 = vadd.f32 %v19332_v12, %v12235_v14  ;;  %v12347_v33 = vmax.f32 %v12233_v29, 0.0 }
 0x691   : > { %v12350_v17 = vmax.f32 %v12244_v1, 0.0  ;;  %12419 = vrot.lane.b32.xlu0 %v12349_v18, %s16298_s14 }
 0x692   : > { %v15030_v25 = vpop.f32.mrb[4].mxu0  ;;  %v12348_v0 = vmax.f32 %v12236_v49, 0.0 }
 0x693   : > { %v19356_v34 = vadd.f32 %v15030_v25, %v19273_v36  ;;  %v11187_v32 = vpop.f32.mrb[5].mxu0  ;;  %12421 = vrot.lane.b32.xlu1 %v12350_v17, %s16298_s14 }
 0x694   : > { %v19360_v44 = vadd.f32 %v11187_v32, %v19275_v16  ;;  %v15031_v3 = vpop.f32.mrb[6].mxu0  ;;  %v15068_v47 = vpop.f32.mrb[104].mxu1 }
 0x695   : > { %v19363_v19 = vadd.f32 %v15031_v3, %v19277_v15  ;;  %v12257_v11 = vadd.f32 %v15068_v47, %v19332_v12  ;;  %v11190_v59 = vpop.f32.mrb[7].mxu0  ;;  %v12248_v62 = vpop.f32.mrb[105].mxu1  ;;  %12415 = vrot.lane.b32.xlu0 %v12347_v33, %s16298_s14 }
 0x696   : > { %v19368_v36 = vadd.f32 %v11190_v59, %v19279_v55  ;;  %v15069_v22 = vpop.f32.mrb[106].mxu1  ;;  %v12249_v16 = vadd.f32 %v19332_v12, %v12248_v62 }
 0x697   : > { %v12353_v28 = vmax.f32 %v12257_v11, 0.0  ;;  %v12260_v13 = vadd.f32 %v15069_v22, %v19332_v12  ;;  %v12251_v41 = vpop.f32.mrb[107].mxu1  ;;  %12417 = vrot.lane.b32.xlu1 %v12348_v0, %s16298_s14 }
 0x698   : > { %v12252_v63 = vadd.f32 %v19332_v12, %v12251_v41  ;;  %v12351_v21 = vmax.f32 %v12249_v16, 0.0 }
 0x699   : > { %v12354_v15 = vmax.f32 %v12260_v13, 0.0  ;;  %12427 = vrot.lane.b32.xlu0 %v12353_v28, %s16298_s14 }
 0x69a   : > { %v15034_v6 = vpop.f32.mrb[8].mxu0  ;;  %v12352_v40 = vmax.f32 %v12252_v63, 0.0 }
 0x69b   : > { %v19376_v54 = vadd.f32 %v15034_v6, %v19281_v52  ;;  %v11203_v55 = vpop.f32.mrb[9].mxu0  ;;  %12429 = vrot.lane.b32.xlu1 %v12354_v15, %s16298_s14 }
 0x69c   : > { %v19380_v38 = vadd.f32 %v11203_v55, %v19283_v45  ;;  %v15035_v23 = vpop.f32.mrb[10].mxu0  ;;  %v15072_v61 = vpop.f32.mrb[108].mxu1 }
 0x69d   : > { %v19383_v48 = vadd.f32 %v15035_v23, %v19285_v8  ;;  %v12273_v18 = vadd.f32 %v15072_v61, %v19332_v12  ;;  %v11206_v29 = vpop.f32.mrb[11].mxu0  ;;  %v12264_v1 = vpop.f32.mrb[109].mxu1  ;;  %12423 = vrot.lane.b32.xlu0 %v12351_v21, %s16298_s14 }
 0x69e   : > { %v19388_v52 = vadd.f32 %v11206_v29, %v19287_v39  ;;  %v15073_v14 = vpop.f32.mrb[110].mxu1  ;;  %v12265_v45 = vadd.f32 %v19332_v12, %v12264_v1 }
 0x69f   : > { %v12357_v17 = vmax.f32 %v12273_v18, 0.0  ;;  %v12276_v49 = vadd.f32 %v15073_v14, %v19332_v12  ;;  %v12267_v25 = vpop.f32.mrb[111].mxu1  ;;  %12425 = vrot.lane.b32.xlu1 %v12352_v40, %s16298_s14 }
 0x6a0   : > { %v12268_v33 = vadd.f32 %v19332_v12, %v12267_v25  ;;  %v12355_v3 = vmax.f32 %v12265_v45, 0.0 }
 0x6a1   : > { %v12358_v8 = vmax.f32 %v12276_v49, 0.0  ;;  %12435 = vrot.lane.b32.xlu0 %v12357_v17, %s16298_s14 }
 0x6a2   : > { %v15038_v32 = vpop.f32.mrb[12].mxu0  ;;  %v12356_v62 = vmax.f32 %v12268_v33, 0.0 }
 0x6a3   : > { %v19396_v47 = vadd.f32 %v15038_v32, %v19289_v31  ;;  %v11219_v39 = vpop.f32.mrb[13].mxu0  ;;  %12437 = vrot.lane.b32.xlu1 %v12358_v8, %s16298_s14 }
 0x6a4   : > { %v19400_v0 = vadd.f32 %v11219_v39, %v19291_v35  ;;  %v15039_v11 = vpop.f32.mrb[14].mxu0  ;;  %v15076_v59 = vpop.f32.mrb[112].mxu1 }
 0x6a5   : > { %v19403_v22 = vadd.f32 %v15039_v11, %v19293_v53  ;;  %v12289_v28 = vadd.f32 %v15076_v59, %v19332_v12  ;;  %v11222_v16 = vpop.f32.mrb[15].mxu0  ;;  %v12280_v13 = vpop.f32.mrb[113].mxu1  ;;  %12431 = vrot.lane.b32.xlu0 %v12355_v3, %s16298_s14 }
 0x6a6   : > { %v19408_v31 = vadd.f32 %v11222_v16, %v19295_v27  ;;  %v15077_v41 = vpop.f32.mrb[114].mxu1  ;;  %v12281_v35 = vadd.f32 %v19332_v12, %v12280_v13 }
 0x6a7   : > { %v12361_v15 = vmax.f32 %v12289_v28, 0.0  ;;  %v12292_v63 = vadd.f32 %v15077_v41, %v19332_v12  ;;  %v12283_v6 = vpop.f32.mrb[115].mxu1  ;;  %12433 = vrot.lane.b32.xlu1 %v12356_v62, %s16298_s14 }
 0x6a8   : > { %v12284_v21 = vadd.f32 %v19332_v12, %v12283_v6  ;;  %v12359_v23 = vmax.f32 %v12281_v35, 0.0 }
 0x6a9   : > { %v12362_v53 = vmax.f32 %v12292_v63, 0.0  ;;  %12443 = vrot.lane.b32.xlu0 %v12361_v15, %s16298_s14 }
 0x6aa   : > { %v15042_v55 = vpop.f32.mrb[16].mxu0  ;;  %v12360_v1 = vmax.f32 %v12284_v21, 0.0 }
 0x6ab   : > { %v19416_v61 = vadd.f32 %v15042_v55, %v19297_v37  ;;  %v11235_v27 = vpop.f32.mrb[17].mxu0  ;;  %12445 = vrot.lane.b32.xlu1 %v12362_v53, %s16298_s14 }
 0x6ac   : > { %v19420_v40 = vadd.f32 %v11235_v27, %v19299_v24  ;;  %v15043_v18 = vpop.f32.mrb[18].mxu0  ;;  %v15080_v29 = vpop.f32.mrb[116].mxu1 }
 0x6ad   : > { %v19423_v14 = vadd.f32 %v15043_v18, %v19301_v56  ;;  %v12305_v17 = vadd.f32 %v15080_v29, %v19332_v12  ;;  %v11238_v45 = vpop.f32.mrb[19].mxu0  ;;  %v12296_v49 = vpop.f32.mrb[117].mxu1  ;;  %12439 = vrot.lane.b32.xlu0 %v12359_v23, %s16298_s14 }
 0x6ae   : > { %v19428_v37 = vadd.f32 %v11238_v45, %v19303_v43  ;;  %v15081_v25 = vpop.f32.mrb[118].mxu1  ;;  %v12297_v24 = vadd.f32 %v19332_v12, %v12296_v49  ;;  %v19465_v49 = vld [vmem:[%s19829_s6] ss:$0 sm:$0xff] }
 0x6af   : > { %v12365_v8 = vmax.f32 %v12305_v17, 0.0  ;;  %v12308_v33 = vadd.f32 %v15081_v25, %v19332_v12  ;;  %v12299_v32 = vpop.f32.mrb[119].mxu1  ;;  %12441 = vrot.lane.b32.xlu1 %v12360_v1, %s16298_s14 }
 0x6b0   : > { %v12300_v3 = vadd.f32 %v19332_v12, %v12299_v32  ;;  %v12363_v11 = vmax.f32 %v12297_v24, 0.0 }
 0x6b1   : > { %v12366_v56 = vmax.f32 %v12308_v33, 0.0  ;;  %12451 = vrot.lane.b32.xlu0 %v12365_v8, %s16298_s14 }
 0x6b2   : > { %v15046_v39 = vpop.f32.mrb[20].mxu0  ;;  %v12364_v13 = vmax.f32 %v12300_v3, 0.0 }
 0x6b3   : > { %v19436_v59 = vadd.f32 %v15046_v39, %v19305_v4  ;;  %v11251_v43 = vpop.f32.mrb[21].mxu0  ;;  %12453 = vrot.lane.b32.xlu1 %v12366_v56, %s16298_s14 }
 0x6b4   : > { %v19440_v62 = vadd.f32 %v11251_v43, %v19307_v5  ;;  %v15047_v28 = vpop.f32.mrb[22].mxu0  ;;  %v15084_v16 = vpop.f32.mrb[120].mxu1 }
 0x6b5   : > { %v19443_v41 = vadd.f32 %v15047_v28, %v19309_v20  ;;  %v12321_v15 = vadd.f32 %v15084_v16, %v19332_v12  ;;  %v11254_v35 = vpop.f32.mrb[23].mxu0  ;;  %v12312_v63 = vpop.f32.mrb[121].mxu1  ;;  %12447 = vrot.lane.b32.xlu0 %v12363_v11, %s16298_s14  ;;  %v11340_v28 = vadd.f32 %v19344_v50, %v19465_v49 }
 0x6b6   : > { %v19448_v4 = vadd.f32 %v11254_v35, %v19311_v30  ;;  %v15085_v6 = vpop.f32.mrb[122].mxu1  ;;  %v12313_v5 = vadd.f32 %v19332_v12, %v12312_v63  ;;  %v11337_v63 = vadd.f32 %v19342_v58, %v19465_v49 }
 0x6b7   : > { %v12369_v53 = vmax.f32 %v12321_v15, 0.0  ;;  %v12324_v21 = vadd.f32 %v15085_v6, %v19332_v12  ;;  %v12315_v55 = vpop.f32.mrb[123].mxu1  ;;  %12449 = vrot.lane.b32.xlu1 %v12364_v13, %s16298_s14 }
 0x6b8   : > { %v12316_v23 = vadd.f32 %v19332_v12, %v12315_v55  ;;  %v12367_v18 = vmax.f32 %v12313_v5, 0.0  ;;  %v11369_v58 = vmax.f32 %v11337_v63, 0.0 }
 0x6b9   : > { %v12370_v20 = vmax.f32 %v12324_v21, 0.0  ;;  %12459 = vrot.lane.b32.xlu0 %v12369_v53, %s16298_s14  ;;  %v11372_v53 = vmax.f32 %v11340_v28, 0.0  ;;  %v11358_v28 = vadd.f32 %v19448_v4, %v19465_v49 }
 0x6ba   : > { %v15050_v27 = vpop.f32.mrb[24].mxu0  ;;  %v12368_v25 = vmax.f32 %v12316_v23, 0.0  ;;  %v11347_v23 = vadd.f32 %v19376_v54, %v19465_v49 }
 0x6bb   : > { %v19456_v29 = vadd.f32 %v15050_v27, %v19313_v51  ;;  %v11267_v30 = vpop.f32.mrb[25].mxu0  ;;  %12461 = vrot.lane.b32.xlu1 %v12370_v20, %s16298_s14  ;;  %v11342_v20 = vadd.f32 %v19368_v36, %v19465_v49  ;;  %v11348_v27 = vadd.f32 %v19383_v48, %v19465_v49 }
 0x6bc   : > { %v19460_v1 = vadd.f32 %v11267_v30, %v19315_v60  ;;  %v15051_v17 = vpop.f32.mrb[26].mxu0  ;;  %v15088_v45 = vpop.f32.mrb[124].mxu1  ;;  %v11346_v30 = vadd.f32 %v19388_v52, %v19465_v49 }
 0x6bd   : > { %v19468_v8 = vadd.f32 %v15051_v17, %v19317_v46  ;;  %v19471_v51 = vadd.f32 %v15088_v45, %v19332_v12  ;;  %v11270_v24 = vpop.f32.mrb[27].mxu0  ;;  %v12328_v33 = vpop.f32.mrb[125].mxu1  ;;  %12455 = vrot.lane.b32.xlu0 %v12367_v18, %s16298_s14  ;;  %v11339_v46 = vadd.f32 %v19339_v2, %v19465_v49  ;;  %v11345_v18 = vadd.f32 %v19380_v38, %v19465_v49 }
 0x6be   : > { %v19475_v60 = vadd.f32 %v11270_v24, %v19319_v9  ;;  %v12329_v32 = vadd.f32 %v19332_v12, %v12328_v33  ;;  %v15089_v56 = vpop.f32.mrb[126].mxu1  ;;  %v11380_v36 = vmax.f32 %v11348_v27, 0.0  ;;  %v11351_v17 = vadd.f32 %v19396_v47, %v19465_v49 }
 0x6bf   : > { %v19479_v3 = vadd.f32 %v15089_v56, %v19332_v12  ;;  %v12331_v39 = vpop.f32.mrb[127].mxu1  ;;  %12457 = vrot.lane.b32.xlu1 %v12368_v25, %s16298_s14  ;;  %v11371_v35 = vmax.f32 %v11339_v46, 0.0  ;;  %v11377_v54 = vmax.f32 %v11345_v18, 0.0  ;;  %v11378_v48 = vmax.f32 %v11346_v30, 0.0 }
 0x6c0   : > { %v12371_v11 = vmax.f32 %v12329_v32, 0.0  ;;  %v12332_v43 = vadd.f32 %v19332_v12, %v12331_v39  ;;  %v11352_v45 = vadd.f32 %v19403_v22, %v19465_v49  ;;  %v11383_v38 = vmax.f32 %v11351_v17, 0.0 }
 0x6c1   : > { %v11349_v25 = vadd.f32 %v19400_v0, %v19465_v49  ;;  %v11350_v24 = vadd.f32 %v19408_v31, %v19465_v49  ;;  %v11355_v33 = vadd.f32 %v19416_v61, %v19465_v49  ;;  %v11356_v32 = vadd.f32 %v19423_v14, %v19465_v49 }
 0x6c2   : > { %v12372_v9 = vmax.f32 %v12332_v43, 0.0  ;;  %v15054_v16 = vpop.f32.mrb[28].mxu0  ;;  %12463 = vrot.lane.b32.xlu0 %v12371_v11, %s16298_s14  ;;  %v11384_v52 = vmax.f32 %v11352_v45, 0.0  ;;  %v11353_v56 = vadd.f32 %v19420_v40, %v19465_v49  ;;  %v11354_v39 = vadd.f32 %v19428_v37, %v19465_v49 }
 0x6c3   : > { %v19489_v13 = vadd.f32 %v15054_v16, %v19321_v7  ;;  %v11283_v15 = vpop.f32.mrb[29].mxu0  ;;  %v11338_v7 = vadd.f32 %v19348_v42, %v19465_v49  ;;  %v11381_v47 = vmax.f32 %v11349_v25, 0.0  ;;  %v11382_v22 = vmax.f32 %v11350_v24, 0.0 }
 0x6c4   : > { %v19494_v2 = vadd.f32 %v11283_v15, %v19323_v10  ;;  %v15055_v6 = vpop.f32.mrb[30].mxu0  ;;  %12465 = vrot.lane.b32.xlu1 %v12372_v9, %s16298_s14  ;;  %v11343_v10 = vadd.f32 %v19356_v34, %v19465_v49  ;;  %v11387_v0 = vmax.f32 %v11355_v33, 0.0  ;;  %v11388_v31 = vmax.f32 %v11356_v32, 0.0 }
 0x6c5   : > { %v19498_v12 = vadd.f32 %v15055_v6, %v19325_v57  ;;  %v11286_v50 = vpop.f32.mrb[31].mxu0  ;;  %v11370_v21 = vmax.f32 %v11338_v7, 0.0  ;;  %v11344_v57 = vadd.f32 %v19363_v19, %v19465_v49  ;;  %v11374_v19 = vmax.f32 %v11342_v20, 0.0 }
 0x6c6   : > { %v19503_v5 = vadd.f32 %v11286_v50, %v19327_v26  ;;  %11437 = vrot.lane.b32.xlu0 %v11371_v35, %s16299_s21  ;;  %v11375_v55 = vmax.f32 %v11343_v10, 0.0  ;;  %v11341_v26 = vadd.f32 %v19360_v44, %v19465_v49  ;;  %v11379_v44 = vmax.f32 %v11347_v23, 0.0 }
 0x6c7   : > { %v11376_v42 = vmax.f32 %v11344_v57, 0.0  ;;  %v11385_v61 = vmax.f32 %v11353_v56, 0.0  ;;  %v11359_v46 = vadd.f32 %v19436_v59, %v19465_v49  ;;  %v11386_v14 = vmax.f32 %v11354_v39, 0.0 }
 0x6c8   : > { %11439 = vrot.lane.b32.xlu1 %v11372_v53, %s16299_s21  ;;  %v11373_v34 = vmax.f32 %v11341_v26, 0.0  ;;  %v11360_v11 = vadd.f32 %v19443_v41, %v19465_v49  ;;  %v11357_v43 = vadd.f32 %v19440_v62, %v19465_v49  ;;  %v11363_v9 = vadd.f32 %v19456_v29, %v19465_v49 }
 0x6c9   : > { %v11391_v40 = vmax.f32 %v11359_v46, 0.0  ;;  %v11390_v41 = vmax.f32 %v11358_v28, 0.0  ;;  %v11364_v16 = vadd.f32 %v19468_v8, %v19465_v49  ;;  %v11361_v15 = vadd.f32 %v19460_v1, %v19465_v49 }
 0x6ca   : > { %11433 = vrot.lane.b32.xlu0 %v11369_v58, %s16299_s21  ;;  %v11392_v37 = vmax.f32 %v11360_v11, 0.0  ;;  %v11389_v59 = vmax.f32 %v11357_v43, 0.0  ;;  %v11395_v62 = vmax.f32 %v11363_v9, 0.0  ;;  %v11362_v35 = vadd.f32 %v19475_v60, %v19465_v49 }
 0x6cb   : > { %v11396_v4 = vmax.f32 %v11364_v16, 0.0  ;;  %v11393_v29 = vmax.f32 %v11361_v15, 0.0  ;;  %v11367_v63 = vadd.f32 %v19489_v13, %v19465_v49  ;;  %v11368_v6 = vadd.f32 %v19498_v12, %v19465_v49 }
 0x6cc   : > { %11435 = vrot.lane.b32.xlu1 %v11370_v21, %s16299_s21  ;;  %v11394_v8 = vmax.f32 %v11362_v35, 0.0  ;;  %v11365_v53 = vadd.f32 %v19494_v2, %v19465_v49  ;;  %v11366_v13 = vadd.f32 %v19503_v5, %v19465_v49  ;;  %v12373_v2 = vmax.f32 %v19471_v51, 0.0 }
 0x6cd   : > { %v11399_v50 = vmax.f32 %v11367_v63, 0.0  ;;  %v11400_v7 = vmax.f32 %v11368_v6, 0.0  ;;  %v12374_v26 = vmax.f32 %v19479_v3, 0.0 }
 0x6ce   : > { %11445 = vrot.lane.b32.xlu0 %v11375_v55, %s16299_s21  ;;  %v11397_v10 = vmax.f32 %v11365_v53, 0.0  ;;  %v11398_v21 = vmax.f32 %v11366_v13, 0.0 }
 0x6d0   : > { %11447 = vrot.lane.b32.xlu1 %v11376_v42, %s16299_s21 }
 0x6d2   : > { %11441 = vrot.lane.b32.xlu0 %v11373_v34, %s16299_s21 }
 0x6d4   : > { %11443 = vrot.lane.b32.xlu1 %v11374_v19, %s16299_s21 }
 0x6d6   : > { %11453 = vrot.lane.b32.xlu0 %v11379_v44, %s16299_s21 }
 0x6d8   : > { %11455 = vrot.lane.b32.xlu1 %v11380_v36, %s16299_s21 }
 0x6da   : > { %11449 = vrot.lane.b32.xlu0 %v11377_v54, %s16299_s21 }
 0x6dc   : > { %11451 = vrot.lane.b32.xlu1 %v11378_v48, %s16299_s21 }
 0x6de   : > { %11461 = vrot.lane.b32.xlu0 %v11383_v38, %s16299_s21 }
 0x6e0   : > { %11463 = vrot.lane.b32.xlu1 %v11384_v52, %s16299_s21 }
 0x6e2   : > { %11457 = vrot.lane.b32.xlu0 %v11381_v47, %s16299_s21 }
 0x6e4   : > { %11459 = vrot.lane.b32.xlu1 %v11382_v22, %s16299_s21 }
 0x6e6   : > { %11469 = vrot.lane.b32.xlu0 %v11387_v0, %s16299_s21 }
 0x6e8   : > { %11471 = vrot.lane.b32.xlu1 %v11388_v31, %s16299_s21 }
 0x6ea   : > { %11465 = vrot.lane.b32.xlu0 %v11385_v61, %s16299_s21 }
 0x6ec   : > { %11467 = vrot.lane.b32.xlu1 %v11386_v14, %s16299_s21 }
 0x6ee   : > { %11477 = vrot.lane.b32.xlu0 %v11391_v40, %s16299_s21 }
 0x6f0   : > { %11479 = vrot.lane.b32.xlu1 %v11392_v37, %s16299_s21 }
 0x6f2   : > { %11473 = vrot.lane.b32.xlu0 %v11389_v59, %s16299_s21 }
 0x6f4   : > { %11475 = vrot.lane.b32.xlu1 %v11390_v41, %s16299_s21 }
 0x6f6   : > { %11485 = vrot.lane.b32.xlu0 %v11395_v62, %s16299_s21 }
 0x6f8   : > { %11487 = vrot.lane.b32.xlu1 %v11396_v4, %s16299_s21 }
 0x6fa   : > { %11481 = vrot.lane.b32.xlu0 %v11393_v29, %s16299_s21 }
 0x6fb   : > { %v12412_v1 = vpop.permute.xlu0 %12411 }
 0x6fc   : > { %11483 = vrot.lane.b32.xlu1 %v11394_v8, %s16299_s21 }
 0x6fd   : > { %v12414_v60 = vpop.permute.xlu1 %12413 }
 0x6fe   : > { %11493 = vrot.lane.b32.xlu0 %v11399_v50, %s16299_s21 }
 0x6ff   : > { %v12408_v58 = vpop.permute.xlu0 %12407 }
 0x700   : > { %11495 = vrot.lane.b32.xlu1 %v11400_v7, %s16299_s21 }
 0x701   : > { %v12410_v12 = vpop.permute.xlu1 %12409 }
 0x702   : > { %11489 = vrot.lane.b32.xlu0 %v11397_v10, %s16299_s21 }
 0x703   : > { %v12420_v57 = vpop.permute.xlu0 %12419 }
 0x704   : > { %11491 = vrot.lane.b32.xlu1 %v11398_v21, %s16299_s21  ;;  %s16235_s21 = scalar_lea.vmem %s16234_s17, 8192 }
 0x705   : > { %v12422_v55 = vpop.permute.xlu1 %12421 }
 0x706   : > { %12467 = vrot.lane.b32.xlu0 %v12373_v2, %s16298_s14 }
 0x707   : > { %v12416_v49 = vpop.permute.xlu0 %12415 }
 0x708   : > { %12469 = vrot.lane.b32.xlu1 %v12374_v26, %s16298_s14  ;;  %s16229_s14 = scalar_lea.vmem %s19775_s25, 4096 }
 0x709   : > { %v12418_v5 = vpop.permute.xlu1 %12417  ;;  %p16230_p11 = scmp.ne.s32.totalorder %s19775_s25, %s16229_s14  ;;  %p16237_p1 = scmp.lt.s32.totalorder %s16235_s21, %s16229_s14 }
 0x70b   : > { %v12428_v42 = vpop.permute.xlu0 %12427  ;;  %p16231_p12 = pnand %p16230_p11, %p16390_p5  ;;  %p16238_p2 = por %p16237_p1, %p16236_p0 }
 0x70d   : > { %v12430_v20 = vpop.permute.xlu1 %12429  ;;  %p16232_p13 = pneg %p16231_p12 }
 0x70f   : > { %v12424_v34 = vpop.permute.xlu0 %12423  ;;  %p16239_p3 = pnand %p16238_p2, %p16232_p13 }
 0x711   : > { %v12426_v23 = vpop.permute.xlu1 %12425 }
 0x713   : > { %v12436_v19 = vpop.permute.xlu0 %12435 }
 0x715   : > { %v12438_v27 = vpop.permute.xlu1 %12437 }
 0x717   : > { %v12432_v44 = vpop.permute.xlu0 %12431 }
 0x719   : > { %v19597_v18 = vpop.permute.xlu1 %12433 }
 0x71b   : > { %v19599_v51 = vpop.permute.xlu0 %12443 }
 0x71d   : > { %v19601_v36 = vpop.permute.xlu1 %12445 }
 0x71f   : > { %v19603_v3 = vpop.permute.xlu0 %12439 }
 0x721   : > { %v19605_v30 = vpop.permute.xlu1 %12441 }
 0x723   : > { %v19607_v54 = vpop.permute.xlu0 %12451 }
 0x725   : > { %v19609_v17 = vpop.permute.xlu1 %12453 }
 0x727   : > { %v19611_v48 = vpop.permute.xlu0 %12447 }
 0x729   : > { %v19613_v45 = vpop.permute.xlu1 %12449 }
 0x72b   : > { %v19615_v38 = vpop.permute.xlu0 %12459 }
 0x72d   : > { %v19617_v25 = vpop.permute.xlu1 %12461 }
 0x72f   : > { %v19619_v52 = vpop.permute.xlu0 %12455 }
 0x731   : > { %v19621_v24 = vpop.permute.xlu1 %12457 }
 0x734   : > { %v19623_v47 = vpop.permute.xlu0 %12463 }
 0x736   : > { %v19625_v33 = vpop.permute.xlu1 %12465 }
 0x738   : > { %v11438_v22 = vpop.permute.xlu0 %11437 }
 0x739   : > { %11532 = vst.msk [vmem:[%s16630_s24 + $0x10] sm:$0xff] %vm11529_vm7, %v11438_v22 }
 0x73a   : > { %12506 = vst.msk [vmem:[%s16630_s24 + $0x10] sm:$0xff] %vm12503_vm8, %v12412_v1  ;;  %v11440_v32 = vpop.permute.xlu1 %11439 }
 0x73b   : > { %11533 = vst.msk [vmem:[%s16630_s24 + $0x18] sm:$0xff] %vm11529_vm7, %v11440_v32 }
 0x73c   : > { %12507 = vst.msk [vmem:[%s16630_s24 + $0x18] sm:$0xff] %vm12503_vm8, %v12414_v60  ;;  %v11434_v0 = vpop.permute.xlu0 %11433 }
 0x73d   : > { %11530 = vst.msk [vmem:[%s16630_s24] sm:$0xff] %vm11529_vm7, %v11434_v0 }
 0x73e   : > { %12504 = vst.msk [vmem:[%s16630_s24] sm:$0xff] %vm12503_vm8, %v12408_v58  ;;  %v11436_v56 = vpop.permute.xlu1 %11435 }
 0x73f   : > { %11531 = vst.msk [vmem:[%s16630_s24 + $0x8] sm:$0xff] %vm11529_vm7, %v11436_v56 }
 0x740   : > { %12505 = vst.msk [vmem:[%s16630_s24 + $0x8] sm:$0xff] %vm12503_vm8, %v12410_v12  ;;  %v11446_v31 = vpop.permute.xlu0 %11445 }
 0x741   : > { %11536 = vst.msk [vmem:[%s16630_s24 + $0x30] sm:$0xff] %vm11529_vm7, %v11446_v31 }
 0x742   : > { %12510 = vst.msk [vmem:[%s16630_s24 + $0x30] sm:$0xff] %vm12503_vm8, %v12420_v57  ;;  %v11448_v39 = vpop.permute.xlu1 %11447 }
 0x743   : > { %11537 = vst.msk [vmem:[%s16630_s24 + $0x38] sm:$0xff] %vm11529_vm7, %v11448_v39 }
 0x744   : > { %12511 = vst.msk [vmem:[%s16630_s24 + $0x38] sm:$0xff] %vm12503_vm8, %v12422_v55  ;;  %v11442_v61 = vpop.permute.xlu0 %11441 }
 0x745   : > { %11534 = vst.msk [vmem:[%s16630_s24 + $0x20] sm:$0xff] %vm11529_vm7, %v11442_v61 }
 0x746   : > { %12508 = vst.msk [vmem:[%s16630_s24 + $0x20] sm:$0xff] %vm12503_vm8, %v12416_v49  ;;  %v11444_v46 = vpop.permute.xlu1 %11443 }
 0x747   : > { %11535 = vst.msk [vmem:[%s16630_s24 + $0x28] sm:$0xff] %vm11529_vm7, %v11444_v46 }
 0x748   : > { %12509 = vst.msk [vmem:[%s16630_s24 + $0x28] sm:$0xff] %vm12503_vm8, %v12418_v5  ;;  %v11454_v14 = vpop.permute.xlu0 %11453 }
 0x749   : > { %11540 = vst.msk [vmem:[%s16630_s24 + $0x50] sm:$0xff] %vm11529_vm7, %v11454_v14 }
 0x74a   : > { %12514 = vst.msk [vmem:[%s16630_s24 + $0x50] sm:$0xff] %vm12503_vm8, %v12428_v42  ;;  %v11456_v11 = vpop.permute.xlu1 %11455 }
 0x74b   : > { %11541 = vst.msk [vmem:[%s16630_s24 + $0x58] sm:$0xff] %vm11529_vm7, %v11456_v11 }
 0x74c   : > { %12515 = vst.msk [vmem:[%s16630_s24 + $0x58] sm:$0xff] %vm12503_vm8, %v12430_v20  ;;  %v11450_v40 = vpop.permute.xlu0 %11449 }
 0x74d   : > { %11538 = vst.msk [vmem:[%s16630_s24 + $0x40] sm:$0xff] %vm11529_vm7, %v11450_v40 }
 0x74e   : > { %12512 = vst.msk [vmem:[%s16630_s24 + $0x40] sm:$0xff] %vm12503_vm8, %v12424_v34  ;;  %v11452_v43 = vpop.permute.xlu1 %11451 }
 0x74f   : > { %11539 = vst.msk [vmem:[%s16630_s24 + $0x48] sm:$0xff] %vm11529_vm7, %v11452_v43 }
 0x750   : > { %12513 = vst.msk [vmem:[%s16630_s24 + $0x48] sm:$0xff] %vm12503_vm8, %v12426_v23  ;;  %v11462_v37 = vpop.permute.xlu0 %11461 }
 0x751   : > { %11544 = vst.msk [vmem:[%s16630_s24 + $0x70] sm:$0xff] %vm11529_vm7, %v11462_v37 }
 0x752   : > { %12518 = vst.msk [vmem:[%s16630_s24 + $0x70] sm:$0xff] %vm12503_vm8, %v12436_v19  ;;  %v11464_v28 = vpop.permute.xlu1 %11463 }
 0x753   : > { %11545 = vst.msk [vmem:[%s16630_s24 + $0x78] sm:$0xff] %vm11529_vm7, %v11464_v28 }
 0x754   : > { %12519 = vst.msk [vmem:[%s16630_s24 + $0x78] sm:$0xff] %vm12503_vm8, %v12438_v27  ;;  %v11458_v59 = vpop.permute.xlu0 %11457 }
 0x755   : > { %11542 = vst.msk [vmem:[%s16630_s24 + $0x60] sm:$0xff] %vm11529_vm7, %v11458_v59 }
 0x756   : > { %12516 = vst.msk [vmem:[%s16630_s24 + $0x60] sm:$0xff] %vm12503_vm8, %v12432_v44  ;;  %v11460_v9 = vpop.permute.xlu1 %11459 }
 0x757   : > { %11543 = vst.msk [vmem:[%s16630_s24 + $0x68] sm:$0xff] %vm11529_vm7, %v11460_v9 }
 0x758   : > { %12517 = vst.msk [vmem:[%s16630_s24 + $0x68] sm:$0xff] %vm12503_vm8, %v19597_v18  ;;  %v11470_v41 = vpop.permute.xlu0 %11469 }
 0x759   : > { %11548 = vst.msk [vmem:[%s16630_s24 + $0x90] sm:$0xff] %vm11529_vm7, %v11470_v41 }
 0x75a   : > { %12522 = vst.msk [vmem:[%s16630_s24 + $0x90] sm:$0xff] %vm12503_vm8, %v19599_v51  ;;  %v11472_v16 = vpop.permute.xlu1 %11471 }
 0x75b   : > { %11549 = vst.msk [vmem:[%s16630_s24 + $0x98] sm:$0xff] %vm11529_vm7, %v11472_v16 }
 0x75c   : > { %12523 = vst.msk [vmem:[%s16630_s24 + $0x98] sm:$0xff] %vm12503_vm8, %v19601_v36  ;;  %v11466_v62 = vpop.permute.xlu0 %11465 }
 0x75d   : > { %11546 = vst.msk [vmem:[%s16630_s24 + $0x80] sm:$0xff] %vm11529_vm7, %v11466_v62 }
 0x75e   : > { %12520 = vst.msk [vmem:[%s16630_s24 + $0x80] sm:$0xff] %vm12503_vm8, %v19603_v3  ;;  %v11468_v15 = vpop.permute.xlu1 %11467 }
 0x75f   : > { %11547 = vst.msk [vmem:[%s16630_s24 + $0x88] sm:$0xff] %vm11529_vm7, %v11468_v15 }
 0x760   : > { %12521 = vst.msk [vmem:[%s16630_s24 + $0x88] sm:$0xff] %vm12503_vm8, %v19605_v30  ;;  %v11478_v4 = vpop.permute.xlu0 %11477 }
 0x761   : > { %11552 = vst.msk [vmem:[%s16630_s24 + $0xb0] sm:$0xff] %vm11529_vm7, %v11478_v4 }
 0x762   : > { %12526 = vst.msk [vmem:[%s16630_s24 + $0xb0] sm:$0xff] %vm12503_vm8, %v19607_v54  ;;  %v11480_v35 = vpop.permute.xlu1 %11479 }
 0x763   : > { %11553 = vst.msk [vmem:[%s16630_s24 + $0xb8] sm:$0xff] %vm11529_vm7, %v11480_v35 }
 0x764   : > { %12527 = vst.msk [vmem:[%s16630_s24 + $0xb8] sm:$0xff] %vm12503_vm8, %v19609_v17  ;;  %v11474_v29 = vpop.permute.xlu0 %11473 }
 0x765   : > { %11550 = vst.msk [vmem:[%s16630_s24 + $0xa0] sm:$0xff] %vm11529_vm7, %v11474_v29 }
 0x766   : > { %12524 = vst.msk [vmem:[%s16630_s24 + $0xa0] sm:$0xff] %vm12503_vm8, %v19611_v48  ;;  %v11476_v63 = vpop.permute.xlu1 %11475 }
 0x767   : > { %11551 = vst.msk [vmem:[%s16630_s24 + $0xa8] sm:$0xff] %vm11529_vm7, %v11476_v63 }
 0x768   : > { %12525 = vst.msk [vmem:[%s16630_s24 + $0xa8] sm:$0xff] %vm12503_vm8, %v19613_v45  ;;  %v11486_v8 = vpop.permute.xlu0 %11485 }
 0x769   : > { %11556 = vst.msk [vmem:[%s16630_s24 + $0xd0] sm:$0xff] %vm11529_vm7, %v11486_v8 }
 0x76a   : > { %12530 = vst.msk [vmem:[%s16630_s24 + $0xd0] sm:$0xff] %vm12503_vm8, %v19615_v38  ;;  %v11488_v6 = vpop.permute.xlu1 %11487 }
 0x76b   : > { %11557 = vst.msk [vmem:[%s16630_s24 + $0xd8] sm:$0xff] %vm11529_vm7, %v11488_v6 }
 0x76c   : > { %12531 = vst.msk [vmem:[%s16630_s24 + $0xd8] sm:$0xff] %vm12503_vm8, %v19617_v25  ;;  %v11482_v1 = vpop.permute.xlu0 %11481 }
 0x76d   : > { %11554 = vst.msk [vmem:[%s16630_s24 + $0xc0] sm:$0xff] %vm11529_vm7, %v11482_v1 }
 0x76e   : > { %12528 = vst.msk [vmem:[%s16630_s24 + $0xc0] sm:$0xff] %vm12503_vm8, %v19619_v52  ;;  %v11484_v50 = vpop.permute.xlu1 %11483 }
 0x76f   : > { %11555 = vst.msk [vmem:[%s16630_s24 + $0xc8] sm:$0xff] %vm11529_vm7, %v11484_v50 }
 0x770   : > { %12529 = vst.msk [vmem:[%s16630_s24 + $0xc8] sm:$0xff] %vm12503_vm8, %v19621_v24  ;;  %v11494_v53 = vpop.permute.xlu0 %11493 }
 0x771   : > { %11560 = vst.msk [vmem:[%s16630_s24 + $0xf0] sm:$0xff] %vm11529_vm7, %v11494_v53 }
 0x772   : > { %v11496_v60 = vpop.permute.xlu1 %11495 }
 0x773   : > { %11561 = vst.msk [vmem:[%s16630_s24 + $0xf8] sm:$0xff] %vm11529_vm7, %v11496_v60 }
 0x774   : > { %v11490_v7 = vpop.permute.xlu0 %11489 }
 0x775   : > { %11558 = vst.msk [vmem:[%s16630_s24 + $0xe0] sm:$0xff] %vm11529_vm7, %v11490_v7 }
 0x776   : > { %12532 = vst.msk [vmem:[%s16630_s24 + $0xe0] sm:$0xff] %vm12503_vm8, %v19623_v47  ;;  %v11492_v13 = vpop.permute.xlu1 %11491 }
 0x777   : > { %11559 = vst.msk [vmem:[%s16630_s24 + $0xe8] sm:$0xff] %vm11529_vm7, %v11492_v13 }
 0x778   : > { %12533 = vst.msk [vmem:[%s16630_s24 + $0xe8] sm:$0xff] %vm12503_vm8, %v19625_v33  ;;  %v12468_v58 = vpop.permute.xlu0 %12467 }
 0x779   : > { %12534 = vst.msk [vmem:[%s16630_s24 + $0xf0] sm:$0xff] %vm12503_vm8, %v12468_v58 }
 0x77a   : > { %v12470_v10 = vpop.permute.xlu1 %12469 }
 0x77b   : > { %12535 = vst.msk [vmem:[%s16630_s24 + $0xf8] sm:$0xff] %vm12503_vm8, %v12470_v10 }
 0x77c   : > { %16242 = shalt.err (!%p16239_p3)
}
 0x77d   : > { %s16243_s28 = scalar_lea.hbm %s19771_s29, 4096  ;;  %s16247_s26 = scalar_lea.hbm %s19832_s9, 8192 }
 0x77e   : > { %p16244_p4 = scmp.ne.s32.totalorder %s19771_s29, %s16243_s28  ;;  %p16248_p9 = scmp.lt.u32.totalorder %s19771_s29, %s19832_s9 }
 0x77f   : > { %p16249_p10 = scmp.lt.u32.totalorder %s16247_s26, %s16243_s28  ;;  %p16251_p12 = scmp.lt.u32.totalorder %s16243_s28, %s19771_s29 }
 0x780   : > { %p16245_p7 = pnand %p16244_p4, %p16390_p5 }
 0x781   : > { %p16250_p11 = por %p16249_p10, %p16248_p9 }
 0x782   : > { %p16246_p8 = pneg %p16245_p7 }
 0x783   : > { %p16252_p13 = por %p16251_p12, %p16250_p11 }
 0x785   : > { %p16253_p0 = pnand %p16252_p13, %p16246_p8 }
 0x787   : > { %16256 = shalt.err (!%p16253_p0)
}
 0x788   : > { %s16301_s14 = smov 128  }
 0x789   : > { %16150 = dma.vmem_to_hbm [thread:$0]  (%p16390_p5), %s19775_s25, 4096, %s19771_s29, %s19781_s13, %s16301_s14, %s16301_s14, %s16296_s22  }
 0x78a PF: > { %p16156_p1 = scmp.ge.s32.totalorder %s16291_s12, 2  ;;  %s12565_s17 = sand.u32 1, %s16279_s30  }
 0x78b   : > { %s12566_s21 = scalar_lea.sflag [#allocation6], %s12565_s17 }
 0x78c   : > { %p16153_p2 = pnand %p16156_p1, %p16394_p6 }
 0x78e   : > { %16274 = dma.done.wait (!%p16153_p2), %s12566_s21, 4096  }
 0x78f   : > { %16276 = vsyncadd (!%p16153_p2), %s12566_s21, 4294963200  ;;  %p19_p3 = scmp.ge.s32.totalorder %s16377_s15, 4   ;;  %s19866_s30 = smov %s16283_s10 }
 0x790   : > { %s19867_s10 = smov %s16287_s11  ;;  %s19868_s11 = smov %s16388_s18 }
 0x791   : > { %s19869_s12 = smov %s16377_s15  ;;  %21 = sbr.rel (!%p19_p3) target bundleno = 3 (0x3), region = 134 }
 0x798   :  { %12571 = vsyncpa [#allocation6], 1 }
 0x799   :  { %12573 = vsyncpa [#allocation6 + $0x1], 1 }

</bundles_post_ra>
